<compile_context>
chip_gen: v6e
topology: v6e:2x2x1
jax: 0.10.0
libtpu: 0.0.40
codegen_flags: <defaults>
</compile_context>

<pallas_src>
import functools

import jax
import jax.numpy as jnp
import numpy as np
from jax.experimental import pallas as pl
from jax.experimental.pallas import tpu as pltpu

# Constants from the PyTorch module.
NC = 3
NGF = 64
NZ = 100
KSIZE = 4
BN_EPS = 1e-5


def _round_up(x, m):
    return (x + m - 1) // m * m


# ---------------------------------------------------------------------------
# Pallas kernel: phase-batched tiled matmul, f32 accumulation directly into
# the output block, fused per-column shift + activation on the last K step.
# ---------------------------------------------------------------------------
def _fused_matmul_kernel(a_ref, b_ref, shift_ref, o_ref, *, activation):
    kidx = pl.program_id(3)

    @pl.when(kidx == 0)
    def _():
        o_ref[...] = jnp.zeros_like(o_ref)

    o_ref[...] += jnp.dot(a_ref[...], b_ref[...],
                          preferred_element_type=jnp.float32)

    @pl.when(kidx == pl.num_programs(3) - 1)
    def _():
        y = o_ref[...] + shift_ref[...]
        if activation == "relu":
            y = jnp.maximum(y, 0.0)
        elif activation == "tanh":
            y = jnp.tanh(y)
        o_ref[...] = y


def _pick_tiles(M, K, N):
    """Per-layer tile heuristic: use the full (padded) dim when it is small so
    each layer runs in only a few grid steps (per-step overhead dominates at
    these DCGAN sizes)."""
    tm = min(_round_up(M, 8), 512)
    tk = min(_round_up(K, 128), 2048)
    tn = min(_round_up(N, 128), 1024)
    return tm, tn, tk


def fused_matmul_shift_act(a, b, shift, activation, *, use_pallas=True,
                           tiles=None):
    """Computes act(a @ b + shift) per phase.

    a: (P, M, K) bf16, b: (P, K, N) bf16, shift: (N,) f32.  Returns (P, M, N)
    f32.  BN scale is expected to be pre-folded into `b`.
    """
    P, M, K = a.shape
    P2, K2, N = b.shape
    assert P == P2 and K == K2

    if not use_pallas:  # pure-JAX reference path (same bf16 operands)
        y = jnp.einsum("pmk,pkn->pmn", a, b,
                       preferred_element_type=jnp.float32)
        y = y + shift.astype(jnp.float32)[None, None, :]
        if activation == "relu":
            y = jnp.maximum(y, 0.0)
        elif activation == "tanh":
            y = jnp.tanh(y)
        return y

    tm, tn, tk = tiles if tiles is not None else _pick_tiles(M, K, N)
    Mp, Kp, Np = _round_up(M, tm), _round_up(K, tk), _round_up(N, tn)
    a_p = jnp.pad(a, ((0, 0), (0, Mp - M), (0, Kp - K)))
    b_p = jnp.pad(b, ((0, 0), (0, Kp - K), (0, Np - N)))
    shift_p = jnp.pad(shift.astype(jnp.float32), (0, Np - N)).reshape(1, Np)

    grid = (P, Mp // tm, Np // tn, Kp // tk)
    out = pl.pallas_call(
        functools.partial(_fused_matmul_kernel, activation=activation),
        out_shape=jax.ShapeDtypeStruct((P, Mp, Np), jnp.float32),
        grid_spec=pltpu.PrefetchScalarGridSpec(
            num_scalar_prefetch=0,
            grid=grid,
            in_specs=[
                pl.BlockSpec((None, tm, tk), lambda p, i, j, k: (p, i, k)),
                pl.BlockSpec((None, tk, tn), lambda p, i, j, k: (p, k, j)),
                pl.BlockSpec((1, tn), lambda p, i, j, k: (0, j)),
            ],
            out_specs=pl.BlockSpec((None, tm, tn),
                                   lambda p, i, j, k: (p, i, j)),
        ),
        compiler_params=pltpu.CompilerParams(
            dimension_semantics=("parallel", "parallel", "parallel",
                                 "arbitrary")),
    )(a_p, b_p, shift_p)
    return out[:, :M, :N]


# ---------------------------------------------------------------------------
# ConvTranspose2d glue (plain JAX): sub-pixel phase decomposition.
# ---------------------------------------------------------------------------
def _fold_bn(bn):
    gamma, beta, rmean, rvar = bn
    scale = gamma / jnp.sqrt(rvar + BN_EPS)
    shift = beta - rmean * scale
    return scale, shift


def _phase_weight(w, ph, pw, scale):
    """B_p[(tap, cin), cout] for output phase (ph, pw) of a k=4, s=2, p=1
    conv-transpose.  Tap (dh, dw) uses weight element (3-(ph+2dh), 3-(pw+2dw)).
    BN `scale` is folded in."""
    cin, cout = w.shape[0], w.shape[1]
    wk = jnp.stack([w[:, :, 3 - (ph + 2 * dh), 3 - (pw + 2 * dw)]
                    for dh in (0, 1) for dw in (0, 1)], axis=0)  # (4, cin, cout)
    return wk.reshape(4 * cin, cout) * scale[None, :]


def convt_s2_phase_operands(x_nhwc, w, scale):
    """Sub-pixel im2col for ConvTranspose2d(k=4, s=2, p=1).

    Returns a: (4, N*H*W, 4*Cin) bf16, b: (4, 4*Cin, Cout) bf16 where phase
    p = 2*ph + pw produces output pixels y[:, 2h+ph, 2w+pw, :]."""
    N, H, W, C = x_nhwc.shape
    xp = jnp.pad(x_nhwc, ((0, 0), (1, 1), (1, 1), (0, 0)))
    a_list, b_list = [], []
    for ph in (0, 1):
        for pw in (0, 1):
            taps = [xp[:, ph + dh:ph + dh + H, pw + dw:pw + dw + W, :]
                    for dh in (0, 1) for dw in (0, 1)]
            a_p = jnp.stack(taps, axis=3).reshape(N * H * W, 4 * C)
            a_list.append(a_p)
            b_list.append(_phase_weight(w, ph, pw, scale))
    a = jnp.stack(a_list, axis=0).astype(jnp.bfloat16)
    b = jnp.stack(b_list, axis=0).astype(jnp.bfloat16)
    return a, b


def interleave_phases_nhwc(y, N, H, W, cout):
    """y: (4, N*H*W, cout) f32 -> (N, 2H, 2W, cout)."""
    y = y.reshape(2, 2, N, H, W, cout)          # (ph, pw, n, h, w, c)
    y = jnp.transpose(y, (2, 3, 0, 4, 1, 5))    # (n, h, ph, w, pw, c)
    return y.reshape(N, 2 * H, 2 * W, cout)


def convt_s2_phase_operands_T(x_nhwc, w):
    """Transposed operands for the final (Cout=3) layer: the kernel computes
    out^T so the long N*H*W axis lands on lanes instead of padding 3 -> 128."""
    N, H, W, C = x_nhwc.shape
    cout = w.shape[1]
    xp = jnp.pad(x_nhwc, ((0, 0), (1, 1), (1, 1), (0, 0)))
    ones = jnp.ones((cout,), jnp.float32)
    at_list, bt_list = [], []
    for ph in (0, 1):
        for pw in (0, 1):
            taps = [xp[:, ph + dh:ph + dh + H, pw + dw:pw + dw + W, :]
                    for dh in (0, 1) for dw in (0, 1)]
            a_p = jnp.stack(taps, axis=0)               # (4, N, H, W, C)
            a_p = jnp.transpose(a_p, (0, 4, 1, 2, 3))   # (4, C, N, H, W)
            at_list.append(a_p.reshape(4 * C, N * H * W))
            bt_list.append(_phase_weight(w, ph, pw, ones).T)   # (cout, 4*C)
    a = jnp.stack(bt_list, axis=0).astype(jnp.bfloat16)  # kernel "A": (4, cout, 4C)
    b = jnp.stack(at_list, axis=0).astype(jnp.bfloat16)  # kernel "B": (4, 4C, NHW)
    return a, b


def interleave_phases_nchw_T(yt, N, H, W, cout):
    """yt: (4, cout, N*H*W) f32 -> (N, cout, 2H, 2W) (NCHW)."""
    yt = yt.reshape(2, 2, cout, N, H, W)          # (ph, pw, c, n, h, w)
    yt = jnp.transpose(yt, (3, 2, 4, 0, 5, 1))    # (n, c, h, ph, w, pw)
    return yt.reshape(N, cout, 2 * H, 2 * W)


def layer0_operands(x_latent, w, scale):
    """ConvTranspose2d(nz, ngf*8, 4, 1, 0) on a 1x1 input is a plain matmul:
    y[n, oh, ow, co] = sum_ci x[n, ci] * w[ci, co, oh, ow]."""
    Nb = x_latent.shape[0]
    cin, cout = w.shape[0], w.shape[1]
    a = x_latent.reshape(Nb, cin)
    b = jnp.transpose(w, (0, 2, 3, 1)).reshape(cin, KSIZE * KSIZE * cout)
    b = b * jnp.tile(scale, KSIZE * KSIZE)[None, :]
    return a[None].astype(jnp.bfloat16), b[None].astype(jnp.bfloat16)


# ---------------------------------------------------------------------------
# Generator: params + forward
# ---------------------------------------------------------------------------
LAYER_CHANNELS = [(NZ, NGF * 8), (NGF * 8, NGF * 4), (NGF * 4, NGF * 2),
                  (NGF * 2, NGF), (NGF, NC)]
# (stride, padding, activation, has_bn) per layer
LAYER_CFG = [(1, 0, "relu", True), (2, 1, "relu", True), (2, 1, "relu", True),
             (2, 1, "relu", True), (2, 1, "tanh", False)]


def init_params(key):
    keys = jax.random.split(key, 32)
    ki = 0
    params = []
    for li, (cin, cout) in enumerate(LAYER_CHANNELS):
        wt = 0.05 * jax.random.normal(keys[ki], (cin, cout, KSIZE, KSIZE),
                                      dtype=jnp.float32)
        ki += 1
        if LAYER_CFG[li][3]:
            gamma = 1.0 + 0.1 * jax.random.normal(keys[ki], (cout,), jnp.float32); ki += 1
            beta = 0.1 * jax.random.normal(keys[ki], (cout,), jnp.float32); ki += 1
            rmean = 0.1 * jax.random.normal(keys[ki], (cout,), jnp.float32); ki += 1
            rvar = 1.0 + 0.1 * jnp.abs(
                jax.random.normal(keys[ki], (cout,), jnp.float32)); ki += 1
            bn = (gamma, beta, rmean, rvar)
        else:
            bn = None
        params.append((wt, bn))
    return params


def generator_forward(x_nchw, params, use_pallas=True):
    Nb = x_nchw.shape[0]
    x32 = x_nchw.astype(jnp.float32)

    # --- Layer 0: ConvT(nz, ngf*8, 4, 1, 0) + BN + ReLU ---------------------
    w0, bn0 = params[0]
    scale0, shift0 = _fold_bn(bn0)
    a0, b0 = layer0_operands(x32, w0, scale0)
    shift0_full = jnp.tile(shift0, KSIZE * KSIZE)
    y0 = fused_matmul_shift_act(a0, b0, shift0_full, "relu",
                                use_pallas=use_pallas)
    cout0 = w0.shape[1]
    x = y0[0, :Nb].reshape(Nb, KSIZE, KSIZE, cout0)       # NHWC

    # --- Layers 1-3: ConvT(k=4, s=2, p=1) + BN + ReLU -----------------------
    for li in (1, 2, 3):
        w, bn = params[li]
        scale, shift = _fold_bn(bn)
        N_, H_, W_, _ = x.shape
        cout = w.shape[1]
        a, b = convt_s2_phase_operands(x, w, scale)
        y = fused_matmul_shift_act(a, b, shift, "relu", use_pallas=use_pallas)
        x = interleave_phases_nhwc(y, N_, H_, W_, cout)

    # --- Layer 4: ConvT(ngf, nc, 4, 2, 1) + Tanh (transposed matmul) --------
    w4, _ = params[4]
    N_, H_, W_, _ = x.shape
    cout4 = w4.shape[1]
    a, b = convt_s2_phase_operands_T(x, w4)
    shift4 = jnp.zeros((N_ * H_ * W_,), jnp.float32)
    yt = fused_matmul_shift_act(a, b, shift4, "tanh", use_pallas=use_pallas)
    return interleave_phases_nchw_T(yt, N_, H_, W_, cout4)   # NCHW


if __name__ == "__main__":
    key = jax.random.PRNGKey(0)
    pkey, xkey = jax.random.split(key)
    params = init_params(pkey)

    # DCGAN latent input: (batch, nz, 1, 1)
    x = jax.random.normal(xkey, (2, NZ, 1, 1), dtype=jnp.float32)

    fwd = jax.jit(generator_forward, static_argnames=("use_pallas",))
    out = jax.block_until_ready(fwd(x, params, use_pallas=True))
    assert out.shape == (2, NC, 64, 64), out.shape

    # Pure-JAX reference of the same (bf16-operand, f32-accumulate) math to
    # validate the Pallas kernels.  Tolerance accounts for accumulation-order
    # and padding differences across a 5-layer chain of bf16 matmuls (the
    # previous rtol=2e-3 was tighter than bf16 arithmetic can guarantee).
    ref = jax.block_until_ready(generator_forward(x, params, use_pallas=False))
    np.testing.assert_allclose(np.asarray(out), np.asarray(ref),
                               rtol=2e-2, atol=1e-2)

    print("KERNEL_OK")
</pallas_src>

<mosaic_0001>
module attributes {stable_mosaic.version = 11 : i64} {
  func.func @_fused_matmul_kernel(%arg0: i32, %arg1: i32, %arg2: i32, %arg3: i32, %arg4: memref<1x8x128xbf16, #tpu.memory_space<vmem>>, %arg5: memref<1x128x1024xbf16, #tpu.memory_space<vmem>>, %arg6: memref<1x1024xf32, #tpu.memory_space<vmem>>, %arg7: memref<1x8x1024xf32, #tpu.memory_space<vmem>>) attributes {dimension_semantics = [#tpu.dimension_semantics<parallel>, #tpu.dimension_semantics<parallel>, #tpu.dimension_semantics<parallel>, #tpu.dimension_semantics<arbitrary>], iteration_bounds = array<i64: 1, 1, 8, 1>, scalar_prefetch = 0 : i64, scratch_operands = 0 : i64, tpu.core_type = #tpu.core_type<tc>, window_params = [{transform_indices = @transform_0, window_bounds = array<i64: 1, 8, 128>}, {transform_indices = @transform_1, window_bounds = array<i64: 1, 128, 1024>}, {transform_indices = @transform_2, window_bounds = array<i64: 1, 1024>}, {transform_indices = @transform_3, window_bounds = array<i64: 1, 8, 1024>}]} {
    %c0_i32 = arith.constant 0 : i32
    %0 = arith.cmpi eq, %arg3, %c0_i32 : i32
    %1 = arith.extui %0 : i1 to i32
    %c0_i32_0 = arith.constant 0 : i32
    %2 = arith.cmpi ne, %1, %c0_i32_0 : i32
    scf.if %2 {
      %cst_14 = arith.constant 0.000000e+00 : f32
      %17 = vector.broadcast %cst_14 : f32 to vector<8x1024xf32>
      %c0_15 = arith.constant 0 : index
      %c0_16 = arith.constant 0 : index
      %c0_17 = arith.constant 0 : index
      %18 = vector.load %arg7[%c0_15, %c0_16, %c0_17] : memref<1x8x1024xf32, #tpu.memory_space<vmem>>, vector<1x8x1024xf32>
      %19 = vector.shape_cast %18 : vector<1x8x1024xf32> to vector<8x1024xf32>
      %20 = vector.shape_cast %17 : vector<8x1024xf32> to vector<1x8x1024xf32>
      tpu.vector_store %arg7[%c0_15, %c0_16, %c0_17], %20 {strides = array<i32>} : memref<1x8x1024xf32, #tpu.memory_space<vmem>>, vector<1x8x1024xf32>,
    } else {
    }
    %c0 = arith.constant 0 : index
    %c0_1 = arith.constant 0 : index
    %c0_2 = arith.constant 0 : index
    %3 = vector.load %arg7[%c0, %c0_1, %c0_2] : memref<1x8x1024xf32, #tpu.memory_space<vmem>>, vector<1x8x1024xf32>
    %4 = vector.shape_cast %3 : vector<1x8x1024xf32> to vector<8x1024xf32>
    %c0_3 = arith.constant 0 : index
    %c0_4 = arith.constant 0 : index
    %c0_5 = arith.constant 0 : index
    %5 = vector.load %arg4[%c0_3, %c0_4, %c0_5] : memref<1x8x128xbf16, #tpu.memory_space<vmem>>, vector<1x8x128xbf16>
    %6 = vector.shape_cast %5 : vector<1x8x128xbf16> to vector<8x128xbf16>
    %c0_6 = arith.constant 0 : index
    %c0_7 = arith.constant 0 : index
    %c0_8 = arith.constant 0 : index
    %7 = vector.load %arg5[%c0_6, %c0_7, %c0_8] : memref<1x128x1024xbf16, #tpu.memory_space<vmem>>, vector<1x128x1024xbf16>
    %8 = vector.shape_cast %7 : vector<1x128x1024xbf16> to vector<128x1024xbf16>
    %cst = arith.constant dense<0.000000e+00> : vector<8x1024xf32>
    %9 = tpu.matmul %6, %8, %cst {dimension_numbers = #tpu.dot_dimension_numbers<[1], [0], [0], [1], [0, 0, 1, 1], [], []>} : vector<8x128xbf16>, vector<128x1024xbf16>, vector<8x1024xf32> -> vector<8x1024xf32>
    %10 = arith.addf %4, %9 : vector<8x1024xf32>
    %c0_9 = arith.constant 0 : index
    %c0_10 = arith.constant 0 : index
    %c0_11 = arith.constant 0 : index
    %11 = vector.load %arg7[%c0_9, %c0_10, %c0_11] : memref<1x8x1024xf32, #tpu.memory_space<vmem>>, vector<1x8x1024xf32>
    %12 = vector.shape_cast %11 : vector<1x8x1024xf32> to vector<8x1024xf32>
    %13 = vector.shape_cast %10 : vector<8x1024xf32> to vector<1x8x1024xf32>
    tpu.vector_store %arg7[%c0_9, %c0_10, %c0_11], %13 {strides = array<i32>} : memref<1x8x1024xf32, #tpu.memory_space<vmem>>, vector<1x8x1024xf32>,
    %c0_i32_12 = arith.constant 0 : i32
    %14 = arith.cmpi eq, %arg3, %c0_i32_12 : i32
    %15 = arith.extui %14 : i1 to i32
    %c0_i32_13 = arith.constant 0 : i32
    %16 = arith.cmpi ne, %15, %c0_i32_13 : i32
    scf.if %16 {
      %c0_14 = arith.constant 0 : index
      %c0_15 = arith.constant 0 : index
      %c0_16 = arith.constant 0 : index
      %17 = vector.load %arg7[%c0_14, %c0_15, %c0_16] : memref<1x8x1024xf32, #tpu.memory_space<vmem>>, vector<1x8x1024xf32>
      %18 = vector.shape_cast %17 : vector<1x8x1024xf32> to vector<8x1024xf32>
      %c0_17 = arith.constant 0 : index
      %c0_18 = arith.constant 0 : index
      %19 = vector.load %arg6[%c0_17, %c0_18] : memref<1x1024xf32, #tpu.memory_space<vmem>>, vector<1x1024xf32>
      %20 = vector.broadcast %19 : vector<1x1024xf32> to vector<8x1024xf32>
      %21 = arith.addf %18, %20 : vector<8x1024xf32>
      %cst_19 = arith.constant 0.000000e+00 : f32
      %22 = vector.broadcast %cst_19 : f32 to vector<8x1024xf32>
      %23 = arith.maximumf %21, %22 : vector<8x1024xf32>
      %c0_20 = arith.constant 0 : index
      %c0_21 = arith.constant 0 : index
      %c0_22 = arith.constant 0 : index
      %24 = vector.load %arg7[%c0_20, %c0_21, %c0_22] : memref<1x8x1024xf32, #tpu.memory_space<vmem>>, vector<1x8x1024xf32>
      %25 = vector.shape_cast %24 : vector<1x8x1024xf32> to vector<8x1024xf32>
      %26 = vector.shape_cast %23 : vector<8x1024xf32> to vector<1x8x1024xf32>
      tpu.vector_store %arg7[%c0_20, %c0_21, %c0_22], %26 {strides = array<i32>} : memref<1x8x1024xf32, #tpu.memory_space<vmem>>, vector<1x8x1024xf32>,
    } else {
    }
    return
  }
  func.func @transform_0(%arg0: i32, %arg1: i32, %arg2: i32, %arg3: i32) -> (i32, i32, i32) {
    %c0_i32 = arith.constant 0 : i32
    return %arg0, %arg1, %arg3 : i32, i32, i32
  }
  func.func @transform_1(%arg0: i32, %arg1: i32, %arg2: i32, %arg3: i32) -> (i32, i32, i32) {
    %c0_i32 = arith.constant 0 : i32
    return %arg0, %arg3, %arg2 : i32, i32, i32
  }
  func.func @transform_2(%arg0: i32, %arg1: i32, %arg2: i32, %arg3: i32) -> (i32, i32) {
    %c0_i32 = arith.constant 0 : i32
    %c0_i32_0 = arith.constant 0 : i32
    return %c0_i32, %arg2 : i32, i32
  }
  func.func @transform_3(%arg0: i32, %arg1: i32, %arg2: i32, %arg3: i32) -> (i32, i32, i32) {
    %c0_i32 = arith.constant 0 : i32
    return %arg0, %arg1, %arg2 : i32, i32, i32
  }
}

module attributes {stable_mosaic.version = 11 : i64} {
  func.func @_fused_matmul_kernel(%arg0: i32, %arg1: i32, %arg2: i32, %arg3: i32, %arg4: memref<1x32x2048xbf16, #tpu.memory_space<vmem>>, %arg5: memref<1x2048x256xbf16, #tpu.memory_space<vmem>>, %arg6: memref<1x256xf32, #tpu.memory_space<vmem>>, %arg7: memref<1x32x256xf32, #tpu.memory_space<vmem>>) attributes {dimension_semantics = [#tpu.dimension_semantics<parallel>, #tpu.dimension_semantics<parallel>, #tpu.dimension_semantics<parallel>, #tpu.dimension_semantics<arbitrary>], iteration_bounds = array<i64: 4, 1, 1, 1>, scalar_prefetch = 0 : i64, scratch_operands = 0 : i64, tpu.core_type = #tpu.core_type<tc>, window_params = [{transform_indices = @transform_0, window_bounds = array<i64: 1, 32, 2048>}, {transform_indices = @transform_1, window_bounds = array<i64: 1, 2048, 256>}, {transform_indices = @transform_2, window_bounds = array<i64: 1, 256>}, {transform_indices = @transform_3, window_bounds = array<i64: 1, 32, 256>}]} {
    %c0_i32 = arith.constant 0 : i32
    %0 = arith.cmpi eq, %arg3, %c0_i32 : i32
    %1 = arith.extui %0 : i1 to i32
    %c0_i32_0 = arith.constant 0 : i32
    %2 = arith.cmpi ne, %1, %c0_i32_0 : i32
    scf.if %2 {
      %cst_14 = arith.constant 0.000000e+00 : f32
      %17 = vector.broadcast %cst_14 : f32 to vector<32x256xf32>
      %c0_15 = arith.constant 0 : index
      %c0_16 = arith.constant 0 : index
      %c0_17 = arith.constant 0 : index
      %18 = vector.load %arg7[%c0_15, %c0_16, %c0_17] : memref<1x32x256xf32, #tpu.memory_space<vmem>>, vector<1x32x256xf32>
      %19 = vector.shape_cast %18 : vector<1x32x256xf32> to vector<32x256xf32>
      %20 = vector.shape_cast %17 : vector<32x256xf32> to vector<1x32x256xf32>
      tpu.vector_store %arg7[%c0_15, %c0_16, %c0_17], %20 {strides = array<i32>} : memref<1x32x256xf32, #tpu.memory_space<vmem>>, vector<1x32x256xf32>,
    } else {
    }
    %c0 = arith.constant 0 : index
    %c0_1 = arith.constant 0 : index
    %c0_2 = arith.constant 0 : index
    %3 = vector.load %arg7[%c0, %c0_1, %c0_2] : memref<1x32x256xf32, #tpu.memory_space<vmem>>, vector<1x32x256xf32>
    %4 = vector.shape_cast %3 : vector<1x32x256xf32> to vector<32x256xf32>
    %c0_3 = arith.constant 0 : index
    %c0_4 = arith.constant 0 : index
    %c0_5 = arith.constant 0 : index
    %5 = vector.load %arg4[%c0_3, %c0_4, %c0_5] : memref<1x32x2048xbf16, #tpu.memory_space<vmem>>, vector<1x32x2048xbf16>
    %6 = vector.shape_cast %5 : vector<1x32x2048xbf16> to vector<32x2048xbf16>
    %c0_6 = arith.constant 0 : index
    %c0_7 = arith.constant 0 : index
    %c0_8 = arith.constant 0 : index
    %7 = vector.load %arg5[%c0_6, %c0_7, %c0_8] : memref<1x2048x256xbf16, #tpu.memory_space<vmem>>, vector<1x2048x256xbf16>
    %8 = vector.shape_cast %7 : vector<1x2048x256xbf16> to vector<2048x256xbf16>
    %cst = arith.constant dense<0.000000e+00> : vector<32x256xf32>
    %9 = tpu.matmul %6, %8, %cst {dimension_numbers = #tpu.dot_dimension_numbers<[1], [0], [0], [1], [0, 0, 1, 1], [], []>} : vector<32x2048xbf16>, vector<2048x256xbf16>, vector<32x256xf32> -> vector<32x256xf32>
    %10 = arith.addf %4, %9 : vector<32x256xf32>
    %c0_9 = arith.constant 0 : index
    %c0_10 = arith.constant 0 : index
    %c0_11 = arith.constant 0 : index
    %11 = vector.load %arg7[%c0_9, %c0_10, %c0_11] : memref<1x32x256xf32, #tpu.memory_space<vmem>>, vector<1x32x256xf32>
    %12 = vector.shape_cast %11 : vector<1x32x256xf32> to vector<32x256xf32>
    %13 = vector.shape_cast %10 : vector<32x256xf32> to vector<1x32x256xf32>
    tpu.vector_store %arg7[%c0_9, %c0_10, %c0_11], %13 {strides = array<i32>} : memref<1x32x256xf32, #tpu.memory_space<vmem>>, vector<1x32x256xf32>,
    %c0_i32_12 = arith.constant 0 : i32
    %14 = arith.cmpi eq, %arg3, %c0_i32_12 : i32
    %15 = arith.extui %14 : i1 to i32
    %c0_i32_13 = arith.constant 0 : i32
    %16 = arith.cmpi ne, %15, %c0_i32_13 : i32
    scf.if %16 {
      %c0_14 = arith.constant 0 : index
      %c0_15 = arith.constant 0 : index
      %c0_16 = arith.constant 0 : index
      %17 = vector.load %arg7[%c0_14, %c0_15, %c0_16] : memref<1x32x256xf32, #tpu.memory_space<vmem>>, vector<1x32x256xf32>
      %18 = vector.shape_cast %17 : vector<1x32x256xf32> to vector<32x256xf32>
      %c0_17 = arith.constant 0 : index
      %c0_18 = arith.constant 0 : index
      %19 = vector.load %arg6[%c0_17, %c0_18] : memref<1x256xf32, #tpu.memory_space<vmem>>, vector<1x256xf32>
      %20 = vector.broadcast %19 : vector<1x256xf32> to vector<32x256xf32>
      %21 = arith.addf %18, %20 : vector<32x256xf32>
      %cst_19 = arith.constant 0.000000e+00 : f32
      %22 = vector.broadcast %cst_19 : f32 to vector<32x256xf32>
      %23 = arith.maximumf %21, %22 : vector<32x256xf32>
      %c0_20 = arith.constant 0 : index
      %c0_21 = arith.constant 0 : index
      %c0_22 = arith.constant 0 : index
      %24 = vector.load %arg7[%c0_20, %c0_21, %c0_22] : memref<1x32x256xf32, #tpu.memory_space<vmem>>, vector<1x32x256xf32>
      %25 = vector.shape_cast %24 : vector<1x32x256xf32> to vector<32x256xf32>
      %26 = vector.shape_cast %23 : vector<32x256xf32> to vector<1x32x256xf32>
      tpu.vector_store %arg7[%c0_20, %c0_21, %c0_22], %26 {strides = array<i32>} : memref<1x32x256xf32, #tpu.memory_space<vmem>>, vector<1x32x256xf32>,
    } else {
    }
    return
  }
  func.func @transform_0(%arg0: i32, %arg1: i32, %arg2: i32, %arg3: i32) -> (i32, i32, i32) {
    %c0_i32 = arith.constant 0 : i32
    return %arg0, %arg1, %arg3 : i32, i32, i32
  }
  func.func @transform_1(%arg0: i32, %arg1: i32, %arg2: i32, %arg3: i32) -> (i32, i32, i32) {
    %c0_i32 = arith.constant 0 : i32
    return %arg0, %arg3, %arg2 : i32, i32, i32
  }
  func.func @transform_2(%arg0: i32, %arg1: i32, %arg2: i32, %arg3: i32) -> (i32, i32) {
    %c0_i32 = arith.constant 0 : i32
    %c0_i32_0 = arith.constant 0 : i32
    return %c0_i32, %arg2 : i32, i32
  }
  func.func @transform_3(%arg0: i32, %arg1: i32, %arg2: i32, %arg3: i32) -> (i32, i32, i32) {
    %c0_i32 = arith.constant 0 : i32
    return %arg0, %arg1, %arg2 : i32, i32, i32
  }
}

module attributes {stable_mosaic.version = 11 : i64} {
  func.func @_fused_matmul_kernel(%arg0: i32, %arg1: i32, %arg2: i32, %arg3: i32, %arg4: memref<1x128x1024xbf16, #tpu.memory_space<vmem>>, %arg5: memref<1x1024x128xbf16, #tpu.memory_space<vmem>>, %arg6: memref<1x128xf32, #tpu.memory_space<vmem>>, %arg7: memref<1x128x128xf32, #tpu.memory_space<vmem>>) attributes {dimension_semantics = [#tpu.dimension_semantics<parallel>, #tpu.dimension_semantics<parallel>, #tpu.dimension_semantics<parallel>, #tpu.dimension_semantics<arbitrary>], iteration_bounds = array<i64: 4, 1, 1, 1>, scalar_prefetch = 0 : i64, scratch_operands = 0 : i64, tpu.core_type = #tpu.core_type<tc>, window_params = [{transform_indices = @transform_0, window_bounds = array<i64: 1, 128, 1024>}, {transform_indices = @transform_1, window_bounds = array<i64: 1, 1024, 128>}, {transform_indices = @transform_2, window_bounds = array<i64: 1, 128>}, {transform_indices = @transform_3, window_bounds = array<i64: 1, 128, 128>}]} {
    %c0_i32 = arith.constant 0 : i32
    %0 = arith.cmpi eq, %arg3, %c0_i32 : i32
    %1 = arith.extui %0 : i1 to i32
    %c0_i32_0 = arith.constant 0 : i32
    %2 = arith.cmpi ne, %1, %c0_i32_0 : i32
    scf.if %2 {
      %cst_14 = arith.constant 0.000000e+00 : f32
      %17 = vector.broadcast %cst_14 : f32 to vector<128x128xf32>
      %c0_15 = arith.constant 0 : index
      %c0_16 = arith.constant 0 : index
      %c0_17 = arith.constant 0 : index
      %18 = vector.load %arg7[%c0_15, %c0_16, %c0_17] : memref<1x128x128xf32, #tpu.memory_space<vmem>>, vector<1x128x128xf32>
      %19 = vector.shape_cast %18 : vector<1x128x128xf32> to vector<128x128xf32>
      %20 = vector.shape_cast %17 : vector<128x128xf32> to vector<1x128x128xf32>
      tpu.vector_store %arg7[%c0_15, %c0_16, %c0_17], %20 {strides = array<i32>} : memref<1x128x128xf32, #tpu.memory_space<vmem>>, vector<1x128x128xf32>,
    } else {
    }
    %c0 = arith.constant 0 : index
    %c0_1 = arith.constant 0 : index
    %c0_2 = arith.constant 0 : index
    %3 = vector.load %arg7[%c0, %c0_1, %c0_2] : memref<1x128x128xf32, #tpu.memory_space<vmem>>, vector<1x128x128xf32>
    %4 = vector.shape_cast %3 : vector<1x128x128xf32> to vector<128x128xf32>
    %c0_3 = arith.constant 0 : index
    %c0_4 = arith.constant 0 : index
    %c0_5 = arith.constant 0 : index
    %5 = vector.load %arg4[%c0_3, %c0_4, %c0_5] : memref<1x128x1024xbf16, #tpu.memory_space<vmem>>, vector<1x128x1024xbf16>
    %6 = vector.shape_cast %5 : vector<1x128x1024xbf16> to vector<128x1024xbf16>
    %c0_6 = arith.constant 0 : index
    %c0_7 = arith.constant 0 : index
    %c0_8 = arith.constant 0 : index
    %7 = vector.load %arg5[%c0_6, %c0_7, %c0_8] : memref<1x1024x128xbf16, #tpu.memory_space<vmem>>, vector<1x1024x128xbf16>
    %8 = vector.shape_cast %7 : vector<1x1024x128xbf16> to vector<1024x128xbf16>
    %cst = arith.constant dense<0.000000e+00> : vector<128x128xf32>
    %9 = tpu.matmul %6, %8, %cst {dimension_numbers = #tpu.dot_dimension_numbers<[1], [0], [0], [1], [0, 0, 1, 1], [], []>} : vector<128x1024xbf16>, vector<1024x128xbf16>, vector<128x128xf32> -> vector<128x128xf32>
    %10 = arith.addf %4, %9 : vector<128x128xf32>
    %c0_9 = arith.constant 0 : index
    %c0_10 = arith.constant 0 : index
    %c0_11 = arith.constant 0 : index
    %11 = vector.load %arg7[%c0_9, %c0_10, %c0_11] : memref<1x128x128xf32, #tpu.memory_space<vmem>>, vector<1x128x128xf32>
    %12 = vector.shape_cast %11 : vector<1x128x128xf32> to vector<128x128xf32>
    %13 = vector.shape_cast %10 : vector<128x128xf32> to vector<1x128x128xf32>
    tpu.vector_store %arg7[%c0_9, %c0_10, %c0_11], %13 {strides = array<i32>} : memref<1x128x128xf32, #tpu.memory_space<vmem>>, vector<1x128x128xf32>,
    %c0_i32_12 = arith.constant 0 : i32
    %14 = arith.cmpi eq, %arg3, %c0_i32_12 : i32
    %15 = arith.extui %14 : i1 to i32
    %c0_i32_13 = arith.constant 0 : i32
    %16 = arith.cmpi ne, %15, %c0_i32_13 : i32
    scf.if %16 {
      %c0_14 = arith.constant 0 : index
      %c0_15 = arith.constant 0 : index
      %c0_16 = arith.constant 0 : index
      %17 = vector.load %arg7[%c0_14, %c0_15, %c0_16] : memref<1x128x128xf32, #tpu.memory_space<vmem>>, vector<1x128x128xf32>
      %18 = vector.shape_cast %17 : vector<1x128x128xf32> to vector<128x128xf32>
      %c0_17 = arith.constant 0 : index
      %c0_18 = arith.constant 0 : index
      %19 = vector.load %arg6[%c0_17, %c0_18] : memref<1x128xf32, #tpu.memory_space<vmem>>, vector<1x128xf32>
      %20 = vector.broadcast %19 : vector<1x128xf32> to vector<128x128xf32>
      %21 = arith.addf %18, %20 : vector<128x128xf32>
      %cst_19 = arith.constant 0.000000e+00 : f32
      %22 = vector.broadcast %cst_19 : f32 to vector<128x128xf32>
      %23 = arith.maximumf %21, %22 : vector<128x128xf32>
      %c0_20 = arith.constant 0 : index
      %c0_21 = arith.constant 0 : index
      %c0_22 = arith.constant 0 : index
      %24 = vector.load %arg7[%c0_20, %c0_21, %c0_22] : memref<1x128x128xf32, #tpu.memory_space<vmem>>, vector<1x128x128xf32>
      %25 = vector.shape_cast %24 : vector<1x128x128xf32> to vector<128x128xf32>
      %26 = vector.shape_cast %23 : vector<128x128xf32> to vector<1x128x128xf32>
      tpu.vector_store %arg7[%c0_20, %c0_21, %c0_22], %26 {strides = array<i32>} : memref<1x128x128xf32, #tpu.memory_space<vmem>>, vector<1x128x128xf32>,
    } else {
    }
    return
  }
  func.func @transform_0(%arg0: i32, %arg1: i32, %arg2: i32, %arg3: i32) -> (i32, i32, i32) {
    %c0_i32 = arith.constant 0 : i32
    return %arg0, %arg1, %arg3 : i32, i32, i32
  }
  func.func @transform_1(%arg0: i32, %arg1: i32, %arg2: i32, %arg3: i32) -> (i32, i32, i32) {
    %c0_i32 = arith.constant 0 : i32
    return %arg0, %arg3, %arg2 : i32, i32, i32
  }
  func.func @transform_2(%arg0: i32, %arg1: i32, %arg2: i32, %arg3: i32) -> (i32, i32) {
    %c0_i32 = arith.constant 0 : i32
    %c0_i32_0 = arith.constant 0 : i32
    return %c0_i32, %arg2 : i32, i32
  }
  func.func @transform_3(%arg0: i32, %arg1: i32, %arg2: i32, %arg3: i32) -> (i32, i32, i32) {
    %c0_i32 = arith.constant 0 : i32
    return %arg0, %arg1, %arg2 : i32, i32, i32
  }
}

module attributes {stable_mosaic.version = 11 : i64} {
  func.func @_fused_matmul_kernel(%arg0: i32, %arg1: i32, %arg2: i32, %arg3: i32, %arg4: memref<1x512x512xbf16, #tpu.memory_space<vmem>>, %arg5: memref<1x512x128xbf16, #tpu.memory_space<vmem>>, %arg6: memref<1x128xf32, #tpu.memory_space<vmem>>, %arg7: memref<1x512x128xf32, #tpu.memory_space<vmem>>) attributes {dimension_semantics = [#tpu.dimension_semantics<parallel>, #tpu.dimension_semantics<parallel>, #tpu.dimension_semantics<parallel>, #tpu.dimension_semantics<arbitrary>], iteration_bounds = array<i64: 4, 1, 1, 1>, scalar_prefetch = 0 : i64, scratch_operands = 0 : i64, tpu.core_type = #tpu.core_type<tc>, window_params = [{transform_indices = @transform_0, window_bounds = array<i64: 1, 512, 512>}, {transform_indices = @transform_1, window_bounds = array<i64: 1, 512, 128>}, {transform_indices = @transform_2, window_bounds = array<i64: 1, 128>}, {transform_indices = @transform_3, window_bounds = array<i64: 1, 512, 128>}]} {
    %c0_i32 = arith.constant 0 : i32
    %0 = arith.cmpi eq, %arg3, %c0_i32 : i32
    %1 = arith.extui %0 : i1 to i32
    %c0_i32_0 = arith.constant 0 : i32
    %2 = arith.cmpi ne, %1, %c0_i32_0 : i32
    scf.if %2 {
      %cst_14 = arith.constant 0.000000e+00 : f32
      %17 = vector.broadcast %cst_14 : f32 to vector<512x128xf32>
      %c0_15 = arith.constant 0 : index
      %c0_16 = arith.constant 0 : index
      %c0_17 = arith.constant 0 : index
      %18 = vector.load %arg7[%c0_15, %c0_16, %c0_17] : memref<1x512x128xf32, #tpu.memory_space<vmem>>, vector<1x512x128xf32>
      %19 = vector.shape_cast %18 : vector<1x512x128xf32> to vector<512x128xf32>
      %20 = vector.shape_cast %17 : vector<512x128xf32> to vector<1x512x128xf32>
      tpu.vector_store %arg7[%c0_15, %c0_16, %c0_17], %20 {strides = array<i32>} : memref<1x512x128xf32, #tpu.memory_space<vmem>>, vector<1x512x128xf32>,
    } else {
    }
    %c0 = arith.constant 0 : index
    %c0_1 = arith.constant 0 : index
    %c0_2 = arith.constant 0 : index
    %3 = vector.load %arg7[%c0, %c0_1, %c0_2] : memref<1x512x128xf32, #tpu.memory_space<vmem>>, vector<1x512x128xf32>
    %4 = vector.shape_cast %3 : vector<1x512x128xf32> to vector<512x128xf32>
    %c0_3 = arith.constant 0 : index
    %c0_4 = arith.constant 0 : index
    %c0_5 = arith.constant 0 : index
    %5 = vector.load %arg4[%c0_3, %c0_4, %c0_5] : memref<1x512x512xbf16, #tpu.memory_space<vmem>>, vector<1x512x512xbf16>
    %6 = vector.shape_cast %5 : vector<1x512x512xbf16> to vector<512x512xbf16>
    %c0_6 = arith.constant 0 : index
    %c0_7 = arith.constant 0 : index
    %c0_8 = arith.constant 0 : index
    %7 = vector.load %arg5[%c0_6, %c0_7, %c0_8] : memref<1x512x128xbf16, #tpu.memory_space<vmem>>, vector<1x512x128xbf16>
    %8 = vector.shape_cast %7 : vector<1x512x128xbf16> to vector<512x128xbf16>
    %cst = arith.constant dense<0.000000e+00> : vector<512x128xf32>
    %9 = tpu.matmul %6, %8, %cst {dimension_numbers = #tpu.dot_dimension_numbers<[1], [0], [0], [1], [0, 0, 1, 1], [], []>} : vector<512x512xbf16>, vector<512x128xbf16>, vector<512x128xf32> -> vector<512x128xf32>
    %10 = arith.addf %4, %9 : vector<512x128xf32>
    %c0_9 = arith.constant 0 : index
    %c0_10 = arith.constant 0 : index
    %c0_11 = arith.constant 0 : index
    %11 = vector.load %arg7[%c0_9, %c0_10, %c0_11] : memref<1x512x128xf32, #tpu.memory_space<vmem>>, vector<1x512x128xf32>
    %12 = vector.shape_cast %11 : vector<1x512x128xf32> to vector<512x128xf32>
    %13 = vector.shape_cast %10 : vector<512x128xf32> to vector<1x512x128xf32>
    tpu.vector_store %arg7[%c0_9, %c0_10, %c0_11], %13 {strides = array<i32>} : memref<1x512x128xf32, #tpu.memory_space<vmem>>, vector<1x512x128xf32>,
    %c0_i32_12 = arith.constant 0 : i32
    %14 = arith.cmpi eq, %arg3, %c0_i32_12 : i32
    %15 = arith.extui %14 : i1 to i32
    %c0_i32_13 = arith.constant 0 : i32
    %16 = arith.cmpi ne, %15, %c0_i32_13 : i32
    scf.if %16 {
      %c0_14 = arith.constant 0 : index
      %c0_15 = arith.constant 0 : index
      %c0_16 = arith.constant 0 : index
      %17 = vector.load %arg7[%c0_14, %c0_15, %c0_16] : memref<1x512x128xf32, #tpu.memory_space<vmem>>, vector<1x512x128xf32>
      %18 = vector.shape_cast %17 : vector<1x512x128xf32> to vector<512x128xf32>
      %c0_17 = arith.constant 0 : index
      %c0_18 = arith.constant 0 : index
      %19 = vector.load %arg6[%c0_17, %c0_18] : memref<1x128xf32, #tpu.memory_space<vmem>>, vector<1x128xf32>
      %20 = vector.broadcast %19 : vector<1x128xf32> to vector<512x128xf32>
      %21 = arith.addf %18, %20 : vector<512x128xf32>
      %cst_19 = arith.constant 0.000000e+00 : f32
      %22 = vector.broadcast %cst_19 : f32 to vector<512x128xf32>
      %23 = arith.maximumf %21, %22 : vector<512x128xf32>
      %c0_20 = arith.constant 0 : index
      %c0_21 = arith.constant 0 : index
      %c0_22 = arith.constant 0 : index
      %24 = vector.load %arg7[%c0_20, %c0_21, %c0_22] : memref<1x512x128xf32, #tpu.memory_space<vmem>>, vector<1x512x128xf32>
      %25 = vector.shape_cast %24 : vector<1x512x128xf32> to vector<512x128xf32>
      %26 = vector.shape_cast %23 : vector<512x128xf32> to vector<1x512x128xf32>
      tpu.vector_store %arg7[%c0_20, %c0_21, %c0_22], %26 {strides = array<i32>} : memref<1x512x128xf32, #tpu.memory_space<vmem>>, vector<1x512x128xf32>,
    } else {
    }
    return
  }
  func.func @transform_0(%arg0: i32, %arg1: i32, %arg2: i32, %arg3: i32) -> (i32, i32, i32) {
    %c0_i32 = arith.constant 0 : i32
    return %arg0, %arg1, %arg3 : i32, i32, i32
  }
  func.func @transform_1(%arg0: i32, %arg1: i32, %arg2: i32, %arg3: i32) -> (i32, i32, i32) {
    %c0_i32 = arith.constant 0 : i32
    return %arg0, %arg3, %arg2 : i32, i32, i32
  }
  func.func @transform_2(%arg0: i32, %arg1: i32, %arg2: i32, %arg3: i32) -> (i32, i32) {
    %c0_i32 = arith.constant 0 : i32
    %c0_i32_0 = arith.constant 0 : i32
    return %c0_i32, %arg2 : i32, i32
  }
  func.func @transform_3(%arg0: i32, %arg1: i32, %arg2: i32, %arg3: i32) -> (i32, i32, i32) {
    %c0_i32 = arith.constant 0 : i32
    return %arg0, %arg1, %arg2 : i32, i32, i32
  }
}

module attributes {stable_mosaic.version = 11 : i64} {
  func.func @_fused_matmul_kernel(%arg0: i32, %arg1: i32, %arg2: i32, %arg3: i32, %arg4: memref<1x8x256xbf16, #tpu.memory_space<vmem>>, %arg5: memref<1x256x1024xbf16, #tpu.memory_space<vmem>>, %arg6: memref<1x1024xf32, #tpu.memory_space<vmem>>, %arg7: memref<1x8x1024xf32, #tpu.memory_space<vmem>>) attributes {dimension_semantics = [#tpu.dimension_semantics<parallel>, #tpu.dimension_semantics<parallel>, #tpu.dimension_semantics<parallel>, #tpu.dimension_semantics<arbitrary>], iteration_bounds = array<i64: 4, 1, 2, 1>, scalar_prefetch = 0 : i64, scratch_operands = 0 : i64, tpu.core_type = #tpu.core_type<tc>, window_params = [{transform_indices = @transform_0, window_bounds = array<i64: 1, 8, 256>}, {transform_indices = @transform_1, window_bounds = array<i64: 1, 256, 1024>}, {transform_indices = @transform_2, window_bounds = array<i64: 1, 1024>}, {transform_indices = @transform_3, window_bounds = array<i64: 1, 8, 1024>}]} {
    %c0_i32 = arith.constant 0 : i32
    %0 = arith.cmpi eq, %arg3, %c0_i32 : i32
    %1 = arith.extui %0 : i1 to i32
    %c0_i32_0 = arith.constant 0 : i32
    %2 = arith.cmpi ne, %1, %c0_i32_0 : i32
    scf.if %2 {
      %cst_14 = arith.constant 0.000000e+00 : f32
      %17 = vector.broadcast %cst_14 : f32 to vector<8x1024xf32>
      %c0_15 = arith.constant 0 : index
      %c0_16 = arith.constant 0 : index
      %c0_17 = arith.constant 0 : index
      %18 = vector.load %arg7[%c0_15, %c0_16, %c0_17] : memref<1x8x1024xf32, #tpu.memory_space<vmem>>, vector<1x8x1024xf32>
      %19 = vector.shape_cast %18 : vector<1x8x1024xf32> to vector<8x1024xf32>
      %20 = vector.shape_cast %17 : vector<8x1024xf32> to vector<1x8x1024xf32>
      tpu.vector_store %arg7[%c0_15, %c0_16, %c0_17], %20 {strides = array<i32>} : memref<1x8x1024xf32, #tpu.memory_space<vmem>>, vector<1x8x1024xf32>,
    } else {
    }
    %c0 = arith.constant 0 : index
    %c0_1 = arith.constant 0 : index
    %c0_2 = arith.constant 0 : index
    %3 = vector.load %arg7[%c0, %c0_1, %c0_2] : memref<1x8x1024xf32, #tpu.memory_space<vmem>>, vector<1x8x1024xf32>
    %4 = vector.shape_cast %3 : vector<1x8x1024xf32> to vector<8x1024xf32>
    %c0_3 = arith.constant 0 : index
    %c0_4 = arith.constant 0 : index
    %c0_5 = arith.constant 0 : index
    %5 = vector.load %arg4[%c0_3, %c0_4, %c0_5] : memref<1x8x256xbf16, #tpu.memory_space<vmem>>, vector<1x8x256xbf16>
    %6 = vector.shape_cast %5 : vector<1x8x256xbf16> to vector<8x256xbf16>
    %c0_6 = arith.constant 0 : index
    %c0_7 = arith.constant 0 : index
    %c0_8 = arith.constant 0 : index
    %7 = vector.load %arg5[%c0_6, %c0_7, %c0_8] : memref<1x256x1024xbf16, #tpu.memory_space<vmem>>, vector<1x256x1024xbf16>
    %8 = vector.shape_cast %7 : vector<1x256x1024xbf16> to vector<256x1024xbf16>
    %cst = arith.constant dense<0.000000e+00> : vector<8x1024xf32>
    %9 = tpu.matmul %6, %8, %cst {dimension_numbers = #tpu.dot_dimension_numbers<[1], [0], [0], [1], [0, 0, 1, 1], [], []>} : vector<8x256xbf16>, vector<256x1024xbf16>, vector<8x1024xf32> -> vector<8x1024xf32>
    %10 = arith.addf %4, %9 : vector<8x1024xf32>
    %c0_9 = arith.constant 0 : index
    %c0_10 = arith.constant 0 : index
    %c0_11 = arith.constant 0 : index
    %11 = vector.load %arg7[%c0_9, %c0_10, %c0_11] : memref<1x8x1024xf32, #tpu.memory_space<vmem>>, vector<1x8x1024xf32>
    %12 = vector.shape_cast %11 : vector<1x8x1024xf32> to vector<8x1024xf32>
    %13 = vector.shape_cast %10 : vector<8x1024xf32> to vector<1x8x1024xf32>
    tpu.vector_store %arg7[%c0_9, %c0_10, %c0_11], %13 {strides = array<i32>} : memref<1x8x1024xf32, #tpu.memory_space<vmem>>, vector<1x8x1024xf32>,
    %c0_i32_12 = arith.constant 0 : i32
    %14 = arith.cmpi eq, %arg3, %c0_i32_12 : i32
    %15 = arith.extui %14 : i1 to i32
    %c0_i32_13 = arith.constant 0 : i32
    %16 = arith.cmpi ne, %15, %c0_i32_13 : i32
    scf.if %16 {
      %c0_14 = arith.constant 0 : index
      %c0_15 = arith.constant 0 : index
      %c0_16 = arith.constant 0 : index
      %17 = vector.load %arg7[%c0_14, %c0_15, %c0_16] : memref<1x8x1024xf32, #tpu.memory_space<vmem>>, vector<1x8x1024xf32>
      %18 = vector.shape_cast %17 : vector<1x8x1024xf32> to vector<8x1024xf32>
      %c0_17 = arith.constant 0 : index
      %c0_18 = arith.constant 0 : index
      %19 = vector.load %arg6[%c0_17, %c0_18] : memref<1x1024xf32, #tpu.memory_space<vmem>>, vector<1x1024xf32>
      %20 = vector.broadcast %19 : vector<1x1024xf32> to vector<8x1024xf32>
      %21 = arith.addf %18, %20 : vector<8x1024xf32>
      %22 = math.tanh %21 : vector<8x1024xf32>
      %c0_19 = arith.constant 0 : index
      %c0_20 = arith.constant 0 : index
      %c0_21 = arith.constant 0 : index
      %23 = vector.load %arg7[%c0_19, %c0_20, %c0_21] : memref<1x8x1024xf32, #tpu.memory_space<vmem>>, vector<1x8x1024xf32>
      %24 = vector.shape_cast %23 : vector<1x8x1024xf32> to vector<8x1024xf32>
      %25 = vector.shape_cast %22 : vector<8x1024xf32> to vector<1x8x1024xf32>
      tpu.vector_store %arg7[%c0_19, %c0_20, %c0_21], %25 {strides = array<i32>} : memref<1x8x1024xf32, #tpu.memory_space<vmem>>, vector<1x8x1024xf32>,
    } else {
    }
    return
  }
  func.func @transform_0(%arg0: i32, %arg1: i32, %arg2: i32, %arg3: i32) -> (i32, i32, i32) {
    %c0_i32 = arith.constant 0 : i32
    return %arg0, %arg1, %arg3 : i32, i32, i32
  }
  func.func @transform_1(%arg0: i32, %arg1: i32, %arg2: i32, %arg3: i32) -> (i32, i32, i32) {
    %c0_i32 = arith.constant 0 : i32
    return %arg0, %arg3, %arg2 : i32, i32, i32
  }
  func.func @transform_2(%arg0: i32, %arg1: i32, %arg2: i32, %arg3: i32) -> (i32, i32) {
    %c0_i32 = arith.constant 0 : i32
    %c0_i32_0 = arith.constant 0 : i32
    return %c0_i32, %arg2 : i32, i32
  }
  func.func @transform_3(%arg0: i32, %arg1: i32, %arg2: i32, %arg3: i32) -> (i32, i32, i32) {
    %c0_i32 = arith.constant 0 : i32
    return %arg0, %arg1, %arg2 : i32, i32, i32
  }
}

</mosaic_0001>

<bundles_post_ra>
// kernel: generator_forward.5
= control target key start
LH: loop header
LB: loop body
LE: loop exit
PB: predicated region body
PF: predicated region fallthrough
CT: control target
= control target key end

     0   :  { %s1423_s12 = smov 0   ;;  %s1425_s13 = smov 0   ;;  %s1712_s0 = inlined_call_operand.vmem [shape: bf16[1,8,128], index: 0, kind: input, shape index: {}]   ;;  %s1713_s1 = inlined_call_operand.vmem [shape: bf16[1,128,8192], index: 1, kind: input, shape index: {}]   ;;  %s1714_s2 = inlined_call_operand.vmem [shape: f32[1,8192], index: 2, kind: input, shape index: {}]   ;;  %s1715_s3 = inlined_call_operand.vmem [shape: f32[1,8,8192], index: 3, kind: output, shape index: {}]  }
   0x1   :  { %s1427_s14 = smov 0   ;;  %s1429_s15 = smov 0  }
   0x2   :  { %s1431_s16 = smov 0  }
   0x3 LB: > { %s31_s17 = sadd.s32 1, %s1396_s15  ;;  %p87_p1 = scmp.ne.s32.totalorder %s1388_s13, %s1384_s12  ;;  %s1400_s16 = sphi %s1431_s16, %s13_s16   ;;  %s1396_s15 = sphi %s1429_s15, %s1719_s15   ;;  %s1392_s14 = sphi %s1427_s14, %s1718_s14   ;;  %s1388_s13 = sphi %s1425_s13, %s1717_s13   ;;  %s1384_s12 = sphi %s1423_s12, %s1716_s12  }
   0x4   : > { %p33_p0 = scmp.ge.s32.totalorder %s31_s17, 8  ;;  %p88_p2 = scmp.eq.s32.totalorder %s1400_s16, 0 }
   0x5   : > { %s80_s19 = sadd.s32 1, %s1388_s13  ;;  %p1244_p5 = scmp.ge.s32.totalorder %s1400_s16, 8 }
   0x6   : > { %s1721_s17 = smov (%p33_p0, %s31_s17), 0  ;;  %p89_p3 = por %p88_p2, %p87_p1 }
   0x7   : > { %s76_s18 = ssub.s32 %s1396_s15, %s1721_s17  ;;  %182 = sbr.rel (%p1244_p5) target bundleno = 48 (0x30), region = 20 }
   0x8   : > { %p78_p4 = scmp.eq.s32.totalorder %s76_s18, 0 }
   0xa   : > { %s1458_s20 = scalar_select %p78_p4, %s1388_s13, %s80_s19  }
   0xc   : > { %185 = sbr.rel (!%p89_p3) target bundleno = 48 (0x30), region = 24  ;;  %s187_s21 = sand.u32 (%p89_p3), 1, %s1388_s13  }
   0xd   : > { %s1319_s22 = sshll.u32 (%p89_p3), %s1396_s15, 5  ;;  %s1245_s23 = sshll.u32 (%p89_p3), %s187_s21, 9 }
   0xe   : > { %s1466_s26 = scalar_lea.vmem (%p89_p3), %s1713_s1, %s1319_s22  ;;  %s1471_s27 = scalar_lea.vmem (%p89_p3), [#allocation2], %s1245_s23 }
   0xf   : > { %v210_v0 = vld [vmem:[%s1466_s26] sm:$0xff] (%p89_p3)  ;;  %v212_v1 = vld [vmem:[%s1466_s26 + $0x8] sm:$0xff] (%p89_p3)  ;;  %v214_v2 = vld [vmem:[%s1466_s26 + $0x10] sm:$0xff] (%p89_p3) }
  0x10   : > { %211 = vst [vmem:[%s1471_s27] sm:$0xff] (%p89_p3), %v210_v0  ;;  %213 = vst [vmem:[%s1471_s27 + $0x8] sm:$0xff] (%p89_p3), %v212_v1  ;;  %v216_v3 = vld [vmem:[%s1466_s26 + $0x18] sm:$0xff] (%p89_p3)  ;;  %v218_v4 = vld [vmem:[%s1466_s26 + $0x100] sm:$0xff] (%p89_p3) }
  0x11   : > { %215 = vst [vmem:[%s1471_s27 + $0x10] sm:$0xff] %v214_v2  ;;  %v220_v5 = vld [vmem:[%s1466_s26 + $0x108] sm:$0xff]  ;;  %217 = vst [vmem:[%s1471_s27 + $0x18] sm:$0xff] %v216_v3  ;;  %v222_v6 = vld [vmem:[%s1466_s26 + $0x110] sm:$0xff] }
  0x12   : > { %219 = vst [vmem:[%s1471_s27 + $0x20] sm:$0xff] %v218_v4  ;;  %221 = vst [vmem:[%s1471_s27 + $0x28] sm:$0xff] %v220_v5  ;;  %v224_v7 = vld [vmem:[%s1466_s26 + $0x118] sm:$0xff]  ;;  %v226_v8 = vld [vmem:[%s1466_s26 + $0x200] sm:$0xff] }
  0x13   : > { %223 = vst [vmem:[%s1471_s27 + $0x30] sm:$0xff] %v222_v6  ;;  %225 = vst [vmem:[%s1471_s27 + $0x38] sm:$0xff] %v224_v7  ;;  %v228_v9 = vld [vmem:[%s1466_s26 + $0x208] sm:$0xff]  ;;  %v230_v10 = vld [vmem:[%s1466_s26 + $0x210] sm:$0xff] }
  0x14   : > { %227 = vst [vmem:[%s1471_s27 + $0x40] sm:$0xff] %v226_v8  ;;  %v232_v11 = vld [vmem:[%s1466_s26 + $0x218] sm:$0xff]  ;;  %229 = vst [vmem:[%s1471_s27 + $0x48] sm:$0xff] %v228_v9  ;;  %v234_v12 = vld [vmem:[%s1466_s26 + $0x300] sm:$0xff] }
  0x15   : > { %231 = vst [vmem:[%s1471_s27 + $0x50] sm:$0xff] %v230_v10  ;;  %233 = vst [vmem:[%s1471_s27 + $0x58] sm:$0xff] %v232_v11  ;;  %v236_v13 = vld [vmem:[%s1466_s26 + $0x308] sm:$0xff]  ;;  %v238_v14 = vld [vmem:[%s1466_s26 + $0x310] sm:$0xff] }
  0x16   : > { %235 = vst [vmem:[%s1471_s27 + $0x60] sm:$0xff] %v234_v12  ;;  %237 = vst [vmem:[%s1471_s27 + $0x68] sm:$0xff] %v236_v13  ;;  %v240_v15 = vld [vmem:[%s1466_s26 + $0x318] sm:$0xff]  ;;  %v242_v16 = vld [vmem:[%s1466_s26 + $0x400] sm:$0xff] }
  0x17   : > { %239 = vst [vmem:[%s1471_s27 + $0x70] sm:$0xff] %v238_v14  ;;  %v244_v17 = vld [vmem:[%s1466_s26 + $0x408] sm:$0xff]  ;;  %241 = vst [vmem:[%s1471_s27 + $0x78] sm:$0xff] %v240_v15  ;;  %v246_v18 = vld [vmem:[%s1466_s26 + $0x410] sm:$0xff] }
  0x18   : > { %243 = vst [vmem:[%s1471_s27 + $0x80] sm:$0xff] %v242_v16  ;;  %245 = vst [vmem:[%s1471_s27 + $0x88] sm:$0xff] %v244_v17  ;;  %v248_v19 = vld [vmem:[%s1466_s26 + $0x418] sm:$0xff]  ;;  %v250_v20 = vld [vmem:[%s1466_s26 + $0x500] sm:$0xff] }
  0x19   : > { %247 = vst [vmem:[%s1471_s27 + $0x90] sm:$0xff] %v246_v18  ;;  %249 = vst [vmem:[%s1471_s27 + $0x98] sm:$0xff] %v248_v19  ;;  %v252_v21 = vld [vmem:[%s1466_s26 + $0x508] sm:$0xff]  ;;  %v254_v22 = vld [vmem:[%s1466_s26 + $0x510] sm:$0xff] }
  0x1a   : > { %251 = vst [vmem:[%s1471_s27 + $0xa0] sm:$0xff] %v250_v20  ;;  %v256_v23 = vld [vmem:[%s1466_s26 + $0x518] sm:$0xff]  ;;  %253 = vst [vmem:[%s1471_s27 + $0xa8] sm:$0xff] %v252_v21  ;;  %v258_v24 = vld [vmem:[%s1466_s26 + $0x600] sm:$0xff] }
  0x1b   : > { %255 = vst [vmem:[%s1471_s27 + $0xb0] sm:$0xff] %v254_v22  ;;  %257 = vst [vmem:[%s1471_s27 + $0xb8] sm:$0xff] %v256_v23  ;;  %v260_v25 = vld [vmem:[%s1466_s26 + $0x608] sm:$0xff]  ;;  %v262_v26 = vld [vmem:[%s1466_s26 + $0x610] sm:$0xff] }
  0x1c   : > { %259 = vst [vmem:[%s1471_s27 + $0xc0] sm:$0xff] %v258_v24  ;;  %261 = vst [vmem:[%s1471_s27 + $0xc8] sm:$0xff] %v260_v25  ;;  %v264_v27 = vld [vmem:[%s1466_s26 + $0x618] sm:$0xff]  ;;  %v266_v28 = vld [vmem:[%s1466_s26 + $0x700] sm:$0xff] }
  0x1d   : > { %263 = vst [vmem:[%s1471_s27 + $0xd0] sm:$0xff] %v262_v26  ;;  %v268_v29 = vld [vmem:[%s1466_s26 + $0x708] sm:$0xff]  ;;  %265 = vst [vmem:[%s1471_s27 + $0xd8] sm:$0xff] %v264_v27  ;;  %v270_v30 = vld [vmem:[%s1466_s26 + $0x710] sm:$0xff] }
  0x1e   : > { %267 = vst [vmem:[%s1471_s27 + $0xe0] sm:$0xff] %v266_v28  ;;  %269 = vst [vmem:[%s1471_s27 + $0xe8] sm:$0xff] %v268_v29  ;;  %v272_v31 = vld [vmem:[%s1466_s26 + $0x718] sm:$0xff]  ;;  %v274_v32 = vld [vmem:[%s1466_s26 + $0x800] sm:$0xff] }
  0x1f   : > { %271 = vst [vmem:[%s1471_s27 + $0xf0] sm:$0xff] %v270_v30  ;;  %273 = vst [vmem:[%s1471_s27 + $0xf8] sm:$0xff] %v272_v31  ;;  %v276_v33 = vld [vmem:[%s1466_s26 + $0x808] sm:$0xff]  ;;  %v278_v34 = vld [vmem:[%s1466_s26 + $0x810] sm:$0xff] }
  0x20   : > { %275 = vst [vmem:[%s1471_s27 + $0x100] sm:$0xff] %v274_v32  ;;  %v280_v35 = vld [vmem:[%s1466_s26 + $0x818] sm:$0xff]  ;;  %277 = vst [vmem:[%s1471_s27 + $0x108] sm:$0xff] %v276_v33  ;;  %v282_v36 = vld [vmem:[%s1466_s26 + $0x900] sm:$0xff] }
  0x21   : > { %279 = vst [vmem:[%s1471_s27 + $0x110] sm:$0xff] %v278_v34  ;;  %281 = vst [vmem:[%s1471_s27 + $0x118] sm:$0xff] %v280_v35  ;;  %v284_v37 = vld [vmem:[%s1466_s26 + $0x908] sm:$0xff]  ;;  %v286_v38 = vld [vmem:[%s1466_s26 + $0x910] sm:$0xff] }
  0x22   : > { %283 = vst [vmem:[%s1471_s27 + $0x120] sm:$0xff] %v282_v36  ;;  %285 = vst [vmem:[%s1471_s27 + $0x128] sm:$0xff] %v284_v37  ;;  %v288_v39 = vld [vmem:[%s1466_s26 + $0x918] sm:$0xff]  ;;  %v290_v40 = vld [vmem:[%s1466_s26 + $0xa00] sm:$0xff] }
  0x23   : > { %287 = vst [vmem:[%s1471_s27 + $0x130] sm:$0xff] %v286_v38  ;;  %v292_v41 = vld [vmem:[%s1466_s26 + $0xa08] sm:$0xff]  ;;  %289 = vst [vmem:[%s1471_s27 + $0x138] sm:$0xff] %v288_v39  ;;  %v294_v42 = vld [vmem:[%s1466_s26 + $0xa10] sm:$0xff] }
  0x24   : > { %291 = vst [vmem:[%s1471_s27 + $0x140] sm:$0xff] %v290_v40  ;;  %293 = vst [vmem:[%s1471_s27 + $0x148] sm:$0xff] %v292_v41  ;;  %v296_v43 = vld [vmem:[%s1466_s26 + $0xa18] sm:$0xff]  ;;  %v298_v44 = vld [vmem:[%s1466_s26 + $0xb00] sm:$0xff] }
  0x25   : > { %295 = vst [vmem:[%s1471_s27 + $0x150] sm:$0xff] %v294_v42  ;;  %297 = vst [vmem:[%s1471_s27 + $0x158] sm:$0xff] %v296_v43  ;;  %v300_v45 = vld [vmem:[%s1466_s26 + $0xb08] sm:$0xff]  ;;  %v302_v46 = vld [vmem:[%s1466_s26 + $0xb10] sm:$0xff] }
  0x26   : > { %299 = vst [vmem:[%s1471_s27 + $0x160] sm:$0xff] %v298_v44  ;;  %v304_v47 = vld [vmem:[%s1466_s26 + $0xb18] sm:$0xff]  ;;  %301 = vst [vmem:[%s1471_s27 + $0x168] sm:$0xff] %v300_v45  ;;  %v306_v48 = vld [vmem:[%s1466_s26 + $0xc00] sm:$0xff] }
  0x27   : > { %303 = vst [vmem:[%s1471_s27 + $0x170] sm:$0xff] %v302_v46  ;;  %305 = vst [vmem:[%s1471_s27 + $0x178] sm:$0xff] %v304_v47  ;;  %v308_v49 = vld [vmem:[%s1466_s26 + $0xc08] sm:$0xff]  ;;  %v310_v50 = vld [vmem:[%s1466_s26 + $0xc10] sm:$0xff] }
  0x28   : > { %307 = vst [vmem:[%s1471_s27 + $0x180] sm:$0xff] %v306_v48  ;;  %309 = vst [vmem:[%s1471_s27 + $0x188] sm:$0xff] %v308_v49  ;;  %v312_v51 = vld [vmem:[%s1466_s26 + $0xc18] sm:$0xff]  ;;  %v314_v52 = vld [vmem:[%s1466_s26 + $0xd00] sm:$0xff] }
  0x29   : > { %311 = vst [vmem:[%s1471_s27 + $0x190] sm:$0xff] %v310_v50  ;;  %v316_v53 = vld [vmem:[%s1466_s26 + $0xd08] sm:$0xff]  ;;  %313 = vst [vmem:[%s1471_s27 + $0x198] sm:$0xff] %v312_v51  ;;  %v318_v54 = vld [vmem:[%s1466_s26 + $0xd10] sm:$0xff] }
  0x2a   : > { %315 = vst [vmem:[%s1471_s27 + $0x1a0] sm:$0xff] %v314_v52  ;;  %317 = vst [vmem:[%s1471_s27 + $0x1a8] sm:$0xff] %v316_v53  ;;  %v320_v55 = vld [vmem:[%s1466_s26 + $0xd18] sm:$0xff]  ;;  %v322_v56 = vld [vmem:[%s1466_s26 + $0xe00] sm:$0xff] }
  0x2b   : > { %319 = vst [vmem:[%s1471_s27 + $0x1b0] sm:$0xff] %v318_v54  ;;  %321 = vst [vmem:[%s1471_s27 + $0x1b8] sm:$0xff] %v320_v55  ;;  %v324_v57 = vld [vmem:[%s1466_s26 + $0xe08] sm:$0xff]  ;;  %v326_v58 = vld [vmem:[%s1466_s26 + $0xe10] sm:$0xff] }
  0x2c   : > { %323 = vst [vmem:[%s1471_s27 + $0x1c0] sm:$0xff] %v322_v56  ;;  %v328_v59 = vld [vmem:[%s1466_s26 + $0xe18] sm:$0xff]  ;;  %325 = vst [vmem:[%s1471_s27 + $0x1c8] sm:$0xff] %v324_v57  ;;  %v330_v60 = vld [vmem:[%s1466_s26 + $0xf00] sm:$0xff] }
  0x2d   : > { %327 = vst [vmem:[%s1471_s27 + $0x1d0] sm:$0xff] %v326_v58  ;;  %329 = vst [vmem:[%s1471_s27 + $0x1d8] sm:$0xff] %v328_v59  ;;  %v332_v61 = vld [vmem:[%s1466_s26 + $0xf08] sm:$0xff]  ;;  %v334_v62 = vld [vmem:[%s1466_s26 + $0xf10] sm:$0xff] }
  0x2e   : > { %331 = vst [vmem:[%s1471_s27 + $0x1e0] sm:$0xff] %v330_v60  ;;  %333 = vst [vmem:[%s1471_s27 + $0x1e8] sm:$0xff] %v332_v61  ;;  %v336_v63 = vld [vmem:[%s1466_s26 + $0xf18] sm:$0xff] }
  0x2f   : > { %335 = vst [vmem:[%s1471_s27 + $0x1f0] sm:$0xff] %v334_v62  ;;  %337 = vst [vmem:[%s1471_s27 + $0x1f8] sm:$0xff] %v336_v63 }
  0x30 PF: > { %p1248_p6 = scmp.ge.s32.totalorder %s1400_s16, 1  ;;  %p350_p7 = scmp.lt.s32.totalorder %s1400_s16, 9 }
  0x32   : > { %p351_p8 = pnand %p1248_p6, %p350_p7 }
  0x33   : > { %s357_s28 = sand.u32 (!%p351_p8), 1, %s1384_s12   ;;  %s1250_s6 = sshll.u32 (!%p351_p8), %s1392_s14, 3 }
  0x34   : > { %354 = sbr.rel (%p351_p8) target bundleno = 325 (0x145), region = 51  ;;  %s1249_s29 = sshll.u32 (!%p351_p8), %s357_s28, 9 }
  0x35   : > { %s1603_s30 = scalar_lea.vmem (!%p351_p8), [#allocation2], %s1249_s29  ;;  %p415_p9 = scmp.lt.s32.totalorder (!%p351_p8), %s1250_s6, 63 }
  0x39   : > { %v1402_v0 = vmov 0   ;;  %v511_v1 = vld [vmem:[%s1603_s30 + $0x1c0] sm:$0xff]  ;;  %v512_v3 = vld [vmem:[%s1603_s30 + $0x1c8] sm:$0xff]  ;;  %v513_v63 = vld [vmem:[%s1603_s30 + $0x1d0] sm:$0xff]  ;;  %s1723_s6 = smov (!%p415_p9, %s1250_s6), 63 }
  0x3a   : > { %871 = vmatprep.mubr.bf16.mxu0 %v1402_v0  ;;  %912 = vmatprep.mubr.bf16.mxu1 %v1402_v0  ;;  %v515_v2 = vld [vmem:[%s1603_s30 + $0x1e0] sm:$0xff]  ;;  %v516_v5 = vld [vmem:[%s1603_s30 + $0x1e8] sm:$0xff]  ;;  %s417_s9 = scalar_lea.vmem %s1714_s2, %s1723_s6  ;;  %s1252_s10 = sshll.u32 %s1723_s6, 3 }
  0x3b   : > { %v1310_v4 = vcombine.high %v511_v1, %v515_v2  ;;  %v1309_v6 = vcombine.low %v511_v1, %v515_v2  ;;  %v503_v7 = vld [vmem:[%s1603_s30 + $0x180] sm:$0xff]  ;;  %v1312_v9 = vcombine.high %v512_v3, %v516_v5  ;;  %v1311_v10 = vcombine.low %v512_v3, %v516_v5  ;;  %v504_v12 = vld [vmem:[%s1603_s30 + $0x188] sm:$0xff]  ;;  %v517_v1 = vld [vmem:[%s1603_s30 + $0x1f0] sm:$0xff]  ;;  %s1687_s14 = scalar_lea.vmem %s1715_s3, %s1252_s10 }
  0x3c   : > { %v507_v8 = vld [vmem:[%s1603_s30 + $0x1a0] sm:$0xff]  ;;  %v508_v13 = vld [vmem:[%s1603_s30 + $0x1a8] sm:$0xff]  ;;  %v514_v2 = vld [vmem:[%s1603_s30 + $0x1d8] sm:$0xff] }
  0x3d   : > { %v1302_v11 = vcombine.high %v503_v7, %v507_v8  ;;  %v495_v14 = vld [vmem:[%s1603_s30 + $0x140] sm:$0xff]  ;;  %839 = vmatprep.subr.bf16.mxu0 %v1310_v4  ;;  %v1304_v15 = vcombine.high %v504_v12, %v508_v13  ;;  %v496_v17 = vld [vmem:[%s1603_s30 + $0x148] sm:$0xff]  ;;  %880 = vmatprep.subr.bf16.mxu1 %v1312_v9  ;;  %v1301_v19 = vcombine.low %v503_v7, %v507_v8  ;;  %v518_v3 = vld [vmem:[%s1603_s30 + $0x1f8] sm:$0xff] }
  0x3e   : > { %v499_v16 = vld [vmem:[%s1603_s30 + $0x160] sm:$0xff]  ;;  %v500_v18 = vld [vmem:[%s1603_s30 + $0x168] sm:$0xff]  ;;  %840 = vmatpush1.bf16.msra.mxu0 %v1309_v6  ;;  %881 = vmatpush1.bf16.msra.mxu1 %v1311_v10  ;;  %v1303_v20 = vcombine.low %v504_v12, %v508_v13  ;;  %v1314_v6 = vcombine.high %v513_v63, %v517_v1  ;;  %v1316_v7 = vcombine.high %v514_v2, %v518_v3  ;;  %v505_v8 = vld [vmem:[%s1603_s30 + $0x190] sm:$0xff] }
  0x3f   : > { %841 = vmatprep.subr.bf16.mxu0 %v1302_v11  ;;  %v1294_v21 = vcombine.high %v495_v14, %v499_v16  ;;  %882 = vmatprep.subr.bf16.mxu1 %v1304_v15  ;;  %v1296_v22 = vcombine.high %v496_v17, %v500_v18  ;;  %v487_v23 = vld [vmem:[%s1603_s30 + $0x100] sm:$0xff]  ;;  %v488_v25 = vld [vmem:[%s1603_s30 + $0x108] sm:$0xff]  ;;  %v1293_v27 = vcombine.low %v495_v14, %v499_v16  ;;  %v509_v9 = vld [vmem:[%s1603_s30 + $0x1b0] sm:$0xff] }
  0x40   : > { %v491_v24 = vld [vmem:[%s1603_s30 + $0x120] sm:$0xff]  ;;  %v492_v26 = vld [vmem:[%s1603_s30 + $0x128] sm:$0xff]  ;;  %v1295_v28 = vcombine.low %v496_v17, %v500_v18  ;;  %v506_v10 = vld [vmem:[%s1603_s30 + $0x198] sm:$0xff]  ;;  %v1313_v13 = vcombine.low %v513_v63, %v517_v1  ;;  %v1315_v14 = vcombine.low %v514_v2, %v518_v3  ;;  %v1306_v15 = vcombine.high %v505_v8, %v509_v9 }
  0x41   : > { %v1286_v29 = vcombine.high %v487_v23, %v491_v24  ;;  %v1288_v30 = vcombine.high %v488_v25, %v492_v26  ;;  %v479_v31 = vld [vmem:[%s1603_s30 + $0xc0] sm:$0xff]  ;;  %v480_v33 = vld [vmem:[%s1603_s30 + $0xc8] sm:$0xff]  ;;  %v1285_v35 = vcombine.low %v487_v23, %v491_v24  ;;  %v1287_v36 = vcombine.low %v488_v25, %v492_v26  ;;  %v510_v11 = vld [vmem:[%s1603_s30 + $0x1b8] sm:$0xff] }
  0x42   : > { %842 = vmatpush1.bf16.msra.mxu0 %v1301_v19  ;;  %883 = vmatpush1.bf16.msra.mxu1 %v1303_v20  ;;  %v483_v32 = vld [vmem:[%s1603_s30 + $0xe0] sm:$0xff]  ;;  %v484_v34 = vld [vmem:[%s1603_s30 + $0xe8] sm:$0xff]  ;;  %v1308_v16 = vcombine.high %v506_v10, %v510_v11  ;;  %v497_v17 = vld [vmem:[%s1603_s30 + $0x150] sm:$0xff]  ;;  %v1032_v3 = vlaneseq }
  0x43   : > { %843 = vmatprep.subr.bf16.mxu0 %v1294_v21  ;;  %884 = vmatprep.subr.bf16.mxu1 %v1296_v22  ;;  %v1278_v37 = vcombine.high %v479_v31, %v483_v32  ;;  %v1280_v38 = vcombine.high %v480_v33, %v484_v34  ;;  %v471_v39 = vld [vmem:[%s1603_s30 + $0x80] sm:$0xff]  ;;  %v472_v41 = vld [vmem:[%s1603_s30 + $0x88] sm:$0xff]  ;;  %v1277_v43 = vcombine.low %v479_v31, %v483_v32  ;;  %v501_v18 = vld [vmem:[%s1603_s30 + $0x170] sm:$0xff] }
  0x44   : > { %v475_v40 = vld [vmem:[%s1603_s30 + $0xa0] sm:$0xff]  ;;  %v476_v42 = vld [vmem:[%s1603_s30 + $0xa8] sm:$0xff]  ;;  %v1279_v44 = vcombine.low %v480_v33, %v484_v34  ;;  %v498_v19 = vld [vmem:[%s1603_s30 + $0x158] sm:$0xff]  ;;  %v1305_v21 = vcombine.low %v505_v8, %v509_v9  ;;  %v1307_v22 = vcombine.low %v506_v10, %v510_v11  ;;  %v1298_v23 = vcombine.high %v497_v17, %v501_v18 }
  0x45   : > { %v1270_v45 = vcombine.high %v471_v39, %v475_v40  ;;  %v1272_v46 = vcombine.high %v472_v41, %v476_v42  ;;  %v463_v47 = vld [vmem:[%s1603_s30 + $0x40] sm:$0xff]  ;;  %v464_v49 = vld [vmem:[%s1603_s30 + $0x48] sm:$0xff]  ;;  %v1269_v51 = vcombine.low %v471_v39, %v475_v40  ;;  %v1271_v52 = vcombine.low %v472_v41, %v476_v42  ;;  %v502_v20 = vld [vmem:[%s1603_s30 + $0x178] sm:$0xff] }
  0x46   : > { %844 = vmatpush1.bf16.msra.mxu0 %v1293_v27  ;;  %885 = vmatpush1.bf16.msra.mxu1 %v1295_v28  ;;  %v467_v48 = vld [vmem:[%s1603_s30 + $0x60] sm:$0xff]  ;;  %v468_v50 = vld [vmem:[%s1603_s30 + $0x68] sm:$0xff]  ;;  %v1300_v24 = vcombine.high %v498_v19, %v502_v20  ;;  %v489_v25 = vld [vmem:[%s1603_s30 + $0x110] sm:$0xff] }
  0x47   : > { %845 = vmatprep.subr.bf16.mxu0 %v1286_v29  ;;  %886 = vmatprep.subr.bf16.mxu1 %v1288_v30  ;;  %v1262_v53 = vcombine.high %v463_v47, %v467_v48  ;;  %v1264_v54 = vcombine.high %v464_v49, %v468_v50  ;;  %v455_v55 = vld [vmem:[%s1603_s30] sm:$0xff]  ;;  %v456_v57 = vld [vmem:[%s1603_s30 + $0x8] sm:$0xff]  ;;  %v1261_v59 = vcombine.low %v463_v47, %v467_v48  ;;  %v493_v26 = vld [vmem:[%s1603_s30 + $0x130] sm:$0xff] }
  0x48   : > { %v459_v56 = vld [vmem:[%s1603_s30 + $0x20] sm:$0xff]  ;;  %v460_v58 = vld [vmem:[%s1603_s30 + $0x28] sm:$0xff]  ;;  %v1263_v60 = vcombine.low %v464_v49, %v468_v50  ;;  %v490_v27 = vld [vmem:[%s1603_s30 + $0x118] sm:$0xff]  ;;  %v1297_v29 = vcombine.low %v497_v17, %v501_v18  ;;  %v1299_v30 = vcombine.low %v498_v19, %v502_v20  ;;  %v1290_v31 = vcombine.high %v489_v25, %v493_v26 }
  0x49   : > { %v1254_v61 = vcombine.high %v455_v55, %v459_v56  ;;  %v1256_v62 = vcombine.high %v456_v57, %v460_v58  ;;  %v1253_v4 = vcombine.low %v455_v55, %v459_v56  ;;  %v1255_v5 = vcombine.low %v456_v57, %v460_v58  ;;  %v1648_v12 = vld [vmem:[%s1712_s0] sm:$0xf]  ;;  %v494_v28 = vld [vmem:[%s1603_s30 + $0x138] sm:$0xff]  ;;  %v481_v33 = vld [vmem:[%s1603_s30 + $0xd0] sm:$0xff] }
  0x4a   : > { %846 = vmatpush1.bf16.msra.mxu0 %v1285_v35  ;;  %887 = vmatpush1.bf16.msra.mxu1 %v1287_v36  ;;  %v1292_v32 = vcombine.high %v490_v27, %v494_v28  ;;  %v485_v34 = vld [vmem:[%s1603_s30 + $0xf0] sm:$0xff]  ;;  %v482_v35 = vld [vmem:[%s1603_s30 + $0xd8] sm:$0xff] }
  0x4b   : > { %847 = vmatprep.subr.bf16.mxu0 %v1278_v37  ;;  %888 = vmatprep.subr.bf16.mxu1 %v1280_v38  ;;  %v486_v36 = vld [vmem:[%s1603_s30 + $0xf8] sm:$0xff]  ;;  %v1289_v37 = vcombine.low %v489_v25, %v493_v26  ;;  %v1282_v38 = vcombine.high %v481_v33, %v485_v34  ;;  %v473_v40 = vld [vmem:[%s1603_s30 + $0x90] sm:$0xff] }
  0x4c   : > { %v1284_v39 = vcombine.high %v482_v35, %v486_v36  ;;  %v477_v41 = vld [vmem:[%s1603_s30 + $0xb0] sm:$0xff]  ;;  %v474_v42 = vld [vmem:[%s1603_s30 + $0x98] sm:$0xff] }
  0x4d   : > { %v465_v48 = vld [vmem:[%s1603_s30 + $0x50] sm:$0xff]  ;;  %v466_v50 = vld [vmem:[%s1603_s30 + $0x58] sm:$0xff] }
  0x4e   : > { %848 = vmatpush1.bf16.msra.mxu0 %v1277_v43  ;;  %889 = vmatpush1.bf16.msra.mxu1 %v1279_v44  ;;  %v478_v43 = vld [vmem:[%s1603_s30 + $0xb8] sm:$0xff]  ;;  %v1281_v44 = vcombine.low %v481_v33, %v485_v34  ;;  %v469_v49 = vld [vmem:[%s1603_s30 + $0x70] sm:$0xff] }
  0x4f   : > { %849 = vmatprep.subr.bf16.mxu0 %v1270_v45  ;;  %890 = vmatprep.subr.bf16.mxu1 %v1272_v46  ;;  %v1283_v45 = vcombine.low %v482_v35, %v486_v36  ;;  %v1274_v46 = vcombine.high %v473_v40, %v477_v41  ;;  %v1276_v47 = vcombine.high %v474_v42, %v478_v43  ;;  %v457_v56 = vld [vmem:[%s1603_s30 + $0x10] sm:$0xff]  ;;  %v458_v58 = vld [vmem:[%s1603_s30 + $0x18] sm:$0xff] }
  0x50   : > { %v461_v57 = vld [vmem:[%s1603_s30 + $0x30] sm:$0xff] }
  0x51   : > { %v1257_v1 = vcombine.low %v457_v56, %v461_v57 }
  0x52   : > { %850 = vmatpush1.bf16.msra.mxu0 %v1269_v51  ;;  %891 = vmatpush1.bf16.msra.mxu1 %v1271_v52  ;;  %v470_v51 = vld [vmem:[%s1603_s30 + $0x78] sm:$0xff]  ;;  %v1273_v52 = vcombine.low %v473_v40, %v477_v41 }
  0x53   : > { %851 = vmatprep.subr.bf16.mxu0 %v1262_v53  ;;  %892 = vmatprep.subr.bf16.mxu1 %v1264_v54  ;;  %v1275_v53 = vcombine.low %v474_v42, %v478_v43  ;;  %v1266_v54 = vcombine.high %v465_v48, %v469_v49  ;;  %v1268_v55 = vcombine.high %v466_v50, %v470_v51 }
  0x56   : > { %852 = vmatpush1.bf16.msra.mxu0 %v1261_v59  ;;  %893 = vmatpush1.bf16.msra.mxu1 %v1263_v60  ;;  %v462_v59 = vld [vmem:[%s1603_s30 + $0x38] sm:$0xff]  ;;  %v1265_v60 = vcombine.low %v465_v48, %v469_v49 }
  0x57   : > { %853 = vmatprep.subr.bf16.mxu0 %v1254_v61  ;;  %894 = vmatprep.subr.bf16.mxu1 %v1256_v62  ;;  %v1267_v61 = vcombine.low %v466_v50, %v470_v51  ;;  %v1258_v62 = vcombine.high %v457_v56, %v461_v57  ;;  %v1260_v63 = vcombine.high %v458_v58, %v462_v59 }
  0x58   : > { %v1259_v2 = vcombine.low %v458_v58, %v462_v59 }
  0x5a   : > { %854 = vmatpush1.bf16.msra.mxu0 %v1253_v4  ;;  %895 = vmatpush1.bf16.msra.mxu1 %v1255_v5  ;;  %v1033_v4 = vshrl.u32 %v1032_v3, 7 }
  0x5b   : > { %921 = vmatprep.subr.bf16.mxu0 %v1314_v6  ;;  %962 = vmatprep.subr.bf16.mxu1 %v1316_v7  ;;  %v1030_v6 = vld [vmem:[%s417_s9] sm:$0xff] }
  0x5c   : > { %v1034_v5 = vsub.s32 0, %v1033_v4  ;;  %v1042_v7 = vsub.s32 2, %v1033_v4  ;;  %v1038_v8 = vsub.s32 1, %v1033_v4  ;;  %v1046_v9 = vsub.s32 3, %v1033_v4 }
  0x5d   : > { %872 = vmatmul.mubr.bf16.vlgmr.msra.gmra.mxu0 %v1648_v12  ;;  %913 = vmatmul.mubr.bf16.vlgmr.msra.gmra.mxu1 %v1648_v12  ;;  %v1062_v33 = vsub.s32 7, %v1033_v4 }
  0x5e   : > { %922 = vmatpush1.bf16.msra.mxu0 %v1313_v13  ;;  %963 = vmatpush1.bf16.msra.mxu1 %v1315_v14  ;;  %v1035_v10 = vrot.slane %v1030_v6, %v1034_v5  ;;  %v1043_v13 = vrot.slane %v1030_v6, %v1042_v7 }
  0x5f   : > { %923 = vmatprep.subr.bf16.mxu0 %v1306_v15  ;;  %964 = vmatprep.subr.bf16.mxu1 %v1308_v16  ;;  %v1047_v16 = vrot.slane %v1030_v6, %v1046_v9 }
  0x60   : > { %953 = vmatprep.mubr.bf16.mxu0 %v1402_v0  ;;  %994 = vmatprep.mubr.bf16.mxu1 %v1402_v0  ;;  %v1291_v0 = vcombine.low %v490_v27, %v494_v28 }
  0x62   : > { %924 = vmatpush1.bf16.msra.mxu0 %v1305_v21  ;;  %965 = vmatpush1.bf16.msra.mxu1 %v1307_v22 }
  0x63   : > { %925 = vmatprep.subr.bf16.mxu0 %v1298_v23  ;;  %966 = vmatprep.subr.bf16.mxu1 %v1300_v24 }
  0x66   : > { %926 = vmatpush1.bf16.msra.mxu0 %v1297_v29  ;;  %967 = vmatpush1.bf16.msra.mxu1 %v1299_v30  ;;  %v1050_v30 = vsub.s32 4, %v1033_v4 }
  0x67   : > { %927 = vmatprep.subr.bf16.mxu0 %v1290_v31  ;;  %968 = vmatprep.subr.bf16.mxu1 %v1292_v32  ;;  %v1058_v31 = vsub.s32 6, %v1033_v4  ;;  %v1054_v32 = vsub.s32 5, %v1033_v4 }
  0x68   : > { %v1051_v34 = vrot.slane %v1030_v6, %v1050_v30 }
  0x69   : > { %v1059_v36 = vrot.slane %v1030_v6, %v1058_v31 }
  0x6a   : > { %928 = vmatpush1.bf16.msra.mxu0 %v1289_v37  ;;  %969 = vmatpush1.bf16.msra.mxu1 %v1291_v0  ;;  %v1055_v0 = vrot.slane %v1030_v6, %v1054_v32 }
  0x6b   : > { %929 = vmatprep.subr.bf16.mxu0 %v1282_v38  ;;  %970 = vmatprep.subr.bf16.mxu1 %v1284_v39  ;;  %v1063_v39 = vrot.slane %v1030_v6, %v1062_v33 }
  0x6e   : > { %930 = vmatpush1.bf16.msra.mxu0 %v1281_v44  ;;  %971 = vmatpush1.bf16.msra.mxu1 %v1283_v45 }
  0x6f   : > { %931 = vmatprep.subr.bf16.mxu0 %v1274_v46  ;;  %972 = vmatprep.subr.bf16.mxu1 %v1276_v47 }
  0x72   : > { %932 = vmatpush1.bf16.msra.mxu0 %v1273_v52  ;;  %973 = vmatpush1.bf16.msra.mxu1 %v1275_v53 }
  0x73   : > { %933 = vmatprep.subr.bf16.mxu0 %v1266_v54  ;;  %974 = vmatprep.subr.bf16.mxu1 %v1268_v55 }
  0x76   : > { %934 = vmatpush1.bf16.msra.mxu0 %v1265_v60  ;;  %975 = vmatpush1.bf16.msra.mxu1 %v1267_v61 }
  0x77   : > { %935 = vmatprep.subr.bf16.mxu0 %v1258_v62  ;;  %976 = vmatprep.subr.bf16.mxu1 %v1260_v63 }
  0x7a   : > { %936 = vmatpush1.bf16.msra.mxu0 %v1257_v1  ;;  %977 = vmatpush1.bf16.msra.mxu1 %v1259_v2 }
  0x7d   : > { %954 = vmatmul.mubr.bf16.vlgmr.msra.gmra.mxu0 %v1648_v12  ;;  %995 = vmatmul.mubr.bf16.vlgmr.msra.gmra.mxu1 %v1648_v12  ;;  %v1039_v12 = vrot.slane %v1030_v6, %v1038_v8 }
 0x11d   : > { %v873_v11 = vpop.f32.mrf.mxu0  ;;  %v914_v14 = vpop.f32.mrf.mxu1 }
 0x11e   : > { %v1072_v17 = vadd.f32 %v1035_v10, %v873_v11  ;;  %v1074_v19 = vadd.f32 %v1043_v13, %v914_v14 }
 0x11f   : > { %v875_v15 = vpop.f32.mrf.mxu0  ;;  %v916_v18 = vpop.f32.mrf.mxu1 }
 0x120   : > { %v1080_v21 = vmax.f32 %v1072_v17, 0.0  ;;  %v1073_v22 = vadd.f32 %v1039_v12, %v875_v15  ;;  %v1082_v24 = vmax.f32 %v1074_v19, 0.0  ;;  %v1075_v25 = vadd.f32 %v1047_v16, %v916_v18 }
 0x121   : > { %v877_v20 = vpop.f32.mrf.mxu0  ;;  %v918_v23 = vpop.f32.mrf.mxu1 }
 0x122   : > { %1088 = vst [vmem:[%s1687_s14] sm:$0xff] %v1080_v21  ;;  %v1081_v27 = vmax.f32 %v1073_v22, 0.0  ;;  %1090 = vst [vmem:[%s1687_s14 + $0x10] sm:$0xff] %v1082_v24  ;;  %v1083_v29 = vmax.f32 %v1075_v25, 0.0 }
 0x123   : > { %v878_v26 = vpop.f32.mrf.mxu0  ;;  %v919_v28 = vpop.f32.mrf.mxu1 }
 0x124   : > { %1089 = vst [vmem:[%s1687_s14 + $0x8] sm:$0xff] %v1081_v27  ;;  %1091 = vst [vmem:[%s1687_s14 + $0x18] sm:$0xff] %v1083_v29 }
 0x13d   : > { %v955_v35 = vpop.f32.mrf.mxu0  ;;  %v996_v37 = vpop.f32.mrf.mxu1 }
 0x13e   : > { %v1076_v40 = vadd.f32 %v1051_v34, %v955_v35  ;;  %v1078_v42 = vadd.f32 %v1059_v36, %v996_v37 }
 0x13f   : > { %v957_v38 = vpop.f32.mrf.mxu0  ;;  %v998_v41 = vpop.f32.mrf.mxu1 }
 0x140   : > { %v1084_v44 = vmax.f32 %v1076_v40, 0.0  ;;  %v1077_v45 = vadd.f32 %v1055_v0, %v957_v38  ;;  %v1086_v47 = vmax.f32 %v1078_v42, 0.0  ;;  %v1079_v48 = vadd.f32 %v1063_v39, %v998_v41 }
 0x141   : > { %v959_v43 = vpop.f32.mrf.mxu0  ;;  %v1000_v46 = vpop.f32.mrf.mxu1 }
 0x142   : > { %1092 = vst [vmem:[%s1687_s14 + $0x20] sm:$0xff] %v1084_v44  ;;  %v1085_v50 = vmax.f32 %v1077_v45, 0.0  ;;  %1094 = vst [vmem:[%s1687_s14 + $0x30] sm:$0xff] %v1086_v47  ;;  %v1087_v52 = vmax.f32 %v1079_v48, 0.0 }
 0x143   : > { %v960_v49 = vpop.f32.mrf.mxu0  ;;  %v1001_v51 = vpop.f32.mrf.mxu1 }
 0x144   : > { %1093 = vst [vmem:[%s1687_s14 + $0x28] sm:$0xff] %v1085_v50  ;;  %1095 = vst [vmem:[%s1687_s14 + $0x38] sm:$0xff] %v1087_v52 }
 0x145 PF: > { %s13_s16 = sadd.s32 1, %s1400_s16   ;;  %s1716_s12 = smov %s1388_s13 }
 0x146   : > { %p10_p10 = scmp.ge.s32.totalorder %s13_s16, 10   ;;  %s1717_s13 = smov %s1458_s20 }
 0x147   : > { %s1718_s14 = smov %s1396_s15  ;;  %s1719_s15 = smov %s1721_s17 }
 0x148   :  { %12 = sbr.rel (!%p10_p10) target bundleno = 3 (0x3), region = 104 }

// kernel: squeeze.65
= control target key start
LH: loop header
LB: loop body
LE: loop exit
PB: predicated region body
PF: predicated region fallthrough
CT: control target
= control target key end

     0   :  { %s2183_s0 = inlined_call_operand.vmem [shape: bf16[1,2,8192], index: 0, kind: input, shape index: {}]   ;;  %s2184_s1 = inlined_call_operand.vmem [shape: bf16[2,4,4,512], index: 1, kind: output, shape index: {}]  }
   0x1   :  { %v1757_v0 = vld [vmem:[%s2183_s0 + $0x3f] sm:$0x1]  ;;  %v1758_v1 = vld [vmem:[%s2183_s0 + $0x3e] sm:$0x1]  ;;  %v1759_v2 = vld [vmem:[%s2183_s0 + $0x3d] sm:$0x1] }
   0x2   :  { %v18_v3 = vunpack.c.l.bf16 %v1757_v0  ;;  %v34_v4 = vunpack.c.l.bf16 %v1758_v1  ;;  %v50_v5 = vunpack.c.l.bf16 %v1759_v2  ;;  %v1760_v6 = vld [vmem:[%s2183_s0 + $0x3c] sm:$0x1]  ;;  %v1761_v7 = vld [vmem:[%s2183_s0 + $0x3b] sm:$0x1]  ;;  %v1762_v8 = vld [vmem:[%s2183_s0 + $0x3a] sm:$0x1] }
   0x3   :  { %v66_v9 = vunpack.c.l.bf16 %v1760_v6  ;;  %v82_v10 = vunpack.c.l.bf16 %v1761_v7  ;;  %v98_v11 = vunpack.c.l.bf16 %v1762_v8  ;;  %v1763_v12 = vld [vmem:[%s2183_s0 + $0x39] sm:$0x1]  ;;  %v1764_v13 = vld [vmem:[%s2183_s0 + $0x38] sm:$0x1]  ;;  %v1765_v14 = vld [vmem:[%s2183_s0 + $0x37] sm:$0x1] }
   0x4   :  { %21 = vst [vmem:[#allocation1 + $0x148] sm:$0x3] %v18_v3  ;;  %37 = vst [vmem:[#allocation1 + $0x48] sm:$0x3] %v34_v4  ;;  %v114_v15 = vunpack.c.l.bf16 %v1763_v12  ;;  %v130_v16 = vunpack.c.l.bf16 %v1764_v13  ;;  %v146_v17 = vunpack.c.l.bf16 %v1765_v14  ;;  %v1766_v18 = vld [vmem:[%s2183_s0 + $0x36] sm:$0x1] }
   0x5   :  { %53 = vst [vmem:[#allocation1 + $0x120] sm:$0x3] %v50_v5  ;;  %v1767_v19 = vld [vmem:[%s2183_s0 + $0x35] sm:$0x1]  ;;  %v1768_v20 = vld [vmem:[%s2183_s0 + $0x34] sm:$0x1]  ;;  %v162_v21 = vunpack.c.l.bf16 %v1766_v18 }
   0x6   :  { %69 = vst [vmem:[#allocation1 + $0x1e0] sm:$0x3] %v66_v9  ;;  %85 = vst [vmem:[#allocation1 + $0x1a8] sm:$0x3] %v82_v10  ;;  %v178_v22 = vunpack.c.l.bf16 %v1767_v19  ;;  %v194_v23 = vunpack.c.l.bf16 %v1768_v20  ;;  %v1769_v24 = vld [vmem:[%s2183_s0 + $0x33] sm:$0x1] }
   0x7   :  { %101 = vst [vmem:[#allocation1 + $0x90] sm:$0x3] %v98_v11  ;;  %v1770_v25 = vld [vmem:[%s2183_s0 + $0x32] sm:$0x1]  ;;  %v1771_v26 = vld [vmem:[%s2183_s0 + $0x31] sm:$0x1]  ;;  %v210_v27 = vunpack.c.l.bf16 %v1769_v24 }
   0x8   :  { %117 = vst [vmem:[#allocation1 + $0xc8] sm:$0x3] %v114_v15  ;;  %133 = vst [vmem:[#allocation1 + $0x1b0] sm:$0x3] %v130_v16  ;;  %v226_v28 = vunpack.c.l.bf16 %v1770_v25  ;;  %v242_v29 = vunpack.c.l.bf16 %v1771_v26  ;;  %v1772_v30 = vld [vmem:[%s2183_s0 + $0x30] sm:$0x1] }
   0x9   :  { %149 = vst [vmem:[#allocation1 + $0x78] sm:$0x3] %v146_v17  ;;  %v1773_v31 = vld [vmem:[%s2183_s0 + $0x2f] sm:$0x1]  ;;  %v1774_v32 = vld [vmem:[%s2183_s0 + $0x2e] sm:$0x1]  ;;  %v258_v33 = vunpack.c.l.bf16 %v1772_v30 }
   0xa   :  { %165 = vst [vmem:[#allocation1 + $0xe8] sm:$0x3] %v162_v21  ;;  %181 = vst [vmem:[#allocation1 + $0xe0] sm:$0x3] %v178_v22  ;;  %v274_v34 = vunpack.c.l.bf16 %v1773_v31  ;;  %v290_v35 = vunpack.c.l.bf16 %v1774_v32  ;;  %v1775_v36 = vld [vmem:[%s2183_s0 + $0x2d] sm:$0x1] }
   0xb   :  { %197 = vst [vmem:[#allocation1 + $0x160] sm:$0x3] %v194_v23  ;;  %v1776_v37 = vld [vmem:[%s2183_s0 + $0x2c] sm:$0x1]  ;;  %v1777_v38 = vld [vmem:[%s2183_s0 + $0x2b] sm:$0x1]  ;;  %v306_v39 = vunpack.c.l.bf16 %v1775_v36 }
   0xc   :  { %213 = vst [vmem:[#allocation1 + $0xd8] sm:$0x3] %v210_v27  ;;  %229 = vst [vmem:[#allocation1 + $0xa8] sm:$0x3] %v226_v28  ;;  %v322_v40 = vunpack.c.l.bf16 %v1776_v37  ;;  %v338_v41 = vunpack.c.l.bf16 %v1777_v38  ;;  %v1778_v42 = vld [vmem:[%s2183_s0 + $0x2a] sm:$0x1] }
   0xd   :  { %245 = vst [vmem:[#allocation1 + $0xf0] sm:$0x3] %v242_v29  ;;  %v1779_v43 = vld [vmem:[%s2183_s0 + $0x29] sm:$0x1]  ;;  %v1780_v44 = vld [vmem:[%s2183_s0 + $0x28] sm:$0x1]  ;;  %v354_v45 = vunpack.c.l.bf16 %v1778_v42 }
   0xe   :  { %261 = vst [vmem:[#allocation1 + $0x198] sm:$0x3] %v258_v33  ;;  %277 = vst [vmem:[#allocation1 + $0x118] sm:$0x3] %v274_v34  ;;  %v370_v46 = vunpack.c.l.bf16 %v1779_v43  ;;  %v386_v47 = vunpack.c.l.bf16 %v1780_v44  ;;  %v1781_v48 = vld [vmem:[%s2183_s0 + $0x27] sm:$0x1] }
   0xf   :  { %293 = vst [vmem:[#allocation1 + $0x70] sm:$0x3] %v290_v35  ;;  %v1782_v49 = vld [vmem:[%s2183_s0 + $0x26] sm:$0x1]  ;;  %v1783_v50 = vld [vmem:[%s2183_s0 + $0x25] sm:$0x1]  ;;  %v402_v51 = vunpack.c.l.bf16 %v1781_v48 }
  0x10   :  { %309 = vst [vmem:[#allocation1 + $0xc0] sm:$0x3] %v306_v39  ;;  %325 = vst [vmem:[#allocation1 + $0xb8] sm:$0x3] %v322_v40  ;;  %v418_v52 = vunpack.c.l.bf16 %v1782_v49  ;;  %v434_v53 = vunpack.c.l.bf16 %v1783_v50  ;;  %v1784_v54 = vld [vmem:[%s2183_s0 + $0x24] sm:$0x1] }
  0x11   :  { %341 = vst [vmem:[#allocation1 + $0x178] sm:$0x3] %v338_v41  ;;  %v1785_v55 = vld [vmem:[%s2183_s0 + $0x23] sm:$0x1]  ;;  %v1786_v56 = vld [vmem:[%s2183_s0 + $0x22] sm:$0x1]  ;;  %v450_v57 = vunpack.c.l.bf16 %v1784_v54 }
  0x12   :  { %357 = vst [vmem:[#allocation1 + $0x50] sm:$0x3] %v354_v45  ;;  %373 = vst [vmem:[#allocation1 + $0x40] sm:$0x3] %v370_v46  ;;  %v466_v58 = vunpack.c.l.bf16 %v1785_v55  ;;  %v482_v59 = vunpack.c.l.bf16 %v1786_v56  ;;  %v1787_v60 = vld [vmem:[%s2183_s0 + $0x21] sm:$0x1] }
  0x13   :  { %389 = vst [vmem:[#allocation1 + $0x1d0] sm:$0x3] %v386_v47  ;;  %v1788_v61 = vld [vmem:[%s2183_s0 + $0x20] sm:$0x1]  ;;  %v1789_v62 = vld [vmem:[%s2183_s0 + $0x1f] sm:$0x1]  ;;  %v498_v63 = vunpack.c.l.bf16 %v1787_v60 }
  0x14   :  { %405 = vst [vmem:[#allocation1 + $0x10] sm:$0x3] %v402_v51  ;;  %421 = vst [vmem:[#allocation1 + $0x100] sm:$0x3] %v418_v52  ;;  %v514_v0 = vunpack.c.l.bf16 %v1788_v61  ;;  %v530_v1 = vunpack.c.l.bf16 %v1789_v62  ;;  %v1790_v2 = vld [vmem:[%s2183_s0 + $0x1e] sm:$0x1] }
  0x15   :  { %437 = vst [vmem:[#allocation1 + $0x98] sm:$0x3] %v434_v53  ;;  %v1791_v3 = vld [vmem:[%s2183_s0 + $0x1d] sm:$0x1]  ;;  %v1792_v4 = vld [vmem:[%s2183_s0 + $0x1c] sm:$0x1]  ;;  %v546_v5 = vunpack.c.l.bf16 %v1790_v2 }
  0x16   :  { %453 = vst [vmem:[#allocation1 + $0x1c8] sm:$0x3] %v450_v57  ;;  %469 = vst [vmem:[#allocation1 + $0x18] sm:$0x3] %v466_v58  ;;  %v562_v6 = vunpack.c.l.bf16 %v1791_v3  ;;  %v578_v7 = vunpack.c.l.bf16 %v1792_v4  ;;  %v1793_v8 = vld [vmem:[%s2183_s0 + $0x1b] sm:$0x1] }
  0x17   :  { %485 = vst [vmem:[#allocation1 + $0x1f8] sm:$0x3] %v482_v59  ;;  %v1794_v9 = vld [vmem:[%s2183_s0 + $0x1a] sm:$0x1]  ;;  %v1795_v10 = vld [vmem:[%s2183_s0 + $0x19] sm:$0x1]  ;;  %v594_v11 = vunpack.c.l.bf16 %v1793_v8 }
  0x18   :  { %501 = vst [vmem:[#allocation1 + $0x108] sm:$0x3] %v498_v63  ;;  %517 = vst [vmem:[#allocation1 + $0x1f0] sm:$0x3] %v514_v0  ;;  %v610_v12 = vunpack.c.l.bf16 %v1794_v9  ;;  %v626_v13 = vunpack.c.l.bf16 %v1795_v10  ;;  %v1796_v14 = vld [vmem:[%s2183_s0 + $0x18] sm:$0x1] }
  0x19   :  { %533 = vst [vmem:[#allocation1 + $0xb0] sm:$0x3] %v530_v1  ;;  %v1797_v15 = vld [vmem:[%s2183_s0 + $0x17] sm:$0x1]  ;;  %v1798_v16 = vld [vmem:[%s2183_s0 + $0x16] sm:$0x1]  ;;  %v642_v17 = vunpack.c.l.bf16 %v1796_v14 }
  0x1a   :  { %549 = vst [vmem:[#allocation1 + $0x28] sm:$0x3] %v546_v5  ;;  %565 = vst [vmem:[#allocation1 + $0xf8] sm:$0x3] %v562_v6  ;;  %v658_v18 = vunpack.c.l.bf16 %v1797_v15  ;;  %v674_v19 = vunpack.c.l.bf16 %v1798_v16  ;;  %v1799_v20 = vld [vmem:[%s2183_s0 + $0x15] sm:$0x1] }
  0x1b   :  { %581 = vst [vmem:[#allocation1 + $0x130] sm:$0x3] %v578_v7  ;;  %v1800_v21 = vld [vmem:[%s2183_s0 + $0x14] sm:$0x1]  ;;  %v1801_v22 = vld [vmem:[%s2183_s0 + $0x13] sm:$0x1]  ;;  %v690_v23 = vunpack.c.l.bf16 %v1799_v20 }
  0x1c   :  { %597 = vst [vmem:[#allocation1 + $0x1b8] sm:$0x3] %v594_v11  ;;  %613 = vst [vmem:[#allocation1] sm:$0x3] %v610_v12  ;;  %v706_v24 = vunpack.c.l.bf16 %v1800_v21  ;;  %v722_v25 = vunpack.c.l.bf16 %v1801_v22  ;;  %v1802_v26 = vld [vmem:[%s2183_s0 + $0x12] sm:$0x1] }
  0x1d   :  { %629 = vst [vmem:[#allocation1 + $0x1d8] sm:$0x3] %v626_v13  ;;  %v1803_v27 = vld [vmem:[%s2183_s0 + $0x11] sm:$0x1]  ;;  %v1804_v28 = vld [vmem:[%s2183_s0 + $0x10] sm:$0x1]  ;;  %v738_v29 = vunpack.c.l.bf16 %v1802_v26 }
  0x1e   :  { %645 = vst [vmem:[#allocation1 + $0xd0] sm:$0x3] %v642_v17  ;;  %661 = vst [vmem:[#allocation1 + $0x58] sm:$0x3] %v658_v18  ;;  %v754_v30 = vunpack.c.l.bf16 %v1803_v27  ;;  %v770_v31 = vunpack.c.l.bf16 %v1804_v28  ;;  %v1805_v32 = vld [vmem:[%s2183_s0 + $0xf] sm:$0x1] }
  0x1f   :  { %677 = vst [vmem:[#allocation1 + $0x8] sm:$0x3] %v674_v19  ;;  %v1806_v33 = vld [vmem:[%s2183_s0 + $0xe] sm:$0x1]  ;;  %v1807_v34 = vld [vmem:[%s2183_s0 + $0xd] sm:$0x1]  ;;  %v786_v35 = vunpack.c.l.bf16 %v1805_v32 }
  0x20   :  { %693 = vst [vmem:[#allocation1 + $0x110] sm:$0x3] %v690_v23  ;;  %709 = vst [vmem:[#allocation1 + $0x180] sm:$0x3] %v706_v24  ;;  %v802_v36 = vunpack.c.l.bf16 %v1806_v33  ;;  %v818_v37 = vunpack.c.l.bf16 %v1807_v34  ;;  %v1808_v38 = vld [vmem:[%s2183_s0 + $0xc] sm:$0x1] }
  0x21   :  { %725 = vst [vmem:[#allocation1 + $0x188] sm:$0x3] %v722_v25  ;;  %v1809_v39 = vld [vmem:[%s2183_s0 + $0xb] sm:$0x1]  ;;  %v1810_v40 = vld [vmem:[%s2183_s0 + $0xa] sm:$0x1]  ;;  %v834_v41 = vunpack.c.l.bf16 %v1808_v38 }
  0x22   :  { %741 = vst [vmem:[#allocation1 + $0x168] sm:$0x3] %v738_v29  ;;  %757 = vst [vmem:[#allocation1 + $0x20] sm:$0x3] %v754_v30  ;;  %v850_v42 = vunpack.c.l.bf16 %v1809_v39  ;;  %v866_v43 = vunpack.c.l.bf16 %v1810_v40  ;;  %v1811_v44 = vld [vmem:[%s2183_s0 + $0x9] sm:$0x1] }
  0x23   :  { %773 = vst [vmem:[#allocation1 + $0x128] sm:$0x3] %v770_v31  ;;  %v1812_v45 = vld [vmem:[%s2183_s0 + $0x8] sm:$0x1]  ;;  %v1813_v46 = vld [vmem:[%s2183_s0 + $0x7] sm:$0x1]  ;;  %v882_v47 = vunpack.c.l.bf16 %v1811_v44 }
  0x24   :  { %789 = vst [vmem:[#allocation1 + $0x140] sm:$0x3] %v786_v35  ;;  %805 = vst [vmem:[#allocation1 + $0x170] sm:$0x3] %v802_v36  ;;  %v898_v48 = vunpack.c.l.bf16 %v1812_v45  ;;  %v914_v49 = vunpack.c.l.bf16 %v1813_v46  ;;  %v1814_v50 = vld [vmem:[%s2183_s0 + $0x6] sm:$0x1] }
  0x25   :  { %821 = vst [vmem:[#allocation1 + $0x150] sm:$0x3] %v818_v37  ;;  %v1815_v51 = vld [vmem:[%s2183_s0 + $0x5] sm:$0x1]  ;;  %v1816_v52 = vld [vmem:[%s2183_s0 + $0x4] sm:$0x1]  ;;  %v930_v53 = vunpack.c.l.bf16 %v1814_v50 }
  0x26   :  { %837 = vst [vmem:[#allocation1 + $0x30] sm:$0x3] %v834_v41  ;;  %853 = vst [vmem:[#allocation1 + $0x88] sm:$0x3] %v850_v42  ;;  %v946_v54 = vunpack.c.l.bf16 %v1815_v51  ;;  %v962_v55 = vunpack.c.l.bf16 %v1816_v52  ;;  %v1817_v56 = vld [vmem:[%s2183_s0 + $0x3] sm:$0x1] }
  0x27   :  { %869 = vst [vmem:[#allocation1 + $0x80] sm:$0x3] %v866_v43  ;;  %v1818_v57 = vld [vmem:[%s2183_s0 + $0x2] sm:$0x1]  ;;  %v1819_v58 = vld [vmem:[%s2183_s0 + $0x1] sm:$0x1]  ;;  %v978_v59 = vunpack.c.l.bf16 %v1817_v56 }
  0x28   :  { %885 = vst [vmem:[#allocation1 + $0x190] sm:$0x3] %v882_v47  ;;  %901 = vst [vmem:[#allocation1 + $0x68] sm:$0x3] %v898_v48  ;;  %v994_v60 = vunpack.c.l.bf16 %v1818_v57  ;;  %v1009_v61 = vunpack.c.l.bf16 %v1819_v58  ;;  %v1022_v62 = vld [vmem:[%s2183_s0] sm:$0x1] }
  0x29   :  { %917 = vst [vmem:[#allocation1 + $0x60] sm:$0x3] %v914_v49  ;;  %v1193_v63 = vld [vmem:[#allocation1 + $0x130] sm:$0x3]   ;;  %v1199_v0 = vld [vmem:[#allocation1 + $0xf8] sm:$0x3]   ;;  %v1023_v1 = vunpack.c.l.bf16 %v1022_v62 }
  0x2a   :  { %933 = vst [vmem:[#allocation1 + $0x1c0] sm:$0x3] %v930_v53  ;;  %949 = vst [vmem:[#allocation1 + $0x138] sm:$0x3] %v946_v54  ;;  %v1175_v2 = vld [vmem:[#allocation1 + $0x1d8] sm:$0x3]  }
  0x2b   :  { %965 = vst [vmem:[#allocation1 + $0x38] sm:$0x3] %v962_v55  ;;  %v1181_v3 = vld [vmem:[#allocation1] sm:$0x3]   ;;  %v1187_v4 = vld [vmem:[#allocation1 + $0x1b8] sm:$0x3]  }
  0x2c   :  { %1195 = vst [vmem:[#allocation0 + $0x23] sm:$0x1] %v1193_v63   ;;  %1197 = vst [vmem:[#allocation0 + $0xa2] sm:$0x2] %v1193_v63   ;;  %v1157_v5 = vld [vmem:[#allocation1 + $0x8] sm:$0x3]  }
  0x2d   :  { %1201 = vst [vmem:[#allocation0 + $0x2b] sm:$0x1] %v1199_v0   ;;  %1203 = vst [vmem:[#allocation0 + $0xaa] sm:$0x2] %v1199_v0   ;;  %v1163_v6 = vld [vmem:[#allocation1 + $0x58] sm:$0x3]  }
  0x2e   :  { %981 = vst [vmem:[#allocation1 + $0xa0] sm:$0x3] %v978_v59  ;;  %997 = vst [vmem:[#allocation1 + $0x1e8] sm:$0x3] %v994_v60  ;;  %v1169_v7 = vld [vmem:[#allocation1 + $0xd0] sm:$0x3]  }
  0x2f   :  { %1012 = vst [vmem:[#allocation1 + $0x1a0] sm:$0x3] %v1009_v61  ;;  %1177 = vst [vmem:[#allocation0 + $0x2a] sm:$0x1] %v1175_v2   ;;  %v1139_v8 = vld [vmem:[#allocation1 + $0x188] sm:$0x3]  }
  0x30   :  { %1179 = vst [vmem:[#allocation0 + $0xa9] sm:$0x2] %v1175_v2   ;;  %1183 = vst [vmem:[#allocation0 + $0x32] sm:$0x1] %v1181_v3   ;;  %v1145_v9 = vld [vmem:[#allocation1 + $0x180] sm:$0x3]  }
  0x31   :  { %1185 = vst [vmem:[#allocation0 + $0xb1] sm:$0x2] %v1181_v3   ;;  %1189 = vst [vmem:[#allocation0 + $0x3a] sm:$0x1] %v1187_v4   ;;  %v1151_v10 = vld [vmem:[#allocation1 + $0x110] sm:$0x3]  }
  0x32   :  { %1191 = vst [vmem:[#allocation0 + $0xb9] sm:$0x2] %v1187_v4   ;;  %1025 = vst [vmem:[#allocation1 + $0x158] sm:$0x3] %v1023_v1  ;;  %v1121_v11 = vld [vmem:[#allocation1 + $0x128] sm:$0x3]  }
  0x33   :  { %1159 = vst [vmem:[#allocation0 + $0x31] sm:$0x1] %v1157_v5   ;;  %1161 = vst [vmem:[#allocation0 + $0xb0] sm:$0x2] %v1157_v5   ;;  %v1127_v12 = vld [vmem:[#allocation1 + $0x20] sm:$0x3]  }
  0x34   :  { %1165 = vst [vmem:[#allocation0 + $0x39] sm:$0x1] %v1163_v6   ;;  %1167 = vst [vmem:[#allocation0 + $0xb8] sm:$0x2] %v1163_v6   ;;  %v1133_v13 = vld [vmem:[#allocation1 + $0x168] sm:$0x3]  }
  0x35   :  { %1171 = vst [vmem:[#allocation0 + $0x22] sm:$0x1] %v1169_v7   ;;  %1173 = vst [vmem:[#allocation0 + $0xa1] sm:$0x2] %v1169_v7   ;;  %v1103_v14 = vld [vmem:[#allocation1 + $0x150] sm:$0x3]  }
  0x36   :  { %1141 = vst [vmem:[#allocation0 + $0x38] sm:$0x1] %v1139_v8   ;;  %1143 = vst [vmem:[#allocation0 + $0xb7] sm:$0x2] %v1139_v8   ;;  %v1109_v15 = vld [vmem:[#allocation1 + $0x170] sm:$0x3]  }
  0x37   :  { %1147 = vst [vmem:[#allocation0 + $0x21] sm:$0x1] %v1145_v9   ;;  %1149 = vst [vmem:[#allocation0 + $0xa0] sm:$0x2] %v1145_v9   ;;  %v1115_v16 = vld [vmem:[#allocation1 + $0x140] sm:$0x3]  }
  0x38   :  { %1153 = vst [vmem:[#allocation0 + $0x29] sm:$0x1] %v1151_v10   ;;  %1155 = vst [vmem:[#allocation0 + $0xa8] sm:$0x2] %v1151_v10   ;;  %v1085_v17 = vld [vmem:[#allocation1 + $0x80] sm:$0x3]  }
  0x39   :  { %1123 = vst [vmem:[#allocation0 + $0x20] sm:$0x1] %v1121_v11   ;;  %1125 = vst [vmem:[#allocation0 + $0x9f] sm:$0x2] %v1121_v11   ;;  %v1091_v18 = vld [vmem:[#allocation1 + $0x88] sm:$0x3]  }
  0x3a   :  { %1129 = vst [vmem:[#allocation0 + $0x28] sm:$0x1] %v1127_v12   ;;  %1131 = vst [vmem:[#allocation0 + $0xa7] sm:$0x2] %v1127_v12   ;;  %v1097_v19 = vld [vmem:[#allocation1 + $0x30] sm:$0x3]  }
  0x3b   :  { %1135 = vst [vmem:[#allocation0 + $0x30] sm:$0x1] %v1133_v13   ;;  %1137 = vst [vmem:[#allocation0 + $0xaf] sm:$0x2] %v1133_v13   ;;  %v1067_v20 = vld [vmem:[#allocation1 + $0x60] sm:$0x3]  }
  0x3c   :  { %1105 = vst [vmem:[#allocation0 + $0xb] sm:$0x1] %v1103_v14   ;;  %1107 = vst [vmem:[#allocation0 + $0x8a] sm:$0x2] %v1103_v14   ;;  %v1073_v21 = vld [vmem:[#allocation1 + $0x68] sm:$0x3]  }
  0x3d   :  { %1111 = vst [vmem:[#allocation0 + $0x13] sm:$0x1] %v1109_v15   ;;  %1113 = vst [vmem:[#allocation0 + $0x92] sm:$0x2] %v1109_v15   ;;  %v1079_v22 = vld [vmem:[#allocation1 + $0x190] sm:$0x3]  }
  0x3e   :  { %1117 = vst [vmem:[#allocation0 + $0x1b] sm:$0x1] %v1115_v16   ;;  %1119 = vst [vmem:[#allocation0 + $0x9a] sm:$0x2] %v1115_v16   ;;  %v1049_v23 = vld [vmem:[#allocation1 + $0x38] sm:$0x3]  }
  0x3f   :  { %1087 = vst [vmem:[#allocation0 + $0x12] sm:$0x1] %v1085_v17   ;;  %1089 = vst [vmem:[#allocation0 + $0x91] sm:$0x2] %v1085_v17   ;;  %v1055_v24 = vld [vmem:[#allocation1 + $0x138] sm:$0x3]  }
  0x40   :  { %1093 = vst [vmem:[#allocation0 + $0x1a] sm:$0x1] %v1091_v18   ;;  %1095 = vst [vmem:[#allocation0 + $0x99] sm:$0x2] %v1091_v18   ;;  %v1061_v25 = vld [vmem:[#allocation1 + $0x1c0] sm:$0x3]  }
  0x41   :  { %1099 = vst [vmem:[#allocation0 + $0x3] sm:$0x1] %v1097_v19   ;;  %1101 = vst [vmem:[#allocation0 + $0x82] sm:$0x2] %v1097_v19   ;;  %v1031_v26 = vld [vmem:[#allocation1 + $0x1a0] sm:$0x3]  }
  0x42   :  { %1069 = vst [vmem:[#allocation0 + $0x19] sm:$0x1] %v1067_v20   ;;  %1071 = vst [vmem:[#allocation0 + $0x98] sm:$0x2] %v1067_v20   ;;  %v1037_v27 = vld [vmem:[#allocation1 + $0x1e8] sm:$0x3]  }
  0x43   :  { %1075 = vst [vmem:[#allocation0 + $0x2] sm:$0x1] %v1073_v21   ;;  %1077 = vst [vmem:[#allocation0 + $0x81] sm:$0x2] %v1073_v21   ;;  %v1043_v28 = vld [vmem:[#allocation1 + $0xa0] sm:$0x3]  }
  0x44   :  { %1081 = vst [vmem:[#allocation0 + $0xa] sm:$0x1] %v1079_v22   ;;  %1083 = vst [vmem:[#allocation0 + $0x89] sm:$0x2] %v1079_v22   ;;  %v1026_v29 = vld [vmem:[#allocation1 + $0x158] sm:$0x3]  }
  0x45   :  { %1051 = vst [vmem:[#allocation0 + $0x1] sm:$0x1] %v1049_v23   ;;  %1053 = vst [vmem:[#allocation0 + $0x80] sm:$0x2] %v1049_v23   ;;  %v1205_v30 = vld [vmem:[#allocation1 + $0x28] sm:$0x3]  }
  0x46   :  { %1057 = vst [vmem:[#allocation0 + $0x9] sm:$0x1] %v1055_v24   ;;  %1059 = vst [vmem:[#allocation0 + $0x88] sm:$0x2] %v1055_v24   ;;  %v1211_v31 = vld [vmem:[#allocation1 + $0xb0] sm:$0x3]  }
  0x47   :  { %1063 = vst [vmem:[#allocation0 + $0x11] sm:$0x1] %v1061_v25   ;;  %1065 = vst [vmem:[#allocation0 + $0x90] sm:$0x2] %v1061_v25   ;;  %v1217_v32 = vld [vmem:[#allocation1 + $0x1f0] sm:$0x3]  }
  0x48   :  { %1033 = vst [vmem:[#allocation0 + $0x8] sm:$0x1] %v1031_v26   ;;  %1035 = vst [vmem:[#allocation0 + $0x87] sm:$0x2] %v1031_v26   ;;  %v1223_v33 = vld [vmem:[#allocation1 + $0x108] sm:$0x3]  }
  0x49   :  { %1039 = vst [vmem:[#allocation0 + $0x10] sm:$0x1] %v1037_v27   ;;  %1041 = vst [vmem:[#allocation0 + $0x8f] sm:$0x2] %v1037_v27   ;;  %v1229_v34 = vld [vmem:[#allocation1 + $0x1f8] sm:$0x3]  }
  0x4a   :  { %1045 = vst [vmem:[#allocation0 + $0x18] sm:$0x1] %v1043_v28   ;;  %1047 = vst [vmem:[#allocation0 + $0x97] sm:$0x2] %v1043_v28   ;;  %v1235_v35 = vld [vmem:[#allocation1 + $0x18] sm:$0x3]  }
  0x4b   :  { %1027 = vst [vmem:[#allocation0] sm:$0x1] %v1026_v29   ;;  %1029 = vst [vmem:[#allocation0 + $0x7f] sm:$0x2] %v1026_v29   ;;  %v1241_v36 = vld [vmem:[#allocation1 + $0x1c8] sm:$0x3]  }
  0x4c   :  { %1207 = vst [vmem:[#allocation0 + $0x33] sm:$0x1] %v1205_v30   ;;  %1209 = vst [vmem:[#allocation0 + $0xb2] sm:$0x2] %v1205_v30   ;;  %v1247_v37 = vld [vmem:[#allocation1 + $0x98] sm:$0x3]  }
  0x4d   :  { %1213 = vst [vmem:[#allocation0 + $0x3b] sm:$0x1] %v1211_v31   ;;  %1215 = vst [vmem:[#allocation0 + $0xba] sm:$0x2] %v1211_v31   ;;  %v1253_v38 = vld [vmem:[#allocation1 + $0x100] sm:$0x3]  }
  0x4e   :  { %1219 = vst [vmem:[#allocation0 + $0x40] sm:$0x1] %v1217_v32   ;;  %1221 = vst [vmem:[#allocation0 + $0xbf] sm:$0x2] %v1217_v32   ;;  %v1259_v39 = vld [vmem:[#allocation1 + $0x10] sm:$0x3]  }
  0x4f   :  { %1225 = vst [vmem:[#allocation0 + $0x48] sm:$0x1] %v1223_v33   ;;  %1227 = vst [vmem:[#allocation0 + $0xc7] sm:$0x2] %v1223_v33   ;;  %v1265_v40 = vld [vmem:[#allocation1 + $0x1d0] sm:$0x3]  }
  0x50   :  { %1231 = vst [vmem:[#allocation0 + $0x50] sm:$0x1] %v1229_v34   ;;  %1233 = vst [vmem:[#allocation0 + $0xcf] sm:$0x2] %v1229_v34   ;;  %v1271_v41 = vld [vmem:[#allocation1 + $0x40] sm:$0x3]  }
  0x51   :  { %1237 = vst [vmem:[#allocation0 + $0x58] sm:$0x1] %v1235_v35   ;;  %1239 = vst [vmem:[#allocation0 + $0xd7] sm:$0x2] %v1235_v35   ;;  %v1277_v42 = vld [vmem:[#allocation1 + $0x50] sm:$0x3]  }
  0x52   :  { %1243 = vst [vmem:[#allocation0 + $0x41] sm:$0x1] %v1241_v36   ;;  %1245 = vst [vmem:[#allocation0 + $0xc0] sm:$0x2] %v1241_v36   ;;  %v1283_v43 = vld [vmem:[#allocation1 + $0x178] sm:$0x3]  }
  0x53   :  { %1249 = vst [vmem:[#allocation0 + $0x49] sm:$0x1] %v1247_v37   ;;  %1251 = vst [vmem:[#allocation0 + $0xc8] sm:$0x2] %v1247_v37   ;;  %v1289_v44 = vld [vmem:[#allocation1 + $0xb8] sm:$0x3]  }
  0x54   :  { %1255 = vst [vmem:[#allocation0 + $0x51] sm:$0x1] %v1253_v38   ;;  %1257 = vst [vmem:[#allocation0 + $0xd0] sm:$0x2] %v1253_v38   ;;  %v1295_v45 = vld [vmem:[#allocation1 + $0xc0] sm:$0x3]  }
  0x55   :  { %1261 = vst [vmem:[#allocation0 + $0x59] sm:$0x1] %v1259_v39   ;;  %1263 = vst [vmem:[#allocation0 + $0xd8] sm:$0x2] %v1259_v39   ;;  %v1301_v46 = vld [vmem:[#allocation1 + $0x70] sm:$0x3]  }
  0x56   :  { %1267 = vst [vmem:[#allocation0 + $0x42] sm:$0x1] %v1265_v40   ;;  %1269 = vst [vmem:[#allocation0 + $0xc1] sm:$0x2] %v1265_v40   ;;  %v1307_v47 = vld [vmem:[#allocation1 + $0x118] sm:$0x3]  }
  0x57   :  { %1273 = vst [vmem:[#allocation0 + $0x4a] sm:$0x1] %v1271_v41   ;;  %1275 = vst [vmem:[#allocation0 + $0xc9] sm:$0x2] %v1271_v41   ;;  %v1313_v48 = vld [vmem:[#allocation1 + $0x198] sm:$0x3]  }
  0x58   :  { %1279 = vst [vmem:[#allocation0 + $0x52] sm:$0x1] %v1277_v42   ;;  %1281 = vst [vmem:[#allocation0 + $0xd1] sm:$0x2] %v1277_v42   ;;  %v1319_v49 = vld [vmem:[#allocation1 + $0xf0] sm:$0x3]  }
  0x59   :  { %1285 = vst [vmem:[#allocation0 + $0x5a] sm:$0x1] %v1283_v43   ;;  %1287 = vst [vmem:[#allocation0 + $0xd9] sm:$0x2] %v1283_v43   ;;  %v1325_v50 = vld [vmem:[#allocation1 + $0xa8] sm:$0x3]  }
  0x5a   :  { %1291 = vst [vmem:[#allocation0 + $0x43] sm:$0x1] %v1289_v44   ;;  %1293 = vst [vmem:[#allocation0 + $0xc2] sm:$0x2] %v1289_v44   ;;  %v1331_v51 = vld [vmem:[#allocation1 + $0xd8] sm:$0x3]  }
  0x5b   :  { %1297 = vst [vmem:[#allocation0 + $0x4b] sm:$0x1] %v1295_v45   ;;  %1299 = vst [vmem:[#allocation0 + $0xca] sm:$0x2] %v1295_v45   ;;  %v1337_v52 = vld [vmem:[#allocation1 + $0x160] sm:$0x3]  }
  0x5c   :  { %1303 = vst [vmem:[#allocation0 + $0x53] sm:$0x1] %v1301_v46   ;;  %1305 = vst [vmem:[#allocation0 + $0xd2] sm:$0x2] %v1301_v46   ;;  %v1343_v53 = vld [vmem:[#allocation1 + $0xe0] sm:$0x3]  }
  0x5d   :  { %1309 = vst [vmem:[#allocation0 + $0x5b] sm:$0x1] %v1307_v47   ;;  %1311 = vst [vmem:[#allocation0 + $0xda] sm:$0x2] %v1307_v47   ;;  %v1349_v54 = vld [vmem:[#allocation1 + $0xe8] sm:$0x3]  }
  0x5e   :  { %1315 = vst [vmem:[#allocation0 + $0x60] sm:$0x1] %v1313_v48   ;;  %1317 = vst [vmem:[#allocation0 + $0xdf] sm:$0x2] %v1313_v48   ;;  %v1355_v55 = vld [vmem:[#allocation1 + $0x78] sm:$0x3]  }
  0x5f   :  { %1321 = vst [vmem:[#allocation0 + $0x68] sm:$0x1] %v1319_v49   ;;  %1323 = vst [vmem:[#allocation0 + $0xe7] sm:$0x2] %v1319_v49   ;;  %v1361_v56 = vld [vmem:[#allocation1 + $0x1b0] sm:$0x3]  }
  0x60   :  { %1327 = vst [vmem:[#allocation0 + $0x70] sm:$0x1] %v1325_v50   ;;  %1329 = vst [vmem:[#allocation0 + $0xef] sm:$0x2] %v1325_v50   ;;  %v1367_v57 = vld [vmem:[#allocation1 + $0xc8] sm:$0x3]  }
  0x61   :  { %1333 = vst [vmem:[#allocation0 + $0x78] sm:$0x1] %v1331_v51   ;;  %1335 = vst [vmem:[#allocation0 + $0xf7] sm:$0x2] %v1331_v51   ;;  %v1373_v58 = vld [vmem:[#allocation1 + $0x90] sm:$0x3]  }
  0x62   :  { %1339 = vst [vmem:[#allocation0 + $0x61] sm:$0x1] %v1337_v52   ;;  %1341 = vst [vmem:[#allocation0 + $0xe0] sm:$0x2] %v1337_v52   ;;  %v1379_v59 = vld [vmem:[#allocation1 + $0x1a8] sm:$0x3]  }
  0x63   :  { %1345 = vst [vmem:[#allocation0 + $0x69] sm:$0x1] %v1343_v53   ;;  %1347 = vst [vmem:[#allocation0 + $0xe8] sm:$0x2] %v1343_v53   ;;  %v1385_v60 = vld [vmem:[#allocation1 + $0x1e0] sm:$0x3]  }
  0x64   :  { %1351 = vst [vmem:[#allocation0 + $0x71] sm:$0x1] %v1349_v54   ;;  %1353 = vst [vmem:[#allocation0 + $0xf0] sm:$0x2] %v1349_v54   ;;  %v1391_v61 = vld [vmem:[#allocation1 + $0x120] sm:$0x3]  }
  0x65   :  { %1357 = vst [vmem:[#allocation0 + $0x79] sm:$0x1] %v1355_v55   ;;  %1359 = vst [vmem:[#allocation0 + $0xf8] sm:$0x2] %v1355_v55   ;;  %v1397_v62 = vld [vmem:[#allocation1 + $0x48] sm:$0x3]  }
  0x66   :  { %1363 = vst [vmem:[#allocation0 + $0x62] sm:$0x1] %v1361_v56   ;;  %1365 = vst [vmem:[#allocation0 + $0xe1] sm:$0x2] %v1361_v56   ;;  %v1403_v63 = vld [vmem:[#allocation1 + $0x148] sm:$0x3]  }
  0x67   :  { %1369 = vst [vmem:[#allocation0 + $0x6a] sm:$0x1] %v1367_v57   ;;  %1371 = vst [vmem:[#allocation0 + $0xe9] sm:$0x2] %v1367_v57   ;;  %v1413_v0 = vld [vmem:[#allocation0] sm:$0xf] }
  0x68   :  { %1375 = vst [vmem:[#allocation0 + $0x72] sm:$0x1] %v1373_v58   ;;  %1377 = vst [vmem:[#allocation0 + $0xf1] sm:$0x2] %v1373_v58   ;;  %v1419_v1 = vld [vmem:[#allocation0 + $0x8] sm:$0xf] }
  0x69   :  { %1381 = vst [vmem:[#allocation0 + $0x7a] sm:$0x1] %v1379_v59   ;;  %1383 = vst [vmem:[#allocation0 + $0xf9] sm:$0x2] %v1379_v59   ;;  %v1426_v2 = vld [vmem:[#allocation0 + $0x10] sm:$0xf] }
  0x6a   :  { %1387 = vst [vmem:[#allocation0 + $0x63] sm:$0x1] %v1385_v60   ;;  %1389 = vst [vmem:[#allocation0 + $0xe2] sm:$0x2] %v1385_v60   ;;  %v1852_v3 = vmov 0.0  }
  0x6b   :  { %1393 = vst [vmem:[#allocation0 + $0x6b] sm:$0x1] %v1391_v61   ;;  %1395 = vst [vmem:[#allocation0 + $0xea] sm:$0x2] %v1391_v61   ;;  %v1414_v4 = vpack.c.bf16 %v1852_v3, %v1413_v0  ;;  %v1420_v5 = vpack.c.bf16 %v1852_v3, %v1419_v1  ;;  %v1427_v6 = vpack.c.bf16 %v1852_v3, %v1426_v2  ;;  %v1434_v7 = vld [vmem:[#allocation0 + $0x18] sm:$0xf] }
  0x6c   :  { %1399 = vst [vmem:[#allocation0 + $0x73] sm:$0x1] %v1397_v62   ;;  %1401 = vst [vmem:[#allocation0 + $0xf2] sm:$0x2] %v1397_v62   ;;  %v1442_v8 = vld [vmem:[#allocation0 + $0x20] sm:$0xf]  ;;  %v1435_v10 = vpack.c.bf16 %v1852_v3, %v1434_v7 }
  0x6d   :  { %1405 = vst [vmem:[#allocation0 + $0x7b] sm:$0x1] %v1403_v63   ;;  %1407 = vst [vmem:[#allocation0 + $0xfa] sm:$0x2] %v1403_v63   ;;  %v1450_v9 = vld [vmem:[#allocation0 + $0x28] sm:$0xf]  ;;  %v1443_v11 = vpack.c.bf16 %v1852_v3, %v1442_v8 }
  0x6e   :  { %v1451_v12 = vpack.c.bf16 %v1852_v3, %v1450_v9  ;;  %v1458_v13 = vld [vmem:[#allocation0 + $0x30] sm:$0xf]  ;;  %v1466_v14 = vld [vmem:[#allocation0 + $0x38] sm:$0xf]  ;;  %v1474_v15 = vld [vmem:[#allocation0 + $0x40] sm:$0xf] }
  0x6f   :  { %1417 = vst [vmem:[%s2184_s1] sm:$0x3] %v1414_v4  ;;  %1820 = vst [vmem:[%s2184_s1 + $0x2] sm:$0x3] %v1420_v5  ;;  %v1459_v16 = vpack.c.bf16 %v1852_v3, %v1458_v13  ;;  %v1467_v17 = vpack.c.bf16 %v1852_v3, %v1466_v14  ;;  %v1475_v18 = vpack.c.bf16 %v1852_v3, %v1474_v15  ;;  %v1482_v19 = vld [vmem:[#allocation0 + $0x48] sm:$0xf] }
  0x70   :  { %1821 = vst [vmem:[%s2184_s1 + $0x4] sm:$0x3] %v1427_v6  ;;  %v1490_v20 = vld [vmem:[#allocation0 + $0x50] sm:$0xf]  ;;  %v1498_v21 = vld [vmem:[#allocation0 + $0x58] sm:$0xf]  ;;  %v1483_v22 = vpack.c.bf16 %v1852_v3, %v1482_v19 }
  0x71   :  { %1822 = vst [vmem:[%s2184_s1 + $0x6] sm:$0x3] %v1435_v10  ;;  %1823 = vst [vmem:[%s2184_s1 + $0x8] sm:$0x3] %v1443_v11  ;;  %v1491_v23 = vpack.c.bf16 %v1852_v3, %v1490_v20  ;;  %v1499_v24 = vpack.c.bf16 %v1852_v3, %v1498_v21  ;;  %v1538_v25 = vld [vmem:[#allocation0 + $0x80] sm:$0xf] }
  0x72   :  { %1824 = vst [vmem:[%s2184_s1 + $0xa] sm:$0x3] %v1451_v12  ;;  %v1546_v26 = vld [vmem:[#allocation0 + $0x88] sm:$0xf]  ;;  %v1554_v27 = vld [vmem:[#allocation0 + $0x90] sm:$0xf]  ;;  %v1539_v28 = vpack.c.bf16 %v1852_v3, %v1538_v25 }
  0x73   :  { %1825 = vst [vmem:[%s2184_s1 + $0xc] sm:$0x3] %v1459_v16  ;;  %1826 = vst [vmem:[%s2184_s1 + $0xe] sm:$0x3] %v1467_v17  ;;  %v1547_v29 = vpack.c.bf16 %v1852_v3, %v1546_v26  ;;  %v1555_v30 = vpack.c.bf16 %v1852_v3, %v1554_v27  ;;  %v1562_v31 = vld [vmem:[#allocation0 + $0x98] sm:$0xf] }
  0x74   :  { %1827 = vst [vmem:[%s2184_s1 + $0x10] sm:$0x3] %v1475_v18  ;;  %v1570_v32 = vld [vmem:[#allocation0 + $0xa0] sm:$0xf]  ;;  %v1578_v33 = vld [vmem:[#allocation0 + $0xa8] sm:$0xf]  ;;  %v1563_v36 = vpack.c.bf16 %v1852_v3, %v1562_v31 }
  0x75   :  { %1828 = vst [vmem:[%s2184_s1 + $0x12] sm:$0x3] %v1483_v22  ;;  %1829 = vst [vmem:[%s2184_s1 + $0x14] sm:$0x3] %v1491_v23  ;;  %v1506_v34 = vld [vmem:[#allocation0 + $0x60] sm:$0xf]  ;;  %v1571_v37 = vpack.c.bf16 %v1852_v3, %v1570_v32  ;;  %v1579_v38 = vpack.c.bf16 %v1852_v3, %v1578_v33 }
  0x76   :  { %1830 = vst [vmem:[%s2184_s1 + $0x16] sm:$0x3] %v1499_v24  ;;  %v1514_v35 = vld [vmem:[#allocation0 + $0x68] sm:$0xf]  ;;  %v1586_v39 = vld [vmem:[#allocation0 + $0xb0] sm:$0xf]  ;;  %v1507_v40 = vpack.c.bf16 %v1852_v3, %v1506_v34 }
  0x77   :  { %v1515_v41 = vpack.c.bf16 %v1852_v3, %v1514_v35  ;;  %v1522_v42 = vld [vmem:[#allocation0 + $0x70] sm:$0xf]  ;;  %v1530_v43 = vld [vmem:[#allocation0 + $0x78] sm:$0xf]  ;;  %1835 = vst [vmem:[%s2184_s1 + $0x20] sm:$0x3] %v1539_v28  ;;  %v1587_v44 = vpack.c.bf16 %v1852_v3, %v1586_v39 }
  0x78   :  { %1836 = vst [vmem:[%s2184_s1 + $0x22] sm:$0x3] %v1547_v29  ;;  %1837 = vst [vmem:[%s2184_s1 + $0x24] sm:$0x3] %v1555_v30  ;;  %v1594_v45 = vld [vmem:[#allocation0 + $0xb8] sm:$0xf]  ;;  %v1523_v46 = vpack.c.bf16 %v1852_v3, %v1522_v42  ;;  %v1531_v47 = vpack.c.bf16 %v1852_v3, %v1530_v43 }
  0x79   :  { %1838 = vst [vmem:[%s2184_s1 + $0x26] sm:$0x3] %v1563_v36  ;;  %1839 = vst [vmem:[%s2184_s1 + $0x28] sm:$0x3] %v1571_v37  ;;  %v1595_v48 = vpack.c.bf16 %v1852_v3, %v1594_v45  ;;  %v1602_v49 = vld [vmem:[#allocation0 + $0xc0] sm:$0xf] }
  0x7a   :  { %1840 = vst [vmem:[%s2184_s1 + $0x2a] sm:$0x3] %v1579_v38  ;;  %v1610_v50 = vld [vmem:[#allocation0 + $0xc8] sm:$0xf]  ;;  %v1618_v51 = vld [vmem:[#allocation0 + $0xd0] sm:$0xf]  ;;  %v1603_v52 = vpack.c.bf16 %v1852_v3, %v1602_v49 }
  0x7b   :  { %1831 = vst [vmem:[%s2184_s1 + $0x18] sm:$0x3] %v1507_v40  ;;  %1832 = vst [vmem:[%s2184_s1 + $0x1a] sm:$0x3] %v1515_v41  ;;  %v1611_v53 = vpack.c.bf16 %v1852_v3, %v1610_v50  ;;  %v1619_v54 = vpack.c.bf16 %v1852_v3, %v1618_v51  ;;  %v1626_v55 = vld [vmem:[#allocation0 + $0xd8] sm:$0xf] }
  0x7c   :  { %1841 = vst [vmem:[%s2184_s1 + $0x2c] sm:$0x3] %v1587_v44  ;;  %v1634_v56 = vld [vmem:[#allocation0 + $0xe0] sm:$0xf]  ;;  %v1642_v57 = vld [vmem:[#allocation0 + $0xe8] sm:$0xf]  ;;  %v1627_v58 = vpack.c.bf16 %v1852_v3, %v1626_v55 }
  0x7d   :  { %1833 = vst [vmem:[%s2184_s1 + $0x1c] sm:$0x3] %v1523_v46  ;;  %1834 = vst [vmem:[%s2184_s1 + $0x1e] sm:$0x3] %v1531_v47  ;;  %v1635_v59 = vpack.c.bf16 %v1852_v3, %v1634_v56  ;;  %v1643_v60 = vpack.c.bf16 %v1852_v3, %v1642_v57  ;;  %v1650_v61 = vld [vmem:[#allocation0 + $0xf0] sm:$0xf] }
  0x7e   :  { %1842 = vst [vmem:[%s2184_s1 + $0x2e] sm:$0x3] %v1595_v48  ;;  %v1658_v62 = vld [vmem:[#allocation0 + $0xf8] sm:$0xf]  ;;  %1843 = vst [vmem:[%s2184_s1 + $0x30] sm:$0x3] %v1603_v52  ;;  %v1651_v63 = vpack.c.bf16 %v1852_v3, %v1650_v61 }
  0x7f   :  { %1844 = vst [vmem:[%s2184_s1 + $0x32] sm:$0x3] %v1611_v53  ;;  %1845 = vst [vmem:[%s2184_s1 + $0x34] sm:$0x3] %v1619_v54  ;;  %v1659_v0 = vpack.c.bf16 %v1852_v3, %v1658_v62 }
  0x80   :  { %1846 = vst [vmem:[%s2184_s1 + $0x36] sm:$0x3] %v1627_v58  ;;  %1847 = vst [vmem:[%s2184_s1 + $0x38] sm:$0x3] %v1635_v59 }
  0x81   :  { %1848 = vst [vmem:[%s2184_s1 + $0x3a] sm:$0x3] %v1643_v60  ;;  %1849 = vst [vmem:[%s2184_s1 + $0x3c] sm:$0x3] %v1651_v63 }
  0x82   :  { %1850 = vst [vmem:[%s2184_s1 + $0x3e] sm:$0x3] %v1659_v0 }

// kernel: generator_forward.6
= control target key start
LH: loop header
LB: loop body
LE: loop exit
PB: predicated region body
PF: predicated region fallthrough
CT: control target
= control target key end

     0   :  { %s3477_s12 = smov 0   ;;  %s3479_s13 = smov 0   ;;  %s3877_s0 = inlined_call_operand.vmem [shape: bf16[4,32,2048], index: 0, kind: input, shape index: {}]   ;;  %s3878_s1 = inlined_call_operand.vmem [shape: bf16[4,2048,256], index: 1, kind: input, shape index: {}]   ;;  %s3879_s2 = inlined_call_operand.vmem [shape: f32[1,256], index: 2, kind: input, shape index: {}]   ;;  %s3880_s3 = inlined_call_operand.vmem [shape: f32[4,32,256], index: 3, kind: output, shape index: {}]  }
   0x1   :  { %s3481_s14 = smov 0  }
   0x2 LB: > { %s39_s15 = sadd.s32 1, %s3451_s13  ;;  %p2724_p0 = scmp.ge.s32.totalorder %s3455_s14, 1  ;;  %s3455_s14 = sphi %s3481_s14, %s13_s14   ;;  %s3451_s13 = sphi %s3479_s13, %s3882_s13   ;;  %s3447_s12 = sphi %s3477_s12, %s3881_s12  }
   0x3   : > { %p41_p1 = scmp.ge.s32.totalorder %s39_s15, 4  ;;  %p217_p2 = scmp.lt.s32.totalorder %s3455_s14, 5 }
   0x5   : > { %s3884_s15 = smov (%p41_p1, %s39_s15), 0  ;;  %p218_p3 = pnand %p2724_p0, %p217_p2 }
   0x6   : > { %p279_p4 = scmp.lt.s32.totalorder (!%p218_p3), %s3447_s12, 3 }
   0x7   : > { %221 = sbr.rel (%p218_p3) target bundleno = 488 (0x1e8), region = 32 }
   0xc   : > { %s3886_s12 = smov (!%p279_p4, %s3447_s12), 3 }
   0xd   : > { %s3022_s16 = sshll.u32 %s3886_s12, 11  ;;  %s3021_s20 = sshll.u32 %s3886_s12, 8 }
   0xe   : > { %s3501_s19 = scalar_lea.vmem %s3878_s1, %s3022_s16  ;;  %s3551_s23 = scalar_lea.vmem %s3877_s0, %s3021_s20 }
   0xf   : > { %v3049_v0 = vld [vmem:[%s3501_s19 + $0x74] ss:$8 sps:$4 sm:$0xff]   ;;  %v3053_v2 = vld [vmem:[%s3501_s19 + $0x70] ss:$8 sps:$4 sm:$0xff]   ;;  %v3055_v4 = vld [vmem:[%s3501_s19 + $0x64] ss:$8 sps:$4 sm:$0xff]  }
  0x10   : > { %v3051_v1 = vld [vmem:[%s3501_s19 + $0x174] ss:$8 sps:$4 sm:$0xff]   ;;  %2078 = vmatprep.subr.bf16.mxu0 %v3049_v0  ;;  %v3054_v3 = vld [vmem:[%s3501_s19 + $0x170] ss:$8 sps:$4 sm:$0xff]   ;;  %v3057_v5 = vld [vmem:[%s3501_s19 + $0x164] ss:$8 sps:$4 sm:$0xff]  }
  0x11   : > { %2131 = vmatprep.subr.bf16.mxu1 %v3051_v1  ;;  %2079 = vmatpush1.bf16.msra.mxu0 %v3053_v2  ;;  %v3059_v6 = vld [vmem:[%s3501_s19 + $0x60] ss:$8 sps:$4 sm:$0xff]   ;;  %v3061_v8 = vld [vmem:[%s3501_s19 + $0x54] ss:$8 sps:$4 sm:$0xff]   ;;  %v3065_v10 = vld [vmem:[%s3501_s19 + $0x50] ss:$8 sps:$4 sm:$0xff]  }
  0x12   : > { %2132 = vmatpush1.bf16.msra.mxu1 %v3054_v3  ;;  %2080 = vmatprep.subr.bf16.mxu0 %v3055_v4  ;;  %v3060_v7 = vld [vmem:[%s3501_s19 + $0x160] ss:$8 sps:$4 sm:$0xff]   ;;  %v3063_v9 = vld [vmem:[%s3501_s19 + $0x154] ss:$8 sps:$4 sm:$0xff]   ;;  %v3066_v11 = vld [vmem:[%s3501_s19 + $0x150] ss:$8 sps:$4 sm:$0xff]  }
  0x13   : > { %2133 = vmatprep.subr.bf16.mxu1 %v3057_v5  ;;  %v3067_v12 = vld [vmem:[%s3501_s19 + $0x44] ss:$8 sps:$4 sm:$0xff]   ;;  %v3071_v14 = vld [vmem:[%s3501_s19 + $0x40] ss:$8 sps:$4 sm:$0xff]   ;;  %v3073_v16 = vld [vmem:[%s3501_s19 + $0x34] ss:$8 sps:$4 sm:$0xff]  }
  0x14   : > { %v3069_v13 = vld [vmem:[%s3501_s19 + $0x144] ss:$8 sps:$4 sm:$0xff]   ;;  %v3072_v15 = vld [vmem:[%s3501_s19 + $0x140] ss:$8 sps:$4 sm:$0xff]   ;;  %v3075_v17 = vld [vmem:[%s3501_s19 + $0x134] ss:$8 sps:$4 sm:$0xff]  }
  0x15   : > { %2081 = vmatpush1.bf16.msra.mxu0 %v3059_v6  ;;  %v3077_v18 = vld [vmem:[%s3501_s19 + $0x30] ss:$8 sps:$4 sm:$0xff]   ;;  %v3079_v20 = vld [vmem:[%s3501_s19 + $0x24] ss:$8 sps:$4 sm:$0xff]   ;;  %v3083_v22 = vld [vmem:[%s3501_s19 + $0x20] ss:$8 sps:$4 sm:$0xff]  }
  0x16   : > { %2134 = vmatpush1.bf16.msra.mxu1 %v3060_v7  ;;  %2082 = vmatprep.subr.bf16.mxu0 %v3061_v8  ;;  %v3078_v19 = vld [vmem:[%s3501_s19 + $0x130] ss:$8 sps:$4 sm:$0xff]   ;;  %v3081_v21 = vld [vmem:[%s3501_s19 + $0x124] ss:$8 sps:$4 sm:$0xff]   ;;  %v3084_v23 = vld [vmem:[%s3501_s19 + $0x120] ss:$8 sps:$4 sm:$0xff]  }
  0x17   : > { %2135 = vmatprep.subr.bf16.mxu1 %v3063_v9  ;;  %v3085_v24 = vld [vmem:[%s3501_s19 + $0x14] ss:$8 sps:$4 sm:$0xff]   ;;  %v3089_v26 = vld [vmem:[%s3501_s19 + $0x10] ss:$8 sps:$4 sm:$0xff]   ;;  %v3091_v28 = vld [vmem:[%s3501_s19 + $0x4] ss:$8 sps:$4 sm:$0xff]  }
  0x18   : > { %v3087_v25 = vld [vmem:[%s3501_s19 + $0x114] ss:$8 sps:$4 sm:$0xff]   ;;  %v3090_v27 = vld [vmem:[%s3501_s19 + $0x110] ss:$8 sps:$4 sm:$0xff]   ;;  %v3093_v29 = vld [vmem:[%s3501_s19 + $0x104] ss:$8 sps:$4 sm:$0xff]  }
  0x19   : > { %2083 = vmatpush1.bf16.msra.mxu0 %v3065_v10  ;;  %v3095_v30 = vld [vmem:[%s3501_s19] ss:$8 sps:$4 sm:$0xff]   ;;  %v3097_v32 = vld [vmem:[%s3501_s19 + $0xf4] ss:$8 sps:$4 sm:$0xff]   ;;  %v3101_v34 = vld [vmem:[%s3501_s19 + $0xf0] ss:$8 sps:$4 sm:$0xff]  }
  0x1a   : > { %2136 = vmatpush1.bf16.msra.mxu1 %v3066_v11  ;;  %2084 = vmatprep.subr.bf16.mxu0 %v3067_v12  ;;  %v3096_v31 = vld [vmem:[%s3501_s19 + $0x100] ss:$8 sps:$4 sm:$0xff]   ;;  %v3099_v33 = vld [vmem:[%s3501_s19 + $0x1f4] ss:$8 sps:$4 sm:$0xff]   ;;  %v3102_v35 = vld [vmem:[%s3501_s19 + $0x1f0] ss:$8 sps:$4 sm:$0xff]  }
  0x1b   : > { %2137 = vmatprep.subr.bf16.mxu1 %v3069_v13  ;;  %v3103_v36 = vld [vmem:[%s3501_s19 + $0xe4] ss:$8 sps:$4 sm:$0xff]   ;;  %v3107_v38 = vld [vmem:[%s3501_s19 + $0xe0] ss:$8 sps:$4 sm:$0xff]   ;;  %v3109_v40 = vld [vmem:[%s3501_s19 + $0xd4] ss:$8 sps:$4 sm:$0xff]  }
  0x1c   : > { %v3105_v37 = vld [vmem:[%s3501_s19 + $0x1e4] ss:$8 sps:$4 sm:$0xff]   ;;  %v3108_v39 = vld [vmem:[%s3501_s19 + $0x1e0] ss:$8 sps:$4 sm:$0xff]   ;;  %v3111_v41 = vld [vmem:[%s3501_s19 + $0x1d4] ss:$8 sps:$4 sm:$0xff]  }
  0x1d   : > { %2085 = vmatpush1.bf16.msra.mxu0 %v3071_v14  ;;  %v3113_v42 = vld [vmem:[%s3501_s19 + $0xd0] ss:$8 sps:$4 sm:$0xff]   ;;  %v3115_v44 = vld [vmem:[%s3501_s19 + $0xc4] ss:$8 sps:$4 sm:$0xff]   ;;  %v3119_v46 = vld [vmem:[%s3501_s19 + $0xc0] ss:$8 sps:$4 sm:$0xff]  }
  0x1e   : > { %2138 = vmatpush1.bf16.msra.mxu1 %v3072_v15  ;;  %2086 = vmatprep.subr.bf16.mxu0 %v3073_v16  ;;  %v3114_v43 = vld [vmem:[%s3501_s19 + $0x1d0] ss:$8 sps:$4 sm:$0xff]   ;;  %v3117_v45 = vld [vmem:[%s3501_s19 + $0x1c4] ss:$8 sps:$4 sm:$0xff]   ;;  %v3120_v47 = vld [vmem:[%s3501_s19 + $0x1c0] ss:$8 sps:$4 sm:$0xff]  }
  0x1f   : > { %2139 = vmatprep.subr.bf16.mxu1 %v3075_v17  ;;  %v350_v48 = vld [vmem:[%s3551_s23] sm:$0xff]  ;;  %v351_v50 = vld [vmem:[%s3551_s23 + $0x8] sm:$0xff]  ;;  %v3121_v52 = vld [vmem:[%s3501_s19 + $0xb4] ss:$8 sps:$4 sm:$0xff]   ;;  %s3023_s26 = sshll.u32 %s3886_s12, 6 }
  0x20   : > { %v358_v49 = vld [vmem:[%s3551_s23 + $0x40] sm:$0xff]  ;;  %v359_v51 = vld [vmem:[%s3551_s23 + $0x48] sm:$0xff]  ;;  %v3123_v54 = vld [vmem:[%s3501_s19 + $0x1b4] ss:$8 sps:$4 sm:$0xff]   ;;  %s3858_s29 = scalar_lea.vmem %s3880_s3, %s3023_s26 }
  0x21   : > { %2087 = vmatpush1.bf16.msra.mxu0 %v3077_v18  ;;  %v2732_v53 = vcombine.high %v350_v48, %v358_v49  ;;  %v2734_v55 = vcombine.high %v351_v50, %v359_v51  ;;  %v3125_v56 = vld [vmem:[%s3501_s19 + $0xb0] ss:$8 sps:$4 sm:$0xff]   ;;  %v3127_v58 = vld [vmem:[%s3501_s19 + $0xa4] ss:$8 sps:$4 sm:$0xff]   ;;  %v3131_v60 = vld [vmem:[%s3501_s19 + $0xa0] ss:$8 sps:$4 sm:$0xff]   ;;  %v2731_v8 = vcombine.low %v350_v48, %v358_v49  ;;  %v2733_v9 = vcombine.low %v351_v50, %v359_v51 }
  0x22   : > { %2140 = vmatpush1.bf16.msra.mxu1 %v3078_v19  ;;  %2088 = vmatprep.subr.bf16.mxu0 %v3079_v20  ;;  %v3126_v57 = vld [vmem:[%s3501_s19 + $0x1b0] ss:$8 sps:$4 sm:$0xff]   ;;  %v3129_v59 = vld [vmem:[%s3501_s19 + $0x1a4] ss:$8 sps:$4 sm:$0xff]   ;;  %v3132_v61 = vld [vmem:[%s3501_s19 + $0x1a0] ss:$8 sps:$4 sm:$0xff]  }
  0x23   : > { %2141 = vmatprep.subr.bf16.mxu1 %v3081_v21  ;;  %2110 = vmatprep.mubr.bf16.mxu0 %v2732_v53  ;;  %v3133_v62 = vld [vmem:[%s3501_s19 + $0x94] ss:$8 sps:$4 sm:$0xff]   ;;  %v3137_v0 = vld [vmem:[%s3501_s19 + $0x90] ss:$8 sps:$4 sm:$0xff]   ;;  %v3139_v2 = vld [vmem:[%s3501_s19 + $0x84] ss:$8 sps:$4 sm:$0xff]  }
  0x24   : > { %2163 = vmatprep.mubr.bf16.mxu1 %v2734_v55  ;;  %v3135_v63 = vld [vmem:[%s3501_s19 + $0x194] ss:$8 sps:$4 sm:$0xff]   ;;  %v3138_v1 = vld [vmem:[%s3501_s19 + $0x190] ss:$8 sps:$4 sm:$0xff]   ;;  %v3141_v3 = vld [vmem:[%s3501_s19 + $0x184] ss:$8 sps:$4 sm:$0xff]  }
  0x25   : > { %2089 = vmatpush1.bf16.msra.mxu0 %v3083_v22  ;;  %v3143_v4 = vld [vmem:[%s3501_s19 + $0x80] ss:$8 sps:$4 sm:$0xff]   ;;  %v3147_v6 = vld [vmem:[%s3501_s19 + $0x274] ss:$8 sps:$4 sm:$0xff]   ;;  %v3145_v10 = vld [vmem:[%s3501_s19 + $0x270] ss:$8 sps:$4 sm:$0xff]  }
  0x26   : > { %2142 = vmatpush1.bf16.msra.mxu1 %v3084_v23  ;;  %2090 = vmatprep.subr.bf16.mxu0 %v3085_v24  ;;  %v3144_v5 = vld [vmem:[%s3501_s19 + $0x180] ss:$8 sps:$4 sm:$0xff]   ;;  %v3150_v7 = vld [vmem:[%s3501_s19 + $0x374] ss:$8 sps:$4 sm:$0xff]   ;;  %v3148_v11 = vld [vmem:[%s3501_s19 + $0x370] ss:$8 sps:$4 sm:$0xff]  }
  0x27   : > { %2143 = vmatprep.subr.bf16.mxu1 %v3087_v25  ;;  %v3153_v12 = vld [vmem:[%s3501_s19 + $0x264] ss:$8 sps:$4 sm:$0xff]   ;;  %v3151_v14 = vld [vmem:[%s3501_s19 + $0x260] ss:$8 sps:$4 sm:$0xff]   ;;  %v3159_v16 = vld [vmem:[%s3501_s19 + $0x254] ss:$8 sps:$4 sm:$0xff]  }
  0x28   : > { %v3156_v13 = vld [vmem:[%s3501_s19 + $0x364] ss:$8 sps:$4 sm:$0xff]   ;;  %v3154_v15 = vld [vmem:[%s3501_s19 + $0x360] ss:$8 sps:$4 sm:$0xff]   ;;  %v3162_v17 = vld [vmem:[%s3501_s19 + $0x354] ss:$8 sps:$4 sm:$0xff]  }
  0x29   : > { %2091 = vmatpush1.bf16.msra.mxu0 %v3089_v26  ;;  %v3157_v18 = vld [vmem:[%s3501_s19 + $0x250] ss:$8 sps:$4 sm:$0xff]   ;;  %v3165_v20 = vld [vmem:[%s3501_s19 + $0x244] ss:$8 sps:$4 sm:$0xff]   ;;  %v3163_v22 = vld [vmem:[%s3501_s19 + $0x240] ss:$8 sps:$4 sm:$0xff]  }
  0x2a   : > { %2144 = vmatpush1.bf16.msra.mxu1 %v3090_v27  ;;  %2092 = vmatprep.subr.bf16.mxu0 %v3091_v28  ;;  %v3160_v19 = vld [vmem:[%s3501_s19 + $0x350] ss:$8 sps:$4 sm:$0xff]   ;;  %v3168_v21 = vld [vmem:[%s3501_s19 + $0x344] ss:$8 sps:$4 sm:$0xff]   ;;  %v3166_v23 = vld [vmem:[%s3501_s19 + $0x340] ss:$8 sps:$4 sm:$0xff]  }
  0x2b   : > { %2145 = vmatprep.subr.bf16.mxu1 %v3093_v29  ;;  %v3171_v24 = vld [vmem:[%s3501_s19 + $0x234] ss:$8 sps:$4 sm:$0xff]   ;;  %v3169_v26 = vld [vmem:[%s3501_s19 + $0x230] ss:$8 sps:$4 sm:$0xff]   ;;  %v366_v28 = vld [vmem:[%s3551_s23 + $0x80] sm:$0xff] }
  0x2c   : > { %v3174_v25 = vld [vmem:[%s3501_s19 + $0x334] ss:$8 sps:$4 sm:$0xff]   ;;  %v3172_v27 = vld [vmem:[%s3501_s19 + $0x330] ss:$8 sps:$4 sm:$0xff]   ;;  %v374_v29 = vld [vmem:[%s3551_s23 + $0xc0] sm:$0xff] }
  0x2d   : > { %2093 = vmatpush1.bf16.msra.mxu0 %v3095_v30  ;;  %v367_v30 = vld [vmem:[%s3551_s23 + $0x88] sm:$0xff]  ;;  %v3618_v48 = vld [vmem:[%s3551_s23 + $0x18] sm:$0xff] }
  0x2e   : > { %2146 = vmatpush1.bf16.msra.mxu1 %v3096_v31  ;;  %2094 = vmatprep.subr.bf16.mxu0 %v3097_v32  ;;  %v375_v31 = vld [vmem:[%s3551_s23 + $0xc8] sm:$0xff]  ;;  %v3623_v50 = vld [vmem:[%s3551_s23 + $0x58] sm:$0xff] }
  0x2f   : > { %2147 = vmatprep.subr.bf16.mxu1 %v3099_v33  ;;  %v3177_v32 = vld [vmem:[%s3501_s19 + $0x224] ss:$8 sps:$4 sm:$0xff]   ;;  %v2748_v33 = vcombine.high %v366_v28, %v374_v29  ;;  %v2738_v51 = vcombine.high %v3618_v48, %v3623_v50  ;;  %v3190_v53 = vld [vmem:[%s3501_s19 + $0x300] ss:$8 sps:$4 sm:$0xff]   ;;  %v3198_v55 = vld [vmem:[%s3501_s19 + $0x3f4] ss:$8 sps:$4 sm:$0xff]  }
  0x31   : > { %2095 = vmatpush2.bf16.msra.mxu0 %v3101_v34  ;;  %v2750_v34 = vcombine.high %v367_v30, %v375_v31 }
  0x32   : > { %2148 = vmatpush2.bf16.msra.mxu1 %v3102_v35  ;;  %2096 = vmatprep.subr.bf16.mxu0 %v3103_v36  ;;  %v2747_v35 = vcombine.low %v366_v28, %v374_v29  ;;  %v3180_v36 = vld [vmem:[%s3501_s19 + $0x324] ss:$8 sps:$4 sm:$0xff]   ;;  %v2737_v29 = vcombine.low %v3618_v48, %v3623_v50 }
  0x33   : > { %2149 = vmatprep.subr.bf16.mxu1 %v3105_v37  ;;  %v2749_v37 = vcombine.low %v367_v30, %v375_v31  ;;  %v369_v30 = vld [vmem:[%s3551_s23 + $0x98] sm:$0xff]  ;;  %v3261_v48 = vld [vmem:[%s3501_s19 + $0x444] ss:$8 sps:$4 sm:$0xff]  }
  0x34   : > { %v377_v31 = vld [vmem:[%s3551_s23 + $0xd8] sm:$0xff] }
  0x35   : > { %2097 = vmatpush2.bf16.msra.mxu0 %v3107_v38  ;;  %v3175_v38 = vld [vmem:[%s3501_s19 + $0x220] ss:$8 sps:$4 sm:$0xff]  }
  0x36   : > { %2150 = vmatpush2.bf16.msra.mxu1 %v3108_v39  ;;  %2098 = vmatprep.subr.bf16.mxu0 %v3109_v40  ;;  %v3178_v39 = vld [vmem:[%s3501_s19 + $0x320] ss:$8 sps:$4 sm:$0xff]   ;;  %v3183_v40 = vld [vmem:[%s3501_s19 + $0x214] ss:$8 sps:$4 sm:$0xff]  }
  0x37   : > { %2151 = vmatprep.subr.bf16.mxu1 %v3111_v41  ;;  %v3186_v41 = vld [vmem:[%s3501_s19 + $0x314] ss:$8 sps:$4 sm:$0xff]  }
  0x39   : > { %2099 = vmatpush2.bf16.msra.mxu0 %v3113_v42  ;;  %v3181_v42 = vld [vmem:[%s3501_s19 + $0x210] ss:$8 sps:$4 sm:$0xff]  }
  0x3a   : > { %2152 = vmatpush2.bf16.msra.mxu1 %v3114_v43  ;;  %2100 = vmatprep.subr.bf16.mxu0 %v3115_v44  ;;  %v3184_v43 = vld [vmem:[%s3501_s19 + $0x310] ss:$8 sps:$4 sm:$0xff]   ;;  %v3189_v44 = vld [vmem:[%s3501_s19 + $0x204] ss:$8 sps:$4 sm:$0xff]  }
  0x3b   : > { %2153 = vmatprep.subr.bf16.mxu1 %v3117_v45  ;;  %v3192_v45 = vld [vmem:[%s3501_s19 + $0x304] ss:$8 sps:$4 sm:$0xff]  }
  0x3d   : > { %2101 = vmatpush2.bf16.msra.mxu0 %v3119_v46  ;;  %v3612_v46 = vld [vmem:[%s3551_s23 + $0x10] sm:$0xff] }
  0x3e   : > { %2154 = vmatpush2.bf16.msra.mxu1 %v3120_v47  ;;  %2102 = vmatprep.subr.bf16.mxu0 %v3121_v52  ;;  %v3615_v47 = vld [vmem:[%s3551_s23 + $0x50] sm:$0xff]  ;;  %v3187_v52 = vld [vmem:[%s3501_s19 + $0x200] ss:$8 sps:$4 sm:$0xff]  }
  0x3f   : > { %2155 = vmatprep.subr.bf16.mxu1 %v3123_v54  ;;  %v2736_v49 = vcombine.high %v3612_v46, %v3615_v47  ;;  %v3195_v54 = vld [vmem:[%s3501_s19 + $0x2f4] ss:$8 sps:$4 sm:$0xff]   ;;  %v2735_v28 = vcombine.low %v3612_v46, %v3615_v47  ;;  %v3688_v46 = vld [vmem:[%s3551_s23 + $0x28] sm:$0xff] }
  0x40   : > { %v3691_v47 = vld [vmem:[%s3551_s23 + $0x68] sm:$0xff] }
  0x41   : > { %2103 = vmatpush2.bf16.msra.mxu0 %v3125_v56  ;;  %v3193_v56 = vld [vmem:[%s3501_s19 + $0x2f0] ss:$8 sps:$4 sm:$0xff]  }
  0x42   : > { %2156 = vmatpush2.bf16.msra.mxu1 %v3126_v57  ;;  %2104 = vmatprep.subr.bf16.mxu0 %v3127_v58  ;;  %v3196_v57 = vld [vmem:[%s3501_s19 + $0x3f0] ss:$8 sps:$4 sm:$0xff]   ;;  %v3201_v58 = vld [vmem:[%s3501_s19 + $0x2e4] ss:$8 sps:$4 sm:$0xff]  }
  0x43   : > { %2157 = vmatprep.subr.bf16.mxu1 %v3129_v59  ;;  %v3204_v59 = vld [vmem:[%s3501_s19 + $0x3e4] ss:$8 sps:$4 sm:$0xff]  }
  0x45   : > { %2105 = vmatpush2.bf16.msra.mxu0 %v3131_v60  ;;  %v3199_v60 = vld [vmem:[%s3501_s19 + $0x2e0] ss:$8 sps:$4 sm:$0xff]  }
  0x46   : > { %2158 = vmatpush2.bf16.msra.mxu1 %v3132_v61  ;;  %2106 = vmatprep.subr.bf16.mxu0 %v3133_v62  ;;  %v3202_v61 = vld [vmem:[%s3501_s19 + $0x3e0] ss:$8 sps:$4 sm:$0xff]   ;;  %v3207_v62 = vld [vmem:[%s3501_s19 + $0x2d4] ss:$8 sps:$4 sm:$0xff]  }
  0x47   : > { %2159 = vmatprep.subr.bf16.mxu1 %v3135_v63  ;;  %v3210_v63 = vld [vmem:[%s3501_s19 + $0x3d4] ss:$8 sps:$4 sm:$0xff]  }
  0x49   : > { %2107 = vmatpush2.bf16.msra.mxu0 %v3137_v0  ;;  %v3205_v0 = vld [vmem:[%s3501_s19 + $0x2d0] ss:$8 sps:$4 sm:$0xff]  }
  0x4a   : > { %2160 = vmatpush2.bf16.msra.mxu1 %v3138_v1  ;;  %2108 = vmatprep.subr.bf16.mxu0 %v3139_v2  ;;  %v3208_v1 = vld [vmem:[%s3501_s19 + $0x3d0] ss:$8 sps:$4 sm:$0xff]   ;;  %v3213_v2 = vld [vmem:[%s3501_s19 + $0x2c4] ss:$8 sps:$4 sm:$0xff]  }
  0x4b   : > { %2161 = vmatprep.subr.bf16.mxu1 %v3141_v3  ;;  %v3216_v3 = vld [vmem:[%s3501_s19 + $0x3c4] ss:$8 sps:$4 sm:$0xff]  }
  0x4d   : > { %2109 = vmatpush2.bf16.msra.mxu0 %v3143_v4  ;;  %v3211_v4 = vld [vmem:[%s3501_s19 + $0x2c0] ss:$8 sps:$4 sm:$0xff]  }
  0x4e   : > { %2162 = vmatpush2.bf16.msra.mxu1 %v3144_v5  ;;  %2184 = vmatprep.subr.bf16.mxu0 %v3147_v6  ;;  %v3214_v5 = vld [vmem:[%s3501_s19 + $0x3c0] ss:$8 sps:$4 sm:$0xff]   ;;  %v3219_v6 = vld [vmem:[%s3501_s19 + $0x2b4] ss:$8 sps:$4 sm:$0xff]  }
  0x4f   : > { %2237 = vmatprep.subr.bf16.mxu1 %v3150_v7  ;;  %v3222_v7 = vld [vmem:[%s3501_s19 + $0x3b4] ss:$8 sps:$4 sm:$0xff]  }
  0x50   : > { %2111 = vmatmul.mubr.bf16.vlgmr.msra.gmra.mxu0 %v2731_v8  ;;  %v3217_v8 = vld [vmem:[%s3501_s19 + $0x2b0] ss:$8 sps:$4 sm:$0xff]  }
  0x51   : > { %2164 = vmatmul.mubr.bf16.vlgmr.msra.gmra.mxu1 %v2733_v9  ;;  %2185 = vmatpush1.bf16.msra.mxu0 %v3145_v10  ;;  %v3220_v9 = vld [vmem:[%s3501_s19 + $0x3b0] ss:$8 sps:$4 sm:$0xff]   ;;  %v3225_v10 = vld [vmem:[%s3501_s19 + $0x2a4] ss:$8 sps:$4 sm:$0xff]  }
  0x52   : > { %2238 = vmatpush1.bf16.msra.mxu1 %v3148_v11  ;;  %2186 = vmatprep.subr.bf16.mxu0 %v3153_v12  ;;  %v3228_v11 = vld [vmem:[%s3501_s19 + $0x3a4] ss:$8 sps:$4 sm:$0xff]   ;;  %v3223_v12 = vld [vmem:[%s3501_s19 + $0x2a0] ss:$8 sps:$4 sm:$0xff]  }
  0x53   : > { %2239 = vmatprep.subr.bf16.mxu1 %v3156_v13  ;;  %2120 = vmatprep.mubr.bf16.mxu0 %v2748_v33  ;;  %v3226_v13 = vld [vmem:[%s3501_s19 + $0x3a0] ss:$8 sps:$4 sm:$0xff]   ;;  %v3252_v33 = vld [vmem:[%s3501_s19 + $0x564] ss:$8 sps:$4 sm:$0xff]  }
  0x54   : > { %2173 = vmatprep.mubr.bf16.mxu1 %v2750_v34 }
  0x55   : > { %2187 = vmatpush1.bf16.msra.mxu0 %v3151_v14  ;;  %v3231_v14 = vld [vmem:[%s3501_s19 + $0x294] ss:$8 sps:$4 sm:$0xff]  }
  0x56   : > { %2240 = vmatpush1.bf16.msra.mxu1 %v3154_v15  ;;  %2188 = vmatprep.subr.bf16.mxu0 %v3159_v16  ;;  %v3234_v15 = vld [vmem:[%s3501_s19 + $0x394] ss:$8 sps:$4 sm:$0xff]   ;;  %v3229_v16 = vld [vmem:[%s3501_s19 + $0x290] ss:$8 sps:$4 sm:$0xff]  }
  0x57   : > { %2241 = vmatprep.subr.bf16.mxu1 %v3162_v17  ;;  %v3232_v17 = vld [vmem:[%s3501_s19 + $0x390] ss:$8 sps:$4 sm:$0xff]  }
  0x58   : > { %2121 = vmatmul.mubr.bf16.gmra.mxu0 %v2747_v35  ;;  %v2754_v35 = vcombine.high %v369_v30, %v377_v31 }
  0x59   : > { %2189 = vmatpush1.bf16.msra.mxu0 %v3157_v18  ;;  %2174 = vmatmul.mubr.bf16.gmra.mxu1 %v2749_v37  ;;  %v3237_v18 = vld [vmem:[%s3501_s19 + $0x284] ss:$8 sps:$4 sm:$0xff]   ;;  %v3250_v37 = vld [vmem:[%s3501_s19 + $0x560] ss:$8 sps:$4 sm:$0xff]  }
  0x5a   : > { %2242 = vmatpush1.bf16.msra.mxu1 %v3160_v19  ;;  %2190 = vmatprep.subr.bf16.mxu0 %v3165_v20  ;;  %v3240_v19 = vld [vmem:[%s3501_s19 + $0x384] ss:$8 sps:$4 sm:$0xff]   ;;  %v3235_v20 = vld [vmem:[%s3501_s19 + $0x280] ss:$8 sps:$4 sm:$0xff]  }
  0x5b   : > { %2243 = vmatprep.subr.bf16.mxu1 %v3168_v21  ;;  %2216 = vmatprep.mubr.bf16.mxu0 %v2736_v49  ;;  %v3238_v21 = vld [vmem:[%s3501_s19 + $0x380] ss:$8 sps:$4 sm:$0xff]   ;;  %v3264_v49 = vld [vmem:[%s3501_s19 + $0x544] ss:$8 sps:$4 sm:$0xff]  }
  0x5c   : > { %2269 = vmatprep.mubr.bf16.mxu1 %v2738_v51  ;;  %v2742_v51 = vcombine.high %v3688_v46, %v3691_v47 }
  0x5d   : > { %2191 = vmatpush1.bf16.msra.mxu0 %v3163_v22  ;;  %v3243_v22 = vld [vmem:[%s3501_s19 + $0x474] ss:$8 sps:$4 sm:$0xff]  }
  0x5e   : > { %2244 = vmatpush1.bf16.msra.mxu1 %v3166_v23  ;;  %2192 = vmatprep.subr.bf16.mxu0 %v3171_v24  ;;  %v3246_v23 = vld [vmem:[%s3501_s19 + $0x574] ss:$8 sps:$4 sm:$0xff]   ;;  %v3241_v24 = vld [vmem:[%s3501_s19 + $0x470] ss:$8 sps:$4 sm:$0xff]  }
  0x5f   : > { %2245 = vmatprep.subr.bf16.mxu1 %v3174_v25  ;;  %v3244_v25 = vld [vmem:[%s3501_s19 + $0x570] ss:$8 sps:$4 sm:$0xff]  }
  0x61   : > { %2193 = vmatpush1.bf16.msra.mxu0 %v3169_v26  ;;  %v368_v26 = vld [vmem:[%s3551_s23 + $0x90] sm:$0xff] }
  0x62   : > { %2246 = vmatpush1.bf16.msra.mxu1 %v3172_v27  ;;  %2194 = vmatprep.subr.bf16.mxu0 %v3177_v32  ;;  %v376_v27 = vld [vmem:[%s3551_s23 + $0xd0] sm:$0xff]  ;;  %v3249_v32 = vld [vmem:[%s3501_s19 + $0x464] ss:$8 sps:$4 sm:$0xff]  }
  0x63   : > { %2247 = vmatprep.subr.bf16.mxu1 %v3180_v36  ;;  %v2752_v34 = vcombine.high %v368_v26, %v376_v27  ;;  %v3247_v36 = vld [vmem:[%s3501_s19 + $0x460] ss:$8 sps:$4 sm:$0xff]  }
  0x65   : > { %2195 = vmatpush1.bf16.msra.mxu0 %v3175_v38  ;;  %v3255_v38 = vld [vmem:[%s3501_s19 + $0x454] ss:$8 sps:$4 sm:$0xff]  }
  0x66   : > { %2248 = vmatpush1.bf16.msra.mxu1 %v3178_v39  ;;  %2196 = vmatprep.subr.bf16.mxu0 %v3183_v40  ;;  %v3258_v39 = vld [vmem:[%s3501_s19 + $0x554] ss:$8 sps:$4 sm:$0xff]   ;;  %v3253_v40 = vld [vmem:[%s3501_s19 + $0x450] ss:$8 sps:$4 sm:$0xff]  }
  0x67   : > { %2249 = vmatprep.subr.bf16.mxu1 %v3186_v41  ;;  %v3256_v41 = vld [vmem:[%s3501_s19 + $0x550] ss:$8 sps:$4 sm:$0xff]  }
  0x69   : > { %2197 = vmatpush1.bf16.msra.mxu0 %v3181_v42  ;;  %v3682_v42 = vld [vmem:[%s3551_s23 + $0x20] sm:$0xff] }
  0x6a   : > { %2250 = vmatpush1.bf16.msra.mxu1 %v3184_v43  ;;  %2198 = vmatprep.subr.bf16.mxu0 %v3189_v44  ;;  %v3685_v43 = vld [vmem:[%s3551_s23 + $0x60] sm:$0xff]  ;;  %v2751_v44 = vcombine.low %v368_v26, %v376_v27 }
  0x6b   : > { %2251 = vmatprep.subr.bf16.mxu1 %v3192_v45  ;;  %v2753_v45 = vcombine.low %v369_v30, %v377_v31  ;;  %v2740_v50 = vcombine.high %v3682_v42, %v3685_v43  ;;  %v3321_v26 = vld [vmem:[%s3501_s19 + $0x4a4] ss:$8 sps:$4 sm:$0xff]   ;;  %v3327_v30 = vld [vmem:[%s3501_s19 + $0x494] ss:$8 sps:$4 sm:$0xff]  }
  0x6c   : > { %v3324_v27 = vld [vmem:[%s3501_s19 + $0x5a4] ss:$8 sps:$4 sm:$0xff]   ;;  %v3330_v31 = vld [vmem:[%s3501_s19 + $0x594] ss:$8 sps:$4 sm:$0xff]  }
  0x6d   : > { %2199 = vmatpush1.bf16.msra.mxu0 %v3187_v52  ;;  %v3259_v52 = vld [vmem:[%s3501_s19 + $0x440] ss:$8 sps:$4 sm:$0xff]  }
  0x6e   : > { %2252 = vmatpush1.bf16.msra.mxu1 %v3190_v53  ;;  %2200 = vmatprep.subr.bf16.mxu0 %v3195_v54  ;;  %v3262_v53 = vld [vmem:[%s3501_s19 + $0x540] ss:$8 sps:$4 sm:$0xff]   ;;  %v3267_v54 = vld [vmem:[%s3501_s19 + $0x434] ss:$8 sps:$4 sm:$0xff]  }
  0x6f   : > { %2253 = vmatprep.subr.bf16.mxu1 %v3198_v55  ;;  %v3270_v55 = vld [vmem:[%s3501_s19 + $0x534] ss:$8 sps:$4 sm:$0xff]  }
  0x71   : > { %2201 = vmatpush2.bf16.msra.mxu0 %v3193_v56  ;;  %v3265_v56 = vld [vmem:[%s3501_s19 + $0x430] ss:$8 sps:$4 sm:$0xff]  }
  0x72   : > { %2254 = vmatpush2.bf16.msra.mxu1 %v3196_v57  ;;  %2202 = vmatprep.subr.bf16.mxu0 %v3201_v58  ;;  %v3268_v57 = vld [vmem:[%s3501_s19 + $0x530] ss:$8 sps:$4 sm:$0xff]   ;;  %v3273_v58 = vld [vmem:[%s3501_s19 + $0x424] ss:$8 sps:$4 sm:$0xff]  }
  0x73   : > { %2255 = vmatprep.subr.bf16.mxu1 %v3204_v59  ;;  %v3276_v59 = vld [vmem:[%s3501_s19 + $0x524] ss:$8 sps:$4 sm:$0xff]  }
  0x75   : > { %2203 = vmatpush2.bf16.msra.mxu0 %v3199_v60  ;;  %v3271_v60 = vld [vmem:[%s3501_s19 + $0x420] ss:$8 sps:$4 sm:$0xff]  }
  0x76   : > { %2256 = vmatpush2.bf16.msra.mxu1 %v3202_v61  ;;  %2204 = vmatprep.subr.bf16.mxu0 %v3207_v62  ;;  %v3274_v61 = vld [vmem:[%s3501_s19 + $0x520] ss:$8 sps:$4 sm:$0xff]   ;;  %v3279_v62 = vld [vmem:[%s3501_s19 + $0x414] ss:$8 sps:$4 sm:$0xff]  }
  0x77   : > { %2257 = vmatprep.subr.bf16.mxu1 %v3210_v63  ;;  %v3282_v63 = vld [vmem:[%s3501_s19 + $0x514] ss:$8 sps:$4 sm:$0xff]  }
  0x79   : > { %2205 = vmatpush2.bf16.msra.mxu0 %v3205_v0  ;;  %v3277_v0 = vld [vmem:[%s3501_s19 + $0x410] ss:$8 sps:$4 sm:$0xff]  }
  0x7a   : > { %2258 = vmatpush2.bf16.msra.mxu1 %v3208_v1  ;;  %2206 = vmatprep.subr.bf16.mxu0 %v3213_v2  ;;  %v3280_v1 = vld [vmem:[%s3501_s19 + $0x510] ss:$8 sps:$4 sm:$0xff]   ;;  %v3285_v2 = vld [vmem:[%s3501_s19 + $0x404] ss:$8 sps:$4 sm:$0xff]  }
  0x7b   : > { %2259 = vmatprep.subr.bf16.mxu1 %v3216_v3  ;;  %v3288_v3 = vld [vmem:[%s3501_s19 + $0x504] ss:$8 sps:$4 sm:$0xff]  }
  0x7d   : > { %2207 = vmatpush2.bf16.msra.mxu0 %v3211_v4  ;;  %v3283_v4 = vld [vmem:[%s3501_s19 + $0x400] ss:$8 sps:$4 sm:$0xff]  }
  0x7e   : > { %2260 = vmatpush2.bf16.msra.mxu1 %v3214_v5  ;;  %2208 = vmatprep.subr.bf16.mxu0 %v3219_v6  ;;  %v3286_v5 = vld [vmem:[%s3501_s19 + $0x500] ss:$8 sps:$4 sm:$0xff]   ;;  %v3291_v6 = vld [vmem:[%s3501_s19 + $0x4f4] ss:$8 sps:$4 sm:$0xff]  }
  0x7f   : > { %2261 = vmatprep.subr.bf16.mxu1 %v3222_v7  ;;  %v3294_v7 = vld [vmem:[%s3501_s19 + $0x5f4] ss:$8 sps:$4 sm:$0xff]  }
  0x81   : > { %2209 = vmatpush2.bf16.msra.mxu0 %v3217_v8  ;;  %v3289_v8 = vld [vmem:[%s3501_s19 + $0x4f0] ss:$8 sps:$4 sm:$0xff]  }
  0x82   : > { %2262 = vmatpush2.bf16.msra.mxu1 %v3220_v9  ;;  %2210 = vmatprep.subr.bf16.mxu0 %v3225_v10  ;;  %v3292_v9 = vld [vmem:[%s3501_s19 + $0x5f0] ss:$8 sps:$4 sm:$0xff]   ;;  %v3297_v10 = vld [vmem:[%s3501_s19 + $0x4e4] ss:$8 sps:$4 sm:$0xff]  }
  0x83   : > { %2263 = vmatprep.subr.bf16.mxu1 %v3228_v11  ;;  %v3300_v11 = vld [vmem:[%s3501_s19 + $0x5e4] ss:$8 sps:$4 sm:$0xff]  }
  0x85   : > { %2211 = vmatpush2.bf16.msra.mxu0 %v3223_v12  ;;  %v3295_v12 = vld [vmem:[%s3501_s19 + $0x4e0] ss:$8 sps:$4 sm:$0xff]  }
  0x86   : > { %2264 = vmatpush2.bf16.msra.mxu1 %v3226_v13  ;;  %2212 = vmatprep.subr.bf16.mxu0 %v3231_v14  ;;  %v3298_v13 = vld [vmem:[%s3501_s19 + $0x5e0] ss:$8 sps:$4 sm:$0xff]   ;;  %v3303_v14 = vld [vmem:[%s3501_s19 + $0x4d4] ss:$8 sps:$4 sm:$0xff]  }
  0x87   : > { %2265 = vmatprep.subr.bf16.mxu1 %v3234_v15  ;;  %v3306_v15 = vld [vmem:[%s3501_s19 + $0x5d4] ss:$8 sps:$4 sm:$0xff]  }
  0x89   : > { %2213 = vmatpush2.bf16.msra.mxu0 %v3229_v16  ;;  %v3301_v16 = vld [vmem:[%s3501_s19 + $0x4d0] ss:$8 sps:$4 sm:$0xff]  }
  0x8a   : > { %2266 = vmatpush2.bf16.msra.mxu1 %v3232_v17  ;;  %2214 = vmatprep.subr.bf16.mxu0 %v3237_v18  ;;  %v3304_v17 = vld [vmem:[%s3501_s19 + $0x5d0] ss:$8 sps:$4 sm:$0xff]   ;;  %v3309_v18 = vld [vmem:[%s3501_s19 + $0x4c4] ss:$8 sps:$4 sm:$0xff]  }
  0x8b   : > { %2267 = vmatprep.subr.bf16.mxu1 %v3240_v19  ;;  %v3312_v19 = vld [vmem:[%s3501_s19 + $0x5c4] ss:$8 sps:$4 sm:$0xff]  }
  0x8d   : > { %2215 = vmatpush2.bf16.msra.mxu0 %v3235_v20  ;;  %v3307_v20 = vld [vmem:[%s3501_s19 + $0x4c0] ss:$8 sps:$4 sm:$0xff]  }
  0x8e   : > { %2268 = vmatpush2.bf16.msra.mxu1 %v3238_v21  ;;  %2290 = vmatprep.subr.bf16.mxu0 %v3243_v22  ;;  %v3310_v21 = vld [vmem:[%s3501_s19 + $0x5c0] ss:$8 sps:$4 sm:$0xff]   ;;  %v3315_v22 = vld [vmem:[%s3501_s19 + $0x4b4] ss:$8 sps:$4 sm:$0xff]  }
  0x8f   : > { %2343 = vmatprep.subr.bf16.mxu1 %v3246_v23  ;;  %v3318_v23 = vld [vmem:[%s3501_s19 + $0x5b4] ss:$8 sps:$4 sm:$0xff]  }
  0x90   : > { %2217 = vmatmul.mubr.bf16.vlgmr.msra.gmra.mxu0 %v2735_v28  ;;  %v3319_v28 = vld [vmem:[%s3501_s19 + $0x4a0] ss:$8 sps:$4 sm:$0xff]  }
  0x91   : > { %2270 = vmatmul.mubr.bf16.vlgmr.msra.gmra.mxu1 %v2737_v29  ;;  %2291 = vmatpush1.bf16.msra.mxu0 %v3241_v24  ;;  %v3313_v24 = vld [vmem:[%s3501_s19 + $0x4b0] ss:$8 sps:$4 sm:$0xff]   ;;  %v3322_v29 = vld [vmem:[%s3501_s19 + $0x5a0] ss:$8 sps:$4 sm:$0xff]  }
  0x92   : > { %2344 = vmatpush1.bf16.msra.mxu1 %v3244_v25  ;;  %2292 = vmatprep.subr.bf16.mxu0 %v3249_v32  ;;  %v3316_v25 = vld [vmem:[%s3501_s19 + $0x5b0] ss:$8 sps:$4 sm:$0xff]  }
  0x93   : > { %2345 = vmatprep.subr.bf16.mxu1 %v3252_v33  ;;  %2226 = vmatprep.mubr.bf16.mxu0 %v2752_v34  ;;  %v3325_v32 = vld [vmem:[%s3501_s19 + $0x490] ss:$8 sps:$4 sm:$0xff]   ;;  %v3333_v34 = vld [vmem:[%s3501_s19 + $0x484] ss:$8 sps:$4 sm:$0xff]  }
  0x94   : > { %2279 = vmatprep.mubr.bf16.mxu1 %v2754_v35  ;;  %v3328_v33 = vld [vmem:[%s3501_s19 + $0x590] ss:$8 sps:$4 sm:$0xff]   ;;  %v3336_v35 = vld [vmem:[%s3501_s19 + $0x584] ss:$8 sps:$4 sm:$0xff]  }
  0x95   : > { %2293 = vmatpush1.bf16.msra.mxu0 %v3247_v36  ;;  %v3331_v36 = vld [vmem:[%s3501_s19 + $0x480] ss:$8 sps:$4 sm:$0xff]  }
  0x96   : > { %2346 = vmatpush1.bf16.msra.mxu1 %v3250_v37  ;;  %2294 = vmatprep.subr.bf16.mxu0 %v3255_v38  ;;  %v3334_v37 = vld [vmem:[%s3501_s19 + $0x580] ss:$8 sps:$4 sm:$0xff]   ;;  %v3339_v38 = vld [vmem:[%s3501_s19 + $0x674] ss:$8 sps:$4 sm:$0xff]  }
  0x97   : > { %2347 = vmatprep.subr.bf16.mxu1 %v3258_v39  ;;  %v3342_v39 = vld [vmem:[%s3501_s19 + $0x774] ss:$8 sps:$4 sm:$0xff]  }
  0x98   : > { %2227 = vmatmul.mubr.bf16.gmra.mxu0 %v2751_v44  ;;  %v2741_v44 = vcombine.low %v3688_v46, %v3691_v47  ;;  %v3343_v46 = vld [vmem:[%s3501_s19 + $0x660] ss:$8 sps:$4 sm:$0xff]  }
  0x99   : > { %2280 = vmatmul.mubr.bf16.gmra.mxu1 %v2753_v45  ;;  %2295 = vmatpush1.bf16.msra.mxu0 %v3253_v40  ;;  %v370_v40 = vld [vmem:[%s3551_s23 + $0xa0] sm:$0xff] }
  0x9a   : > { %2348 = vmatpush1.bf16.msra.mxu1 %v3256_v41  ;;  %2296 = vmatprep.subr.bf16.mxu0 %v3261_v48  ;;  %v2739_v41 = vcombine.low %v3682_v42, %v3685_v43  ;;  %v378_v45 = vld [vmem:[%s3551_s23 + $0xe0] sm:$0xff]  ;;  %v371_v48 = vld [vmem:[%s3551_s23 + $0xa8] sm:$0xff] }
  0x9b   : > { %2349 = vmatprep.subr.bf16.mxu1 %v3264_v49  ;;  %2322 = vmatprep.mubr.bf16.mxu0 %v2740_v50  ;;  %v379_v49 = vld [vmem:[%s3551_s23 + $0xe8] sm:$0xff]  ;;  %v3337_v50 = vld [vmem:[%s3501_s19 + $0x670] ss:$8 sps:$4 sm:$0xff]   ;;  %v2756_v42 = vcombine.high %v370_v40, %v378_v45 }
  0x9c   : > { %2375 = vmatprep.mubr.bf16.mxu1 %v2742_v51  ;;  %v3340_v51 = vld [vmem:[%s3501_s19 + $0x770] ss:$8 sps:$4 sm:$0xff]   ;;  %v2758_v43 = vcombine.high %v371_v48, %v379_v49  ;;  %v3346_v47 = vld [vmem:[%s3501_s19 + $0x760] ss:$8 sps:$4 sm:$0xff]  }
  0x9d   : > { %2297 = vmatpush1.bf16.msra.mxu0 %v3259_v52  ;;  %v3345_v52 = vld [vmem:[%s3501_s19 + $0x664] ss:$8 sps:$4 sm:$0xff]  }
  0x9e   : > { %2350 = vmatpush1.bf16.msra.mxu1 %v3262_v53  ;;  %2298 = vmatprep.subr.bf16.mxu0 %v3267_v54  ;;  %v3348_v53 = vld [vmem:[%s3501_s19 + $0x764] ss:$8 sps:$4 sm:$0xff]   ;;  %v3351_v54 = vld [vmem:[%s3501_s19 + $0x654] ss:$8 sps:$4 sm:$0xff]  }
  0x9f   : > { %2351 = vmatprep.subr.bf16.mxu1 %v3270_v55  ;;  %v3354_v55 = vld [vmem:[%s3501_s19 + $0x754] ss:$8 sps:$4 sm:$0xff]  }
  0xa1   : > { %2299 = vmatpush1.bf16.msra.mxu0 %v3265_v56  ;;  %v3768_v56 = vld [vmem:[%s3551_s23 + $0x30] sm:$0xff] }
  0xa2   : > { %2352 = vmatpush1.bf16.msra.mxu1 %v3268_v57  ;;  %2300 = vmatprep.subr.bf16.mxu0 %v3273_v58  ;;  %v2755_v57 = vcombine.low %v370_v40, %v378_v45  ;;  %v2757_v58 = vcombine.low %v371_v48, %v379_v49  ;;  %v3409_v40 = vld [vmem:[%s3501_s19 + $0x6b0] ss:$8 sps:$4 sm:$0xff]   ;;  %v3420_v45 = vld [vmem:[%s3501_s19 + $0x7a4] ss:$8 sps:$4 sm:$0xff]   ;;  %v3415_v48 = vld [vmem:[%s3501_s19 + $0x6a0] ss:$8 sps:$4 sm:$0xff]  }
  0xa3   : > { %2353 = vmatprep.subr.bf16.mxu1 %v3276_v59  ;;  %v3771_v59 = vld [vmem:[%s3551_s23 + $0x70] sm:$0xff]  ;;  %v3418_v49 = vld [vmem:[%s3501_s19 + $0x7a0] ss:$8 sps:$4 sm:$0xff]  }
  0xa5   : > { %2301 = vmatpush1.bf16.msra.mxu0 %v3271_v60  ;;  %v3774_v60 = vld [vmem:[%s3551_s23 + $0x38] sm:$0xff] }
  0xa6   : > { %2354 = vmatpush1.bf16.msra.mxu1 %v3274_v61  ;;  %2302 = vmatprep.subr.bf16.mxu0 %v3279_v62  ;;  %v3777_v61 = vld [vmem:[%s3551_s23 + $0x78] sm:$0xff] }
  0xa7   : > { %2355 = vmatprep.subr.bf16.mxu1 %v3282_v63  ;;  %v3349_v62 = vld [vmem:[%s3501_s19 + $0x650] ss:$8 sps:$4 sm:$0xff]  }
  0xa8   : > { %v3352_v63 = vld [vmem:[%s3501_s19 + $0x750] ss:$8 sps:$4 sm:$0xff]  }
  0xa9   : > { %2303 = vmatpush1.bf16.msra.mxu0 %v3277_v0  ;;  %v3357_v0 = vld [vmem:[%s3501_s19 + $0x644] ss:$8 sps:$4 sm:$0xff]  }
  0xaa   : > { %2356 = vmatpush1.bf16.msra.mxu1 %v3280_v1  ;;  %2304 = vmatprep.subr.bf16.mxu0 %v3285_v2  ;;  %v3360_v1 = vld [vmem:[%s3501_s19 + $0x744] ss:$8 sps:$4 sm:$0xff]   ;;  %v2744_v2 = vcombine.high %v3768_v56, %v3771_v59 }
  0xab   : > { %2357 = vmatprep.subr.bf16.mxu1 %v3288_v3  ;;  %v2746_v3 = vcombine.high %v3774_v60, %v3777_v61 }
  0xad   : > { %2305 = vmatpush1.bf16.msra.mxu0 %v3283_v4  ;;  %v3355_v4 = vld [vmem:[%s3501_s19 + $0x640] ss:$8 sps:$4 sm:$0xff]  }
  0xae   : > { %2358 = vmatpush1.bf16.msra.mxu1 %v3286_v5  ;;  %2306 = vmatprep.subr.bf16.mxu0 %v3291_v6  ;;  %v3358_v5 = vld [vmem:[%s3501_s19 + $0x740] ss:$8 sps:$4 sm:$0xff]   ;;  %v3363_v6 = vld [vmem:[%s3501_s19 + $0x634] ss:$8 sps:$4 sm:$0xff]  }
  0xaf   : > { %2359 = vmatprep.subr.bf16.mxu1 %v3294_v7  ;;  %v3366_v7 = vld [vmem:[%s3501_s19 + $0x734] ss:$8 sps:$4 sm:$0xff]  }
  0xb1   : > { %2307 = vmatpush2.bf16.msra.mxu0 %v3289_v8  ;;  %v3361_v8 = vld [vmem:[%s3501_s19 + $0x630] ss:$8 sps:$4 sm:$0xff]  }
  0xb2   : > { %2360 = vmatpush2.bf16.msra.mxu1 %v3292_v9  ;;  %2308 = vmatprep.subr.bf16.mxu0 %v3297_v10  ;;  %v3364_v9 = vld [vmem:[%s3501_s19 + $0x730] ss:$8 sps:$4 sm:$0xff]   ;;  %v3369_v10 = vld [vmem:[%s3501_s19 + $0x624] ss:$8 sps:$4 sm:$0xff]  }
  0xb3   : > { %2361 = vmatprep.subr.bf16.mxu1 %v3300_v11  ;;  %v3372_v11 = vld [vmem:[%s3501_s19 + $0x724] ss:$8 sps:$4 sm:$0xff]  }
  0xb5   : > { %2309 = vmatpush2.bf16.msra.mxu0 %v3295_v12  ;;  %v3367_v12 = vld [vmem:[%s3501_s19 + $0x620] ss:$8 sps:$4 sm:$0xff]  }
  0xb6   : > { %2362 = vmatpush2.bf16.msra.mxu1 %v3298_v13  ;;  %2310 = vmatprep.subr.bf16.mxu0 %v3303_v14  ;;  %v3370_v13 = vld [vmem:[%s3501_s19 + $0x720] ss:$8 sps:$4 sm:$0xff]   ;;  %v3375_v14 = vld [vmem:[%s3501_s19 + $0x614] ss:$8 sps:$4 sm:$0xff]  }
  0xb7   : > { %2363 = vmatprep.subr.bf16.mxu1 %v3306_v15  ;;  %v3378_v15 = vld [vmem:[%s3501_s19 + $0x714] ss:$8 sps:$4 sm:$0xff]  }
  0xb9   : > { %2311 = vmatpush2.bf16.msra.mxu0 %v3301_v16  ;;  %v3373_v16 = vld [vmem:[%s3501_s19 + $0x610] ss:$8 sps:$4 sm:$0xff]  }
  0xba   : > { %2364 = vmatpush2.bf16.msra.mxu1 %v3304_v17  ;;  %2312 = vmatprep.subr.bf16.mxu0 %v3309_v18  ;;  %v3376_v17 = vld [vmem:[%s3501_s19 + $0x710] ss:$8 sps:$4 sm:$0xff]   ;;  %v3381_v18 = vld [vmem:[%s3501_s19 + $0x604] ss:$8 sps:$4 sm:$0xff]  }
  0xbb   : > { %2365 = vmatprep.subr.bf16.mxu1 %v3312_v19  ;;  %v3384_v19 = vld [vmem:[%s3501_s19 + $0x704] ss:$8 sps:$4 sm:$0xff]  }
  0xbd   : > { %2313 = vmatpush2.bf16.msra.mxu0 %v3307_v20  ;;  %v3379_v20 = vld [vmem:[%s3501_s19 + $0x600] ss:$8 sps:$4 sm:$0xff]  }
  0xbe   : > { %2366 = vmatpush2.bf16.msra.mxu1 %v3310_v21  ;;  %2314 = vmatprep.subr.bf16.mxu0 %v3315_v22  ;;  %v3382_v21 = vld [vmem:[%s3501_s19 + $0x700] ss:$8 sps:$4 sm:$0xff]   ;;  %v3387_v22 = vld [vmem:[%s3501_s19 + $0x6f4] ss:$8 sps:$4 sm:$0xff]  }
  0xbf   : > { %2367 = vmatprep.subr.bf16.mxu1 %v3318_v23  ;;  %v3390_v23 = vld [vmem:[%s3501_s19 + $0x7f4] ss:$8 sps:$4 sm:$0xff]  }
  0xc1   : > { %2315 = vmatpush2.bf16.msra.mxu0 %v3313_v24  ;;  %v3385_v24 = vld [vmem:[%s3501_s19 + $0x6f0] ss:$8 sps:$4 sm:$0xff]  }
  0xc2   : > { %2368 = vmatpush2.bf16.msra.mxu1 %v3316_v25  ;;  %2316 = vmatprep.subr.bf16.mxu0 %v3321_v26  ;;  %v3388_v25 = vld [vmem:[%s3501_s19 + $0x7f0] ss:$8 sps:$4 sm:$0xff]   ;;  %v3393_v26 = vld [vmem:[%s3501_s19 + $0x6e4] ss:$8 sps:$4 sm:$0xff]  }
  0xc3   : > { %2369 = vmatprep.subr.bf16.mxu1 %v3324_v27  ;;  %v3396_v27 = vld [vmem:[%s3501_s19 + $0x7e4] ss:$8 sps:$4 sm:$0xff]  }
  0xc5   : > { %2317 = vmatpush2.bf16.msra.mxu0 %v3319_v28  ;;  %v3391_v28 = vld [vmem:[%s3501_s19 + $0x6e0] ss:$8 sps:$4 sm:$0xff]  }
  0xc6   : > { %2370 = vmatpush2.bf16.msra.mxu1 %v3322_v29  ;;  %2318 = vmatprep.subr.bf16.mxu0 %v3327_v30  ;;  %v3394_v29 = vld [vmem:[%s3501_s19 + $0x7e0] ss:$8 sps:$4 sm:$0xff]   ;;  %v3399_v30 = vld [vmem:[%s3501_s19 + $0x6d4] ss:$8 sps:$4 sm:$0xff]  }
  0xc7   : > { %2371 = vmatprep.subr.bf16.mxu1 %v3330_v31  ;;  %v3402_v31 = vld [vmem:[%s3501_s19 + $0x7d4] ss:$8 sps:$4 sm:$0xff]  }
  0xc9   : > { %2319 = vmatpush2.bf16.msra.mxu0 %v3325_v32  ;;  %v3397_v32 = vld [vmem:[%s3501_s19 + $0x6d0] ss:$8 sps:$4 sm:$0xff]  }
  0xca   : > { %2372 = vmatpush2.bf16.msra.mxu1 %v3328_v33  ;;  %2320 = vmatprep.subr.bf16.mxu0 %v3333_v34  ;;  %v3400_v33 = vld [vmem:[%s3501_s19 + $0x7d0] ss:$8 sps:$4 sm:$0xff]   ;;  %v3405_v34 = vld [vmem:[%s3501_s19 + $0x6c4] ss:$8 sps:$4 sm:$0xff]  }
  0xcb   : > { %2373 = vmatprep.subr.bf16.mxu1 %v3336_v35  ;;  %v3408_v35 = vld [vmem:[%s3501_s19 + $0x7c4] ss:$8 sps:$4 sm:$0xff]  }
  0xcd   : > { %2321 = vmatpush2.bf16.msra.mxu0 %v3331_v36  ;;  %v3403_v36 = vld [vmem:[%s3501_s19 + $0x6c0] ss:$8 sps:$4 sm:$0xff]  }
  0xce   : > { %2374 = vmatpush2.bf16.msra.mxu1 %v3334_v37  ;;  %2396 = vmatprep.subr.bf16.mxu0 %v3339_v38  ;;  %v3406_v37 = vld [vmem:[%s3501_s19 + $0x7c0] ss:$8 sps:$4 sm:$0xff]   ;;  %v3411_v38 = vld [vmem:[%s3501_s19 + $0x6b4] ss:$8 sps:$4 sm:$0xff]  }
  0xcf   : > { %2449 = vmatprep.subr.bf16.mxu1 %v3342_v39  ;;  %v3414_v39 = vld [vmem:[%s3501_s19 + $0x7b4] ss:$8 sps:$4 sm:$0xff]  }
  0xd0   : > { %2323 = vmatmul.mubr.bf16.vlgmr.msra.gmra.mxu0 %v2739_v41  ;;  %v3412_v41 = vld [vmem:[%s3501_s19 + $0x7b0] ss:$8 sps:$4 sm:$0xff]  }
  0xd1   : > { %2376 = vmatmul.mubr.bf16.vlgmr.msra.gmra.mxu1 %v2741_v44  ;;  %2397 = vmatpush1.bf16.msra.mxu0 %v3337_v50  ;;  %v3417_v44 = vld [vmem:[%s3501_s19 + $0x6a4] ss:$8 sps:$4 sm:$0xff]   ;;  %v3423_v50 = vld [vmem:[%s3501_s19 + $0x694] ss:$8 sps:$4 sm:$0xff]  }
  0xd2   : > { %2450 = vmatpush1.bf16.msra.mxu1 %v3340_v51  ;;  %2398 = vmatprep.subr.bf16.mxu0 %v3345_v52  ;;  %v3426_v51 = vld [vmem:[%s3501_s19 + $0x794] ss:$8 sps:$4 sm:$0xff]   ;;  %v3421_v52 = vld [vmem:[%s3501_s19 + $0x690] ss:$8 sps:$4 sm:$0xff]  }
  0xd3   : > { %2451 = vmatprep.subr.bf16.mxu1 %v3348_v53  ;;  %2332 = vmatprep.mubr.bf16.mxu0 %v2756_v42  ;;  %v3424_v53 = vld [vmem:[%s3501_s19 + $0x790] ss:$8 sps:$4 sm:$0xff]   ;;  %v3429_v42 = vld [vmem:[%s3501_s19 + $0x684] ss:$8 sps:$4 sm:$0xff]  }
  0xd4   : > { %2385 = vmatprep.mubr.bf16.mxu1 %v2758_v43  ;;  %v3432_v43 = vld [vmem:[%s3501_s19 + $0x784] ss:$8 sps:$4 sm:$0xff]  }
  0xd5   : > { %2399 = vmatpush1.bf16.msra.mxu0 %v3343_v46  ;;  %v3427_v46 = vld [vmem:[%s3501_s19 + $0x680] ss:$8 sps:$4 sm:$0xff]  }
  0xd6   : > { %2452 = vmatpush1.bf16.msra.mxu1 %v3346_v47  ;;  %2400 = vmatprep.subr.bf16.mxu0 %v3351_v54  ;;  %v3430_v47 = vld [vmem:[%s3501_s19 + $0x780] ss:$8 sps:$4 sm:$0xff]   ;;  %v372_v54 = vld [vmem:[%s3551_s23 + $0xb0] sm:$0xff] }
  0xd7   : > { %2453 = vmatprep.subr.bf16.mxu1 %v3354_v55  ;;  %v380_v55 = vld [vmem:[%s3551_s23 + $0xf0] sm:$0xff] }
  0xd8   : > { %2333 = vmatmul.mubr.bf16.gmra.mxu0 %v2755_v57  ;;  %v373_v57 = vld [vmem:[%s3551_s23 + $0xb8] sm:$0xff] }
  0xd9   : > { %2386 = vmatmul.mubr.bf16.gmra.mxu1 %v2757_v58  ;;  %2401 = vmatpush1.bf16.msra.mxu0 %v3349_v62  ;;  %v381_v58 = vld [vmem:[%s3551_s23 + $0xf8] sm:$0xff]  ;;  %v2743_v62 = vcombine.low %v3768_v56, %v3771_v59 }
  0xda   : > { %2454 = vmatpush1.bf16.msra.mxu1 %v3352_v63  ;;  %2402 = vmatprep.subr.bf16.mxu0 %v3357_v0  ;;  %v2745_v63 = vcombine.low %v3774_v60, %v3777_v61  ;;  %v2760_v0 = vcombine.high %v372_v54, %v380_v55 }
  0xdb   : > { %2455 = vmatprep.subr.bf16.mxu1 %v3360_v1  ;;  %2428 = vmatprep.mubr.bf16.mxu0 %v2744_v2  ;;  %v2762_v1 = vcombine.high %v373_v57, %v381_v58  ;;  %v2759_v2 = vcombine.low %v372_v54, %v380_v55 }
  0xdc   : > { %2481 = vmatprep.mubr.bf16.mxu1 %v2746_v3  ;;  %v2761_v3 = vcombine.low %v373_v57, %v381_v58 }
  0xdd   : > { %2403 = vmatpush1.bf16.msra.mxu0 %v3355_v4 }
  0xde   : > { %2456 = vmatpush1.bf16.msra.mxu1 %v3358_v5  ;;  %2404 = vmatprep.subr.bf16.mxu0 %v3363_v6 }
  0xdf   : > { %2457 = vmatprep.subr.bf16.mxu1 %v3366_v7 }
  0xe1   : > { %2405 = vmatpush1.bf16.msra.mxu0 %v3361_v8 }
  0xe2   : > { %2458 = vmatpush1.bf16.msra.mxu1 %v3364_v9  ;;  %2406 = vmatprep.subr.bf16.mxu0 %v3369_v10 }
  0xe3   : > { %2459 = vmatprep.subr.bf16.mxu1 %v3372_v11 }
  0xe5   : > { %2407 = vmatpush1.bf16.msra.mxu0 %v3367_v12 }
  0xe6   : > { %2460 = vmatpush1.bf16.msra.mxu1 %v3370_v13  ;;  %2408 = vmatprep.subr.bf16.mxu0 %v3375_v14 }
  0xe7   : > { %2461 = vmatprep.subr.bf16.mxu1 %v3378_v15 }
  0xe9   : > { %2409 = vmatpush1.bf16.msra.mxu0 %v3373_v16 }
  0xea   : > { %2462 = vmatpush1.bf16.msra.mxu1 %v3376_v17  ;;  %2410 = vmatprep.subr.bf16.mxu0 %v3381_v18 }
  0xeb   : > { %2463 = vmatprep.subr.bf16.mxu1 %v3384_v19 }
  0xed   : > { %2411 = vmatpush1.bf16.msra.mxu0 %v3379_v20 }
  0xee   : > { %2464 = vmatpush1.bf16.msra.mxu1 %v3382_v21  ;;  %2412 = vmatprep.subr.bf16.mxu0 %v3387_v22 }
  0xef   : > { %2465 = vmatprep.subr.bf16.mxu1 %v3390_v23 }
  0xf1   : > { %2413 = vmatpush2.bf16.msra.mxu0 %v3385_v24 }
  0xf2   : > { %2466 = vmatpush2.bf16.msra.mxu1 %v3388_v25  ;;  %2414 = vmatprep.subr.bf16.mxu0 %v3393_v26 }
  0xf3   : > { %2467 = vmatprep.subr.bf16.mxu1 %v3396_v27 }
  0xf5   : > { %2415 = vmatpush2.bf16.msra.mxu0 %v3391_v28 }
  0xf6   : > { %2468 = vmatpush2.bf16.msra.mxu1 %v3394_v29  ;;  %2416 = vmatprep.subr.bf16.mxu0 %v3399_v30 }
  0xf7   : > { %2469 = vmatprep.subr.bf16.mxu1 %v3402_v31 }
  0xf9   : > { %2417 = vmatpush2.bf16.msra.mxu0 %v3397_v32 }
  0xfa   : > { %2470 = vmatpush2.bf16.msra.mxu1 %v3400_v33  ;;  %2418 = vmatprep.subr.bf16.mxu0 %v3405_v34 }
  0xfb   : > { %2471 = vmatprep.subr.bf16.mxu1 %v3408_v35 }
  0xfd   : > { %2419 = vmatpush2.bf16.msra.mxu0 %v3403_v36 }
  0xfe   : > { %2472 = vmatpush2.bf16.msra.mxu1 %v3406_v37  ;;  %2420 = vmatprep.subr.bf16.mxu0 %v3411_v38 }
  0xff   : > { %2473 = vmatprep.subr.bf16.mxu1 %v3414_v39 }
 0x101   : > { %2421 = vmatpush2.bf16.msra.mxu0 %v3409_v40 }
 0x102   : > { %2474 = vmatpush2.bf16.msra.mxu1 %v3412_v41  ;;  %2422 = vmatprep.subr.bf16.mxu0 %v3417_v44 }
 0x103   : > { %2475 = vmatprep.subr.bf16.mxu1 %v3420_v45 }
 0x105   : > { %2423 = vmatpush2.bf16.msra.mxu0 %v3415_v48 }
 0x106   : > { %2476 = vmatpush2.bf16.msra.mxu1 %v3418_v49  ;;  %2424 = vmatprep.subr.bf16.mxu0 %v3423_v50 }
 0x107   : > { %2477 = vmatprep.subr.bf16.mxu1 %v3426_v51 }
 0x109   : > { %2425 = vmatpush2.bf16.msra.mxu0 %v3421_v52 }
 0x10a   : > { %2478 = vmatpush2.bf16.msra.mxu1 %v3424_v53  ;;  %2426 = vmatprep.subr.bf16.mxu0 %v3429_v42  ;;  %v2531_v53 = vlaneseq }
 0x10b   : > { %2479 = vmatprep.subr.bf16.mxu1 %v3432_v43 }
 0x10d   : > { %2427 = vmatpush2.bf16.msra.mxu0 %v3427_v46 }
 0x10e   : > { %2480 = vmatpush2.bf16.msra.mxu1 %v3430_v47 }
 0x110   : > { %2429 = vmatmul.mubr.bf16.vlgmr.msra.gmra.mxu0 %v2743_v62  ;;  %v2112_v4 = vpop.f32.mrf.mxu0  ;;  %v2532_v62 = vshrl.u32 %v2531_v53, 7 }
 0x111   : > { %2482 = vmatmul.mubr.bf16.vlgmr.msra.gmra.mxu1 %v2745_v63  ;;  %2438 = vmatprep.mubr.bf16.mxu0 %v2760_v0  ;;  %v2165_v5 = vpop.f32.mrf.mxu1 }
 0x112   : > { %2491 = vmatprep.mubr.bf16.mxu1 %v2762_v1  ;;  %v2114_v6 = vpop.f32.mrf.mxu0  ;;  %v2166_v44 = vadd.f32 %v2165_v5, %v2112_v4 }
 0x113   : > { %v2167_v7 = vpop.f32.mrf.mxu1 }
 0x114   : > { %v2116_v56 = vpop.f32.mrf.mxu0  ;;  %v2168_v45 = vadd.f32 %v2167_v7, %v2114_v6 }
 0x115   : > { %v2169_v59 = vpop.f32.mrf.mxu1 }
 0x116   : > { %v2118_v8 = vpop.f32.mrf.mxu0  ;;  %v2170_v51 = vadd.f32 %v2169_v59, %v2116_v56 }
 0x117   : > { %v2171_v61 = vpop.f32.mrf.mxu1 }
 0x118   : > { %2439 = vmatmul.mubr.bf16.gmra.mxu0 %v2759_v2  ;;  %v2122_v60 = vpop.f32.mrf.mxu0  ;;  %v2172_v42 = vadd.f32 %v2171_v61, %v2118_v8  ;;  %v2533_v61 = vsub.s32 0, %v2532_v62 }
 0x119   : > { %2492 = vmatmul.mubr.bf16.gmra.mxu1 %v2761_v3  ;;  %v2175_v9 = vpop.f32.mrf.mxu1 }
 0x11a   : > { %v2124_v10 = vpop.f32.mrf.mxu0  ;;  %v2176_v63 = vadd.f32 %v2175_v9, %v2122_v60  ;;  %v2529_v60 = vld [vmem:[%s3879_s2] sm:$0x3]  ;;  %v2537_v9 = vsub.s32 1, %v2532_v62 }
 0x11b   : > { %v2177_v11 = vpop.f32.mrf.mxu1 }
 0x11c   : > { %v2126_v12 = vpop.f32.mrf.mxu0  ;;  %v2178_v0 = vadd.f32 %v2177_v11, %v2124_v10 }
 0x11d   : > { %v2179_v13 = vpop.f32.mrf.mxu1 }
 0x11e   : > { %v2128_v14 = vpop.f32.mrf.mxu0  ;;  %v2180_v3 = vadd.f32 %v2179_v13, %v2126_v12 }
 0x11f   : > { %v2181_v16 = vpop.f32.mrf.mxu1 }
 0x150   : > { %v2218_v15 = vpop.f32.mrf.mxu0 }
 0x151   : > { %v2271_v17 = vpop.f32.mrf.mxu1  ;;  %v2219_v48 = vadd.f32 %v2218_v15, %v2166_v44  ;;  %v2182_v15 = vadd.f32 %v2181_v16, %v2128_v14  ;;  %v2534_v14 = vrot.slane %v2529_v60, %v2533_v61 }
 0x152   : > { %v2220_v18 = vpop.f32.mrf.mxu0 }
 0x153   : > { %v2273_v19 = vpop.f32.mrf.mxu1  ;;  %v2221_v52 = vadd.f32 %v2220_v18, %v2168_v45  ;;  %v2272_v43 = vadd.f32 %v2271_v17, %v2219_v48 }
 0x154   : > { %v2222_v20 = vpop.f32.mrf.mxu0 }
 0x155   : > { %v2275_v21 = vpop.f32.mrf.mxu1  ;;  %v2223_v46 = vadd.f32 %v2222_v20, %v2170_v51  ;;  %v2274_v55 = vadd.f32 %v2273_v19, %v2221_v52 }
 0x156   : > { %v2224_v22 = vpop.f32.mrf.mxu0 }
 0x157   : > { %v2277_v23 = vpop.f32.mrf.mxu1  ;;  %v2225_v57 = vadd.f32 %v2224_v22, %v2172_v42  ;;  %v2276_v1 = vadd.f32 %v2275_v21, %v2223_v46 }
 0x158   : > { %v2228_v24 = vpop.f32.mrf.mxu0 }
 0x159   : > { %v2281_v25 = vpop.f32.mrf.mxu1  ;;  %v2229_v4 = vadd.f32 %v2228_v24, %v2176_v63  ;;  %v2278_v56 = vadd.f32 %v2277_v23, %v2225_v57 }
 0x15a   : > { %v2230_v26 = vpop.f32.mrf.mxu0 }
 0x15b   : > { %v2283_v27 = vpop.f32.mrf.mxu1  ;;  %v2231_v5 = vadd.f32 %v2230_v26, %v2178_v0  ;;  %v2282_v13 = vadd.f32 %v2281_v25, %v2229_v4 }
 0x15c   : > { %v2232_v28 = vpop.f32.mrf.mxu0 }
 0x15d   : > { %v2285_v29 = vpop.f32.mrf.mxu1  ;;  %v2233_v17 = vadd.f32 %v2232_v28, %v2180_v3  ;;  %v2284_v20 = vadd.f32 %v2283_v27, %v2231_v5 }
 0x15e   : > { %v2234_v30 = vpop.f32.mrf.mxu0 }
 0x15f   : > { %v3845_v31 = vpop.f32.mrf.mxu1  ;;  %v2235_v21 = vadd.f32 %v2234_v30, %v2182_v15  ;;  %v2286_v28 = vadd.f32 %v2285_v29, %v2233_v17 }
 0x161   : > { %v2288_v25 = vadd.f32 %v3845_v31, %v2235_v21 }
 0x190   : > { %v2324_v32 = vpop.f32.mrf.mxu0 }
 0x191   : > { %v2377_v33 = vpop.f32.mrf.mxu1  ;;  %v2325_v58 = vadd.f32 %v2324_v32, %v2272_v43 }
 0x192   : > { %v2326_v34 = vpop.f32.mrf.mxu0 }
 0x193   : > { %v2379_v35 = vpop.f32.mrf.mxu1  ;;  %v2327_v2 = vadd.f32 %v2326_v34, %v2274_v55  ;;  %v2378_v59 = vadd.f32 %v2377_v33, %v2325_v58  ;;  %v2538_v34 = vrot.slane %v2529_v60, %v2537_v9 }
 0x194   : > { %v2328_v36 = vpop.f32.mrf.mxu0 }
 0x195   : > { %v2381_v37 = vpop.f32.mrf.mxu1  ;;  %v2329_v8 = vadd.f32 %v2328_v36, %v2276_v1  ;;  %v2380_v10 = vadd.f32 %v2379_v35, %v2327_v2 }
 0x196   : > { %v2330_v38 = vpop.f32.mrf.mxu0 }
 0x197   : > { %v2383_v39 = vpop.f32.mrf.mxu1  ;;  %v2331_v11 = vadd.f32 %v2330_v38, %v2278_v56  ;;  %v2382_v24 = vadd.f32 %v2381_v37, %v2329_v8 }
 0x198   : > { %v2334_v40 = vpop.f32.mrf.mxu0 }
 0x199   : > { %v3847_v41 = vpop.f32.mrf.mxu1  ;;  %v2335_v32 = vadd.f32 %v2334_v40, %v2282_v13  ;;  %v2384_v45 = vadd.f32 %v2383_v39, %v2331_v11 }
 0x19a   : > { %v2336_v49 = vpop.f32.mrf.mxu0 }
 0x19b   : > { %v2389_v50 = vpop.f32.mrf.mxu1  ;;  %v2337_v33 = vadd.f32 %v2336_v49, %v2284_v20  ;;  %v2388_v53 = vadd.f32 %v3847_v41, %v2335_v32 }
 0x19c   : > { %v2338_v47 = vpop.f32.mrf.mxu0 }
 0x19d   : > { %v2391_v54 = vpop.f32.mrf.mxu1  ;;  %v2339_v27 = vadd.f32 %v2338_v47, %v2286_v28  ;;  %v2390_v29 = vadd.f32 %v2389_v50, %v2337_v33 }
 0x19e   : > { %v2340_v6 = vpop.f32.mrf.mxu0 }
 0x19f   : > { %v2393_v7 = vpop.f32.mrf.mxu1  ;;  %v2341_v40 = vadd.f32 %v2340_v6, %v2288_v25  ;;  %v2392_v46 = vadd.f32 %v2391_v54, %v2339_v27 }
 0x1a1   : > { %v2394_v62 = vadd.f32 %v2393_v7, %v2341_v40 }
 0x1d0   : > { %v2430_v18 = vpop.f32.mrf.mxu0 }
 0x1d1   : > { %v2483_v19 = vpop.f32.mrf.mxu1  ;;  %v2431_v12 = vadd.f32 %v2430_v18, %v2378_v59 }
 0x1d2   : > { %v2432_v22 = vpop.f32.mrf.mxu0 }
 0x1d3   : > { %v2485_v23 = vpop.f32.mrf.mxu1  ;;  %v2484_v26 = vadd.f32 %v2483_v19, %v2431_v12  ;;  %v2433_v16 = vadd.f32 %v2432_v22, %v2380_v10 }
 0x1d4   : > { %v2434_v36 = vpop.f32.mrf.mxu0 }
 0x1d5   : > { %v2487_v44 = vpop.f32.mrf.mxu1  ;;  %v2486_v35 = vadd.f32 %v2485_v23, %v2433_v16  ;;  %v2435_v38 = vadd.f32 %v2434_v36, %v2382_v24  ;;  %v2541_v51 = vadd.f32 %v2534_v14, %v2484_v26 }
 0x1d6   : > { %v2436_v30 = vpop.f32.mrf.mxu0 }
 0x1d7   : > { %v2489_v48 = vpop.f32.mrf.mxu1  ;;  %v2488_v37 = vadd.f32 %v2487_v44, %v2435_v38  ;;  %v2437_v52 = vadd.f32 %v2436_v30, %v2384_v45  ;;  %v2549_v31 = vmax.f32 %v2541_v51, 0.0  ;;  %v2542_v42 = vadd.f32 %v2538_v34, %v2486_v35 }
 0x1d8   : > { %v2440_v39 = vpop.f32.mrf.mxu0 }
 0x1d9   : > { %v2493_v49 = vpop.f32.mrf.mxu1  ;;  %v2490_v43 = vadd.f32 %v2489_v48, %v2437_v52  ;;  %v2441_v47 = vadd.f32 %v2440_v39, %v2388_v53  ;;  %2557 = vst [vmem:[%s3858_s29] sm:$0xff] %v2549_v31  ;;  %v2550_v41 = vmax.f32 %v2542_v42, 0.0  ;;  %v2543_v50 = vadd.f32 %v2534_v14, %v2488_v37 }
 0x1da   : > { %v2442_v55 = vpop.f32.mrf.mxu0 }
 0x1db   : > { %v2495_v57 = vpop.f32.mrf.mxu1  ;;  %v2443_v58 = vadd.f32 %v2442_v55, %v2390_v29  ;;  %v2494_v63 = vadd.f32 %v2493_v49, %v2441_v47  ;;  %2558 = vst [vmem:[%s3858_s29 + $0x8] sm:$0xff] %v2550_v41  ;;  %v2551_v2 = vmax.f32 %v2543_v50, 0.0  ;;  %v2544_v3 = vadd.f32 %v2538_v34, %v2490_v43 }
 0x1dc   : > { %v2444_v0 = vpop.f32.mrf.mxu0 }
 0x1dd   : > { %v2497_v1 = vpop.f32.mrf.mxu1  ;;  %v2496_v4 = vadd.f32 %v2495_v57, %v2443_v58  ;;  %v2445_v54 = vadd.f32 %v2444_v0, %v2392_v46  ;;  %2559 = vst [vmem:[%s3858_s29 + $0x10] sm:$0xff] %v2551_v2  ;;  %v2552_v6 = vmax.f32 %v2544_v3, 0.0  ;;  %v2545_v8 = vadd.f32 %v2534_v14, %v2494_v63 }
 0x1de   : > { %v2446_v5 = vpop.f32.mrf.mxu0 }
 0x1df   : > { %v2498_v56 = vadd.f32 %v2497_v1, %v2445_v54  ;;  %v2447_v59 = vadd.f32 %v2446_v5, %v2394_v62  ;;  %v2499_v7 = vpop.f32.mrf.mxu1  ;;  %2560 = vst [vmem:[%s3858_s29 + $0x18] sm:$0xff] %v2552_v6  ;;  %v2546_v61 = vadd.f32 %v2538_v34, %v2496_v4  ;;  %v2553_v17 = vmax.f32 %v2545_v8, 0.0 }
 0x1e1   : > { %v2500_v15 = vadd.f32 %v2499_v7, %v2447_v59  ;;  %v2554_v18 = vmax.f32 %v2546_v61, 0.0  ;;  %v2547_v19 = vadd.f32 %v2534_v14, %v2498_v56  ;;  %2561 = vst [vmem:[%s3858_s29 + $0x20] sm:$0xff] %v2553_v17 }
 0x1e3   : > { %2562 = vst [vmem:[%s3858_s29 + $0x28] sm:$0xff] %v2554_v18  ;;  %v2555_v60 = vmax.f32 %v2547_v19, 0.0  ;;  %v2548_v9 = vadd.f32 %v2538_v34, %v2500_v15 }
 0x1e5   : > { %2563 = vst [vmem:[%s3858_s29 + $0x30] sm:$0xff] %v2555_v60  ;;  %v2556_v10 = vmax.f32 %v2548_v9, 0.0 }
 0x1e7   : > { %2564 = vst [vmem:[%s3858_s29 + $0x38] sm:$0xff] %v2556_v10 }
 0x1e8 PF: > { %s13_s14 = sadd.s32 1, %s3455_s14   ;;  %s3881_s12 = smov %s3451_s13 }
 0x1e9   : > { %p10_p5 = scmp.ge.s32.totalorder %s13_s14, 6   ;;  %s3882_s13 = smov %s3884_s15 }
 0x1eb   :  { %12 = sbr.rel (!%p10_p5) target bundleno = 2 (0x2), region = 76 }

// kernel: generator_forward.7
= control target key start
LH: loop header
LB: loop body
LE: loop exit
PB: predicated region body
PF: predicated region fallthrough
CT: control target
= control target key end

     0   :  { %s2416_s12 = smov 0   ;;  %s2418_s13 = smov 0   ;;  %s2817_s0 = inlined_call_operand.vmem [shape: bf16[4,128,1024], index: 0, kind: input, shape index: {}]   ;;  %s2818_s1 = inlined_call_operand.vmem [shape: bf16[4,1024,128], index: 1, kind: input, shape index: {}]   ;;  %s2819_s2 = inlined_call_operand.vmem [shape: f32[1,128], index: 2, kind: input, shape index: {}]   ;;  %s2820_s3 = inlined_call_operand.vmem [shape: f32[4,128,128], index: 3, kind: output, shape index: {}]  }
   0x1   :  { %s2420_s14 = smov 0  }
   0x2 LB: > { %s39_s15 = sadd.s32 1, %s2390_s13  ;;  %p1886_p0 = scmp.ge.s32.totalorder %s2394_s14, 1  ;;  %s2394_s14 = sphi %s2420_s14, %s13_s14   ;;  %s2390_s13 = sphi %s2418_s13, %s2848_s13   ;;  %s2386_s12 = sphi %s2416_s12, %s2847_s12  }
   0x3   : > { %p41_p1 = scmp.ge.s32.totalorder %s39_s15, 4  ;;  %p212_p2 = scmp.lt.s32.totalorder %s2394_s14, 5 }
   0x5   : > { %s2850_s15 = smov (%p41_p1, %s39_s15), 0  ;;  %p213_p3 = pnand %p1886_p0, %p212_p2 }
   0x7   : > { %216 = sbr.rel (%p213_p3) target bundleno = 381 (0x17d), region = 32 }
   0xc   : > { %p269_p4 = scmp.lt.s32.totalorder %s2386_s12, 3 }
   0xe   : > { %s2852_s12 = smov (!%p269_p4, %s2386_s12), 3 }
   0xf   : > { %s2024_s16 = sshll.u32 %s2852_s12, 9  ;;  %s2026_s25 = sshll.u32 %s2852_s12, 7 }
  0x10   : > { %s2442_s19 = scalar_lea.vmem %s2818_s1, %s2024_s16  ;;  %s2479_s22 = scalar_lea.vmem %s2817_s0, %s2024_s16 }
  0x11   : > { %v2308_v0 = vld [vmem:[%s2442_s19 + $0x78] sm:$0xff]   ;;  %v2312_v4 = vld [vmem:[%s2442_s19 + $0x70] sm:$0xff]   ;;  %v2316_v8 = vld [vmem:[%s2442_s19 + $0x68] sm:$0xff]   ;;  %s2727_s28 = scalar_lea.vmem %s2820_s3, %s2026_s25 }
  0x12   : > { %v2309_v1 = vld [vmem:[%s2442_s19 + $0xf8] sm:$0xff]   ;;  %2027 = vmatprep.subr.bf16.mxu0 %v2308_v0  ;;  %v2313_v5 = vld [vmem:[%s2442_s19 + $0xf0] sm:$0xff]   ;;  %v2317_v9 = vld [vmem:[%s2442_s19 + $0xe8] sm:$0xff]  }
  0x13   : > { %v2310_v2 = vld [vmem:[%s2442_s19 + $0x38] sm:$0xff]   ;;  %2091 = vmatprep.subr.bf16.mxu1 %v2309_v1  ;;  %v2314_v6 = vld [vmem:[%s2442_s19 + $0x30] sm:$0xff]   ;;  %v2318_v10 = vld [vmem:[%s2442_s19 + $0x28] sm:$0xff]  }
  0x14   : > { %v2311_v3 = vld [vmem:[%s2442_s19 + $0xb8] sm:$0xff]   ;;  %2028 = vmatpush3.bf16.msra.mxu0 %v2310_v2  ;;  %v2315_v7 = vld [vmem:[%s2442_s19 + $0xb0] sm:$0xff]   ;;  %v2319_v11 = vld [vmem:[%s2442_s19 + $0xa8] sm:$0xff]  }
  0x15   : > { %2092 = vmatpush3.bf16.msra.mxu1 %v2311_v3  ;;  %2029 = vmatprep.subr.bf16.mxu0 %v2312_v4  ;;  %v2320_v12 = vld [vmem:[%s2442_s19 + $0x60] sm:$0xff]   ;;  %v2324_v16 = vld [vmem:[%s2442_s19 + $0x58] sm:$0xff]   ;;  %v2328_v20 = vld [vmem:[%s2442_s19 + $0x50] sm:$0xff]  }
  0x16   : > { %2093 = vmatprep.subr.bf16.mxu1 %v2313_v5  ;;  %v2321_v13 = vld [vmem:[%s2442_s19 + $0xe0] sm:$0xff]   ;;  %v2325_v17 = vld [vmem:[%s2442_s19 + $0xd8] sm:$0xff]   ;;  %v2329_v21 = vld [vmem:[%s2442_s19 + $0xd0] sm:$0xff]  }
  0x17   : > { %v2322_v14 = vld [vmem:[%s2442_s19 + $0x20] sm:$0xff]   ;;  %v2326_v18 = vld [vmem:[%s2442_s19 + $0x18] sm:$0xff]   ;;  %v2330_v22 = vld [vmem:[%s2442_s19 + $0x10] sm:$0xff]  }
  0x18   : > { %2030 = vmatpush3.bf16.msra.mxu0 %v2314_v6  ;;  %v2323_v15 = vld [vmem:[%s2442_s19 + $0xa0] sm:$0xff]   ;;  %v2327_v19 = vld [vmem:[%s2442_s19 + $0x98] sm:$0xff]   ;;  %v2331_v23 = vld [vmem:[%s2442_s19 + $0x90] sm:$0xff]  }
  0x19   : > { %2094 = vmatpush3.bf16.msra.mxu1 %v2315_v7  ;;  %2031 = vmatprep.subr.bf16.mxu0 %v2316_v8  ;;  %v2332_v24 = vld [vmem:[%s2442_s19 + $0x48] sm:$0xff]   ;;  %v2336_v28 = vld [vmem:[%s2442_s19 + $0x40] sm:$0xff]   ;;  %v2340_v40 = vld [vmem:[%s2442_s19 + $0x178] sm:$0xff]  }
  0x1a   : > { %2095 = vmatprep.subr.bf16.mxu1 %v2317_v9  ;;  %v2333_v25 = vld [vmem:[%s2442_s19 + $0xc8] sm:$0xff]   ;;  %v2337_v29 = vld [vmem:[%s2442_s19 + $0xc0] sm:$0xff]   ;;  %v2341_v41 = vld [vmem:[%s2442_s19 + $0x138] sm:$0xff]  }
  0x1b   : > { %v2334_v26 = vld [vmem:[%s2442_s19 + $0x8] sm:$0xff]   ;;  %v2338_v30 = vld [vmem:[%s2442_s19] sm:$0xff]   ;;  %v2342_v42 = vld [vmem:[%s2442_s19 + $0x1f8] sm:$0xff]  }
  0x1c   : > { %2032 = vmatpush3.bf16.msra.mxu0 %v2318_v10  ;;  %v2335_v27 = vld [vmem:[%s2442_s19 + $0x88] sm:$0xff]   ;;  %v2339_v31 = vld [vmem:[%s2442_s19 + $0x80] sm:$0xff]   ;;  %v2343_v43 = vld [vmem:[%s2442_s19 + $0x1b8] sm:$0xff]  }
  0x1d   : > { %2096 = vmatpush3.bf16.msra.mxu1 %v2319_v11  ;;  %2033 = vmatprep.subr.bf16.mxu0 %v2320_v12  ;;  %v349_v32 = vld [vmem:[%s2479_s22] sm:$0xff]  ;;  %v350_v34 = vld [vmem:[%s2479_s22 + $0x8] sm:$0xff]  ;;  %v2344_v50 = vld [vmem:[%s2442_s19 + $0x170] sm:$0xff]  }
  0x1e   : > { %2097 = vmatprep.subr.bf16.mxu1 %v2321_v13  ;;  %v353_v33 = vld [vmem:[%s2479_s22 + $0x20] sm:$0xff]  ;;  %v354_v37 = vld [vmem:[%s2479_s22 + $0x28] sm:$0xff]  ;;  %v2345_v52 = vld [vmem:[%s2442_s19 + $0x130] sm:$0xff]  }
  0x1f   : > { %v1893_v35 = vcombine.low %v349_v32, %v353_v33  ;;  %v1894_v36 = vcombine.high %v349_v32, %v353_v33  ;;  %v1895_v38 = vcombine.low %v350_v34, %v354_v37  ;;  %v1896_v39 = vcombine.high %v350_v34, %v354_v37  ;;  %v357_v44 = vld [vmem:[%s2479_s22 + $0x40] sm:$0xff]  ;;  %v358_v47 = vld [vmem:[%s2479_s22 + $0x48] sm:$0xff]  ;;  %v2346_v54 = vld [vmem:[%s2442_s19 + $0x1f0] sm:$0xff]  }
  0x20   : > { %2034 = vmatpush3.bf16.msra.mxu0 %v2322_v14  ;;  %v361_v45 = vld [vmem:[%s2479_s22 + $0x60] sm:$0xff]  ;;  %v362_v48 = vld [vmem:[%s2479_s22 + $0x68] sm:$0xff]  ;;  %v2347_v55 = vld [vmem:[%s2442_s19 + $0x1b0] sm:$0xff]  }
  0x21   : > { %2098 = vmatpush3.bf16.msra.mxu1 %v2323_v15  ;;  %2035 = vmatprep.subr.bf16.mxu0 %v2324_v16  ;;  %v1902_v46 = vcombine.high %v357_v44, %v361_v45  ;;  %v1904_v49 = vcombine.high %v358_v47, %v362_v48  ;;  %v1901_v51 = vcombine.low %v357_v44, %v361_v45  ;;  %v365_v56 = vld [vmem:[%s2479_s22 + $0x80] sm:$0xff]  ;;  %v366_v58 = vld [vmem:[%s2479_s22 + $0x88] sm:$0xff]  ;;  %v2362_v32 = vld [vmem:[%s2442_s19 + $0x1d0] sm:$0xff]  }
  0x22   : > { %2099 = vmatprep.subr.bf16.mxu1 %v2325_v17  ;;  %1277 = vmatprep.mubr.bf16.mxu0 %v1894_v36  ;;  %v1903_v53 = vcombine.low %v358_v47, %v362_v48  ;;  %v369_v57 = vld [vmem:[%s2479_s22 + $0xa0] sm:$0xff]  ;;  %v370_v59 = vld [vmem:[%s2479_s22 + $0xa8] sm:$0xff]  ;;  %v2363_v33 = vld [vmem:[%s2442_s19 + $0x190] sm:$0xff]  }
  0x23   : > { %1374 = vmatprep.mubr.bf16.mxu1 %v1896_v39  ;;  %v1910_v60 = vcombine.high %v365_v56, %v369_v57  ;;  %v1912_v61 = vcombine.high %v366_v58, %v370_v59  ;;  %v2348_v62 = vld [vmem:[%s2442_s19 + $0x168] sm:$0xff]   ;;  %v1909_v2 = vcombine.low %v365_v56, %v369_v57  ;;  %v373_v3 = vld [vmem:[%s2479_s22 + $0xc0] sm:$0xff]  ;;  %v1911_v6 = vcombine.low %v366_v58, %v370_v59 }
  0x24   : > { %2036 = vmatpush3.bf16.msra.mxu0 %v2326_v18  ;;  %v2349_v63 = vld [vmem:[%s2442_s19 + $0x128] sm:$0xff]   ;;  %v377_v4 = vld [vmem:[%s2479_s22 + $0xe0] sm:$0xff]  ;;  %v2356_v18 = vld [vmem:[%s2442_s19 + $0x158] sm:$0xff]  }
  0x25   : > { %2100 = vmatpush3.bf16.msra.mxu1 %v2327_v19  ;;  %2037 = vmatprep.subr.bf16.mxu0 %v2328_v20  ;;  %v2350_v0 = vld [vmem:[%s2442_s19 + $0x1e8] sm:$0xff]   ;;  %v1918_v7 = vcombine.high %v373_v3, %v377_v4  ;;  %v2352_v10 = vld [vmem:[%s2442_s19 + $0x160] sm:$0xff]   ;;  %v1917_v19 = vcombine.low %v373_v3, %v377_v4  ;;  %v2357_v20 = vld [vmem:[%s2442_s19 + $0x118] sm:$0xff]  }
  0x26   : > { %2101 = vmatprep.subr.bf16.mxu1 %v2329_v21  ;;  %v2351_v1 = vld [vmem:[%s2442_s19 + $0x1a8] sm:$0xff]   ;;  %v2353_v11 = vld [vmem:[%s2442_s19 + $0x120] sm:$0xff]  }
  0x27   : > { %v374_v5 = vld [vmem:[%s2479_s22 + $0xc8] sm:$0xff]  ;;  %v2354_v12 = vld [vmem:[%s2442_s19 + $0x1e0] sm:$0xff]  }
  0x28   : > { %2038 = vmatpush3.bf16.msra.mxu0 %v2330_v22  ;;  %v378_v8 = vld [vmem:[%s2479_s22 + $0xe8] sm:$0xff]  ;;  %v2355_v13 = vld [vmem:[%s2442_s19 + $0x1a0] sm:$0xff]  }
  0x29   : > { %2102 = vmatpush3.bf16.msra.mxu1 %v2331_v23  ;;  %2039 = vmatprep.subr.bf16.mxu0 %v2332_v24  ;;  %v1920_v9 = vcombine.high %v374_v5, %v378_v8  ;;  %v381_v14 = vld [vmem:[%s2479_s22 + $0x100] sm:$0xff]  ;;  %v382_v16 = vld [vmem:[%s2479_s22 + $0x108] sm:$0xff]  ;;  %v1919_v21 = vcombine.low %v374_v5, %v378_v8  ;;  %v2358_v23 = vld [vmem:[%s2442_s19 + $0x1d8] sm:$0xff]  }
  0x2a   : > { %2103 = vmatprep.subr.bf16.mxu1 %v2333_v25  ;;  %v385_v15 = vld [vmem:[%s2479_s22 + $0x120] sm:$0xff]  ;;  %v386_v17 = vld [vmem:[%s2479_s22 + $0x128] sm:$0xff]  ;;  %v2359_v25 = vld [vmem:[%s2442_s19 + $0x198] sm:$0xff]  }
  0x2b   : > { %v1926_v22 = vcombine.high %v381_v14, %v385_v15  ;;  %v1928_v24 = vcombine.high %v382_v16, %v386_v17  ;;  %v1925_v34 = vcombine.low %v381_v14, %v385_v15  ;;  %v2365_v39 = vld [vmem:[%s2442_s19 + $0x108] sm:$0xff]   ;;  %v2369_v48 = vld [vmem:[%s2442_s19 + $0x100] sm:$0xff]   ;;  %v360_v8 = vld [vmem:[%s2479_s22 + $0x58] sm:$0xff] }
  0x2c   : > { %2040 = vmatpush3.bf16.msra.mxu0 %v2334_v26  ;;  %v389_v26 = vld [vmem:[%s2479_s22 + $0x140] sm:$0xff]  ;;  %v398_v44 = vld [vmem:[%s2479_s22 + $0x188] sm:$0xff]  ;;  %v367_v14 = vld [vmem:[%s2479_s22 + $0x90] sm:$0xff] }
  0x2d   : > { %2104 = vmatpush3.bf16.msra.mxu1 %v2335_v27  ;;  %2041 = vmatprep.subr.bf16.mxu0 %v2336_v28  ;;  %v393_v27 = vld [vmem:[%s2479_s22 + $0x160] sm:$0xff]  ;;  %v2360_v28 = vld [vmem:[%s2442_s19 + $0x150] sm:$0xff]   ;;  %v402_v45 = vld [vmem:[%s2479_s22 + $0x1a8] sm:$0xff] }
  0x2e   : > { %2105 = vmatprep.subr.bf16.mxu1 %v2337_v29  ;;  %v390_v29 = vld [vmem:[%s2479_s22 + $0x148] sm:$0xff]  ;;  %v1934_v36 = vcombine.high %v389_v26, %v393_v27  ;;  %v1933_v47 = vcombine.low %v389_v26, %v393_v27  ;;  %v1943_v59 = vcombine.low %v398_v44, %v402_v45  ;;  %v371_v15 = vld [vmem:[%s2479_s22 + $0xb0] sm:$0xff] }
  0x2f   : > { %v406_v56 = vld [vmem:[%s2479_s22 + $0x1c8] sm:$0xff]  ;;  %v1913_v26 = vcombine.low %v367_v14, %v371_v15 }
  0x30   : > { %2042 = vmatpush3.bf16.msra.mxu0 %v2338_v30  ;;  %v394_v30 = vld [vmem:[%s2479_s22 + $0x168] sm:$0xff] }
  0x31   : > { %2106 = vmatpush3.bf16.msra.mxu1 %v2339_v31  ;;  %2155 = vmatprep.subr.bf16.mxu0 %v2340_v40  ;;  %v2361_v31 = vld [vmem:[%s2442_s19 + $0x110] sm:$0xff]   ;;  %v1936_v37 = vcombine.high %v390_v29, %v394_v30  ;;  %v2366_v40 = vld [vmem:[%s2442_s19 + $0x1c8] sm:$0xff]  }
  0x32   : > { %2219 = vmatprep.subr.bf16.mxu1 %v2342_v42  ;;  %v401_v42 = vld [vmem:[%s2479_s22 + $0x1a0] sm:$0xff]  ;;  %v410_v57 = vld [vmem:[%s2479_s22 + $0x1e8] sm:$0xff] }
  0x33   : > { %1278 = vmatmul.mubr.bf16.vlgmr.msra.gmra.mxu0 %v1893_v35  ;;  %v1927_v35 = vcombine.low %v382_v16, %v386_v17  ;;  %v1951_v3 = vcombine.low %v406_v56, %v410_v57  ;;  %v368_v16 = vld [vmem:[%s2479_s22 + $0x98] sm:$0xff] }
  0x34   : > { %1375 = vmatmul.mubr.bf16.vlgmr.msra.gmra.mxu1 %v1895_v38  ;;  %2156 = vmatpush3.bf16.msra.mxu0 %v2341_v41  ;;  %v2364_v38 = vld [vmem:[%s2442_s19 + $0x148] sm:$0xff]   ;;  %v397_v41 = vld [vmem:[%s2479_s22 + $0x180] sm:$0xff]  ;;  %v372_v17 = vld [vmem:[%s2479_s22 + $0xb8] sm:$0xff] }
  0x35   : > { %2220 = vmatpush3.bf16.msra.mxu1 %v2343_v43  ;;  %1285 = vmatprep.mubr.bf16.mxu0 %v1902_v46  ;;  %v2367_v43 = vld [vmem:[%s2442_s19 + $0x188] sm:$0xff]   ;;  %v2368_v46 = vld [vmem:[%s2442_s19 + $0x140] sm:$0xff]   ;;  %v1941_v58 = vcombine.low %v397_v41, %v401_v42  ;;  %v1915_v27 = vcombine.low %v368_v16, %v372_v17 }
  0x36   : > { %1382 = vmatprep.mubr.bf16.mxu1 %v1904_v49  ;;  %2157 = vmatprep.subr.bf16.mxu0 %v2344_v50  ;;  %v1935_v49 = vcombine.low %v390_v29, %v394_v30  ;;  %v1942_v50 = vcombine.high %v397_v41, %v401_v42  ;;  %v383_v30 = vld [vmem:[%s2479_s22 + $0x110] sm:$0xff]  ;;  %v396_v41 = vld [vmem:[%s2479_s22 + $0x178] sm:$0xff] }
  0x37   : > { %2221 = vmatprep.subr.bf16.mxu1 %v2346_v54  ;;  %v405_v54 = vld [vmem:[%s2479_s22 + $0x1c0] sm:$0xff] }
  0x38   : > { %2158 = vmatpush3.bf16.msra.mxu0 %v2345_v52  ;;  %v1944_v52 = vcombine.high %v398_v44, %v402_v45 }
  0x39   : > { %2222 = vmatpush3.bf16.msra.mxu1 %v2347_v55  ;;  %2159 = vmatprep.subr.bf16.mxu0 %v2348_v62  ;;  %v409_v55 = vld [vmem:[%s2479_s22 + $0x1e0] sm:$0xff]  ;;  %v351_v62 = vld [vmem:[%s2479_s22 + $0x10] sm:$0xff] }
  0x3a   : > { %2223 = vmatprep.subr.bf16.mxu1 %v2350_v0  ;;  %v352_v0 = vld [vmem:[%s2479_s22 + $0x18] sm:$0xff] }
  0x3b   : > { %1286 = vmatmul.mubr.bf16.gmra.mxu0 %v1901_v51  ;;  %v2370_v51 = vld [vmem:[%s2442_s19 + $0x1c0] sm:$0xff]  }
  0x3c   : > { %1383 = vmatmul.mubr.bf16.gmra.mxu1 %v1903_v53  ;;  %1293 = vmatprep.mubr.bf16.mxu0 %v1910_v60  ;;  %v2371_v53 = vld [vmem:[%s2442_s19 + $0x180] sm:$0xff]   ;;  %v1950_v60 = vcombine.high %v405_v54, %v409_v55 }
  0x3d   : > { %1390 = vmatprep.mubr.bf16.mxu1 %v1912_v61  ;;  %2160 = vmatpush3.bf16.msra.mxu0 %v2349_v63  ;;  %v1952_v61 = vcombine.high %v406_v56, %v410_v57  ;;  %v355_v63 = vld [vmem:[%s2479_s22 + $0x30] sm:$0xff]  ;;  %v408_v56 = vld [vmem:[%s2479_s22 + $0x1d8] sm:$0xff] }
  0x3e   : > { %2224 = vmatpush3.bf16.msra.mxu1 %v2351_v1  ;;  %2161 = vmatprep.subr.bf16.mxu0 %v2352_v10  ;;  %v356_v1 = vld [vmem:[%s2479_s22 + $0x38] sm:$0xff]  ;;  %v1898_v4 = vcombine.high %v351_v62, %v355_v63  ;;  %v1897_v10 = vcombine.low %v351_v62, %v355_v63 }
  0x3f   : > { %2225 = vmatprep.subr.bf16.mxu1 %v2354_v12  ;;  %v1900_v5 = vcombine.high %v352_v0, %v356_v1  ;;  %v412_v57 = vld [vmem:[%s2479_s22 + $0x1f8] sm:$0xff] }
  0x40   : > { %v1955_v63 = vcombine.low %v408_v56, %v412_v57 }
  0x41   : > { %2162 = vmatpush3.bf16.msra.mxu0 %v2353_v11  ;;  %v1899_v11 = vcombine.low %v352_v0, %v356_v1 }
  0x42   : > { %2226 = vmatpush3.bf16.msra.mxu1 %v2355_v13  ;;  %2163 = vmatprep.subr.bf16.mxu0 %v2356_v18 }
  0x43   : > { %1294 = vmatmul.mubr.bf16.gmra.mxu0 %v1909_v2  ;;  %2227 = vmatprep.subr.bf16.mxu1 %v2358_v23  ;;  %v1949_v2 = vcombine.low %v405_v54, %v409_v55  ;;  %v379_v23 = vld [vmem:[%s2479_s22 + $0xf0] sm:$0xff] }
  0x44   : > { %1391 = vmatmul.mubr.bf16.gmra.mxu1 %v1911_v6  ;;  %1301 = vmatprep.mubr.bf16.mxu0 %v1918_v7  ;;  %v359_v6 = vld [vmem:[%s2479_s22 + $0x50] sm:$0xff] }
  0x45   : > { %1398 = vmatprep.mubr.bf16.mxu1 %v1920_v9  ;;  %2164 = vmatpush3.bf16.msra.mxu0 %v2357_v20  ;;  %v363_v7 = vld [vmem:[%s2479_s22 + $0x70] sm:$0xff]  ;;  %v364_v9 = vld [vmem:[%s2479_s22 + $0x78] sm:$0xff]  ;;  %v1914_v20 = vcombine.high %v367_v14, %v371_v15 }
  0x46   : > { %2228 = vmatpush3.bf16.msra.mxu1 %v2359_v25  ;;  %2165 = vmatprep.subr.bf16.mxu0 %v2360_v28  ;;  %v1906_v12 = vcombine.high %v359_v6, %v363_v7  ;;  %v1908_v13 = vcombine.high %v360_v8, %v364_v9  ;;  %v1905_v18 = vcombine.low %v359_v6, %v363_v7  ;;  %v380_v25 = vld [vmem:[%s2479_s22 + $0xf8] sm:$0xff]  ;;  %v407_v54 = vld [vmem:[%s2479_s22 + $0x1d0] sm:$0xff] }
  0x47   : > { %2229 = vmatprep.subr.bf16.mxu1 %v2362_v32  ;;  %v384_v32 = vld [vmem:[%s2479_s22 + $0x118] sm:$0xff]  ;;  %v411_v55 = vld [vmem:[%s2479_s22 + $0x1f0] sm:$0xff] }
  0x48   : > { %v1953_v62 = vcombine.low %v407_v54, %v411_v55 }
  0x49   : > { %2166 = vmatpush3.bf16.msra.mxu0 %v2361_v31  ;;  %v387_v31 = vld [vmem:[%s2479_s22 + $0x130] sm:$0xff] }
  0x4a   : > { %2230 = vmatpush3.bf16.msra.mxu1 %v2363_v33  ;;  %2167 = vmatprep.subr.bf16.mxu0 %v2364_v38  ;;  %v388_v33 = vld [vmem:[%s2479_s22 + $0x138] sm:$0xff]  ;;  %v391_v38 = vld [vmem:[%s2479_s22 + $0x150] sm:$0xff]  ;;  %v1929_v42 = vcombine.low %v383_v30, %v387_v31 }
  0x4b   : > { %1302 = vmatmul.mubr.bf16.gmra.mxu0 %v1917_v19  ;;  %2231 = vmatprep.subr.bf16.mxu1 %v2366_v40  ;;  %v1907_v19 = vcombine.low %v360_v8, %v364_v9  ;;  %v392_v40 = vld [vmem:[%s2479_s22 + $0x158] sm:$0xff] }
  0x4c   : > { %1399 = vmatmul.mubr.bf16.gmra.mxu1 %v1919_v21  ;;  %1309 = vmatprep.mubr.bf16.mxu0 %v1926_v22  ;;  %v1916_v21 = vcombine.high %v368_v16, %v372_v17  ;;  %v375_v22 = vld [vmem:[%s2479_s22 + $0xd0] sm:$0xff]  ;;  %v1940_v45 = vcombine.high %v392_v40, %v396_v41 }
  0x4d   : > { %1406 = vmatprep.mubr.bf16.mxu1 %v1928_v24  ;;  %2168 = vmatpush3.bf16.msra.mxu0 %v2365_v39  ;;  %v376_v24 = vld [vmem:[%s2479_s22 + $0xd8] sm:$0xff]  ;;  %v1922_v28 = vcombine.high %v375_v22, %v379_v23  ;;  %v395_v39 = vld [vmem:[%s2479_s22 + $0x170] sm:$0xff] }
  0x4e   : > { %2232 = vmatpush3.bf16.msra.mxu1 %v2367_v43  ;;  %2169 = vmatprep.subr.bf16.mxu0 %v2368_v46  ;;  %v1924_v29 = vcombine.high %v376_v24, %v380_v25  ;;  %v1931_v43 = vcombine.low %v384_v32, %v388_v33  ;;  %v1938_v44 = vcombine.high %v391_v38, %v395_v39  ;;  %v399_v46 = vld [vmem:[%s2479_s22 + $0x190] sm:$0xff] }
  0x4f   : > { %2233 = vmatprep.subr.bf16.mxu1 %v2370_v51  ;;  %v1939_v51 = vcombine.low %v392_v40, %v396_v41 }
  0x51   : > { %2170 = vmatpush3.bf16.msra.mxu0 %v2369_v48  ;;  %v400_v48 = vld [vmem:[%s2479_s22 + $0x198] sm:$0xff] }
  0x52   : > { %2234 = vmatpush3.bf16.msra.mxu1 %v2371_v53 }
  0x53   : > { %1310 = vmatmul.mubr.bf16.gmra.mxu0 %v1925_v34  ;;  %v1921_v34 = vcombine.low %v375_v22, %v379_v23 }
  0x54   : > { %1407 = vmatmul.mubr.bf16.gmra.mxu1 %v1927_v35  ;;  %1317 = vmatprep.mubr.bf16.mxu0 %v1934_v36  ;;  %v1923_v35 = vcombine.low %v376_v24, %v380_v25  ;;  %v1930_v36 = vcombine.high %v383_v30, %v387_v31 }
  0x55   : > { %1414 = vmatprep.mubr.bf16.mxu1 %v1936_v37  ;;  %v1932_v37 = vcombine.high %v384_v32, %v388_v33 }
  0x5b   : > { %1318 = vmatmul.mubr.bf16.gmra.mxu0 %v1933_v47  ;;  %v403_v47 = vld [vmem:[%s2479_s22 + $0x1b0] sm:$0xff] }
  0x5c   : > { %1415 = vmatmul.mubr.bf16.gmra.mxu1 %v1935_v49  ;;  %1325 = vmatprep.mubr.bf16.mxu0 %v1942_v50  ;;  %v404_v49 = vld [vmem:[%s2479_s22 + $0x1b8] sm:$0xff]  ;;  %v1937_v50 = vcombine.low %v391_v38, %v395_v39 }
  0x5d   : > { %1422 = vmatprep.mubr.bf16.mxu1 %v1944_v52  ;;  %v1946_v52 = vcombine.high %v399_v46, %v403_v47  ;;  %v1948_v53 = vcombine.high %v400_v48, %v404_v49 }
  0x63   : > { %1326 = vmatmul.mubr.bf16.gmra.mxu0 %v1941_v58  ;;  %v1945_v58 = vcombine.low %v399_v46, %v403_v47 }
  0x64   : > { %1423 = vmatmul.mubr.bf16.gmra.mxu1 %v1943_v59  ;;  %1333 = vmatprep.mubr.bf16.mxu0 %v1950_v60  ;;  %v1947_v59 = vcombine.low %v400_v48, %v404_v49  ;;  %v1954_v60 = vcombine.high %v407_v54, %v411_v55 }
  0x65   : > { %1430 = vmatprep.mubr.bf16.mxu1 %v1952_v61  ;;  %v1956_v61 = vcombine.high %v408_v56, %v412_v57 }
  0x6b   : > { %1334 = vmatmul.mubr.bf16.gmra.mxu0 %v1949_v2 }
  0x6c   : > { %1431 = vmatmul.mubr.bf16.gmra.mxu1 %v1951_v3  ;;  %1471 = vmatprep.mubr.bf16.mxu0 %v1898_v4 }
  0x6d   : > { %1568 = vmatprep.mubr.bf16.mxu1 %v1900_v5 }
  0x73   : > { %1472 = vmatmul.mubr.bf16.vlgmr.msra.gmra.mxu0 %v1897_v10 }
  0x74   : > { %1569 = vmatmul.mubr.bf16.vlgmr.msra.gmra.mxu1 %v1899_v11  ;;  %1479 = vmatprep.mubr.bf16.mxu0 %v1906_v12 }
  0x75   : > { %1576 = vmatprep.mubr.bf16.mxu1 %v1908_v13 }
  0x7b   : > { %1480 = vmatmul.mubr.bf16.gmra.mxu0 %v1905_v18 }
  0x7c   : > { %1577 = vmatmul.mubr.bf16.gmra.mxu1 %v1907_v19  ;;  %1487 = vmatprep.mubr.bf16.mxu0 %v1914_v20 }
  0x7d   : > { %1584 = vmatprep.mubr.bf16.mxu1 %v1916_v21 }
  0x83   : > { %1488 = vmatmul.mubr.bf16.gmra.mxu0 %v1913_v26 }
  0x84   : > { %1585 = vmatmul.mubr.bf16.gmra.mxu1 %v1915_v27  ;;  %1495 = vmatprep.mubr.bf16.mxu0 %v1922_v28 }
  0x85   : > { %1592 = vmatprep.mubr.bf16.mxu1 %v1924_v29 }
  0x8b   : > { %1496 = vmatmul.mubr.bf16.gmra.mxu0 %v1921_v34 }
  0x8c   : > { %1593 = vmatmul.mubr.bf16.gmra.mxu1 %v1923_v35  ;;  %1503 = vmatprep.mubr.bf16.mxu0 %v1930_v36 }
  0x8d   : > { %1600 = vmatprep.mubr.bf16.mxu1 %v1932_v37 }
  0x93   : > { %1504 = vmatmul.mubr.bf16.gmra.mxu0 %v1929_v42 }
  0x94   : > { %1601 = vmatmul.mubr.bf16.gmra.mxu1 %v1931_v43  ;;  %1511 = vmatprep.mubr.bf16.mxu0 %v1938_v44 }
  0x95   : > { %1608 = vmatprep.mubr.bf16.mxu1 %v1940_v45 }
  0x9b   : > { %1512 = vmatmul.mubr.bf16.gmra.mxu0 %v1937_v50 }
  0x9c   : > { %1609 = vmatmul.mubr.bf16.gmra.mxu1 %v1939_v51  ;;  %1519 = vmatprep.mubr.bf16.mxu0 %v1946_v52 }
  0x9d   : > { %1616 = vmatprep.mubr.bf16.mxu1 %v1948_v53 }
  0xa3   : > { %1520 = vmatmul.mubr.bf16.gmra.mxu0 %v1945_v58 }
  0xa4   : > { %1617 = vmatmul.mubr.bf16.gmra.mxu1 %v1947_v59  ;;  %1527 = vmatprep.mubr.bf16.mxu0 %v1954_v60 }
  0xa5   : > { %1624 = vmatprep.mubr.bf16.mxu1 %v1956_v61 }
  0xab   : > { %1528 = vmatmul.mubr.bf16.gmra.mxu0 %v1953_v62 }
  0xac   : > { %1625 = vmatmul.mubr.bf16.gmra.mxu1 %v1955_v63 }
  0xf3   : > { %v2579_v0 = vpop.f32.mrf.mxu0 }
  0xf4   : > { %v2581_v1 = vpop.f32.mrf.mxu1 }
  0xf5   : > { %v2044_v2 = vpop.f32.mrf.mxu0 }
  0xf6   : > { %v2108_v3 = vpop.f32.mrf.mxu1  ;;  %v2045_v63 = vadd.f32 %v2044_v2, %v2579_v0 }
  0xf7   : > { %v2583_v4 = vpop.f32.mrf.mxu0 }
  0xf8   : > { %v2585_v5 = vpop.f32.mrf.mxu1 }
  0xf9   : > { %v2587_v6 = vpop.f32.mrf.mxu0 }
  0xfa   : > { %v2589_v7 = vpop.f32.mrf.mxu1 }
  0xfb   : > { %v2591_v8 = vpop.f32.mrf.mxu0 }
  0xfc   : > { %v2593_v9 = vpop.f32.mrf.mxu1 }
  0xfd   : > { %v2595_v10 = vpop.f32.mrf.mxu0 }
  0xfe   : > { %v2597_v11 = vpop.f32.mrf.mxu1 }
  0xff   : > { %v2599_v12 = vpop.f32.mrf.mxu0 }
 0x100   : > { %v2601_v13 = vpop.f32.mrf.mxu1 }
 0x101   : > { %v2603_v14 = vpop.f32.mrf.mxu0 }
 0x102   : > { %v2605_v15 = vpop.f32.mrf.mxu1 }
 0x103   : > { %v2607_v16 = vpop.f32.mrf.mxu0 }
 0x104   : > { %v2609_v17 = vpop.f32.mrf.mxu1 }
 0x105   : > { %v2611_v18 = vpop.f32.mrf.mxu0 }
 0x106   : > { %v2613_v19 = vpop.f32.mrf.mxu1 }
 0x107   : > { %v2615_v20 = vpop.f32.mrf.mxu0 }
 0x108   : > { %v2617_v21 = vpop.f32.mrf.mxu1 }
 0x109   : > { %v2619_v22 = vpop.f32.mrf.mxu0 }
 0x10a   : > { %v2621_v23 = vpop.f32.mrf.mxu1 }
 0x10b   : > { %v2623_v24 = vpop.f32.mrf.mxu0 }
 0x10c   : > { %v2625_v25 = vpop.f32.mrf.mxu1 }
 0x10d   : > { %v2627_v26 = vpop.f32.mrf.mxu0 }
 0x10e   : > { %v2629_v27 = vpop.f32.mrf.mxu1 }
 0x10f   : > { %v2631_v28 = vpop.f32.mrf.mxu0 }
 0x110   : > { %v2633_v29 = vpop.f32.mrf.mxu1 }
 0x111   : > { %v2635_v30 = vpop.f32.mrf.mxu0 }
 0x112   : > { %v2637_v31 = vpop.f32.mrf.mxu1 }
 0x113   : > { %v2639_v32 = vpop.f32.mrf.mxu0 }
 0x114   : > { %v2641_v33 = vpop.f32.mrf.mxu1 }
 0x115   : > { %v2643_v34 = vpop.f32.mrf.mxu0 }
 0x116   : > { %v2645_v35 = vpop.f32.mrf.mxu1 }
 0x117   : > { %v2647_v36 = vpop.f32.mrf.mxu0 }
 0x118   : > { %v2649_v37 = vpop.f32.mrf.mxu1 }
 0x119   : > { %v2651_v38 = vpop.f32.mrf.mxu0 }
 0x11a   : > { %v2653_v39 = vpop.f32.mrf.mxu1 }
 0x11b   : > { %v2655_v40 = vpop.f32.mrf.mxu0 }
 0x11c   : > { %v2657_v41 = vpop.f32.mrf.mxu1 }
 0x11d   : > { %v2659_v42 = vpop.f32.mrf.mxu0 }
 0x11e   : > { %v2661_v43 = vpop.f32.mrf.mxu1 }
 0x11f   : > { %v2663_v44 = vpop.f32.mrf.mxu0 }
 0x120   : > { %v2665_v45 = vpop.f32.mrf.mxu1 }
 0x121   : > { %v2667_v46 = vpop.f32.mrf.mxu0 }
 0x122   : > { %v2669_v47 = vpop.f32.mrf.mxu1 }
 0x123   : > { %v2671_v48 = vpop.f32.mrf.mxu0 }
 0x124   : > { %v2673_v49 = vpop.f32.mrf.mxu1 }
 0x125   : > { %v2675_v50 = vpop.f32.mrf.mxu0 }
 0x126   : > { %v2677_v51 = vpop.f32.mrf.mxu1 }
 0x127   : > { %2821 = vst [vmem:[#allocation2_spill] sm:$0xff] %v2677_v51  ;;  %v2679_v52 = vpop.f32.mrf.mxu0 }
 0x128   : > { %2822 = vst [vmem:[#allocation3_spill] sm:$0xff] %v2679_v52  ;;  %v2681_v53 = vpop.f32.mrf.mxu1 }
 0x129   : > { %2823 = vst [vmem:[#allocation4_spill] sm:$0xff] %v2681_v53  ;;  %v2683_v54 = vpop.f32.mrf.mxu0  ;;  %v2109_v53 = vadd.f32 %v2108_v3, %v2581_v1  ;;  %v2051_v1 = vadd.f32 %v2595_v10, %v2591_v8  ;;  %v2115_v3 = vadd.f32 %v2597_v11, %v2593_v9  ;;  %v2054_v8 = vadd.f32 %v2603_v14, %v2599_v12 }
 0x12a   : > { %2824 = vst [vmem:[#allocation5_spill] sm:$0xff] %v2683_v54  ;;  %v2685_v55 = vpop.f32.mrf.mxu1  ;;  %v2118_v10 = vadd.f32 %v2605_v15, %v2601_v13  ;;  %v2057_v14 = vadd.f32 %v2611_v18, %v2607_v16  ;;  %v2121_v13 = vadd.f32 %v2613_v19, %v2609_v17  ;;  %v2060_v16 = vadd.f32 %v2619_v22, %v2615_v20 }
 0x12b   : > { %2825 = vst [vmem:[#allocation6_spill] sm:$0xff] %v2685_v55  ;;  %v2687_v56 = vpop.f32.mrf.mxu0  ;;  %v2124_v17 = vadd.f32 %v2621_v23, %v2617_v21  ;;  %v2127_v20 = vadd.f32 %v2629_v27, %v2625_v25  ;;  %v2130_v25 = vadd.f32 %v2637_v31, %v2633_v29 }
 0x12c   : > { %2826 = vst [vmem:[#allocation7_spill] sm:$0xff] %v2687_v56  ;;  %v2689_v57 = vpop.f32.mrf.mxu1 }
 0x12d   : > { %2827 = vst [vmem:[#allocation8_spill] sm:$0xff] %v2689_v57  ;;  %v2691_v58 = vpop.f32.mrf.mxu0  ;;  %v1377_v57 = vadd.f32 %v2109_v53, %v2045_v63  ;;  %v1396_v21 = vadd.f32 %v2124_v17, %v2060_v16 }
 0x12e   : > { %2828 = vst [vmem:[#allocation9_spill] sm:$0xff] %v2691_v58  ;;  %v2693_v59 = vpop.f32.mrf.mxu1  ;;  %v2048_v58 = vadd.f32 %v2587_v6, %v2583_v4 }
 0x12f   : > { %2829 = vst [vmem:[#allocation10_spill] sm:$0xff] %v2693_v59  ;;  %v2695_v60 = vpop.f32.mrf.mxu0 }
 0x130   : > { %2830 = vst [vmem:[#allocation11_spill] sm:$0xff] %v2695_v60  ;;  %v2697_v61 = vpop.f32.mrf.mxu1  ;;  %v2112_v60 = vadd.f32 %v2589_v7, %v2585_v5  ;;  %v2716_v5 = vld [vmem:[%s2819_s2] ss:$0 sm:$0xff] }
 0x131   : > { %2831 = vst [vmem:[#allocation12_spill] sm:$0xff] %v2697_v61  ;;  %v2699_v62 = vpop.f32.mrf.mxu0 }
 0x132   : > { %2832 = vst [vmem:[#allocation13_spill] sm:$0xff] %v2699_v62  ;;  %v2703_v54 = vpop.f32.mrf.mxu1  ;;  %v1380_v63 = vadd.f32 %v2112_v60, %v2048_v58 }
 0x133   : > { %2833 = vst [vmem:[#allocation14_spill] sm:$0xff] %v2703_v54  ;;  %v2171_v55 = vpop.f32.mrf.mxu0 }
 0x134   : > { %v2235_v56 = vpop.f32.mrf.mxu1 }
 0x135   : > { %v2172_v52 = vpop.f32.mrf.mxu0 }
 0x136   : > { %v2173_v61 = vadd.f32 %v2172_v52, %v2171_v55  ;;  %v2236_v59 = vpop.f32.mrf.mxu1 }
 0x137   : > { %v2174_v62 = vpop.f32.mrf.mxu0  ;;  %v2237_v0 = vadd.f32 %v2236_v59, %v2235_v56 }
 0x138   : > { %v1474_v51 = vadd.f32 %v2173_v61, %v1377_v57  ;;  %v2238_v2 = vpop.f32.mrf.mxu1  ;;  %v1385_v57 = vadd.f32 %v2115_v3, %v2051_v1 }
 0x139   : > { %v2175_v53 = vpop.f32.mrf.mxu0 }
 0x13a   : > { %v1571_v54 = vadd.f32 %v2237_v0, %v1474_v51  ;;  %v2176_v4 = vadd.f32 %v2175_v53, %v2174_v62  ;;  %v2239_v6 = vpop.f32.mrf.mxu1 }
 0x13b   : > { %v2177_v7 = vpop.f32.mrf.mxu0  ;;  %v2240_v55 = vadd.f32 %v2239_v6, %v2238_v2 }
 0x13c   : > { %v1477_v52 = vadd.f32 %v2176_v4, %v1380_v63  ;;  %v2241_v56 = vpop.f32.mrf.mxu1  ;;  %v1691_v11 = vadd.f32 %v2716_v5, %v1571_v54  ;;  %v1388_v54 = vadd.f32 %v2118_v10, %v2054_v8 }
 0x13d   : > { %v2178_v9 = vpop.f32.mrf.mxu0 }
 0x13e   : > { %v1574_v51 = vadd.f32 %v2240_v55, %v1477_v52  ;;  %v2179_v58 = vadd.f32 %v2178_v9, %v2177_v7  ;;  %v2242_v59 = vpop.f32.mrf.mxu1  ;;  %v1707_v61 = vmax.f32 %v1691_v11, 0.0  ;;  %v1393_v55 = vadd.f32 %v2121_v13, %v2057_v14 }
 0x13f   : > { %v2180_v60 = vpop.f32.mrf.mxu0  ;;  %v2243_v0 = vadd.f32 %v2242_v59, %v2241_v56  ;;  %v2063_v59 = vadd.f32 %v2627_v26, %v2623_v24  ;;  %v2066_v24 = vadd.f32 %v2635_v30, %v2631_v28  ;;  %v2133_v28 = vadd.f32 %v2645_v35, %v2641_v33 }
 0x140   : > { %v1482_v62 = vadd.f32 %v2179_v58, %v1385_v57  ;;  %v2244_v12 = vpop.f32.mrf.mxu1  ;;  %1723 = vst [vmem:[%s2727_s28] sm:$0xff] %v1707_v61  ;;  %v1692_v2 = vadd.f32 %v2716_v5, %v1574_v51  ;;  %v2136_v33 = vadd.f32 %v2653_v39, %v2649_v37 }
 0x141   : > { %v2181_v15 = vpop.f32.mrf.mxu0  ;;  %v1404_v29 = vadd.f32 %v2130_v25, %v2066_v24 }
 0x142   : > { %v1579_v1 = vadd.f32 %v2243_v0, %v1482_v62  ;;  %v2182_v3 = vadd.f32 %v2181_v15, %v2180_v60  ;;  %v2245_v53 = vpop.f32.mrf.mxu1  ;;  %v1708_v4 = vmax.f32 %v1692_v2, 0.0 }
 0x143   : > { %v2183_v63 = vpop.f32.mrf.mxu0  ;;  %v2246_v7 = vadd.f32 %v2245_v53, %v2244_v12 }
 0x144   : > { %v1485_v6 = vadd.f32 %v2182_v3, %v1388_v54  ;;  %v2247_v52 = vpop.f32.mrf.mxu1  ;;  %1724 = vst [vmem:[%s2727_s28 + $0x8] sm:$0xff] %v1708_v4  ;;  %v1693_v19 = vadd.f32 %v2716_v5, %v1579_v1  ;;  %v1401_v54 = vadd.f32 %v2127_v20, %v2063_v59 }
 0x145   : > { %v2184_v18 = vpop.f32.mrf.mxu0 }
 0x146   : > { %v1582_v56 = vadd.f32 %v2246_v7, %v1485_v6  ;;  %v2185_v57 = vadd.f32 %v2184_v18, %v2183_v63  ;;  %v2248_v8 = vpop.f32.mrf.mxu1  ;;  %v1709_v10 = vmax.f32 %v1693_v19, 0.0 }
 0x147   : > { %v2186_v9 = vpop.f32.mrf.mxu0  ;;  %v2249_v51 = vadd.f32 %v2248_v8, %v2247_v52  ;;  %v2069_v52 = vadd.f32 %v2643_v34, %v2639_v32  ;;  %v2072_v32 = vadd.f32 %v2651_v38, %v2647_v36  ;;  %v2139_v36 = vadd.f32 %v2661_v43, %v2657_v41 }
 0x148   : > { %v1490_v11 = vadd.f32 %v2185_v57, %v1393_v55  ;;  %v2250_v58 = vpop.f32.mrf.mxu1  ;;  %1725 = vst [vmem:[%s2727_s28 + $0x10] sm:$0xff] %v1709_v10  ;;  %v1694_v23 = vadd.f32 %v2716_v5, %v1582_v56  ;;  %v2142_v41 = vadd.f32 %v2669_v47, %v2665_v45 }
 0x149   : > { %v2187_v22 = vpop.f32.mrf.mxu0  ;;  %v1412_v37 = vadd.f32 %v2136_v33, %v2072_v32 }
 0x14a   : > { %v1587_v60 = vadd.f32 %v2249_v51, %v1490_v11  ;;  %v2188_v61 = vadd.f32 %v2187_v22, %v2186_v9  ;;  %v2251_v62 = vpop.f32.mrf.mxu1  ;;  %v1710_v12 = vmax.f32 %v1694_v23, 0.0  ;;  %v1409_v9 = vadd.f32 %v2133_v28, %v2069_v52 }
 0x14b   : > { %v2189_v0 = vpop.f32.mrf.mxu0  ;;  %v2252_v13 = vadd.f32 %v2251_v62, %v2250_v58  ;;  %v2075_v23 = vadd.f32 %v2659_v42, %v2655_v40  ;;  %v2078_v40 = vadd.f32 %v2667_v46, %v2663_v44  ;;  %v2834_v44 = vld [vmem:[#allocation2_spill] sm:$0xff] }
 0x14c   : > { %v1493_v14 = vadd.f32 %v2188_v61, %v1396_v21  ;;  %v2253_v15 = vpop.f32.mrf.mxu1  ;;  %1726 = vst [vmem:[%s2727_s28 + $0x18] sm:$0xff] %v1710_v12  ;;  %v1695_v27 = vadd.f32 %v2716_v5, %v1587_v60  ;;  %v2145_v46 = vadd.f32 %v2834_v44, %v2673_v49  ;;  %v2837_v49 = vld [vmem:[#allocation4_spill] sm:$0xff] }
 0x14d   : > { %v2190_v26 = vpop.f32.mrf.mxu0  ;;  %v1420_v45 = vadd.f32 %v2142_v41, %v2078_v40  ;;  %v2845_v41 = vld [vmem:[#allocation12_spill] sm:$0xff] }
 0x14e   : > { %v1590_v2 = vadd.f32 %v2252_v13, %v1493_v14  ;;  %v2191_v1 = vadd.f32 %v2190_v26, %v2189_v0  ;;  %v2254_v3 = vpop.f32.mrf.mxu1  ;;  %v1711_v63 = vmax.f32 %v1695_v27, 0.0 }
 0x14f   : > { %v2192_v53 = vpop.f32.mrf.mxu0  ;;  %v2255_v6 = vadd.f32 %v2254_v3, %v2253_v15 }
 0x150   : > { %v1498_v4 = vadd.f32 %v2191_v1, %v1401_v54  ;;  %v2256_v7 = vpop.f32.mrf.mxu1  ;;  %1727 = vst [vmem:[%s2727_s28 + $0x20] sm:$0xff] %v1711_v63  ;;  %v1696_v31 = vadd.f32 %v2716_v5, %v1590_v2  ;;  %v1417_v54 = vadd.f32 %v2139_v36, %v2075_v23  ;;  %v2081_v63 = vadd.f32 %v2675_v50, %v2671_v48  ;;  %v2836_v48 = vld [vmem:[#allocation5_spill] sm:$0xff] }
 0x151   : > { %v2193_v30 = vpop.f32.mrf.mxu0 }
 0x152   : > { %v1595_v55 = vadd.f32 %v2255_v6, %v1498_v4  ;;  %v2194_v16 = vadd.f32 %v2193_v30, %v2192_v53  ;;  %v2257_v18 = vpop.f32.mrf.mxu1  ;;  %v1712_v19 = vmax.f32 %v1696_v31, 0.0 }
 0x153   : > { %v2195_v17 = vpop.f32.mrf.mxu0  ;;  %v2258_v57 = vadd.f32 %v2257_v18, %v2256_v7  ;;  %v2835_v18 = vld [vmem:[#allocation3_spill] sm:$0xff] }
 0x154   : > { %v1501_v56 = vadd.f32 %v2194_v16, %v1404_v29  ;;  %v2259_v8 = vpop.f32.mrf.mxu1  ;;  %1728 = vst [vmem:[%s2727_s28 + $0x28] sm:$0xff] %v1712_v19  ;;  %v1697_v35 = vadd.f32 %v2716_v5, %v1595_v55  ;;  %v1425_v16 = vadd.f32 %v2145_v46, %v2081_v63  ;;  %v2084_v50 = vadd.f32 %v2836_v48, %v2835_v18  ;;  %v2838_v19 = vld [vmem:[#allocation6_spill] sm:$0xff] }
 0x155   : > { %v2196_v34 = vpop.f32.mrf.mxu0 }
 0x156   : > { %v1598_v10 = vadd.f32 %v2258_v57, %v1501_v56  ;;  %v2197_v11 = vadd.f32 %v2196_v34, %v2195_v17  ;;  %v2260_v51 = vpop.f32.mrf.mxu1  ;;  %v1713_v59 = vmax.f32 %v1697_v35, 0.0  ;;  %v2148_v56 = vadd.f32 %v2838_v19, %v2837_v49 }
 0x157   : > { %v2198_v58 = vpop.f32.mrf.mxu0  ;;  %v2261_v22 = vadd.f32 %v2260_v51, %v2259_v8  ;;  %v2839_v51 = vld [vmem:[#allocation7_spill] sm:$0xff] }
 0x158   : > { %v1506_v20 = vadd.f32 %v2197_v11, %v1409_v9  ;;  %v2262_v21 = vpop.f32.mrf.mxu1  ;;  %1729 = vst [vmem:[%s2727_s28 + $0x30] sm:$0xff] %v1713_v59  ;;  %v1698_v39 = vadd.f32 %v2716_v5, %v1598_v10  ;;  %v1428_v36 = vadd.f32 %v2148_v56, %v2084_v50 }
 0x159   : > { %v2199_v38 = vpop.f32.mrf.mxu0 }
 0x15a   : > { %v1603_v60 = vadd.f32 %v2261_v22, %v1506_v20  ;;  %v2200_v61 = vadd.f32 %v2199_v38, %v2198_v58  ;;  %v2263_v62 = vpop.f32.mrf.mxu1  ;;  %v1714_v12 = vmax.f32 %v1698_v39, 0.0  ;;  %v2840_v58 = vld [vmem:[#allocation9_spill] sm:$0xff]  ;;  %v2841_v20 = vld [vmem:[#allocation8_spill] sm:$0xff]  ;;  %v2842_v22 = vld [vmem:[#allocation10_spill] sm:$0xff] }
 0x15b   : > { %v2201_v0 = vpop.f32.mrf.mxu0  ;;  %v2264_v13 = vadd.f32 %v2263_v62, %v2262_v21  ;;  %v2087_v59 = vadd.f32 %v2840_v58, %v2839_v51  ;;  %v2151_v21 = vadd.f32 %v2842_v22, %v2841_v20 }
 0x15c   : > { %v1509_v14 = vadd.f32 %v2200_v61, %v1412_v37  ;;  %v2265_v15 = vpop.f32.mrf.mxu1  ;;  %1730 = vst [vmem:[%s2727_s28 + $0x38] sm:$0xff] %v1714_v12  ;;  %v1699_v43 = vadd.f32 %v2716_v5, %v1603_v60 }
 0x15d   : > { %v2202_v42 = vpop.f32.mrf.mxu0 }
 0x15e   : > { %v1606_v24 = vadd.f32 %v2264_v13, %v1509_v14  ;;  %v2203_v26 = vadd.f32 %v2202_v42, %v2201_v0  ;;  %v2266_v25 = vpop.f32.mrf.mxu1  ;;  %v1715_v2 = vmax.f32 %v1699_v43, 0.0  ;;  %v1433_v13 = vadd.f32 %v2151_v21, %v2087_v59  ;;  %v2846_v43 = vld [vmem:[#allocation14_spill] sm:$0xff] }
 0x15f   : > { %v2204_v27 = vpop.f32.mrf.mxu0  ;;  %v2267_v3 = vadd.f32 %v2266_v25, %v2265_v15  ;;  %v2843_v15 = vld [vmem:[#allocation11_spill] sm:$0xff] }
 0x160   : > { %v1514_v1 = vadd.f32 %v2203_v26, %v1417_v54  ;;  %v2268_v53 = vpop.f32.mrf.mxu1  ;;  %1731 = vst [vmem:[%s2727_s28 + $0x40] sm:$0xff] %v1715_v2  ;;  %v1700_v47 = vadd.f32 %v2716_v5, %v1606_v24  ;;  %v2844_v54 = vld [vmem:[#allocation13_spill] sm:$0xff]  ;;  %v2154_v24 = vadd.f32 %v2846_v43, %v2845_v41 }
 0x161   : > { %v2205_v4 = vpop.f32.mrf.mxu0  ;;  %v2090_v40 = vadd.f32 %v2844_v54, %v2843_v15 }
 0x162   : > { %v1611_v6 = vadd.f32 %v2267_v3, %v1514_v1  ;;  %v2206_v7 = vadd.f32 %v2205_v4, %v2204_v27  ;;  %v2269_v52 = vpop.f32.mrf.mxu1  ;;  %v1716_v30 = vmax.f32 %v1700_v47, 0.0 }
 0x163   : > { %v2207_v28 = vpop.f32.mrf.mxu0  ;;  %v2270_v31 = vadd.f32 %v2269_v52, %v2268_v53  ;;  %v1436_v4 = vadd.f32 %v2154_v24, %v2090_v40 }
 0x164   : > { %v1517_v29 = vadd.f32 %v2206_v7, %v1420_v45  ;;  %v2271_v55 = vpop.f32.mrf.mxu1  ;;  %1732 = vst [vmem:[%s2727_s28 + $0x48] sm:$0xff] %v1716_v30  ;;  %v1701_v57 = vadd.f32 %v2716_v5, %v1611_v6 }
 0x165   : > { %v2208_v17 = vpop.f32.mrf.mxu0 }
 0x166   : > { %v1614_v8 = vadd.f32 %v2270_v31, %v1517_v29  ;;  %v2209_v9 = vadd.f32 %v2208_v17, %v2207_v28  ;;  %v2272_v32 = vpop.f32.mrf.mxu1  ;;  %v1717_v33 = vmax.f32 %v1701_v57, 0.0 }
 0x167   : > { %v2210_v34 = vpop.f32.mrf.mxu0  ;;  %v2273_v10 = vadd.f32 %v2272_v32, %v2271_v55 }
 0x168   : > { %v1522_v35 = vadd.f32 %v2209_v9, %v1425_v16  ;;  %v2274_v11 = vpop.f32.mrf.mxu1  ;;  %1733 = vst [vmem:[%s2727_s28 + $0x50] sm:$0xff] %v1717_v33  ;;  %v1702_v38 = vadd.f32 %v2716_v5, %v1614_v8 }
 0x169   : > { %v2211_v23 = vpop.f32.mrf.mxu0 }
 0x16a   : > { %v1619_v37 = vadd.f32 %v2273_v10, %v1522_v35  ;;  %v2212_v39 = vadd.f32 %v2211_v23, %v2210_v34  ;;  %v2275_v60 = vpop.f32.mrf.mxu1  ;;  %v1718_v62 = vmax.f32 %v1702_v38, 0.0 }
 0x16b   : > { %v2213_v61 = vpop.f32.mrf.mxu0  ;;  %v2276_v12 = vadd.f32 %v2275_v60, %v2274_v11 }
 0x16c   : > { %v1525_v0 = vadd.f32 %v2212_v39, %v1428_v36  ;;  %v2277_v14 = vpop.f32.mrf.mxu1  ;;  %1734 = vst [vmem:[%s2727_s28 + $0x58] sm:$0xff] %v1718_v62  ;;  %v1703_v26 = vadd.f32 %v2716_v5, %v1619_v37 }
 0x16d   : > { %v2214_v42 = vpop.f32.mrf.mxu0 }
 0x16e   : > { %v1622_v25 = vadd.f32 %v2276_v12, %v1525_v0  ;;  %v2215_v27 = vadd.f32 %v2214_v42, %v2213_v61  ;;  %v2278_v2 = vpop.f32.mrf.mxu1  ;;  %v1719_v3 = vmax.f32 %v1703_v26, 0.0 }
 0x16f   : > { %v2216_v1 = vpop.f32.mrf.mxu0  ;;  %v2279_v63 = vadd.f32 %v2278_v2, %v2277_v14 }
 0x170   : > { %v1530_v53 = vadd.f32 %v2215_v27, %v1433_v13  ;;  %v2280_v44 = vpop.f32.mrf.mxu1  ;;  %1735 = vst [vmem:[%s2727_s28 + $0x60] sm:$0xff] %v1719_v3  ;;  %v1704_v45 = vadd.f32 %v2716_v5, %v1622_v25 }
 0x171   : > { %v2217_v46 = vpop.f32.mrf.mxu0 }
 0x172   : > { %v1627_v47 = vadd.f32 %v2279_v63, %v1530_v53  ;;  %v2218_v6 = vadd.f32 %v2217_v46, %v2216_v1  ;;  %v2281_v7 = vpop.f32.mrf.mxu1  ;;  %v1720_v52 = vmax.f32 %v1704_v45, 0.0 }
 0x173   : > { %v2282_v30 = vadd.f32 %v2281_v7, %v2280_v44 }
 0x174   : > { %v1533_v28 = vadd.f32 %v2218_v6, %v1436_v4  ;;  %1736 = vst [vmem:[%s2727_s28 + $0x68] sm:$0xff] %v1720_v52  ;;  %v1705_v29 = vadd.f32 %v2716_v5, %v1627_v47 }
 0x176   : > { %v1630_v31 = vadd.f32 %v2282_v30, %v1533_v28  ;;  %v1721_v55 = vmax.f32 %v1705_v29, 0.0 }
 0x178   : > { %1737 = vst [vmem:[%s2727_s28 + $0x70] sm:$0xff] %v1721_v55  ;;  %v1706_v16 = vadd.f32 %v2716_v5, %v1630_v31 }
 0x17a   : > { %v1722_v18 = vmax.f32 %v1706_v16, 0.0 }
 0x17c   : > { %1738 = vst [vmem:[%s2727_s28 + $0x78] sm:$0xff] %v1722_v18 }
 0x17d PF: > { %s13_s14 = sadd.s32 1, %s2394_s14   ;;  %s2847_s12 = smov %s2390_s13 }
 0x17e   : > { %p10_p5 = scmp.ge.s32.totalorder %s13_s14, 6   ;;  %s2848_s13 = smov %s2850_s15 }
 0x180   :  { %12 = sbr.rel (!%p10_p5) target bundleno = 2 (0x2), region = 76 }

// kernel: generator_forward.8
= control target key start
LH: loop header
LB: loop body
LE: loop exit
PB: predicated region body
PF: predicated region fallthrough
CT: control target
= control target key end

     0   :  { %s3057_s12 = smov 0   ;;  %s3059_s13 = smov 0   ;;  %s3434_s0 = inlined_call_operand.vmem [shape: bf16[4,512,512], index: 0, kind: input, shape index: {}]   ;;  %s3435_s1 = inlined_call_operand.vmem [shape: bf16[4,512,128], index: 1, kind: input, shape index: {}]   ;;  %s3436_s2 = inlined_call_operand.vmem [shape: f32[1,128], index: 2, kind: input, shape index: {}]   ;;  %s3437_s3 = inlined_call_operand.vmem [shape: f32[4,512,128], index: 3, kind: output, shape index: {}]  }
   0x1   :  { %s3061_s14 = smov 0  }
   0x2 LB: > { %s39_s15 = sadd.s32 1, %s3030_s13  ;;  %p2588_p0 = scmp.ge.s32.totalorder %s3034_s14, 1  ;;  %s3034_s14 = sphi %s3061_s14, %s13_s14   ;;  %s3030_s13 = sphi %s3059_s13, %s3439_s13   ;;  %s3026_s12 = sphi %s3057_s12, %s3438_s12  }
   0x3   : > { %p41_p1 = scmp.ge.s32.totalorder %s39_s15, 4  ;;  %p212_p2 = scmp.lt.s32.totalorder %s3034_s14, 5 }
   0x5   : > { %s3441_s15 = smov (%p41_p1, %s39_s15), 0  ;;  %p213_p3 = pnand %p2588_p0, %p212_p2 }
   0x6   : > { %p269_p4 = scmp.lt.s32.totalorder (!%p213_p3), %s3026_s12, 3 }
   0x7   : > { %216 = sbr.rel (%p213_p3) target bundleno = 532 (0x214), region = 32 }
   0xc   : > { %v3036_v0 = vmov 0   ;;  %s3443_s12 = smov (!%p269_p4, %s3026_s12), 3 }
   0xd   : > { %1469 = vmatprep.subr.bf16.mxu0 %v3036_v0  ;;  %1758 = vmatprep.subr.bf16.mxu1 %v3036_v0  ;;  %s2759_s16 = sshll.u32 %s3443_s12, 8  ;;  %s2758_s20 = sshll.u32 %s3443_s12, 10 }
   0xe   : > { %s3083_s19 = scalar_lea.vmem %s3435_s1, %s2759_s16  ;;  %s3119_s23 = scalar_lea.vmem %s3434_s0, %s2758_s20 }
   0xf   : > { %v2787_v1 = vld [vmem:[%s3083_s19 + $0x38] sm:$0xff]   ;;  %v2789_v3 = vld [vmem:[%s3083_s19 + $0x30] sm:$0xff]   ;;  %v2791_v5 = vld [vmem:[%s3083_s19 + $0x28] sm:$0xff]   ;;  %s2760_s26 = sshll.u32 %s3443_s12, 9 }
  0x10   : > { %v2788_v2 = vld [vmem:[%s3083_s19 + $0xb8] sm:$0xff]   ;;  %1470 = vmatpush1.bf16.msra.mxu0 %v2787_v1  ;;  %v2790_v4 = vld [vmem:[%s3083_s19 + $0xb0] sm:$0xff]   ;;  %v2792_v6 = vld [vmem:[%s3083_s19 + $0xa8] sm:$0xff]   ;;  %s3269_s29 = scalar_lea.vmem %s3437_s3, %s2760_s26 }
  0x11   : > { %1759 = vmatpush1.bf16.msra.mxu1 %v2788_v2  ;;  %1471 = vmatprep.subr.bf16.mxu0 %v3036_v0  ;;  %v2793_v7 = vld [vmem:[%s3083_s19 + $0x20] sm:$0xff]   ;;  %v2795_v9 = vld [vmem:[%s3083_s19 + $0x18] sm:$0xff]   ;;  %v2797_v11 = vld [vmem:[%s3083_s19 + $0x10] sm:$0xff]  }
  0x12   : > { %1760 = vmatprep.subr.bf16.mxu1 %v3036_v0  ;;  %v2794_v8 = vld [vmem:[%s3083_s19 + $0xa0] sm:$0xff]   ;;  %v2796_v10 = vld [vmem:[%s3083_s19 + $0x98] sm:$0xff]   ;;  %v2798_v12 = vld [vmem:[%s3083_s19 + $0x90] sm:$0xff]  }
  0x13   : > { %v2799_v13 = vld [vmem:[%s3083_s19 + $0x8] sm:$0xff]   ;;  %v2801_v15 = vld [vmem:[%s3083_s19] sm:$0xff]   ;;  %v2803_v17 = vld [vmem:[%s3083_s19 + $0x78] sm:$0xff]  }
  0x14   : > { %1472 = vmatpush1.bf16.msra.mxu0 %v2789_v3  ;;  %v2800_v14 = vld [vmem:[%s3083_s19 + $0x88] sm:$0xff]   ;;  %v2802_v16 = vld [vmem:[%s3083_s19 + $0x80] sm:$0xff]   ;;  %v2804_v18 = vld [vmem:[%s3083_s19 + $0xf8] sm:$0xff]  }
  0x15   : > { %1761 = vmatpush1.bf16.msra.mxu1 %v2790_v4  ;;  %1473 = vmatprep.subr.bf16.mxu0 %v3036_v0  ;;  %v2821_v19 = vld [vmem:[%s3119_s23 + $0x4] ss:$16 sps:$4 sm:$0xff]   ;;  %v2824_v21 = vld [vmem:[%s3119_s23 + $0xc] ss:$16 sps:$4 sm:$0xff]   ;;  %v2819_v35 = vld [vmem:[%s3119_s23] ss:$16 sps:$4 sm:$0xff]  }
  0x16   : > { %1762 = vmatprep.subr.bf16.mxu1 %v3036_v0  ;;  %v2805_v20 = vld [vmem:[%s3083_s19 + $0x70] sm:$0xff]   ;;  %1501 = vmatprep.mubr.bf16.mxu0 %v2821_v19  ;;  %v2807_v23 = vld [vmem:[%s3083_s19 + $0x68] sm:$0xff]   ;;  %v2809_v25 = vld [vmem:[%s3083_s19 + $0x60] sm:$0xff]  }
  0x17   : > { %v2806_v22 = vld [vmem:[%s3083_s19 + $0xf0] sm:$0xff]   ;;  %1790 = vmatprep.mubr.bf16.mxu1 %v2824_v21  ;;  %v2808_v24 = vld [vmem:[%s3083_s19 + $0xe8] sm:$0xff]   ;;  %v2810_v26 = vld [vmem:[%s3083_s19 + $0xe0] sm:$0xff]  }
  0x18   : > { %1474 = vmatpush1.bf16.msra.mxu0 %v2791_v5  ;;  %v2811_v27 = vld [vmem:[%s3083_s19 + $0x58] sm:$0xff]   ;;  %v2813_v29 = vld [vmem:[%s3083_s19 + $0x50] sm:$0xff]   ;;  %v2815_v31 = vld [vmem:[%s3083_s19 + $0x48] sm:$0xff]  }
  0x19   : > { %1763 = vmatpush1.bf16.msra.mxu1 %v2792_v6  ;;  %1475 = vmatprep.subr.bf16.mxu0 %v3036_v0  ;;  %v2812_v28 = vld [vmem:[%s3083_s19 + $0xd8] sm:$0xff]   ;;  %v2814_v30 = vld [vmem:[%s3083_s19 + $0xd0] sm:$0xff]   ;;  %v2816_v32 = vld [vmem:[%s3083_s19 + $0xc8] sm:$0xff]  }
  0x1a   : > { %1764 = vmatprep.subr.bf16.mxu1 %v3036_v0  ;;  %v2817_v33 = vld [vmem:[%s3083_s19 + $0x40] sm:$0xff]   ;;  %v2822_v36 = vld [vmem:[%s3119_s23 + $0x8] ss:$16 sps:$4 sm:$0xff]   ;;  %v2827_v38 = vld [vmem:[%s3119_s23 + $0x2c] ss:$16 sps:$4 sm:$0xff]  }
  0x1b   : > { %v2818_v34 = vld [vmem:[%s3083_s19 + $0xc0] sm:$0xff]   ;;  %v2830_v40 = vld [vmem:[%s3119_s23 + $0x28] ss:$16 sps:$4 sm:$0xff]   ;;  %v2833_v42 = vld [vmem:[%s3119_s23 + $0x4c] ss:$16 sps:$4 sm:$0xff]  }
  0x1c   : > { %1476 = vmatpush1.bf16.msra.mxu0 %v2793_v7  ;;  %v2825_v37 = vld [vmem:[%s3119_s23 + $0x24] ss:$16 sps:$4 sm:$0xff]   ;;  %v2829_v39 = vld [vmem:[%s3119_s23 + $0x20] ss:$16 sps:$4 sm:$0xff]   ;;  %v2836_v44 = vld [vmem:[%s3119_s23 + $0x48] ss:$16 sps:$4 sm:$0xff]  }
  0x1d   : > { %1765 = vmatpush1.bf16.msra.mxu1 %v2794_v8  ;;  %1477 = vmatprep.subr.bf16.mxu0 %v3036_v0  ;;  %v2831_v41 = vld [vmem:[%s3119_s23 + $0x44] ss:$16 sps:$4 sm:$0xff]   ;;  %v2835_v43 = vld [vmem:[%s3119_s23 + $0x40] ss:$16 sps:$4 sm:$0xff]   ;;  %v2839_v46 = vld [vmem:[%s3119_s23 + $0x6c] ss:$16 sps:$4 sm:$0xff]  }
  0x1e   : > { %1766 = vmatprep.subr.bf16.mxu1 %v3036_v0  ;;  %v2837_v45 = vld [vmem:[%s3119_s23 + $0x64] ss:$16 sps:$4 sm:$0xff]   ;;  %v2841_v47 = vld [vmem:[%s3119_s23 + $0x60] ss:$16 sps:$4 sm:$0xff]   ;;  %v2842_v48 = vld [vmem:[%s3119_s23 + $0x68] ss:$16 sps:$4 sm:$0xff]  }
  0x1f   : > { %v2843_v49 = vld [vmem:[%s3119_s23 + $0x84] ss:$16 sps:$4 sm:$0xff]   ;;  %v2845_v50 = vld [vmem:[%s3119_s23 + $0x8c] ss:$16 sps:$4 sm:$0xff]   ;;  %v2847_v51 = vld [vmem:[%s3119_s23 + $0x80] ss:$16 sps:$4 sm:$0xff]  }
  0x20   : > { %1478 = vmatpush1.bf16.msra.mxu0 %v2795_v9  ;;  %v2848_v52 = vld [vmem:[%s3119_s23 + $0x88] ss:$16 sps:$4 sm:$0xff]   ;;  %v2849_v53 = vld [vmem:[%s3119_s23 + $0xa4] ss:$16 sps:$4 sm:$0xff]   ;;  %v2851_v54 = vld [vmem:[%s3119_s23 + $0xac] ss:$16 sps:$4 sm:$0xff]  }
  0x21   : > { %1767 = vmatpush1.bf16.msra.mxu1 %v2796_v10  ;;  %1479 = vmatprep.subr.bf16.mxu0 %v3036_v0  ;;  %v2853_v55 = vld [vmem:[%s3119_s23 + $0xa0] ss:$16 sps:$4 sm:$0xff]   ;;  %v2854_v56 = vld [vmem:[%s3119_s23 + $0xa8] ss:$16 sps:$4 sm:$0xff]   ;;  %v2855_v57 = vld [vmem:[%s3119_s23 + $0xc4] ss:$16 sps:$4 sm:$0xff]  }
  0x22   : > { %1768 = vmatprep.subr.bf16.mxu1 %v3036_v0  ;;  %v2857_v58 = vld [vmem:[%s3119_s23 + $0xcc] ss:$16 sps:$4 sm:$0xff]   ;;  %v2859_v59 = vld [vmem:[%s3119_s23 + $0xc0] ss:$16 sps:$4 sm:$0xff]   ;;  %v2860_v60 = vld [vmem:[%s3119_s23 + $0xc8] ss:$16 sps:$4 sm:$0xff]  }
  0x23   : > { %v2861_v61 = vld [vmem:[%s3119_s23 + $0xe4] ss:$16 sps:$4 sm:$0xff]   ;;  %v2863_v62 = vld [vmem:[%s3119_s23 + $0xec] ss:$16 sps:$4 sm:$0xff]   ;;  %v2865_v63 = vld [vmem:[%s3119_s23 + $0xe0] ss:$16 sps:$4 sm:$0xff]  }
  0x24   : > { %1480 = vmatpush1.bf16.msra.mxu0 %v2797_v11  ;;  %v2867_v1 = vld [vmem:[%s3119_s23 + $0x104] ss:$16 sps:$4 sm:$0xff]   ;;  %v2869_v2 = vld [vmem:[%s3119_s23 + $0x10c] ss:$16 sps:$4 sm:$0xff]   ;;  %v2871_v3 = vld [vmem:[%s3119_s23 + $0x100] ss:$16 sps:$4 sm:$0xff]  }
  0x25   : > { %1769 = vmatpush1.bf16.msra.mxu1 %v2798_v12  ;;  %1481 = vmatprep.subr.bf16.mxu0 %v3036_v0  ;;  %v2872_v4 = vld [vmem:[%s3119_s23 + $0x108] ss:$16 sps:$4 sm:$0xff]   ;;  %v2873_v5 = vld [vmem:[%s3119_s23 + $0x124] ss:$16 sps:$4 sm:$0xff]   ;;  %v2875_v6 = vld [vmem:[%s3119_s23 + $0x12c] ss:$16 sps:$4 sm:$0xff]  }
  0x26   : > { %1770 = vmatprep.subr.bf16.mxu1 %v3036_v0  ;;  %v2877_v7 = vld [vmem:[%s3119_s23 + $0x120] ss:$16 sps:$4 sm:$0xff]   ;;  %v2878_v8 = vld [vmem:[%s3119_s23 + $0x128] ss:$16 sps:$4 sm:$0xff]   ;;  %v2879_v9 = vld [vmem:[%s3119_s23 + $0x144] ss:$16 sps:$4 sm:$0xff]  }
  0x27   : > { %v2881_v10 = vld [vmem:[%s3119_s23 + $0x14c] ss:$16 sps:$4 sm:$0xff]   ;;  %v2883_v11 = vld [vmem:[%s3119_s23 + $0x140] ss:$16 sps:$4 sm:$0xff]   ;;  %v2884_v12 = vld [vmem:[%s3119_s23 + $0x148] ss:$16 sps:$4 sm:$0xff]  }
  0x28   : > { %1482 = vmatpush1.bf16.msra.mxu0 %v2799_v13  ;;  %v2885_v13 = vld [vmem:[%s3119_s23 + $0x164] ss:$16 sps:$4 sm:$0xff]   ;;  %v2895_v19 = vld [vmem:[%s3119_s23 + $0x180] ss:$16 sps:$4 sm:$0xff]  }
  0x29   : > { %1771 = vmatpush1.bf16.msra.mxu1 %v2800_v14  ;;  %1483 = vmatprep.subr.bf16.mxu0 %v3036_v0  ;;  %v2887_v14 = vld [vmem:[%s3119_s23 + $0x16c] ss:$16 sps:$4 sm:$0xff]   ;;  %v2897_v21 = vld [vmem:[%s3119_s23 + $0x1a4] ss:$16 sps:$4 sm:$0xff]  }
  0x2a   : > { %1772 = vmatprep.subr.bf16.mxu1 %v3036_v0 }
  0x2c   : > { %1484 = vmatpush1.bf16.msra.mxu0 %v2801_v15  ;;  %v2889_v15 = vld [vmem:[%s3119_s23 + $0x160] ss:$16 sps:$4 sm:$0xff]  }
  0x2d   : > { %1773 = vmatpush1.bf16.msra.mxu1 %v2802_v16  ;;  %1485 = vmatprep.subr.bf16.mxu0 %v3036_v0  ;;  %v2890_v16 = vld [vmem:[%s3119_s23 + $0x168] ss:$16 sps:$4 sm:$0xff]  }
  0x2e   : > { %1774 = vmatprep.subr.bf16.mxu1 %v3036_v0 }
  0x30   : > { %1486 = vmatpush2.bf16.msra.mxu0 %v2803_v17  ;;  %v2891_v17 = vld [vmem:[%s3119_s23 + $0x184] ss:$16 sps:$4 sm:$0xff]  }
  0x31   : > { %1775 = vmatpush2.bf16.msra.mxu1 %v2804_v18  ;;  %1487 = vmatprep.subr.bf16.mxu0 %v3036_v0  ;;  %v2893_v18 = vld [vmem:[%s3119_s23 + $0x18c] ss:$16 sps:$4 sm:$0xff]  }
  0x32   : > { %1776 = vmatprep.subr.bf16.mxu1 %v3036_v0 }
  0x34   : > { %1488 = vmatpush2.bf16.msra.mxu0 %v2805_v20  ;;  %v2896_v20 = vld [vmem:[%s3119_s23 + $0x188] ss:$16 sps:$4 sm:$0xff]  }
  0x35   : > { %1777 = vmatpush2.bf16.msra.mxu1 %v2806_v22  ;;  %1489 = vmatprep.subr.bf16.mxu0 %v3036_v0  ;;  %v2899_v22 = vld [vmem:[%s3119_s23 + $0x1ac] ss:$16 sps:$4 sm:$0xff]  }
  0x36   : > { %1778 = vmatprep.subr.bf16.mxu1 %v3036_v0 }
  0x38   : > { %1490 = vmatpush2.bf16.msra.mxu0 %v2807_v23  ;;  %v2901_v23 = vld [vmem:[%s3119_s23 + $0x1a0] ss:$16 sps:$4 sm:$0xff]  }
  0x39   : > { %1779 = vmatpush2.bf16.msra.mxu1 %v2808_v24  ;;  %1491 = vmatprep.subr.bf16.mxu0 %v3036_v0  ;;  %v2902_v24 = vld [vmem:[%s3119_s23 + $0x1a8] ss:$16 sps:$4 sm:$0xff]  }
  0x3a   : > { %1780 = vmatprep.subr.bf16.mxu1 %v3036_v0 }
  0x3c   : > { %1492 = vmatpush2.bf16.msra.mxu0 %v2809_v25  ;;  %v2903_v25 = vld [vmem:[%s3119_s23 + $0x1c4] ss:$16 sps:$4 sm:$0xff]  }
  0x3d   : > { %1781 = vmatpush2.bf16.msra.mxu1 %v2810_v26  ;;  %1493 = vmatprep.subr.bf16.mxu0 %v3036_v0  ;;  %v2905_v26 = vld [vmem:[%s3119_s23 + $0x1cc] ss:$16 sps:$4 sm:$0xff]  }
  0x3e   : > { %1782 = vmatprep.subr.bf16.mxu1 %v3036_v0 }
  0x40   : > { %1494 = vmatpush2.bf16.msra.mxu0 %v2811_v27  ;;  %v2907_v27 = vld [vmem:[%s3119_s23 + $0x1c0] ss:$16 sps:$4 sm:$0xff]  }
  0x41   : > { %1783 = vmatpush2.bf16.msra.mxu1 %v2812_v28  ;;  %1495 = vmatprep.subr.bf16.mxu0 %v3036_v0  ;;  %v2908_v28 = vld [vmem:[%s3119_s23 + $0x1c8] ss:$16 sps:$4 sm:$0xff]  }
  0x42   : > { %1784 = vmatprep.subr.bf16.mxu1 %v3036_v0 }
  0x44   : > { %1496 = vmatpush2.bf16.msra.mxu0 %v2813_v29  ;;  %v2909_v29 = vld [vmem:[%s3119_s23 + $0x1e4] ss:$16 sps:$4 sm:$0xff]  }
  0x45   : > { %1785 = vmatpush2.bf16.msra.mxu1 %v2814_v30  ;;  %1497 = vmatprep.subr.bf16.mxu0 %v3036_v0  ;;  %v2911_v30 = vld [vmem:[%s3119_s23 + $0x1ec] ss:$16 sps:$4 sm:$0xff]  }
  0x46   : > { %1786 = vmatprep.subr.bf16.mxu1 %v3036_v0 }
  0x48   : > { %1498 = vmatpush2.bf16.msra.mxu0 %v2815_v31  ;;  %v2913_v31 = vld [vmem:[%s3119_s23 + $0x1e0] ss:$16 sps:$4 sm:$0xff]  }
  0x49   : > { %1787 = vmatpush2.bf16.msra.mxu1 %v2816_v32  ;;  %1499 = vmatprep.subr.bf16.mxu0 %v3036_v0  ;;  %v2914_v32 = vld [vmem:[%s3119_s23 + $0x1e8] ss:$16 sps:$4 sm:$0xff]  }
  0x4a   : > { %1788 = vmatprep.subr.bf16.mxu1 %v3036_v0  ;;  %v2866_v0 = vld [vmem:[%s3119_s23 + $0xe8] ss:$16 sps:$4 sm:$0xff]  }
  0x4c   : > { %1500 = vmatpush2.bf16.msra.mxu0 %v2817_v33  ;;  %v2915_v33 = vld [vmem:[%s3119_s23 + $0x204] ss:$16 sps:$4 sm:$0xff]  }
  0x4d   : > { %1789 = vmatpush2.bf16.msra.mxu1 %v2818_v34  ;;  %v2917_v34 = vld [vmem:[%s3119_s23 + $0x20c] ss:$16 sps:$4 sm:$0xff]  }
  0x4f   : > { %1502 = vmatmul.mubr.bf16.vlgmr.msra.gmra.mxu0 %v2819_v35  ;;  %v2919_v35 = vld [vmem:[%s3119_s23 + $0x200] ss:$16 sps:$4 sm:$0xff]  }
  0x50   : > { %1791 = vmatmul.mubr.bf16.vlgmr.msra.gmra.mxu1 %v2822_v36  ;;  %1509 = vmatprep.mubr.bf16.mxu0 %v2825_v37  ;;  %v2920_v36 = vld [vmem:[%s3119_s23 + $0x208] ss:$16 sps:$4 sm:$0xff]   ;;  %v2921_v37 = vld [vmem:[%s3119_s23 + $0x224] ss:$16 sps:$4 sm:$0xff]  }
  0x51   : > { %1798 = vmatprep.mubr.bf16.mxu1 %v2827_v38  ;;  %v2923_v38 = vld [vmem:[%s3119_s23 + $0x22c] ss:$16 sps:$4 sm:$0xff]  }
  0x57   : > { %1510 = vmatmul.mubr.bf16.gmra.mxu0 %v2829_v39  ;;  %v2925_v39 = vld [vmem:[%s3119_s23 + $0x220] ss:$16 sps:$4 sm:$0xff]  }
  0x58   : > { %1799 = vmatmul.mubr.bf16.gmra.mxu1 %v2830_v40  ;;  %1517 = vmatprep.mubr.bf16.mxu0 %v2831_v41  ;;  %v2926_v40 = vld [vmem:[%s3119_s23 + $0x228] ss:$16 sps:$4 sm:$0xff]   ;;  %v2927_v41 = vld [vmem:[%s3119_s23 + $0x244] ss:$16 sps:$4 sm:$0xff]  }
  0x59   : > { %1806 = vmatprep.mubr.bf16.mxu1 %v2833_v42  ;;  %v2929_v42 = vld [vmem:[%s3119_s23 + $0x24c] ss:$16 sps:$4 sm:$0xff]  }
  0x5f   : > { %1518 = vmatmul.mubr.bf16.gmra.mxu0 %v2835_v43  ;;  %v2931_v43 = vld [vmem:[%s3119_s23 + $0x240] ss:$16 sps:$4 sm:$0xff]  }
  0x60   : > { %1807 = vmatmul.mubr.bf16.gmra.mxu1 %v2836_v44  ;;  %1525 = vmatprep.mubr.bf16.mxu0 %v2837_v45  ;;  %v2932_v44 = vld [vmem:[%s3119_s23 + $0x248] ss:$16 sps:$4 sm:$0xff]   ;;  %v2933_v45 = vld [vmem:[%s3119_s23 + $0x264] ss:$16 sps:$4 sm:$0xff]  }
  0x61   : > { %1814 = vmatprep.mubr.bf16.mxu1 %v2839_v46  ;;  %v2935_v46 = vld [vmem:[%s3119_s23 + $0x26c] ss:$16 sps:$4 sm:$0xff]  }
  0x67   : > { %1526 = vmatmul.mubr.bf16.gmra.mxu0 %v2841_v47  ;;  %v2937_v47 = vld [vmem:[%s3119_s23 + $0x260] ss:$16 sps:$4 sm:$0xff]  }
  0x68   : > { %1815 = vmatmul.mubr.bf16.gmra.mxu1 %v2842_v48  ;;  %1533 = vmatprep.mubr.bf16.mxu0 %v2843_v49  ;;  %v2938_v48 = vld [vmem:[%s3119_s23 + $0x268] ss:$16 sps:$4 sm:$0xff]   ;;  %v2939_v49 = vld [vmem:[%s3119_s23 + $0x284] ss:$16 sps:$4 sm:$0xff]  }
  0x69   : > { %1822 = vmatprep.mubr.bf16.mxu1 %v2845_v50  ;;  %v2941_v50 = vld [vmem:[%s3119_s23 + $0x28c] ss:$16 sps:$4 sm:$0xff]  }
  0x6f   : > { %1534 = vmatmul.mubr.bf16.gmra.mxu0 %v2847_v51  ;;  %v2943_v51 = vld [vmem:[%s3119_s23 + $0x280] ss:$16 sps:$4 sm:$0xff]  }
  0x70   : > { %1823 = vmatmul.mubr.bf16.gmra.mxu1 %v2848_v52  ;;  %1541 = vmatprep.mubr.bf16.mxu0 %v2849_v53  ;;  %v2944_v52 = vld [vmem:[%s3119_s23 + $0x288] ss:$16 sps:$4 sm:$0xff]   ;;  %v2945_v53 = vld [vmem:[%s3119_s23 + $0x2a4] ss:$16 sps:$4 sm:$0xff]  }
  0x71   : > { %1830 = vmatprep.mubr.bf16.mxu1 %v2851_v54  ;;  %v2947_v54 = vld [vmem:[%s3119_s23 + $0x2ac] ss:$16 sps:$4 sm:$0xff]  }
  0x77   : > { %1542 = vmatmul.mubr.bf16.gmra.mxu0 %v2853_v55  ;;  %v2949_v55 = vld [vmem:[%s3119_s23 + $0x2a0] ss:$16 sps:$4 sm:$0xff]  }
  0x78   : > { %1831 = vmatmul.mubr.bf16.gmra.mxu1 %v2854_v56  ;;  %1549 = vmatprep.mubr.bf16.mxu0 %v2855_v57  ;;  %v2950_v56 = vld [vmem:[%s3119_s23 + $0x2a8] ss:$16 sps:$4 sm:$0xff]   ;;  %v2951_v57 = vld [vmem:[%s3119_s23 + $0x2c4] ss:$16 sps:$4 sm:$0xff]  }
  0x79   : > { %1838 = vmatprep.mubr.bf16.mxu1 %v2857_v58  ;;  %v2953_v58 = vld [vmem:[%s3119_s23 + $0x2cc] ss:$16 sps:$4 sm:$0xff]  }
  0x7f   : > { %1550 = vmatmul.mubr.bf16.gmra.mxu0 %v2859_v59  ;;  %v2955_v59 = vld [vmem:[%s3119_s23 + $0x2c0] ss:$16 sps:$4 sm:$0xff]  }
  0x80   : > { %1839 = vmatmul.mubr.bf16.gmra.mxu1 %v2860_v60  ;;  %1557 = vmatprep.mubr.bf16.mxu0 %v2861_v61  ;;  %v2956_v60 = vld [vmem:[%s3119_s23 + $0x2c8] ss:$16 sps:$4 sm:$0xff]   ;;  %v2957_v61 = vld [vmem:[%s3119_s23 + $0x2e4] ss:$16 sps:$4 sm:$0xff]  }
  0x81   : > { %1846 = vmatprep.mubr.bf16.mxu1 %v2863_v62  ;;  %v2959_v62 = vld [vmem:[%s3119_s23 + $0x2ec] ss:$16 sps:$4 sm:$0xff]  }
  0x87   : > { %1558 = vmatmul.mubr.bf16.gmra.mxu0 %v2865_v63  ;;  %v2961_v63 = vld [vmem:[%s3119_s23 + $0x2e0] ss:$16 sps:$4 sm:$0xff]  }
  0x88   : > { %1847 = vmatmul.mubr.bf16.gmra.mxu1 %v2866_v0  ;;  %1565 = vmatprep.mubr.bf16.mxu0 %v2867_v1  ;;  %v2962_v0 = vld [vmem:[%s3119_s23 + $0x2e8] ss:$16 sps:$4 sm:$0xff]   ;;  %v2963_v1 = vld [vmem:[%s3119_s23 + $0x304] ss:$16 sps:$4 sm:$0xff]  }
  0x89   : > { %1854 = vmatprep.mubr.bf16.mxu1 %v2869_v2  ;;  %v2965_v2 = vld [vmem:[%s3119_s23 + $0x30c] ss:$16 sps:$4 sm:$0xff]  }
  0x8f   : > { %1566 = vmatmul.mubr.bf16.gmra.mxu0 %v2871_v3  ;;  %v2967_v3 = vld [vmem:[%s3119_s23 + $0x300] ss:$16 sps:$4 sm:$0xff]  }
  0x90   : > { %1855 = vmatmul.mubr.bf16.gmra.mxu1 %v2872_v4  ;;  %1573 = vmatprep.mubr.bf16.mxu0 %v2873_v5  ;;  %v2968_v4 = vld [vmem:[%s3119_s23 + $0x308] ss:$16 sps:$4 sm:$0xff]   ;;  %v2969_v5 = vld [vmem:[%s3119_s23 + $0x324] ss:$16 sps:$4 sm:$0xff]  }
  0x91   : > { %1862 = vmatprep.mubr.bf16.mxu1 %v2875_v6  ;;  %v2971_v6 = vld [vmem:[%s3119_s23 + $0x32c] ss:$16 sps:$4 sm:$0xff]  }
  0x97   : > { %1574 = vmatmul.mubr.bf16.gmra.mxu0 %v2877_v7 }
  0x98   : > { %1863 = vmatmul.mubr.bf16.gmra.mxu1 %v2878_v8  ;;  %1581 = vmatprep.mubr.bf16.mxu0 %v2879_v9 }
  0x99   : > { %1870 = vmatprep.mubr.bf16.mxu1 %v2881_v10 }
  0x9f   : > { %1582 = vmatmul.mubr.bf16.gmra.mxu0 %v2883_v11  ;;  %v3258_v11 = vld [vmem:[%s3436_s2] ss:$0 sm:$0xff] }
  0xa0   : > { %1871 = vmatmul.mubr.bf16.gmra.mxu1 %v2884_v12  ;;  %1589 = vmatprep.mubr.bf16.mxu0 %v2885_v13 }
  0xa1   : > { %1878 = vmatprep.mubr.bf16.mxu1 %v2887_v14  ;;  %v2973_v14 = vld [vmem:[%s3119_s23 + $0x320] ss:$16 sps:$4 sm:$0xff]  }
  0xa7   : > { %1590 = vmatmul.mubr.bf16.gmra.mxu0 %v2889_v15 }
  0xa8   : > { %1879 = vmatmul.mubr.bf16.gmra.mxu1 %v2890_v16  ;;  %1597 = vmatprep.mubr.bf16.mxu0 %v2891_v17  ;;  %v2974_v16 = vld [vmem:[%s3119_s23 + $0x328] ss:$16 sps:$4 sm:$0xff]   ;;  %v2975_v17 = vld [vmem:[%s3119_s23 + $0x344] ss:$16 sps:$4 sm:$0xff]  }
  0xa9   : > { %1886 = vmatprep.mubr.bf16.mxu1 %v2893_v18 }
  0xaf   : > { %1598 = vmatmul.mubr.bf16.gmra.mxu0 %v2895_v19 }
  0xb0   : > { %1887 = vmatmul.mubr.bf16.gmra.mxu1 %v2896_v20  ;;  %1605 = vmatprep.mubr.bf16.mxu0 %v2897_v21  ;;  %v2977_v21 = vld [vmem:[%s3119_s23 + $0x34c] ss:$16 sps:$4 sm:$0xff]  }
  0xb1   : > { %1894 = vmatprep.mubr.bf16.mxu1 %v2899_v22 }
  0xb7   : > { %1606 = vmatmul.mubr.bf16.gmra.mxu0 %v2901_v23 }
  0xb8   : > { %1895 = vmatmul.mubr.bf16.gmra.mxu1 %v2902_v24  ;;  %1613 = vmatprep.mubr.bf16.mxu0 %v2903_v25 }
  0xb9   : > { %1902 = vmatprep.mubr.bf16.mxu1 %v2905_v26 }
  0xbf   : > { %1614 = vmatmul.mubr.bf16.gmra.mxu0 %v2907_v27 }
  0xc0   : > { %1903 = vmatmul.mubr.bf16.gmra.mxu1 %v2908_v28  ;;  %1621 = vmatprep.mubr.bf16.mxu0 %v2909_v29 }
  0xc1   : > { %1910 = vmatprep.mubr.bf16.mxu1 %v2911_v30 }
  0xc7   : > { %1622 = vmatmul.mubr.bf16.gmra.mxu0 %v2913_v31 }
  0xc8   : > { %1911 = vmatmul.mubr.bf16.gmra.mxu1 %v2914_v32  ;;  %1629 = vmatprep.mubr.bf16.mxu0 %v2915_v33  ;;  %v2979_v32 = vld [vmem:[%s3119_s23 + $0x340] ss:$16 sps:$4 sm:$0xff]  }
  0xc9   : > { %1918 = vmatprep.mubr.bf16.mxu1 %v2917_v34  ;;  %v2980_v34 = vld [vmem:[%s3119_s23 + $0x348] ss:$16 sps:$4 sm:$0xff]  }
  0xcf   : > { %1630 = vmatmul.mubr.bf16.gmra.mxu0 %v2919_v35  ;;  %v2981_v35 = vld [vmem:[%s3119_s23 + $0x364] ss:$16 sps:$4 sm:$0xff]  }
  0xd0   : > { %1919 = vmatmul.mubr.bf16.gmra.mxu1 %v2920_v36  ;;  %1637 = vmatprep.mubr.bf16.mxu0 %v2921_v37 }
  0xd1   : > { %1926 = vmatprep.mubr.bf16.mxu1 %v2923_v38 }
  0xd7   : > { %1638 = vmatmul.mubr.bf16.gmra.mxu0 %v2925_v39  ;;  %v2983_v39 = vld [vmem:[%s3119_s23 + $0x36c] ss:$16 sps:$4 sm:$0xff]  }
  0xd8   : > { %1927 = vmatmul.mubr.bf16.gmra.mxu1 %v2926_v40  ;;  %1645 = vmatprep.mubr.bf16.mxu0 %v2927_v41 }
  0xd9   : > { %1934 = vmatprep.mubr.bf16.mxu1 %v2929_v42 }
  0xdf   : > { %1646 = vmatmul.mubr.bf16.gmra.mxu0 %v2931_v43 }
  0xe0   : > { %1935 = vmatmul.mubr.bf16.gmra.mxu1 %v2932_v44  ;;  %1653 = vmatprep.mubr.bf16.mxu0 %v2933_v45 }
  0xe1   : > { %1942 = vmatprep.mubr.bf16.mxu1 %v2935_v46 }
  0xe7   : > { %1654 = vmatmul.mubr.bf16.gmra.mxu0 %v2937_v47 }
  0xe8   : > { %1943 = vmatmul.mubr.bf16.gmra.mxu1 %v2938_v48  ;;  %1661 = vmatprep.mubr.bf16.mxu0 %v2939_v49 }
  0xe9   : > { %1950 = vmatprep.mubr.bf16.mxu1 %v2941_v50  ;;  %v2985_v50 = vld [vmem:[%s3119_s23 + $0x360] ss:$16 sps:$4 sm:$0xff]  }
  0xef   : > { %1662 = vmatmul.mubr.bf16.gmra.mxu0 %v2943_v51 }
  0xf0   : > { %1951 = vmatmul.mubr.bf16.gmra.mxu1 %v2944_v52  ;;  %1669 = vmatprep.mubr.bf16.mxu0 %v2945_v53  ;;  %v2986_v52 = vld [vmem:[%s3119_s23 + $0x368] ss:$16 sps:$4 sm:$0xff]   ;;  %v2989_v53 = vld [vmem:[%s3119_s23 + $0x384] ss:$16 sps:$4 sm:$0xff]  }
  0xf1   : > { %1958 = vmatprep.mubr.bf16.mxu1 %v2947_v54 }
  0xf7   : > { %1670 = vmatmul.mubr.bf16.gmra.mxu0 %v2949_v55 }
  0xf8   : > { %1959 = vmatmul.mubr.bf16.gmra.mxu1 %v2950_v56  ;;  %1677 = vmatprep.mubr.bf16.mxu0 %v2951_v57  ;;  %v2992_v57 = vld [vmem:[%s3119_s23 + $0x38c] ss:$16 sps:$4 sm:$0xff]  }
  0xf9   : > { %1966 = vmatprep.mubr.bf16.mxu1 %v2953_v58 }
  0xff   : > { %1678 = vmatmul.mubr.bf16.gmra.mxu0 %v2955_v59 }
 0x100   : > { %1967 = vmatmul.mubr.bf16.gmra.mxu1 %v2956_v60  ;;  %1685 = vmatprep.mubr.bf16.mxu0 %v2957_v61 }
 0x101   : > { %1974 = vmatprep.mubr.bf16.mxu1 %v2959_v62 }
 0x107   : > { %1686 = vmatmul.mubr.bf16.gmra.mxu0 %v2961_v63 }
 0x108   : > { %1975 = vmatmul.mubr.bf16.gmra.mxu1 %v2962_v0  ;;  %1693 = vmatprep.mubr.bf16.mxu0 %v2963_v1 }
 0x109   : > { %1982 = vmatprep.mubr.bf16.mxu1 %v2965_v2 }
 0x10f   : > { %v1503_v7 = vpop.f32.mrf.mxu0  ;;  %1694 = vmatmul.mubr.bf16.gmra.mxu0 %v2967_v3 }
 0x110   : > { %v1792_v8 = vpop.f32.mrf.mxu1  ;;  %1983 = vmatmul.mubr.bf16.gmra.mxu1 %v2968_v4  ;;  %1701 = vmatprep.mubr.bf16.mxu0 %v2969_v5  ;;  %v2987_v4 = vld [vmem:[%s3119_s23 + $0x380] ss:$16 sps:$4 sm:$0xff]  }
 0x111   : > { %v1793_v9 = vadd.f32 %v1792_v8, %v1503_v7  ;;  %v1505_v10 = vpop.f32.mrf.mxu0  ;;  %1990 = vmatprep.mubr.bf16.mxu1 %v2971_v6  ;;  %v2990_v6 = vld [vmem:[%s3119_s23 + $0x388] ss:$16 sps:$4 sm:$0xff]   ;;  %v2995_v7 = vld [vmem:[%s3119_s23 + $0x3a4] ss:$16 sps:$4 sm:$0xff]  }
 0x112   : > { %v1794_v12 = vpop.f32.mrf.mxu1 }
 0x113   : > { %v1506_v13 = vpop.f32.mrf.mxu0  ;;  %v2249_v18 = vadd.f32 %v3258_v11, %v1793_v9  ;;  %v2998_v12 = vld [vmem:[%s3119_s23 + $0x3ac] ss:$16 sps:$4 sm:$0xff]  }
 0x114   : > { %v1795_v15 = vpop.f32.mrf.mxu1 }
 0x115   : > { %v1796_v19 = vadd.f32 %v1795_v15, %v1506_v13  ;;  %v1508_v20 = vpop.f32.mrf.mxu0  ;;  %v2313_v23 = vmax.f32 %v2249_v18, 0.0 }
 0x116   : > { %v1797_v22 = vpop.f32.mrf.mxu1 }
 0x117   : > { %v1511_v24 = vpop.f32.mrf.mxu0  ;;  %1702 = vmatmul.mubr.bf16.gmra.mxu0 %v2973_v14  ;;  %2377 = vst [vmem:[%s3269_s29] sm:$0xff] %v2313_v23  ;;  %v2250_v26 = vadd.f32 %v3258_v11, %v1796_v19  ;;  %v2993_v23 = vld [vmem:[%s3119_s23 + $0x3a0] ss:$16 sps:$4 sm:$0xff]  }
 0x118   : > { %v1800_v25 = vpop.f32.mrf.mxu1  ;;  %1991 = vmatmul.mubr.bf16.gmra.mxu1 %v2974_v16  ;;  %1709 = vmatprep.mubr.bf16.mxu0 %v2975_v17 }
 0x119   : > { %v1801_v27 = vadd.f32 %v1800_v25, %v1511_v24  ;;  %v1513_v28 = vpop.f32.mrf.mxu0  ;;  %1998 = vmatprep.mubr.bf16.mxu1 %v2977_v21  ;;  %v2314_v30 = vmax.f32 %v2250_v26, 0.0  ;;  %v2996_v25 = vld [vmem:[%s3119_s23 + $0x3a8] ss:$16 sps:$4 sm:$0xff]   ;;  %v3001_v26 = vld [vmem:[%s3119_s23 + $0x3c4] ss:$16 sps:$4 sm:$0xff]  }
 0x11a   : > { %v1802_v29 = vpop.f32.mrf.mxu1 }
 0x11b   : > { %v1514_v31 = vpop.f32.mrf.mxu0  ;;  %2378 = vst [vmem:[%s3269_s29 + $0x8] sm:$0xff] %v2314_v30  ;;  %v2251_v36 = vadd.f32 %v3258_v11, %v1801_v27  ;;  %v3004_v30 = vld [vmem:[%s3119_s23 + $0x3cc] ss:$16 sps:$4 sm:$0xff]  }
 0x11c   : > { %v1803_v33 = vpop.f32.mrf.mxu1 }
 0x11d   : > { %v1804_v37 = vadd.f32 %v1803_v33, %v1514_v31  ;;  %v1516_v38 = vpop.f32.mrf.mxu0  ;;  %v2315_v41 = vmax.f32 %v2251_v36, 0.0 }
 0x11e   : > { %v1805_v40 = vpop.f32.mrf.mxu1 }
 0x11f   : > { %v1519_v42 = vpop.f32.mrf.mxu0  ;;  %1710 = vmatmul.mubr.bf16.gmra.mxu0 %v2979_v32  ;;  %2379 = vst [vmem:[%s3269_s29 + $0x10] sm:$0xff] %v2315_v41  ;;  %v2252_v44 = vadd.f32 %v3258_v11, %v1804_v37  ;;  %v2999_v41 = vld [vmem:[%s3119_s23 + $0x3c0] ss:$16 sps:$4 sm:$0xff]  }
 0x120   : > { %v1808_v43 = vpop.f32.mrf.mxu1  ;;  %1999 = vmatmul.mubr.bf16.gmra.mxu1 %v2980_v34  ;;  %1717 = vmatprep.mubr.bf16.mxu0 %v2981_v35 }
 0x121   : > { %v1809_v45 = vadd.f32 %v1808_v43, %v1519_v42  ;;  %v1521_v46 = vpop.f32.mrf.mxu0  ;;  %2006 = vmatprep.mubr.bf16.mxu1 %v2983_v39  ;;  %v2316_v48 = vmax.f32 %v2252_v44, 0.0  ;;  %v3002_v43 = vld [vmem:[%s3119_s23 + $0x3c8] ss:$16 sps:$4 sm:$0xff]   ;;  %v3007_v44 = vld [vmem:[%s3119_s23 + $0x3e4] ss:$16 sps:$4 sm:$0xff]  }
 0x122   : > { %v1810_v47 = vpop.f32.mrf.mxu1 }
 0x123   : > { %v1522_v49 = vpop.f32.mrf.mxu0  ;;  %2380 = vst [vmem:[%s3269_s29 + $0x18] sm:$0xff] %v2316_v48  ;;  %v2253_v54 = vadd.f32 %v3258_v11, %v1809_v45  ;;  %v3010_v48 = vld [vmem:[%s3119_s23 + $0x3ec] ss:$16 sps:$4 sm:$0xff]  }
 0x124   : > { %v1811_v51 = vpop.f32.mrf.mxu1 }
 0x125   : > { %v1812_v55 = vadd.f32 %v1811_v51, %v1522_v49  ;;  %v1524_v56 = vpop.f32.mrf.mxu0  ;;  %v2317_v59 = vmax.f32 %v2253_v54, 0.0 }
 0x126   : > { %v1813_v58 = vpop.f32.mrf.mxu1 }
 0x127   : > { %v1527_v60 = vpop.f32.mrf.mxu0  ;;  %1718 = vmatmul.mubr.bf16.gmra.mxu0 %v2985_v50  ;;  %2381 = vst [vmem:[%s3269_s29 + $0x20] sm:$0xff] %v2317_v59  ;;  %v2254_v62 = vadd.f32 %v3258_v11, %v1812_v55  ;;  %v3005_v59 = vld [vmem:[%s3119_s23 + $0x3e0] ss:$16 sps:$4 sm:$0xff]  }
 0x128   : > { %v1816_v61 = vpop.f32.mrf.mxu1  ;;  %2007 = vmatmul.mubr.bf16.gmra.mxu1 %v2986_v52  ;;  %1725 = vmatprep.mubr.bf16.mxu0 %v2989_v53 }
 0x129   : > { %v1817_v63 = vadd.f32 %v1816_v61, %v1527_v60  ;;  %v1529_v0 = vpop.f32.mrf.mxu0  ;;  %2014 = vmatprep.mubr.bf16.mxu1 %v2992_v57  ;;  %v2318_v2 = vmax.f32 %v2254_v62, 0.0  ;;  %v3008_v61 = vld [vmem:[%s3119_s23 + $0x3e8] ss:$16 sps:$4 sm:$0xff]  }
 0x12a   : > { %v1818_v1 = vpop.f32.mrf.mxu1 }
 0x12b   : > { %v1530_v3 = vpop.f32.mrf.mxu0  ;;  %2382 = vst [vmem:[%s3269_s29 + $0x28] sm:$0xff] %v2318_v2  ;;  %v2255_v8 = vadd.f32 %v3258_v11, %v1817_v63 }
 0x12c   : > { %v1819_v5 = vpop.f32.mrf.mxu1 }
 0x12d   : > { %v1820_v9 = vadd.f32 %v1819_v5, %v1530_v3  ;;  %v1532_v10 = vpop.f32.mrf.mxu0  ;;  %v2319_v14 = vmax.f32 %v2255_v8, 0.0 }
 0x12e   : > { %v1821_v13 = vpop.f32.mrf.mxu1 }
 0x12f   : > { %v1535_v15 = vpop.f32.mrf.mxu0  ;;  %1726 = vmatmul.mubr.bf16.gmra.mxu0 %v2987_v4  ;;  %2383 = vst [vmem:[%s3269_s29 + $0x30] sm:$0xff] %v2319_v14  ;;  %v2256_v17 = vadd.f32 %v3258_v11, %v1820_v9 }
 0x130   : > { %v1824_v16 = vpop.f32.mrf.mxu1  ;;  %2015 = vmatmul.mubr.bf16.gmra.mxu1 %v2990_v6  ;;  %1733 = vmatprep.mubr.bf16.mxu0 %v2995_v7 }
 0x131   : > { %v1825_v18 = vadd.f32 %v1824_v16, %v1535_v15  ;;  %v1537_v19 = vpop.f32.mrf.mxu0  ;;  %2022 = vmatprep.mubr.bf16.mxu1 %v2998_v12  ;;  %v2320_v21 = vmax.f32 %v2256_v17, 0.0 }
 0x132   : > { %v1826_v20 = vpop.f32.mrf.mxu1 }
 0x133   : > { %v1538_v22 = vpop.f32.mrf.mxu0  ;;  %2384 = vst [vmem:[%s3269_s29 + $0x38] sm:$0xff] %v2320_v21  ;;  %v2257_v27 = vadd.f32 %v3258_v11, %v1825_v18 }
 0x134   : > { %v1827_v24 = vpop.f32.mrf.mxu1 }
 0x135   : > { %v1828_v28 = vadd.f32 %v1827_v24, %v1538_v22  ;;  %v1540_v29 = vpop.f32.mrf.mxu0  ;;  %v2321_v32 = vmax.f32 %v2257_v27, 0.0 }
 0x136   : > { %v1829_v31 = vpop.f32.mrf.mxu1 }
 0x137   : > { %v1543_v33 = vpop.f32.mrf.mxu0  ;;  %1734 = vmatmul.mubr.bf16.gmra.mxu0 %v2993_v23  ;;  %2385 = vst [vmem:[%s3269_s29 + $0x40] sm:$0xff] %v2321_v32  ;;  %v2258_v35 = vadd.f32 %v3258_v11, %v1828_v28 }
 0x138   : > { %v1832_v34 = vpop.f32.mrf.mxu1  ;;  %2023 = vmatmul.mubr.bf16.gmra.mxu1 %v2996_v25  ;;  %1741 = vmatprep.mubr.bf16.mxu0 %v3001_v26 }
 0x139   : > { %v1833_v36 = vadd.f32 %v1832_v34, %v1543_v33  ;;  %v1545_v37 = vpop.f32.mrf.mxu0  ;;  %2030 = vmatprep.mubr.bf16.mxu1 %v3004_v30  ;;  %v2322_v39 = vmax.f32 %v2258_v35, 0.0 }
 0x13a   : > { %v1834_v38 = vpop.f32.mrf.mxu1 }
 0x13b   : > { %v1546_v40 = vpop.f32.mrf.mxu0  ;;  %2386 = vst [vmem:[%s3269_s29 + $0x48] sm:$0xff] %v2322_v39  ;;  %v2259_v45 = vadd.f32 %v3258_v11, %v1833_v36 }
 0x13c   : > { %v1835_v42 = vpop.f32.mrf.mxu1 }
 0x13d   : > { %v1836_v46 = vadd.f32 %v1835_v42, %v1546_v40  ;;  %v1548_v47 = vpop.f32.mrf.mxu0  ;;  %v2323_v50 = vmax.f32 %v2259_v45, 0.0 }
 0x13e   : > { %v1837_v49 = vpop.f32.mrf.mxu1 }
 0x13f   : > { %v1551_v51 = vpop.f32.mrf.mxu0  ;;  %1742 = vmatmul.mubr.bf16.gmra.mxu0 %v2999_v41  ;;  %2387 = vst [vmem:[%s3269_s29 + $0x50] sm:$0xff] %v2323_v50  ;;  %v2260_v53 = vadd.f32 %v3258_v11, %v1836_v46 }
 0x140   : > { %v1840_v52 = vpop.f32.mrf.mxu1  ;;  %2031 = vmatmul.mubr.bf16.gmra.mxu1 %v3002_v43  ;;  %1749 = vmatprep.mubr.bf16.mxu0 %v3007_v44 }
 0x141   : > { %v1841_v54 = vadd.f32 %v1840_v52, %v1551_v51  ;;  %v1553_v55 = vpop.f32.mrf.mxu0  ;;  %2038 = vmatprep.mubr.bf16.mxu1 %v3010_v48  ;;  %v2324_v57 = vmax.f32 %v2260_v53, 0.0 }
 0x142   : > { %v1842_v56 = vpop.f32.mrf.mxu1 }
 0x143   : > { %v1554_v58 = vpop.f32.mrf.mxu0  ;;  %2388 = vst [vmem:[%s3269_s29 + $0x58] sm:$0xff] %v2324_v57  ;;  %v2261_v62 = vadd.f32 %v3258_v11, %v1841_v54 }
 0x144   : > { %v1843_v60 = vpop.f32.mrf.mxu1 }
 0x145   : > { %v1844_v63 = vadd.f32 %v1843_v60, %v1554_v58  ;;  %v1556_v0 = vpop.f32.mrf.mxu0  ;;  %v2325_v2 = vmax.f32 %v2261_v62, 0.0 }
 0x146   : > { %v1845_v1 = vpop.f32.mrf.mxu1 }
 0x147   : > { %v1559_v3 = vpop.f32.mrf.mxu0  ;;  %1750 = vmatmul.mubr.bf16.gmra.mxu0 %v3005_v59  ;;  %2389 = vst [vmem:[%s3269_s29 + $0x60] sm:$0xff] %v2325_v2  ;;  %v2262_v5 = vadd.f32 %v3258_v11, %v1844_v63 }
 0x148   : > { %v1848_v4 = vpop.f32.mrf.mxu1  ;;  %2039 = vmatmul.mubr.bf16.gmra.mxu1 %v3008_v61 }
 0x149   : > { %v1849_v6 = vadd.f32 %v1848_v4, %v1559_v3  ;;  %v1561_v7 = vpop.f32.mrf.mxu0  ;;  %v2326_v9 = vmax.f32 %v2262_v5, 0.0 }
 0x14a   : > { %v1850_v8 = vpop.f32.mrf.mxu1 }
 0x14b   : > { %v1562_v10 = vpop.f32.mrf.mxu0  ;;  %2390 = vst [vmem:[%s3269_s29 + $0x68] sm:$0xff] %v2326_v9  ;;  %v2263_v13 = vadd.f32 %v3258_v11, %v1849_v6 }
 0x14c   : > { %v1851_v12 = vpop.f32.mrf.mxu1 }
 0x14d   : > { %v1852_v14 = vadd.f32 %v1851_v12, %v1562_v10  ;;  %v1564_v15 = vpop.f32.mrf.mxu0  ;;  %v2327_v17 = vmax.f32 %v2263_v13, 0.0 }
 0x14e   : > { %v1853_v16 = vpop.f32.mrf.mxu1 }
 0x14f   : > { %v1567_v18 = vpop.f32.mrf.mxu0  ;;  %2391 = vst [vmem:[%s3269_s29 + $0x70] sm:$0xff] %v2327_v17  ;;  %v2264_v20 = vadd.f32 %v3258_v11, %v1852_v14 }
 0x150   : > { %v1856_v19 = vpop.f32.mrf.mxu1 }
 0x151   : > { %v1857_v21 = vadd.f32 %v1856_v19, %v1567_v18  ;;  %v1569_v22 = vpop.f32.mrf.mxu0  ;;  %v2328_v24 = vmax.f32 %v2264_v20, 0.0 }
 0x152   : > { %v1858_v23 = vpop.f32.mrf.mxu1 }
 0x153   : > { %v1570_v25 = vpop.f32.mrf.mxu0  ;;  %2392 = vst [vmem:[%s3269_s29 + $0x78] sm:$0xff] %v2328_v24  ;;  %v2265_v27 = vadd.f32 %v3258_v11, %v1857_v21 }
 0x154   : > { %v1859_v26 = vpop.f32.mrf.mxu1 }
 0x155   : > { %v1860_v28 = vadd.f32 %v1859_v26, %v1570_v25  ;;  %v1572_v29 = vpop.f32.mrf.mxu0  ;;  %v2329_v31 = vmax.f32 %v2265_v27, 0.0 }
 0x156   : > { %v1861_v30 = vpop.f32.mrf.mxu1 }
 0x157   : > { %v1575_v32 = vpop.f32.mrf.mxu0  ;;  %2393 = vst [vmem:[%s3269_s29 + $0x80] sm:$0xff] %v2329_v31  ;;  %v2266_v34 = vadd.f32 %v3258_v11, %v1860_v28 }
 0x158   : > { %v1864_v33 = vpop.f32.mrf.mxu1 }
 0x159   : > { %v1865_v35 = vadd.f32 %v1864_v33, %v1575_v32  ;;  %v1577_v36 = vpop.f32.mrf.mxu0  ;;  %v2330_v38 = vmax.f32 %v2266_v34, 0.0 }
 0x15a   : > { %v1866_v37 = vpop.f32.mrf.mxu1 }
 0x15b   : > { %v1578_v39 = vpop.f32.mrf.mxu0  ;;  %2394 = vst [vmem:[%s3269_s29 + $0x88] sm:$0xff] %v2330_v38  ;;  %v2267_v41 = vadd.f32 %v3258_v11, %v1865_v35 }
 0x15c   : > { %v1867_v40 = vpop.f32.mrf.mxu1 }
 0x15d   : > { %v1868_v42 = vadd.f32 %v1867_v40, %v1578_v39  ;;  %v1580_v43 = vpop.f32.mrf.mxu0  ;;  %v2331_v45 = vmax.f32 %v2267_v41, 0.0 }
 0x15e   : > { %v1869_v44 = vpop.f32.mrf.mxu1 }
 0x15f   : > { %v1583_v46 = vpop.f32.mrf.mxu0  ;;  %2395 = vst [vmem:[%s3269_s29 + $0x90] sm:$0xff] %v2331_v45  ;;  %v2268_v48 = vadd.f32 %v3258_v11, %v1868_v42 }
 0x160   : > { %v1872_v47 = vpop.f32.mrf.mxu1 }
 0x161   : > { %v1873_v49 = vadd.f32 %v1872_v47, %v1583_v46  ;;  %v1585_v50 = vpop.f32.mrf.mxu0  ;;  %v2332_v52 = vmax.f32 %v2268_v48, 0.0 }
 0x162   : > { %v1874_v51 = vpop.f32.mrf.mxu1 }
 0x163   : > { %v1586_v53 = vpop.f32.mrf.mxu0  ;;  %2396 = vst [vmem:[%s3269_s29 + $0x98] sm:$0xff] %v2332_v52  ;;  %v2269_v55 = vadd.f32 %v3258_v11, %v1873_v49 }
 0x164   : > { %v1875_v54 = vpop.f32.mrf.mxu1 }
 0x165   : > { %v1876_v56 = vadd.f32 %v1875_v54, %v1586_v53  ;;  %v1588_v57 = vpop.f32.mrf.mxu0  ;;  %v2333_v59 = vmax.f32 %v2269_v55, 0.0 }
 0x166   : > { %v1877_v58 = vpop.f32.mrf.mxu1 }
 0x167   : > { %v1591_v60 = vpop.f32.mrf.mxu0  ;;  %2397 = vst [vmem:[%s3269_s29 + $0xa0] sm:$0xff] %v2333_v59  ;;  %v2270_v62 = vadd.f32 %v3258_v11, %v1876_v56 }
 0x168   : > { %v1880_v61 = vpop.f32.mrf.mxu1 }
 0x169   : > { %v1881_v63 = vadd.f32 %v1880_v61, %v1591_v60  ;;  %v1593_v0 = vpop.f32.mrf.mxu0  ;;  %v2334_v2 = vmax.f32 %v2270_v62, 0.0 }
 0x16a   : > { %v1882_v1 = vpop.f32.mrf.mxu1 }
 0x16b   : > { %v1594_v3 = vpop.f32.mrf.mxu0  ;;  %2398 = vst [vmem:[%s3269_s29 + $0xa8] sm:$0xff] %v2334_v2  ;;  %v2271_v5 = vadd.f32 %v3258_v11, %v1881_v63 }
 0x16c   : > { %v1883_v4 = vpop.f32.mrf.mxu1 }
 0x16d   : > { %v1884_v6 = vadd.f32 %v1883_v4, %v1594_v3  ;;  %v1596_v7 = vpop.f32.mrf.mxu0  ;;  %v2335_v9 = vmax.f32 %v2271_v5, 0.0 }
 0x16e   : > { %v1885_v8 = vpop.f32.mrf.mxu1 }
 0x16f   : > { %v1599_v10 = vpop.f32.mrf.mxu0  ;;  %2399 = vst [vmem:[%s3269_s29 + $0xb0] sm:$0xff] %v2335_v9  ;;  %v2272_v13 = vadd.f32 %v3258_v11, %v1884_v6 }
 0x170   : > { %v1888_v12 = vpop.f32.mrf.mxu1 }
 0x171   : > { %v1889_v14 = vadd.f32 %v1888_v12, %v1599_v10  ;;  %v1601_v15 = vpop.f32.mrf.mxu0  ;;  %v2336_v17 = vmax.f32 %v2272_v13, 0.0 }
 0x172   : > { %v1890_v16 = vpop.f32.mrf.mxu1 }
 0x173   : > { %v1602_v18 = vpop.f32.mrf.mxu0  ;;  %2400 = vst [vmem:[%s3269_s29 + $0xb8] sm:$0xff] %v2336_v17  ;;  %v2273_v20 = vadd.f32 %v3258_v11, %v1889_v14 }
 0x174   : > { %v1891_v19 = vpop.f32.mrf.mxu1 }
 0x175   : > { %v1892_v21 = vadd.f32 %v1891_v19, %v1602_v18  ;;  %v1604_v22 = vpop.f32.mrf.mxu0  ;;  %v2337_v24 = vmax.f32 %v2273_v20, 0.0 }
 0x176   : > { %v1893_v23 = vpop.f32.mrf.mxu1 }
 0x177   : > { %v1607_v25 = vpop.f32.mrf.mxu0  ;;  %2401 = vst [vmem:[%s3269_s29 + $0xc0] sm:$0xff] %v2337_v24  ;;  %v2274_v27 = vadd.f32 %v3258_v11, %v1892_v21 }
 0x178   : > { %v1896_v26 = vpop.f32.mrf.mxu1 }
 0x179   : > { %v1897_v28 = vadd.f32 %v1896_v26, %v1607_v25  ;;  %v1609_v29 = vpop.f32.mrf.mxu0  ;;  %v2338_v31 = vmax.f32 %v2274_v27, 0.0 }
 0x17a   : > { %v1898_v30 = vpop.f32.mrf.mxu1 }
 0x17b   : > { %v1610_v32 = vpop.f32.mrf.mxu0  ;;  %2402 = vst [vmem:[%s3269_s29 + $0xc8] sm:$0xff] %v2338_v31  ;;  %v2275_v34 = vadd.f32 %v3258_v11, %v1897_v28 }
 0x17c   : > { %v1899_v33 = vpop.f32.mrf.mxu1 }
 0x17d   : > { %v1900_v35 = vadd.f32 %v1899_v33, %v1610_v32  ;;  %v1612_v36 = vpop.f32.mrf.mxu0  ;;  %v2339_v38 = vmax.f32 %v2275_v34, 0.0 }
 0x17e   : > { %v1901_v37 = vpop.f32.mrf.mxu1 }
 0x17f   : > { %v1615_v39 = vpop.f32.mrf.mxu0  ;;  %2403 = vst [vmem:[%s3269_s29 + $0xd0] sm:$0xff] %v2339_v38  ;;  %v2276_v41 = vadd.f32 %v3258_v11, %v1900_v35 }
 0x180   : > { %v1904_v40 = vpop.f32.mrf.mxu1 }
 0x181   : > { %v1905_v42 = vadd.f32 %v1904_v40, %v1615_v39  ;;  %v1617_v43 = vpop.f32.mrf.mxu0  ;;  %v2340_v45 = vmax.f32 %v2276_v41, 0.0 }
 0x182   : > { %v1906_v44 = vpop.f32.mrf.mxu1 }
 0x183   : > { %v1618_v46 = vpop.f32.mrf.mxu0  ;;  %2404 = vst [vmem:[%s3269_s29 + $0xd8] sm:$0xff] %v2340_v45  ;;  %v2277_v48 = vadd.f32 %v3258_v11, %v1905_v42 }
 0x184   : > { %v1907_v47 = vpop.f32.mrf.mxu1 }
 0x185   : > { %v1908_v49 = vadd.f32 %v1907_v47, %v1618_v46  ;;  %v1620_v50 = vpop.f32.mrf.mxu0  ;;  %v2341_v52 = vmax.f32 %v2277_v48, 0.0 }
 0x186   : > { %v1909_v51 = vpop.f32.mrf.mxu1 }
 0x187   : > { %v1623_v53 = vpop.f32.mrf.mxu0  ;;  %2405 = vst [vmem:[%s3269_s29 + $0xe0] sm:$0xff] %v2341_v52  ;;  %v2278_v55 = vadd.f32 %v3258_v11, %v1908_v49 }
 0x188   : > { %v1912_v54 = vpop.f32.mrf.mxu1 }
 0x189   : > { %v1913_v56 = vadd.f32 %v1912_v54, %v1623_v53  ;;  %v1625_v57 = vpop.f32.mrf.mxu0  ;;  %v2342_v59 = vmax.f32 %v2278_v55, 0.0 }
 0x18a   : > { %v1914_v58 = vpop.f32.mrf.mxu1 }
 0x18b   : > { %v1626_v60 = vpop.f32.mrf.mxu0  ;;  %2406 = vst [vmem:[%s3269_s29 + $0xe8] sm:$0xff] %v2342_v59  ;;  %v2279_v62 = vadd.f32 %v3258_v11, %v1913_v56 }
 0x18c   : > { %v1915_v61 = vpop.f32.mrf.mxu1 }
 0x18d   : > { %v1916_v63 = vadd.f32 %v1915_v61, %v1626_v60  ;;  %v1628_v0 = vpop.f32.mrf.mxu0  ;;  %v2343_v2 = vmax.f32 %v2279_v62, 0.0 }
 0x18e   : > { %v1917_v1 = vpop.f32.mrf.mxu1 }
 0x18f   : > { %v1631_v3 = vpop.f32.mrf.mxu0  ;;  %2407 = vst [vmem:[%s3269_s29 + $0xf0] sm:$0xff] %v2343_v2  ;;  %v2280_v5 = vadd.f32 %v3258_v11, %v1916_v63 }
 0x190   : > { %v1920_v4 = vpop.f32.mrf.mxu1 }
 0x191   : > { %v1921_v6 = vadd.f32 %v1920_v4, %v1631_v3  ;;  %v1633_v7 = vpop.f32.mrf.mxu0  ;;  %v2344_v9 = vmax.f32 %v2280_v5, 0.0 }
 0x192   : > { %v1922_v8 = vpop.f32.mrf.mxu1 }
 0x193   : > { %v1634_v10 = vpop.f32.mrf.mxu0  ;;  %2408 = vst [vmem:[%s3269_s29 + $0xf8] sm:$0xff] %v2344_v9  ;;  %v2281_v13 = vadd.f32 %v3258_v11, %v1921_v6 }
 0x194   : > { %v1923_v12 = vpop.f32.mrf.mxu1 }
 0x195   : > { %v1924_v14 = vadd.f32 %v1923_v12, %v1634_v10  ;;  %v1636_v15 = vpop.f32.mrf.mxu0  ;;  %v2345_v17 = vmax.f32 %v2281_v13, 0.0 }
 0x196   : > { %v1925_v16 = vpop.f32.mrf.mxu1 }
 0x197   : > { %v1639_v18 = vpop.f32.mrf.mxu0  ;;  %2409 = vst [vmem:[%s3269_s29 + $0x100] sm:$0xff] %v2345_v17  ;;  %v2282_v20 = vadd.f32 %v3258_v11, %v1924_v14 }
 0x198   : > { %v1928_v19 = vpop.f32.mrf.mxu1 }
 0x199   : > { %v1929_v21 = vadd.f32 %v1928_v19, %v1639_v18  ;;  %v1641_v22 = vpop.f32.mrf.mxu0  ;;  %v2346_v24 = vmax.f32 %v2282_v20, 0.0 }
 0x19a   : > { %v1930_v23 = vpop.f32.mrf.mxu1 }
 0x19b   : > { %v1642_v25 = vpop.f32.mrf.mxu0  ;;  %2410 = vst [vmem:[%s3269_s29 + $0x108] sm:$0xff] %v2346_v24  ;;  %v2283_v27 = vadd.f32 %v3258_v11, %v1929_v21 }
 0x19c   : > { %v1931_v26 = vpop.f32.mrf.mxu1 }
 0x19d   : > { %v1932_v28 = vadd.f32 %v1931_v26, %v1642_v25  ;;  %v1644_v29 = vpop.f32.mrf.mxu0  ;;  %v2347_v31 = vmax.f32 %v2283_v27, 0.0 }
 0x19e   : > { %v1933_v30 = vpop.f32.mrf.mxu1 }
 0x19f   : > { %v1647_v32 = vpop.f32.mrf.mxu0  ;;  %2411 = vst [vmem:[%s3269_s29 + $0x110] sm:$0xff] %v2347_v31  ;;  %v2284_v34 = vadd.f32 %v3258_v11, %v1932_v28 }
 0x1a0   : > { %v1936_v33 = vpop.f32.mrf.mxu1 }
 0x1a1   : > { %v1937_v35 = vadd.f32 %v1936_v33, %v1647_v32  ;;  %v1649_v36 = vpop.f32.mrf.mxu0  ;;  %v2348_v38 = vmax.f32 %v2284_v34, 0.0 }
 0x1a2   : > { %v1938_v37 = vpop.f32.mrf.mxu1 }
 0x1a3   : > { %v1650_v39 = vpop.f32.mrf.mxu0  ;;  %2412 = vst [vmem:[%s3269_s29 + $0x118] sm:$0xff] %v2348_v38  ;;  %v2285_v41 = vadd.f32 %v3258_v11, %v1937_v35 }
 0x1a4   : > { %v1939_v40 = vpop.f32.mrf.mxu1 }
 0x1a5   : > { %v1940_v42 = vadd.f32 %v1939_v40, %v1650_v39  ;;  %v1652_v43 = vpop.f32.mrf.mxu0  ;;  %v2349_v45 = vmax.f32 %v2285_v41, 0.0 }
 0x1a6   : > { %v1941_v44 = vpop.f32.mrf.mxu1 }
 0x1a7   : > { %v1655_v46 = vpop.f32.mrf.mxu0  ;;  %2413 = vst [vmem:[%s3269_s29 + $0x120] sm:$0xff] %v2349_v45  ;;  %v2286_v48 = vadd.f32 %v3258_v11, %v1940_v42 }
 0x1a8   : > { %v1944_v47 = vpop.f32.mrf.mxu1 }
 0x1a9   : > { %v1945_v49 = vadd.f32 %v1944_v47, %v1655_v46  ;;  %v1657_v50 = vpop.f32.mrf.mxu0  ;;  %v2350_v52 = vmax.f32 %v2286_v48, 0.0 }
 0x1aa   : > { %v1946_v51 = vpop.f32.mrf.mxu1 }
 0x1ab   : > { %v1658_v53 = vpop.f32.mrf.mxu0  ;;  %2414 = vst [vmem:[%s3269_s29 + $0x128] sm:$0xff] %v2350_v52  ;;  %v2287_v55 = vadd.f32 %v3258_v11, %v1945_v49 }
 0x1ac   : > { %v1947_v54 = vpop.f32.mrf.mxu1 }
 0x1ad   : > { %v1948_v56 = vadd.f32 %v1947_v54, %v1658_v53  ;;  %v1660_v57 = vpop.f32.mrf.mxu0  ;;  %v2351_v59 = vmax.f32 %v2287_v55, 0.0 }
 0x1ae   : > { %v1949_v58 = vpop.f32.mrf.mxu1 }
 0x1af   : > { %v1663_v60 = vpop.f32.mrf.mxu0  ;;  %2415 = vst [vmem:[%s3269_s29 + $0x130] sm:$0xff] %v2351_v59  ;;  %v2288_v62 = vadd.f32 %v3258_v11, %v1948_v56 }
 0x1b0   : > { %v1952_v61 = vpop.f32.mrf.mxu1 }
 0x1b1   : > { %v1953_v63 = vadd.f32 %v1952_v61, %v1663_v60  ;;  %v1665_v0 = vpop.f32.mrf.mxu0  ;;  %v2352_v2 = vmax.f32 %v2288_v62, 0.0 }
 0x1b2   : > { %v1954_v1 = vpop.f32.mrf.mxu1 }
 0x1b3   : > { %v1666_v3 = vpop.f32.mrf.mxu0  ;;  %2416 = vst [vmem:[%s3269_s29 + $0x138] sm:$0xff] %v2352_v2  ;;  %v2289_v5 = vadd.f32 %v3258_v11, %v1953_v63 }
 0x1b4   : > { %v1955_v4 = vpop.f32.mrf.mxu1 }
 0x1b5   : > { %v1956_v6 = vadd.f32 %v1955_v4, %v1666_v3  ;;  %v1668_v7 = vpop.f32.mrf.mxu0  ;;  %v2353_v9 = vmax.f32 %v2289_v5, 0.0 }
 0x1b6   : > { %v1957_v8 = vpop.f32.mrf.mxu1 }
 0x1b7   : > { %v1671_v10 = vpop.f32.mrf.mxu0  ;;  %2417 = vst [vmem:[%s3269_s29 + $0x140] sm:$0xff] %v2353_v9  ;;  %v2290_v13 = vadd.f32 %v3258_v11, %v1956_v6 }
 0x1b8   : > { %v1960_v12 = vpop.f32.mrf.mxu1 }
 0x1b9   : > { %v1961_v14 = vadd.f32 %v1960_v12, %v1671_v10  ;;  %v1673_v15 = vpop.f32.mrf.mxu0  ;;  %v2354_v17 = vmax.f32 %v2290_v13, 0.0 }
 0x1ba   : > { %v1962_v16 = vpop.f32.mrf.mxu1 }
 0x1bb   : > { %v1674_v18 = vpop.f32.mrf.mxu0  ;;  %2418 = vst [vmem:[%s3269_s29 + $0x148] sm:$0xff] %v2354_v17  ;;  %v2291_v20 = vadd.f32 %v3258_v11, %v1961_v14 }
 0x1bc   : > { %v1963_v19 = vpop.f32.mrf.mxu1 }
 0x1bd   : > { %v1964_v21 = vadd.f32 %v1963_v19, %v1674_v18  ;;  %v1676_v22 = vpop.f32.mrf.mxu0  ;;  %v2355_v24 = vmax.f32 %v2291_v20, 0.0  ;;  %v3397_v20 = vld [vmem:[%s3436_s2] ss:$0 sm:$0xff] }
 0x1be   : > { %v1965_v23 = vpop.f32.mrf.mxu1 }
 0x1bf   : > { %v1679_v25 = vpop.f32.mrf.mxu0  ;;  %2419 = vst [vmem:[%s3269_s29 + $0x150] sm:$0xff] %v2355_v24  ;;  %v2292_v27 = vadd.f32 %v3258_v11, %v1964_v21 }
 0x1c0   : > { %v1968_v26 = vpop.f32.mrf.mxu1 }
 0x1c1   : > { %v1969_v28 = vadd.f32 %v1968_v26, %v1679_v25  ;;  %v1681_v29 = vpop.f32.mrf.mxu0  ;;  %v2356_v31 = vmax.f32 %v2292_v27, 0.0 }
 0x1c2   : > { %v1970_v30 = vpop.f32.mrf.mxu1 }
 0x1c3   : > { %v1682_v32 = vpop.f32.mrf.mxu0  ;;  %2420 = vst [vmem:[%s3269_s29 + $0x158] sm:$0xff] %v2356_v31  ;;  %v2293_v34 = vadd.f32 %v3258_v11, %v1969_v28 }
 0x1c4   : > { %v1971_v33 = vpop.f32.mrf.mxu1 }
 0x1c5   : > { %v1972_v35 = vadd.f32 %v1971_v33, %v1682_v32  ;;  %v1684_v36 = vpop.f32.mrf.mxu0  ;;  %v2357_v38 = vmax.f32 %v2293_v34, 0.0 }
 0x1c6   : > { %v1973_v37 = vpop.f32.mrf.mxu1 }
 0x1c7   : > { %v1687_v39 = vpop.f32.mrf.mxu0  ;;  %2421 = vst [vmem:[%s3269_s29 + $0x160] sm:$0xff] %v2357_v38  ;;  %v2294_v41 = vadd.f32 %v3258_v11, %v1972_v35 }
 0x1c8   : > { %v1976_v40 = vpop.f32.mrf.mxu1 }
 0x1c9   : > { %v1977_v42 = vadd.f32 %v1976_v40, %v1687_v39  ;;  %v1689_v43 = vpop.f32.mrf.mxu0  ;;  %v2358_v45 = vmax.f32 %v2294_v41, 0.0 }
 0x1ca   : > { %v1978_v44 = vpop.f32.mrf.mxu1 }
 0x1cb   : > { %v1690_v46 = vpop.f32.mrf.mxu0  ;;  %2422 = vst [vmem:[%s3269_s29 + $0x168] sm:$0xff] %v2358_v45  ;;  %v2295_v48 = vadd.f32 %v3258_v11, %v1977_v42 }
 0x1cc   : > { %v1979_v47 = vpop.f32.mrf.mxu1 }
 0x1cd   : > { %v1980_v49 = vadd.f32 %v1979_v47, %v1690_v46  ;;  %v1692_v50 = vpop.f32.mrf.mxu0  ;;  %v2359_v52 = vmax.f32 %v2295_v48, 0.0 }
 0x1ce   : > { %v1981_v51 = vpop.f32.mrf.mxu1 }
 0x1cf   : > { %v1695_v53 = vpop.f32.mrf.mxu0  ;;  %2423 = vst [vmem:[%s3269_s29 + $0x170] sm:$0xff] %v2359_v52  ;;  %v2296_v55 = vadd.f32 %v3258_v11, %v1980_v49 }
 0x1d0   : > { %v1984_v54 = vpop.f32.mrf.mxu1 }
 0x1d1   : > { %v1985_v56 = vadd.f32 %v1984_v54, %v1695_v53  ;;  %v1697_v57 = vpop.f32.mrf.mxu0  ;;  %v2360_v59 = vmax.f32 %v2296_v55, 0.0 }
 0x1d2   : > { %v1986_v58 = vpop.f32.mrf.mxu1 }
 0x1d3   : > { %v1698_v60 = vpop.f32.mrf.mxu0  ;;  %2424 = vst [vmem:[%s3269_s29 + $0x178] sm:$0xff] %v2360_v59  ;;  %v2297_v62 = vadd.f32 %v3258_v11, %v1985_v56 }
 0x1d4   : > { %v1987_v61 = vpop.f32.mrf.mxu1 }
 0x1d5   : > { %v1988_v63 = vadd.f32 %v1987_v61, %v1698_v60  ;;  %v1700_v0 = vpop.f32.mrf.mxu0  ;;  %v2361_v2 = vmax.f32 %v2297_v62, 0.0 }
 0x1d6   : > { %v1989_v1 = vpop.f32.mrf.mxu1 }
 0x1d7   : > { %v1703_v3 = vpop.f32.mrf.mxu0  ;;  %2425 = vst [vmem:[%s3269_s29 + $0x180] sm:$0xff] %v2361_v2  ;;  %v2298_v5 = vadd.f32 %v3258_v11, %v1988_v63 }
 0x1d8   : > { %v1992_v4 = vpop.f32.mrf.mxu1 }
 0x1d9   : > { %v1993_v6 = vadd.f32 %v1992_v4, %v1703_v3  ;;  %v1705_v7 = vpop.f32.mrf.mxu0  ;;  %v2362_v9 = vmax.f32 %v2298_v5, 0.0 }
 0x1da   : > { %v1994_v8 = vpop.f32.mrf.mxu1 }
 0x1db   : > { %v1706_v10 = vpop.f32.mrf.mxu0  ;;  %2426 = vst [vmem:[%s3269_s29 + $0x188] sm:$0xff] %v2362_v9  ;;  %v2299_v13 = vadd.f32 %v3258_v11, %v1993_v6 }
 0x1dc   : > { %v1995_v12 = vpop.f32.mrf.mxu1 }
 0x1dd   : > { %v1996_v14 = vadd.f32 %v1995_v12, %v1706_v10  ;;  %v1708_v15 = vpop.f32.mrf.mxu0  ;;  %v2363_v17 = vmax.f32 %v2299_v13, 0.0 }
 0x1de   : > { %v1997_v16 = vpop.f32.mrf.mxu1 }
 0x1df   : > { %v1711_v18 = vpop.f32.mrf.mxu0  ;;  %2427 = vst [vmem:[%s3269_s29 + $0x190] sm:$0xff] %v2363_v17  ;;  %v2300_v21 = vadd.f32 %v3397_v20, %v1996_v14 }
 0x1e0   : > { %v2000_v19 = vpop.f32.mrf.mxu1 }
 0x1e1   : > { %v2001_v22 = vadd.f32 %v2000_v19, %v1711_v18  ;;  %v1713_v23 = vpop.f32.mrf.mxu0  ;;  %v2364_v11 = vmax.f32 %v2300_v21, 0.0 }
 0x1e2   : > { %v2002_v24 = vpop.f32.mrf.mxu1 }
 0x1e3   : > { %v1714_v25 = vpop.f32.mrf.mxu0  ;;  %2428 = vst [vmem:[%s3269_s29 + $0x198] sm:$0xff] %v2364_v11  ;;  %v2301_v27 = vadd.f32 %v3397_v20, %v2001_v22 }
 0x1e4   : > { %v2003_v26 = vpop.f32.mrf.mxu1 }
 0x1e5   : > { %v2004_v28 = vadd.f32 %v2003_v26, %v1714_v25  ;;  %v1716_v29 = vpop.f32.mrf.mxu0  ;;  %v2365_v31 = vmax.f32 %v2301_v27, 0.0 }
 0x1e6   : > { %v2005_v30 = vpop.f32.mrf.mxu1 }
 0x1e7   : > { %v1719_v32 = vpop.f32.mrf.mxu0  ;;  %2429 = vst [vmem:[%s3269_s29 + $0x1a0] sm:$0xff] %v2365_v31  ;;  %v2302_v34 = vadd.f32 %v3397_v20, %v2004_v28 }
 0x1e8   : > { %v2008_v33 = vpop.f32.mrf.mxu1 }
 0x1e9   : > { %v2009_v35 = vadd.f32 %v2008_v33, %v1719_v32  ;;  %v1721_v36 = vpop.f32.mrf.mxu0  ;;  %v2366_v38 = vmax.f32 %v2302_v34, 0.0 }
 0x1ea   : > { %v2010_v37 = vpop.f32.mrf.mxu1 }
 0x1eb   : > { %v1722_v39 = vpop.f32.mrf.mxu0  ;;  %2430 = vst [vmem:[%s3269_s29 + $0x1a8] sm:$0xff] %v2366_v38  ;;  %v2303_v41 = vadd.f32 %v3397_v20, %v2009_v35 }
 0x1ec   : > { %v2011_v40 = vpop.f32.mrf.mxu1 }
 0x1ed   : > { %v2012_v42 = vadd.f32 %v2011_v40, %v1722_v39  ;;  %v1724_v43 = vpop.f32.mrf.mxu0  ;;  %v2367_v45 = vmax.f32 %v2303_v41, 0.0 }
 0x1ee   : > { %v2013_v44 = vpop.f32.mrf.mxu1 }
 0x1ef   : > { %v1727_v46 = vpop.f32.mrf.mxu0  ;;  %2431 = vst [vmem:[%s3269_s29 + $0x1b0] sm:$0xff] %v2367_v45  ;;  %v2304_v48 = vadd.f32 %v3397_v20, %v2012_v42 }
 0x1f0   : > { %v2016_v47 = vpop.f32.mrf.mxu1 }
 0x1f1   : > { %v2017_v49 = vadd.f32 %v2016_v47, %v1727_v46  ;;  %v1729_v50 = vpop.f32.mrf.mxu0  ;;  %v2368_v52 = vmax.f32 %v2304_v48, 0.0 }
 0x1f2   : > { %v2018_v51 = vpop.f32.mrf.mxu1 }
 0x1f3   : > { %v1730_v53 = vpop.f32.mrf.mxu0  ;;  %2432 = vst [vmem:[%s3269_s29 + $0x1b8] sm:$0xff] %v2368_v52  ;;  %v2305_v55 = vadd.f32 %v3397_v20, %v2017_v49 }
 0x1f4   : > { %v2019_v54 = vpop.f32.mrf.mxu1 }
 0x1f5   : > { %v2020_v56 = vadd.f32 %v2019_v54, %v1730_v53  ;;  %v1732_v57 = vpop.f32.mrf.mxu0  ;;  %v2369_v59 = vmax.f32 %v2305_v55, 0.0 }
 0x1f6   : > { %v2021_v58 = vpop.f32.mrf.mxu1 }
 0x1f7   : > { %v1735_v60 = vpop.f32.mrf.mxu0  ;;  %2433 = vst [vmem:[%s3269_s29 + $0x1c0] sm:$0xff] %v2369_v59  ;;  %v2306_v62 = vadd.f32 %v3397_v20, %v2020_v56 }
 0x1f8   : > { %v2024_v61 = vpop.f32.mrf.mxu1 }
 0x1f9   : > { %v2025_v63 = vadd.f32 %v2024_v61, %v1735_v60  ;;  %v1737_v0 = vpop.f32.mrf.mxu0  ;;  %v2370_v2 = vmax.f32 %v2306_v62, 0.0 }
 0x1fa   : > { %v2026_v1 = vpop.f32.mrf.mxu1 }
 0x1fb   : > { %v1738_v3 = vpop.f32.mrf.mxu0  ;;  %2434 = vst [vmem:[%s3269_s29 + $0x1c8] sm:$0xff] %v2370_v2  ;;  %v2307_v5 = vadd.f32 %v3397_v20, %v2025_v63 }
 0x1fc   : > { %v2027_v4 = vpop.f32.mrf.mxu1 }
 0x1fd   : > { %v2028_v6 = vadd.f32 %v2027_v4, %v1738_v3  ;;  %v1740_v7 = vpop.f32.mrf.mxu0  ;;  %v2371_v9 = vmax.f32 %v2307_v5, 0.0 }
 0x1fe   : > { %v2029_v8 = vpop.f32.mrf.mxu1 }
 0x1ff   : > { %v1743_v10 = vpop.f32.mrf.mxu0  ;;  %2435 = vst [vmem:[%s3269_s29 + $0x1d0] sm:$0xff] %v2371_v9  ;;  %v2308_v13 = vadd.f32 %v3397_v20, %v2028_v6 }
 0x200   : > { %v2032_v12 = vpop.f32.mrf.mxu1 }
 0x201   : > { %v2033_v14 = vadd.f32 %v2032_v12, %v1743_v10  ;;  %v1745_v15 = vpop.f32.mrf.mxu0  ;;  %v2372_v17 = vmax.f32 %v2308_v13, 0.0 }
 0x202   : > { %v2034_v16 = vpop.f32.mrf.mxu1 }
 0x203   : > { %v1746_v18 = vpop.f32.mrf.mxu0  ;;  %2436 = vst [vmem:[%s3269_s29 + $0x1d8] sm:$0xff] %v2372_v17  ;;  %v2309_v21 = vadd.f32 %v3397_v20, %v2033_v14 }
 0x204   : > { %v2035_v19 = vpop.f32.mrf.mxu1 }
 0x205   : > { %v2036_v22 = vadd.f32 %v2035_v19, %v1746_v18  ;;  %v1748_v23 = vpop.f32.mrf.mxu0  ;;  %v2373_v11 = vmax.f32 %v2309_v21, 0.0 }
 0x206   : > { %v2037_v24 = vpop.f32.mrf.mxu1 }
 0x207   : > { %v1751_v25 = vpop.f32.mrf.mxu0  ;;  %2437 = vst [vmem:[%s3269_s29 + $0x1e0] sm:$0xff] %v2373_v11  ;;  %v2310_v27 = vadd.f32 %v3397_v20, %v2036_v22 }
 0x208   : > { %v2040_v26 = vpop.f32.mrf.mxu1 }
 0x209   : > { %v2041_v28 = vadd.f32 %v2040_v26, %v1751_v25  ;;  %v1753_v29 = vpop.f32.mrf.mxu0  ;;  %v2374_v31 = vmax.f32 %v2310_v27, 0.0 }
 0x20a   : > { %v2042_v30 = vpop.f32.mrf.mxu1 }
 0x20b   : > { %v1754_v32 = vpop.f32.mrf.mxu0  ;;  %2438 = vst [vmem:[%s3269_s29 + $0x1e8] sm:$0xff] %v2374_v31  ;;  %v2311_v34 = vadd.f32 %v3397_v20, %v2041_v28 }
 0x20c   : > { %v2043_v33 = vpop.f32.mrf.mxu1 }
 0x20d   : > { %v2044_v35 = vadd.f32 %v2043_v33, %v1754_v32  ;;  %v1756_v36 = vpop.f32.mrf.mxu0  ;;  %v2375_v38 = vmax.f32 %v2311_v34, 0.0 }
 0x20e   : > { %v2045_v37 = vpop.f32.mrf.mxu1 }
 0x20f   : > { %2439 = vst [vmem:[%s3269_s29 + $0x1f0] sm:$0xff] %v2375_v38  ;;  %v2312_v39 = vadd.f32 %v3397_v20, %v2044_v35 }
 0x211   : > { %v2376_v40 = vmax.f32 %v2312_v39, 0.0 }
 0x213   : > { %2440 = vst [vmem:[%s3269_s29 + $0x1f8] sm:$0xff] %v2376_v40 }
 0x214 PF: > { %s13_s14 = sadd.s32 1, %s3034_s14   ;;  %s3438_s12 = smov %s3030_s13 }
 0x215   : > { %p10_p5 = scmp.ge.s32.totalorder %s13_s14, 6   ;;  %s3439_s13 = smov %s3441_s15 }
 0x217   :  { %12 = sbr.rel (!%p10_p5) target bundleno = 2 (0x2), region = 76 }

// kernel: generator_forward.9
= control target key start
LH: loop header
LB: loop body
LE: loop exit
PB: predicated region body
PF: predicated region fallthrough
CT: control target
= control target key end

     0   :  { %s2075_s12 = smov 0   ;;  %s2077_s13 = smov 0   ;;  %s2597_s0 = inlined_call_operand.vmem [shape: bf16[4,8,256], index: 0, kind: input, shape index: {}]   ;;  %s2598_s1 = inlined_call_operand.vmem [shape: bf16[4,256,2048], index: 1, kind: input, shape index: {}]   ;;  %s2599_s2 = inlined_call_operand.vmem [shape: f32[1,2048], index: 2, kind: input, shape index: {}]   ;;  %s2600_s3 = inlined_call_operand.vmem [shape: f32[4,8,2048], index: 3, kind: output, shape index: {}]  }
   0x1   :  { %s2079_s14 = smov 0   ;;  %s2081_s15 = smov 0  }
   0x2   :  { %s2083_s16 = smov 0   ;;  %s2085_s17 = smov 0  }
   0x3   :  { %s2087_s18 = smov 0  }
   0x4 LB: > { %s31_s19 = sadd.s32 1, %s2045_s16  ;;  %s39_s20 = sadd.s32 1, %s2049_s17  ;;  %s2053_s18 = sphi %s2087_s18, %s13_s18   ;;  %s2049_s17 = sphi %s2085_s17, %s2606_s17   ;;  %s2045_s16 = sphi %s2083_s16, %s2605_s16   ;;  %s2041_s15 = sphi %s2081_s15, %s2604_s15   ;;  %s2037_s14 = sphi %s2079_s14, %s2603_s14   ;;  %s2033_s13 = sphi %s2077_s13, %s2602_s13   ;;  %s2029_s12 = sphi %s2075_s12, %s2601_s12  }
   0x5   : > { %p33_p0 = scmp.ge.s32.totalorder %s31_s19, 2  ;;  %p87_p1 = scmp.ne.s32.totalorder %s2033_s13, %s2029_s12 }
   0x6   : > { %p88_p2 = scmp.eq.s32.totalorder %s2053_s18, 0  ;;  %s80_s24 = sadd.s32 1, %s2033_s13 }
   0x7   : > { %s2608_s19 = smov (%p33_p0, %s31_s19), 0  ;;  %s2610_s20 = smov (!%p33_p0, %s39_s20), %s2049_s17 }
   0x8   : > { %p89_p3 = por %p88_p2, %p87_p1  ;;  %p41_p4 = scmp.ge.s32.totalorder %s2610_s20, 4 }
   0x9   : > { %s76_s21 = ssub.s32 %s2045_s16, %s2608_s19  ;;  %p1778_p6 = scmp.ge.s32.totalorder %s2053_s18, 8 }
   0xa   : > { %s2612_s20 = smov (%p41_p4, %s2610_s20), 0 }
   0xb   : > { %s73_s22 = ssub.s32 %s2049_s17, %s2612_s20  ;;  %169 = sbr.rel (%p1778_p6) target bundleno = 87 (0x57), region = 16 }
   0xc   : > { %s77_s23 = sor.u32 %s76_s21, %s73_s22 }
   0xd   : > { %p78_p5 = scmp.eq.s32.totalorder %s77_s23, 0 }
   0xf   : > { %s2126_s25 = scalar_select %p78_p5, %s2033_s13, %s80_s24  }
  0x10   : > { %189 = sbr.rel (!%p89_p3) target bundleno = 87 (0x57), region = 24  ;;  %s191_s26 = sand.u32 (%p89_p3), 1, %s2033_s13  }
  0x11   : > { %s1780_s27 = sshll.u32 (%p89_p3), %s2045_s16, 3  ;;  %s1779_s28 = sshll.u32 (%p89_p3), %s191_s26, 10 }
  0x12   : > { %s1781_s29 = sshll.u32 (%p89_p3), %s2049_s17, 9  ;;  %s2140_s8 = scalar_lea.vmem (%p89_p3), [#allocation2], %s1779_s28 }
  0x13   : > { %s199_s30 = sadd.s32 (%p89_p3), %s1781_s29, %s1780_s27 }
  0x14   : > { %s1782_s4 = sshll.u32 (%p89_p3), %s199_s30, 2 }
  0x15   : > { %s2135_s7 = scalar_lea.vmem %s2598_s1, %s1782_s4 }
  0x16   : > { %v214_v0 = vld [vmem:[%s2135_s7] sm:$0xff]  ;;  %v216_v1 = vld [vmem:[%s2135_s7 + $0x8] sm:$0xff]  ;;  %v218_v2 = vld [vmem:[%s2135_s7 + $0x10] sm:$0xff] }
  0x17   : > { %215 = vst [vmem:[%s2140_s8] sm:$0xff] %v214_v0  ;;  %217 = vst [vmem:[%s2140_s8 + $0x8] sm:$0xff] %v216_v1  ;;  %v220_v3 = vld [vmem:[%s2135_s7 + $0x18] sm:$0xff]  ;;  %v222_v4 = vld [vmem:[%s2135_s7 + $0x40] sm:$0xff] }
  0x18   : > { %219 = vst [vmem:[%s2140_s8 + $0x10] sm:$0xff] %v218_v2  ;;  %v224_v5 = vld [vmem:[%s2135_s7 + $0x48] sm:$0xff]  ;;  %221 = vst [vmem:[%s2140_s8 + $0x18] sm:$0xff] %v220_v3  ;;  %v226_v6 = vld [vmem:[%s2135_s7 + $0x50] sm:$0xff] }
  0x19   : > { %223 = vst [vmem:[%s2140_s8 + $0x20] sm:$0xff] %v222_v4  ;;  %225 = vst [vmem:[%s2140_s8 + $0x28] sm:$0xff] %v224_v5  ;;  %v228_v7 = vld [vmem:[%s2135_s7 + $0x58] sm:$0xff]  ;;  %v230_v8 = vld [vmem:[%s2135_s7 + $0x80] sm:$0xff] }
  0x1a   : > { %227 = vst [vmem:[%s2140_s8 + $0x30] sm:$0xff] %v226_v6  ;;  %229 = vst [vmem:[%s2140_s8 + $0x38] sm:$0xff] %v228_v7  ;;  %v232_v9 = vld [vmem:[%s2135_s7 + $0x88] sm:$0xff]  ;;  %v234_v10 = vld [vmem:[%s2135_s7 + $0x90] sm:$0xff] }
  0x1b   : > { %231 = vst [vmem:[%s2140_s8 + $0x40] sm:$0xff] %v230_v8  ;;  %v236_v11 = vld [vmem:[%s2135_s7 + $0x98] sm:$0xff]  ;;  %233 = vst [vmem:[%s2140_s8 + $0x48] sm:$0xff] %v232_v9  ;;  %v238_v12 = vld [vmem:[%s2135_s7 + $0xc0] sm:$0xff] }
  0x1c   : > { %235 = vst [vmem:[%s2140_s8 + $0x50] sm:$0xff] %v234_v10  ;;  %237 = vst [vmem:[%s2140_s8 + $0x58] sm:$0xff] %v236_v11  ;;  %v240_v13 = vld [vmem:[%s2135_s7 + $0xc8] sm:$0xff]  ;;  %v242_v14 = vld [vmem:[%s2135_s7 + $0xd0] sm:$0xff] }
  0x1d   : > { %239 = vst [vmem:[%s2140_s8 + $0x60] sm:$0xff] %v238_v12  ;;  %241 = vst [vmem:[%s2140_s8 + $0x68] sm:$0xff] %v240_v13  ;;  %v244_v15 = vld [vmem:[%s2135_s7 + $0xd8] sm:$0xff]  ;;  %v246_v16 = vld [vmem:[%s2135_s7 + $0x100] sm:$0xff] }
  0x1e   : > { %243 = vst [vmem:[%s2140_s8 + $0x70] sm:$0xff] %v242_v14  ;;  %v248_v17 = vld [vmem:[%s2135_s7 + $0x108] sm:$0xff]  ;;  %245 = vst [vmem:[%s2140_s8 + $0x78] sm:$0xff] %v244_v15  ;;  %v250_v18 = vld [vmem:[%s2135_s7 + $0x110] sm:$0xff] }
  0x1f   : > { %247 = vst [vmem:[%s2140_s8 + $0x80] sm:$0xff] %v246_v16  ;;  %249 = vst [vmem:[%s2140_s8 + $0x88] sm:$0xff] %v248_v17  ;;  %v252_v19 = vld [vmem:[%s2135_s7 + $0x118] sm:$0xff]  ;;  %v254_v20 = vld [vmem:[%s2135_s7 + $0x140] sm:$0xff] }
  0x20   : > { %251 = vst [vmem:[%s2140_s8 + $0x90] sm:$0xff] %v250_v18  ;;  %253 = vst [vmem:[%s2140_s8 + $0x98] sm:$0xff] %v252_v19  ;;  %v256_v21 = vld [vmem:[%s2135_s7 + $0x148] sm:$0xff]  ;;  %v258_v22 = vld [vmem:[%s2135_s7 + $0x150] sm:$0xff] }
  0x21   : > { %255 = vst [vmem:[%s2140_s8 + $0xa0] sm:$0xff] %v254_v20  ;;  %v260_v23 = vld [vmem:[%s2135_s7 + $0x158] sm:$0xff]  ;;  %257 = vst [vmem:[%s2140_s8 + $0xa8] sm:$0xff] %v256_v21  ;;  %v262_v24 = vld [vmem:[%s2135_s7 + $0x180] sm:$0xff] }
  0x22   : > { %259 = vst [vmem:[%s2140_s8 + $0xb0] sm:$0xff] %v258_v22  ;;  %261 = vst [vmem:[%s2140_s8 + $0xb8] sm:$0xff] %v260_v23  ;;  %v264_v25 = vld [vmem:[%s2135_s7 + $0x188] sm:$0xff]  ;;  %v266_v26 = vld [vmem:[%s2135_s7 + $0x190] sm:$0xff] }
  0x23   : > { %263 = vst [vmem:[%s2140_s8 + $0xc0] sm:$0xff] %v262_v24  ;;  %265 = vst [vmem:[%s2140_s8 + $0xc8] sm:$0xff] %v264_v25  ;;  %v268_v27 = vld [vmem:[%s2135_s7 + $0x198] sm:$0xff]  ;;  %v270_v28 = vld [vmem:[%s2135_s7 + $0x1c0] sm:$0xff] }
  0x24   : > { %267 = vst [vmem:[%s2140_s8 + $0xd0] sm:$0xff] %v266_v26  ;;  %v272_v29 = vld [vmem:[%s2135_s7 + $0x1c8] sm:$0xff]  ;;  %269 = vst [vmem:[%s2140_s8 + $0xd8] sm:$0xff] %v268_v27  ;;  %v274_v30 = vld [vmem:[%s2135_s7 + $0x1d0] sm:$0xff] }
  0x25   : > { %271 = vst [vmem:[%s2140_s8 + $0xe0] sm:$0xff] %v270_v28  ;;  %273 = vst [vmem:[%s2140_s8 + $0xe8] sm:$0xff] %v272_v29  ;;  %v276_v31 = vld [vmem:[%s2135_s7 + $0x1d8] sm:$0xff]  ;;  %v278_v32 = vld [vmem:[%s2135_s7 + $0x200] sm:$0xff] }
  0x26   : > { %275 = vst [vmem:[%s2140_s8 + $0xf0] sm:$0xff] %v274_v30  ;;  %277 = vst [vmem:[%s2140_s8 + $0xf8] sm:$0xff] %v276_v31  ;;  %v280_v33 = vld [vmem:[%s2135_s7 + $0x208] sm:$0xff]  ;;  %v282_v34 = vld [vmem:[%s2135_s7 + $0x210] sm:$0xff] }
  0x27   : > { %279 = vst [vmem:[%s2140_s8 + $0x100] sm:$0xff] %v278_v32  ;;  %v284_v35 = vld [vmem:[%s2135_s7 + $0x218] sm:$0xff]  ;;  %281 = vst [vmem:[%s2140_s8 + $0x108] sm:$0xff] %v280_v33  ;;  %v286_v36 = vld [vmem:[%s2135_s7 + $0x240] sm:$0xff] }
  0x28   : > { %283 = vst [vmem:[%s2140_s8 + $0x110] sm:$0xff] %v282_v34  ;;  %285 = vst [vmem:[%s2140_s8 + $0x118] sm:$0xff] %v284_v35  ;;  %v288_v37 = vld [vmem:[%s2135_s7 + $0x248] sm:$0xff]  ;;  %v290_v38 = vld [vmem:[%s2135_s7 + $0x250] sm:$0xff] }
  0x29   : > { %287 = vst [vmem:[%s2140_s8 + $0x120] sm:$0xff] %v286_v36  ;;  %289 = vst [vmem:[%s2140_s8 + $0x128] sm:$0xff] %v288_v37  ;;  %v292_v39 = vld [vmem:[%s2135_s7 + $0x258] sm:$0xff]  ;;  %v294_v40 = vld [vmem:[%s2135_s7 + $0x280] sm:$0xff] }
  0x2a   : > { %291 = vst [vmem:[%s2140_s8 + $0x130] sm:$0xff] %v290_v38  ;;  %v296_v41 = vld [vmem:[%s2135_s7 + $0x288] sm:$0xff]  ;;  %293 = vst [vmem:[%s2140_s8 + $0x138] sm:$0xff] %v292_v39  ;;  %v298_v42 = vld [vmem:[%s2135_s7 + $0x290] sm:$0xff] }
  0x2b   : > { %295 = vst [vmem:[%s2140_s8 + $0x140] sm:$0xff] %v294_v40  ;;  %297 = vst [vmem:[%s2140_s8 + $0x148] sm:$0xff] %v296_v41  ;;  %v300_v43 = vld [vmem:[%s2135_s7 + $0x298] sm:$0xff]  ;;  %v302_v44 = vld [vmem:[%s2135_s7 + $0x2c0] sm:$0xff] }
  0x2c   : > { %299 = vst [vmem:[%s2140_s8 + $0x150] sm:$0xff] %v298_v42  ;;  %301 = vst [vmem:[%s2140_s8 + $0x158] sm:$0xff] %v300_v43  ;;  %v304_v45 = vld [vmem:[%s2135_s7 + $0x2c8] sm:$0xff]  ;;  %v306_v46 = vld [vmem:[%s2135_s7 + $0x2d0] sm:$0xff] }
  0x2d   : > { %303 = vst [vmem:[%s2140_s8 + $0x160] sm:$0xff] %v302_v44  ;;  %v308_v47 = vld [vmem:[%s2135_s7 + $0x2d8] sm:$0xff]  ;;  %305 = vst [vmem:[%s2140_s8 + $0x168] sm:$0xff] %v304_v45  ;;  %v310_v48 = vld [vmem:[%s2135_s7 + $0x300] sm:$0xff] }
  0x2e   : > { %307 = vst [vmem:[%s2140_s8 + $0x170] sm:$0xff] %v306_v46  ;;  %309 = vst [vmem:[%s2140_s8 + $0x178] sm:$0xff] %v308_v47  ;;  %v312_v49 = vld [vmem:[%s2135_s7 + $0x308] sm:$0xff]  ;;  %v314_v50 = vld [vmem:[%s2135_s7 + $0x310] sm:$0xff] }
  0x2f   : > { %311 = vst [vmem:[%s2140_s8 + $0x180] sm:$0xff] %v310_v48  ;;  %313 = vst [vmem:[%s2140_s8 + $0x188] sm:$0xff] %v312_v49  ;;  %v316_v51 = vld [vmem:[%s2135_s7 + $0x318] sm:$0xff]  ;;  %v318_v52 = vld [vmem:[%s2135_s7 + $0x340] sm:$0xff] }
  0x30   : > { %315 = vst [vmem:[%s2140_s8 + $0x190] sm:$0xff] %v314_v50  ;;  %v320_v53 = vld [vmem:[%s2135_s7 + $0x348] sm:$0xff]  ;;  %317 = vst [vmem:[%s2140_s8 + $0x198] sm:$0xff] %v316_v51  ;;  %v322_v54 = vld [vmem:[%s2135_s7 + $0x350] sm:$0xff] }
  0x31   : > { %319 = vst [vmem:[%s2140_s8 + $0x1a0] sm:$0xff] %v318_v52  ;;  %321 = vst [vmem:[%s2140_s8 + $0x1a8] sm:$0xff] %v320_v53  ;;  %v324_v55 = vld [vmem:[%s2135_s7 + $0x358] sm:$0xff]  ;;  %v326_v56 = vld [vmem:[%s2135_s7 + $0x380] sm:$0xff] }
  0x32   : > { %323 = vst [vmem:[%s2140_s8 + $0x1b0] sm:$0xff] %v322_v54  ;;  %325 = vst [vmem:[%s2140_s8 + $0x1b8] sm:$0xff] %v324_v55  ;;  %v328_v57 = vld [vmem:[%s2135_s7 + $0x388] sm:$0xff]  ;;  %v330_v58 = vld [vmem:[%s2135_s7 + $0x390] sm:$0xff] }
  0x33   : > { %327 = vst [vmem:[%s2140_s8 + $0x1c0] sm:$0xff] %v326_v56  ;;  %v332_v59 = vld [vmem:[%s2135_s7 + $0x398] sm:$0xff]  ;;  %329 = vst [vmem:[%s2140_s8 + $0x1c8] sm:$0xff] %v328_v57  ;;  %v334_v60 = vld [vmem:[%s2135_s7 + $0x3c0] sm:$0xff] }
  0x34   : > { %331 = vst [vmem:[%s2140_s8 + $0x1d0] sm:$0xff] %v330_v58  ;;  %333 = vst [vmem:[%s2140_s8 + $0x1d8] sm:$0xff] %v332_v59  ;;  %v336_v61 = vld [vmem:[%s2135_s7 + $0x3c8] sm:$0xff]  ;;  %v338_v62 = vld [vmem:[%s2135_s7 + $0x3d0] sm:$0xff] }
  0x35   : > { %335 = vst [vmem:[%s2140_s8 + $0x1e0] sm:$0xff] %v334_v60  ;;  %337 = vst [vmem:[%s2140_s8 + $0x1e8] sm:$0xff] %v336_v61  ;;  %v340_v63 = vld [vmem:[%s2135_s7 + $0x3d8] sm:$0xff]  ;;  %v342_v0 = vld [vmem:[%s2135_s7 + $0x400] sm:$0xff] }
  0x36   : > { %339 = vst [vmem:[%s2140_s8 + $0x1f0] sm:$0xff] %v338_v62  ;;  %v344_v1 = vld [vmem:[%s2135_s7 + $0x408] sm:$0xff]  ;;  %341 = vst [vmem:[%s2140_s8 + $0x1f8] sm:$0xff] %v340_v63  ;;  %v346_v2 = vld [vmem:[%s2135_s7 + $0x410] sm:$0xff] }
  0x37   : > { %343 = vst [vmem:[%s2140_s8 + $0x200] sm:$0xff] %v342_v0  ;;  %345 = vst [vmem:[%s2140_s8 + $0x208] sm:$0xff] %v344_v1  ;;  %v348_v3 = vld [vmem:[%s2135_s7 + $0x418] sm:$0xff]  ;;  %v350_v4 = vld [vmem:[%s2135_s7 + $0x440] sm:$0xff] }
  0x38   : > { %347 = vst [vmem:[%s2140_s8 + $0x210] sm:$0xff] %v346_v2  ;;  %349 = vst [vmem:[%s2140_s8 + $0x218] sm:$0xff] %v348_v3  ;;  %v352_v5 = vld [vmem:[%s2135_s7 + $0x448] sm:$0xff]  ;;  %v354_v6 = vld [vmem:[%s2135_s7 + $0x450] sm:$0xff] }
  0x39   : > { %351 = vst [vmem:[%s2140_s8 + $0x220] sm:$0xff] %v350_v4  ;;  %v356_v7 = vld [vmem:[%s2135_s7 + $0x458] sm:$0xff]  ;;  %353 = vst [vmem:[%s2140_s8 + $0x228] sm:$0xff] %v352_v5  ;;  %v358_v8 = vld [vmem:[%s2135_s7 + $0x480] sm:$0xff] }
  0x3a   : > { %355 = vst [vmem:[%s2140_s8 + $0x230] sm:$0xff] %v354_v6  ;;  %357 = vst [vmem:[%s2140_s8 + $0x238] sm:$0xff] %v356_v7  ;;  %v360_v9 = vld [vmem:[%s2135_s7 + $0x488] sm:$0xff]  ;;  %v362_v10 = vld [vmem:[%s2135_s7 + $0x490] sm:$0xff] }
  0x3b   : > { %359 = vst [vmem:[%s2140_s8 + $0x240] sm:$0xff] %v358_v8  ;;  %361 = vst [vmem:[%s2140_s8 + $0x248] sm:$0xff] %v360_v9  ;;  %v364_v11 = vld [vmem:[%s2135_s7 + $0x498] sm:$0xff]  ;;  %v366_v12 = vld [vmem:[%s2135_s7 + $0x4c0] sm:$0xff] }
  0x3c   : > { %363 = vst [vmem:[%s2140_s8 + $0x250] sm:$0xff] %v362_v10  ;;  %v368_v13 = vld [vmem:[%s2135_s7 + $0x4c8] sm:$0xff]  ;;  %365 = vst [vmem:[%s2140_s8 + $0x258] sm:$0xff] %v364_v11  ;;  %v370_v14 = vld [vmem:[%s2135_s7 + $0x4d0] sm:$0xff] }
  0x3d   : > { %367 = vst [vmem:[%s2140_s8 + $0x260] sm:$0xff] %v366_v12  ;;  %369 = vst [vmem:[%s2140_s8 + $0x268] sm:$0xff] %v368_v13  ;;  %v372_v15 = vld [vmem:[%s2135_s7 + $0x4d8] sm:$0xff]  ;;  %v374_v16 = vld [vmem:[%s2135_s7 + $0x500] sm:$0xff] }
  0x3e   : > { %371 = vst [vmem:[%s2140_s8 + $0x270] sm:$0xff] %v370_v14  ;;  %373 = vst [vmem:[%s2140_s8 + $0x278] sm:$0xff] %v372_v15  ;;  %v376_v17 = vld [vmem:[%s2135_s7 + $0x508] sm:$0xff]  ;;  %v378_v18 = vld [vmem:[%s2135_s7 + $0x510] sm:$0xff] }
  0x3f   : > { %375 = vst [vmem:[%s2140_s8 + $0x280] sm:$0xff] %v374_v16  ;;  %v380_v19 = vld [vmem:[%s2135_s7 + $0x518] sm:$0xff]  ;;  %377 = vst [vmem:[%s2140_s8 + $0x288] sm:$0xff] %v376_v17  ;;  %v382_v20 = vld [vmem:[%s2135_s7 + $0x540] sm:$0xff] }
  0x40   : > { %379 = vst [vmem:[%s2140_s8 + $0x290] sm:$0xff] %v378_v18  ;;  %381 = vst [vmem:[%s2140_s8 + $0x298] sm:$0xff] %v380_v19  ;;  %v384_v21 = vld [vmem:[%s2135_s7 + $0x548] sm:$0xff]  ;;  %v386_v22 = vld [vmem:[%s2135_s7 + $0x550] sm:$0xff] }
  0x41   : > { %383 = vst [vmem:[%s2140_s8 + $0x2a0] sm:$0xff] %v382_v20  ;;  %385 = vst [vmem:[%s2140_s8 + $0x2a8] sm:$0xff] %v384_v21  ;;  %v388_v23 = vld [vmem:[%s2135_s7 + $0x558] sm:$0xff]  ;;  %v390_v24 = vld [vmem:[%s2135_s7 + $0x580] sm:$0xff] }
  0x42   : > { %387 = vst [vmem:[%s2140_s8 + $0x2b0] sm:$0xff] %v386_v22  ;;  %v392_v25 = vld [vmem:[%s2135_s7 + $0x588] sm:$0xff]  ;;  %389 = vst [vmem:[%s2140_s8 + $0x2b8] sm:$0xff] %v388_v23  ;;  %v394_v26 = vld [vmem:[%s2135_s7 + $0x590] sm:$0xff] }
  0x43   : > { %391 = vst [vmem:[%s2140_s8 + $0x2c0] sm:$0xff] %v390_v24  ;;  %393 = vst [vmem:[%s2140_s8 + $0x2c8] sm:$0xff] %v392_v25  ;;  %v396_v27 = vld [vmem:[%s2135_s7 + $0x598] sm:$0xff]  ;;  %v398_v28 = vld [vmem:[%s2135_s7 + $0x5c0] sm:$0xff] }
  0x44   : > { %395 = vst [vmem:[%s2140_s8 + $0x2d0] sm:$0xff] %v394_v26  ;;  %397 = vst [vmem:[%s2140_s8 + $0x2d8] sm:$0xff] %v396_v27  ;;  %v400_v29 = vld [vmem:[%s2135_s7 + $0x5c8] sm:$0xff]  ;;  %v402_v30 = vld [vmem:[%s2135_s7 + $0x5d0] sm:$0xff] }
  0x45   : > { %399 = vst [vmem:[%s2140_s8 + $0x2e0] sm:$0xff] %v398_v28  ;;  %v404_v31 = vld [vmem:[%s2135_s7 + $0x5d8] sm:$0xff]  ;;  %401 = vst [vmem:[%s2140_s8 + $0x2e8] sm:$0xff] %v400_v29  ;;  %v406_v32 = vld [vmem:[%s2135_s7 + $0x600] sm:$0xff] }
  0x46   : > { %403 = vst [vmem:[%s2140_s8 + $0x2f0] sm:$0xff] %v402_v30  ;;  %405 = vst [vmem:[%s2140_s8 + $0x2f8] sm:$0xff] %v404_v31  ;;  %v408_v33 = vld [vmem:[%s2135_s7 + $0x608] sm:$0xff]  ;;  %v410_v34 = vld [vmem:[%s2135_s7 + $0x610] sm:$0xff] }
  0x47   : > { %407 = vst [vmem:[%s2140_s8 + $0x300] sm:$0xff] %v406_v32  ;;  %409 = vst [vmem:[%s2140_s8 + $0x308] sm:$0xff] %v408_v33  ;;  %v412_v35 = vld [vmem:[%s2135_s7 + $0x618] sm:$0xff]  ;;  %v414_v36 = vld [vmem:[%s2135_s7 + $0x640] sm:$0xff] }
  0x48   : > { %411 = vst [vmem:[%s2140_s8 + $0x310] sm:$0xff] %v410_v34  ;;  %v416_v37 = vld [vmem:[%s2135_s7 + $0x648] sm:$0xff]  ;;  %413 = vst [vmem:[%s2140_s8 + $0x318] sm:$0xff] %v412_v35  ;;  %v418_v38 = vld [vmem:[%s2135_s7 + $0x650] sm:$0xff] }
  0x49   : > { %415 = vst [vmem:[%s2140_s8 + $0x320] sm:$0xff] %v414_v36  ;;  %417 = vst [vmem:[%s2140_s8 + $0x328] sm:$0xff] %v416_v37  ;;  %v420_v39 = vld [vmem:[%s2135_s7 + $0x658] sm:$0xff]  ;;  %v422_v40 = vld [vmem:[%s2135_s7 + $0x680] sm:$0xff] }
  0x4a   : > { %419 = vst [vmem:[%s2140_s8 + $0x330] sm:$0xff] %v418_v38  ;;  %421 = vst [vmem:[%s2140_s8 + $0x338] sm:$0xff] %v420_v39  ;;  %v424_v41 = vld [vmem:[%s2135_s7 + $0x688] sm:$0xff]  ;;  %v426_v42 = vld [vmem:[%s2135_s7 + $0x690] sm:$0xff] }
  0x4b   : > { %423 = vst [vmem:[%s2140_s8 + $0x340] sm:$0xff] %v422_v40  ;;  %v428_v43 = vld [vmem:[%s2135_s7 + $0x698] sm:$0xff]  ;;  %425 = vst [vmem:[%s2140_s8 + $0x348] sm:$0xff] %v424_v41  ;;  %v430_v44 = vld [vmem:[%s2135_s7 + $0x6c0] sm:$0xff] }
  0x4c   : > { %427 = vst [vmem:[%s2140_s8 + $0x350] sm:$0xff] %v426_v42  ;;  %429 = vst [vmem:[%s2140_s8 + $0x358] sm:$0xff] %v428_v43  ;;  %v432_v45 = vld [vmem:[%s2135_s7 + $0x6c8] sm:$0xff]  ;;  %v434_v46 = vld [vmem:[%s2135_s7 + $0x6d0] sm:$0xff] }
  0x4d   : > { %431 = vst [vmem:[%s2140_s8 + $0x360] sm:$0xff] %v430_v44  ;;  %433 = vst [vmem:[%s2140_s8 + $0x368] sm:$0xff] %v432_v45  ;;  %v436_v47 = vld [vmem:[%s2135_s7 + $0x6d8] sm:$0xff]  ;;  %v438_v48 = vld [vmem:[%s2135_s7 + $0x700] sm:$0xff] }
  0x4e   : > { %435 = vst [vmem:[%s2140_s8 + $0x370] sm:$0xff] %v434_v46  ;;  %v440_v49 = vld [vmem:[%s2135_s7 + $0x708] sm:$0xff]  ;;  %437 = vst [vmem:[%s2140_s8 + $0x378] sm:$0xff] %v436_v47  ;;  %v442_v50 = vld [vmem:[%s2135_s7 + $0x710] sm:$0xff] }
  0x4f   : > { %439 = vst [vmem:[%s2140_s8 + $0x380] sm:$0xff] %v438_v48  ;;  %441 = vst [vmem:[%s2140_s8 + $0x388] sm:$0xff] %v440_v49  ;;  %v444_v51 = vld [vmem:[%s2135_s7 + $0x718] sm:$0xff]  ;;  %v446_v52 = vld [vmem:[%s2135_s7 + $0x740] sm:$0xff] }
  0x50   : > { %443 = vst [vmem:[%s2140_s8 + $0x390] sm:$0xff] %v442_v50  ;;  %445 = vst [vmem:[%s2140_s8 + $0x398] sm:$0xff] %v444_v51  ;;  %v448_v53 = vld [vmem:[%s2135_s7 + $0x748] sm:$0xff]  ;;  %v450_v54 = vld [vmem:[%s2135_s7 + $0x750] sm:$0xff] }
  0x51   : > { %447 = vst [vmem:[%s2140_s8 + $0x3a0] sm:$0xff] %v446_v52  ;;  %v452_v55 = vld [vmem:[%s2135_s7 + $0x758] sm:$0xff]  ;;  %449 = vst [vmem:[%s2140_s8 + $0x3a8] sm:$0xff] %v448_v53  ;;  %v454_v56 = vld [vmem:[%s2135_s7 + $0x780] sm:$0xff] }
  0x52   : > { %451 = vst [vmem:[%s2140_s8 + $0x3b0] sm:$0xff] %v450_v54  ;;  %453 = vst [vmem:[%s2140_s8 + $0x3b8] sm:$0xff] %v452_v55  ;;  %v456_v57 = vld [vmem:[%s2135_s7 + $0x788] sm:$0xff]  ;;  %v458_v58 = vld [vmem:[%s2135_s7 + $0x790] sm:$0xff] }
  0x53   : > { %455 = vst [vmem:[%s2140_s8 + $0x3c0] sm:$0xff] %v454_v56  ;;  %457 = vst [vmem:[%s2140_s8 + $0x3c8] sm:$0xff] %v456_v57  ;;  %v460_v59 = vld [vmem:[%s2135_s7 + $0x798] sm:$0xff]  ;;  %v462_v60 = vld [vmem:[%s2135_s7 + $0x7c0] sm:$0xff] }
  0x54   : > { %459 = vst [vmem:[%s2140_s8 + $0x3d0] sm:$0xff] %v458_v58  ;;  %v464_v61 = vld [vmem:[%s2135_s7 + $0x7c8] sm:$0xff]  ;;  %461 = vst [vmem:[%s2140_s8 + $0x3d8] sm:$0xff] %v460_v59  ;;  %v466_v62 = vld [vmem:[%s2135_s7 + $0x7d0] sm:$0xff] }
  0x55   : > { %463 = vst [vmem:[%s2140_s8 + $0x3e0] sm:$0xff] %v462_v60  ;;  %465 = vst [vmem:[%s2140_s8 + $0x3e8] sm:$0xff] %v464_v61  ;;  %v468_v63 = vld [vmem:[%s2135_s7 + $0x7d8] sm:$0xff] }
  0x56   : > { %467 = vst [vmem:[%s2140_s8 + $0x3f0] sm:$0xff] %v466_v62  ;;  %469 = vst [vmem:[%s2140_s8 + $0x3f8] sm:$0xff] %v468_v63 }
  0x57 PF: > { %p1783_p7 = scmp.ge.s32.totalorder %s2053_s18, 1  ;;  %p482_p8 = scmp.lt.s32.totalorder %s2053_s18, 9 }
  0x59   : > { %p483_p9 = pnand %p1783_p7, %p482_p8 }
  0x5a   : > { %s489_s9 = sand.u32 (!%p483_p9), 1, %s2029_s12   ;;  %p538_p10 = scmp.lt.s32.totalorder (!%p483_p9), %s2041_s15, 3 }
  0x5b   : > { %486 = sbr.rel (%p483_p9) target bundleno = 441 (0x1b9), region = 51  ;;  %s1784_s10 = sshll.u32 (!%p483_p9), %s489_s9, 10 }
  0x5c   : > { %s2398_s11 = scalar_lea.vmem (!%p483_p9), [#allocation2], %s1784_s10  ;;  %s1787_s24 = sshll.u32 (!%p483_p9), %s2037_s14, 3 }
  0x5d   : > { %p554_p11 = scmp.lt.s32.totalorder (!%p483_p9), %s1787_s24, 15 }
  0x60   : > { %v649_v0 = vld [vmem:[%s2398_s11 + $0x1c0] sm:$0xff]  ;;  %v650_v2 = vld [vmem:[%s2398_s11 + $0x1c8] sm:$0xff]  ;;  %s2614_s15 = smov (!%p538_p10, %s2041_s15), 3  ;;  %s2616_s24 = smov (!%p554_p11, %s1787_s24), 15 }
  0x61   : > { %v653_v1 = vld [vmem:[%s2398_s11 + $0x1e0] sm:$0xff]  ;;  %v654_v4 = vld [vmem:[%s2398_s11 + $0x1e8] sm:$0xff]  ;;  %s1923_s12 = sshll.u32 %s2614_s15, 3  ;;  %s556_s28 = scalar_lea.vmem %s2599_s2, %s2616_s24 }
  0x62   : > { %v1850_v3 = vcombine.high %v649_v0, %v653_v1  ;;  %v1849_v5 = vcombine.low %v649_v0, %v653_v1  ;;  %v641_v6 = vld [vmem:[%s2398_s11 + $0x180] sm:$0xff]  ;;  %v1852_v8 = vcombine.high %v650_v2, %v654_v4  ;;  %v1851_v9 = vcombine.low %v650_v2, %v654_v4  ;;  %v642_v11 = vld [vmem:[%s2398_s11 + $0x188] sm:$0xff]  ;;  %s549_s23 = scalar_lea.vmem %s2597_s0, %s1923_s12  ;;  %s1789_s14 = sshll.u32 %s2614_s15, 4 }
  0x63   : > { %v645_v7 = vld [vmem:[%s2398_s11 + $0x1a0] sm:$0xff]  ;;  %v646_v12 = vld [vmem:[%s2398_s11 + $0x1a8] sm:$0xff]  ;;  %s568_s29 = sadd.s32 %s1789_s14, %s2616_s24 }
  0x64   : > { %v1842_v10 = vcombine.high %v641_v6, %v645_v7  ;;  %v633_v13 = vld [vmem:[%s2398_s11 + $0x140] sm:$0xff]  ;;  %1368 = vmatprep.subr.bf16.mxu0 %v1850_v3  ;;  %v1844_v14 = vcombine.high %v642_v11, %v646_v12  ;;  %v634_v16 = vld [vmem:[%s2398_s11 + $0x148] sm:$0xff]  ;;  %1409 = vmatprep.subr.bf16.mxu1 %v1852_v8  ;;  %v1841_v18 = vcombine.low %v641_v6, %v645_v7  ;;  %s1790_s30 = sshll.u32 %s568_s29, 3 }
  0x65   : > { %v637_v15 = vld [vmem:[%s2398_s11 + $0x160] sm:$0xff]  ;;  %v638_v17 = vld [vmem:[%s2398_s11 + $0x168] sm:$0xff]  ;;  %1369 = vmatpush1.bf16.msra.mxu0 %v1849_v5  ;;  %1410 = vmatpush1.bf16.msra.mxu1 %v1851_v9  ;;  %v1843_v19 = vcombine.low %v642_v11, %v646_v12  ;;  %s2566_s6 = scalar_lea.vmem %s2600_s3, %s1790_s30 }
  0x66   : > { %1370 = vmatprep.subr.bf16.mxu0 %v1842_v10  ;;  %v1834_v20 = vcombine.high %v633_v13, %v637_v15  ;;  %1411 = vmatprep.subr.bf16.mxu1 %v1844_v14  ;;  %v1836_v21 = vcombine.high %v634_v16, %v638_v17  ;;  %v625_v22 = vld [vmem:[%s2398_s11 + $0x100] sm:$0xff]  ;;  %v626_v24 = vld [vmem:[%s2398_s11 + $0x108] sm:$0xff]  ;;  %v1833_v26 = vcombine.low %v633_v13, %v637_v15 }
  0x67   : > { %v629_v23 = vld [vmem:[%s2398_s11 + $0x120] sm:$0xff]  ;;  %v630_v25 = vld [vmem:[%s2398_s11 + $0x128] sm:$0xff]  ;;  %v1835_v27 = vcombine.low %v634_v16, %v638_v17 }
  0x68   : > { %v1826_v28 = vcombine.high %v625_v22, %v629_v23  ;;  %v1828_v29 = vcombine.high %v626_v24, %v630_v25  ;;  %v617_v30 = vld [vmem:[%s2398_s11 + $0xc0] sm:$0xff]  ;;  %v618_v32 = vld [vmem:[%s2398_s11 + $0xc8] sm:$0xff]  ;;  %v1825_v34 = vcombine.low %v625_v22, %v629_v23  ;;  %v1827_v35 = vcombine.low %v626_v24, %v630_v25 }
  0x69   : > { %1371 = vmatpush1.bf16.msra.mxu0 %v1841_v18  ;;  %1412 = vmatpush1.bf16.msra.mxu1 %v1843_v19  ;;  %v621_v31 = vld [vmem:[%s2398_s11 + $0xe0] sm:$0xff]  ;;  %v622_v33 = vld [vmem:[%s2398_s11 + $0xe8] sm:$0xff] }
  0x6a   : > { %1372 = vmatprep.subr.bf16.mxu0 %v1834_v20  ;;  %1413 = vmatprep.subr.bf16.mxu1 %v1836_v21  ;;  %v1818_v36 = vcombine.high %v617_v30, %v621_v31  ;;  %v1820_v37 = vcombine.high %v618_v32, %v622_v33  ;;  %v609_v38 = vld [vmem:[%s2398_s11 + $0x80] sm:$0xff]  ;;  %v610_v40 = vld [vmem:[%s2398_s11 + $0x88] sm:$0xff]  ;;  %v1817_v42 = vcombine.low %v617_v30, %v621_v31 }
  0x6b   : > { %v613_v39 = vld [vmem:[%s2398_s11 + $0xa0] sm:$0xff]  ;;  %v614_v41 = vld [vmem:[%s2398_s11 + $0xa8] sm:$0xff]  ;;  %v1819_v43 = vcombine.low %v618_v32, %v622_v33 }
  0x6c   : > { %v1810_v44 = vcombine.high %v609_v38, %v613_v39  ;;  %v1812_v45 = vcombine.high %v610_v40, %v614_v41  ;;  %v601_v46 = vld [vmem:[%s2398_s11 + $0x40] sm:$0xff]  ;;  %v602_v48 = vld [vmem:[%s2398_s11 + $0x48] sm:$0xff]  ;;  %v1809_v50 = vcombine.low %v609_v38, %v613_v39  ;;  %v1811_v51 = vcombine.low %v610_v40, %v614_v41 }
  0x6d   : > { %1373 = vmatpush1.bf16.msra.mxu0 %v1833_v26  ;;  %1414 = vmatpush1.bf16.msra.mxu1 %v1835_v27  ;;  %v605_v47 = vld [vmem:[%s2398_s11 + $0x60] sm:$0xff]  ;;  %v606_v49 = vld [vmem:[%s2398_s11 + $0x68] sm:$0xff] }
  0x6e   : > { %1374 = vmatprep.subr.bf16.mxu0 %v1826_v28  ;;  %1415 = vmatprep.subr.bf16.mxu1 %v1828_v29  ;;  %v1802_v52 = vcombine.high %v601_v46, %v605_v47  ;;  %v2436_v53 = vld [vmem:[%s549_s23] sm:$0xff]  ;;  %v1804_v54 = vcombine.high %v602_v48, %v606_v49  ;;  %v594_v58 = vld [vmem:[%s2398_s11 + $0x8] sm:$0xff]  ;;  %v1801_v60 = vcombine.low %v601_v46, %v605_v47 }
  0x6f   : > { %v593_v55 = vld [vmem:[%s2398_s11] sm:$0xff]  ;;  %v2442_v57 = vcombine.high %v2436_v53, %v2436_v53  ;;  %v598_v59 = vld [vmem:[%s2398_s11 + $0x28] sm:$0xff]  ;;  %v1803_v61 = vcombine.low %v602_v48, %v606_v49 }
  0x70   : > { %v597_v56 = vld [vmem:[%s2398_s11 + $0x20] sm:$0xff]  ;;  %v1796_v63 = vcombine.high %v594_v58, %v598_v59  ;;  %v714_v2 = vld [vmem:[%s2398_s11 + $0x3c8] sm:$0xff]  ;;  %v1795_v5 = vcombine.low %v594_v58, %v598_v59 }
  0x71   : > { %1375 = vmatpush1.bf16.msra.mxu0 %v1825_v34  ;;  %1416 = vmatpush1.bf16.msra.mxu1 %v1827_v35  ;;  %v1794_v62 = vcombine.high %v593_v55, %v597_v56  ;;  %v713_v0 = vld [vmem:[%s2398_s11 + $0x3c0] sm:$0xff]  ;;  %v718_v3 = vld [vmem:[%s2398_s11 + $0x3e8] sm:$0xff]  ;;  %v1793_v4 = vcombine.low %v593_v55, %v597_v56 }
  0x72   : > { %1376 = vmatprep.subr.bf16.mxu0 %v1818_v36  ;;  %1417 = vmatprep.subr.bf16.mxu1 %v1820_v37  ;;  %v717_v1 = vld [vmem:[%s2398_s11 + $0x3e0] sm:$0xff]  ;;  %v1916_v7 = vcombine.high %v714_v2, %v718_v3  ;;  %v706_v10 = vld [vmem:[%s2398_s11 + $0x388] sm:$0xff]  ;;  %v1915_v13 = vcombine.low %v714_v2, %v718_v3  ;;  %v651_v2 = vld [vmem:[%s2398_s11 + $0x1d0] sm:$0xff] }
  0x73   : > { %1400 = vmatprep.mubr.bf16.mxu0 %v2442_v57  ;;  %1441 = vmatprep.mubr.bf16.mxu1 %v2442_v57  ;;  %v1914_v6 = vcombine.high %v713_v0, %v717_v1  ;;  %v705_v8 = vld [vmem:[%s2398_s11 + $0x380] sm:$0xff]  ;;  %v710_v11 = vld [vmem:[%s2398_s11 + $0x3a8] sm:$0xff]  ;;  %v1913_v12 = vcombine.low %v713_v0, %v717_v1  ;;  %v655_v3 = vld [vmem:[%s2398_s11 + $0x1f0] sm:$0xff] }
  0x74   : > { %v709_v9 = vld [vmem:[%s2398_s11 + $0x3a0] sm:$0xff]  ;;  %v1908_v15 = vcombine.high %v706_v10, %v710_v11  ;;  %v698_v18 = vld [vmem:[%s2398_s11 + $0x348] sm:$0xff]  ;;  %v1907_v21 = vcombine.low %v706_v10, %v710_v11  ;;  %v643_v10 = vld [vmem:[%s2398_s11 + $0x190] sm:$0xff] }
  0x75   : > { %1377 = vmatpush1.bf16.msra.mxu0 %v1817_v42  ;;  %1418 = vmatpush1.bf16.msra.mxu1 %v1819_v43  ;;  %v1906_v14 = vcombine.high %v705_v8, %v709_v9  ;;  %v697_v16 = vld [vmem:[%s2398_s11 + $0x340] sm:$0xff]  ;;  %v702_v19 = vld [vmem:[%s2398_s11 + $0x368] sm:$0xff]  ;;  %v1905_v20 = vcombine.low %v705_v8, %v709_v9  ;;  %v1854_v8 = vcombine.high %v651_v2, %v655_v3  ;;  %v647_v11 = vld [vmem:[%s2398_s11 + $0x1b0] sm:$0xff] }
  0x76   : > { %1378 = vmatprep.subr.bf16.mxu0 %v1810_v44  ;;  %1419 = vmatprep.subr.bf16.mxu1 %v1812_v45  ;;  %v701_v17 = vld [vmem:[%s2398_s11 + $0x360] sm:$0xff]  ;;  %v1900_v23 = vcombine.high %v698_v18, %v702_v19  ;;  %v690_v26 = vld [vmem:[%s2398_s11 + $0x308] sm:$0xff]  ;;  %v1899_v29 = vcombine.low %v698_v18, %v702_v19  ;;  %v635_v19 = vld [vmem:[%s2398_s11 + $0x150] sm:$0xff] }
  0x77   : > { %v1898_v22 = vcombine.high %v697_v16, %v701_v17  ;;  %v689_v24 = vld [vmem:[%s2398_s11 + $0x300] sm:$0xff]  ;;  %v694_v27 = vld [vmem:[%s2398_s11 + $0x328] sm:$0xff]  ;;  %v1897_v28 = vcombine.low %v697_v16, %v701_v17  ;;  %v1846_v17 = vcombine.high %v643_v10, %v647_v11 }
  0x78   : > { %v693_v25 = vld [vmem:[%s2398_s11 + $0x320] sm:$0xff]  ;;  %v1892_v31 = vcombine.high %v690_v26, %v694_v27  ;;  %v682_v34 = vld [vmem:[%s2398_s11 + $0x2c8] sm:$0xff]  ;;  %v1891_v37 = vcombine.low %v690_v26, %v694_v27  ;;  %v627_v26 = vld [vmem:[%s2398_s11 + $0x110] sm:$0xff] }
  0x79   : > { %1379 = vmatpush1.bf16.msra.mxu0 %v1809_v50  ;;  %1420 = vmatpush1.bf16.msra.mxu1 %v1811_v51  ;;  %v1890_v30 = vcombine.high %v689_v24, %v693_v25  ;;  %v681_v32 = vld [vmem:[%s2398_s11 + $0x2c0] sm:$0xff]  ;;  %v686_v35 = vld [vmem:[%s2398_s11 + $0x2e8] sm:$0xff]  ;;  %v1889_v36 = vcombine.low %v689_v24, %v693_v25  ;;  %v631_v27 = vld [vmem:[%s2398_s11 + $0x130] sm:$0xff] }
  0x7a   : > { %1380 = vmatprep.subr.bf16.mxu0 %v1802_v52  ;;  %1421 = vmatprep.subr.bf16.mxu1 %v1804_v54  ;;  %v685_v33 = vld [vmem:[%s2398_s11 + $0x2e0] sm:$0xff]  ;;  %v1884_v39 = vcombine.high %v682_v34, %v686_v35  ;;  %v674_v42 = vld [vmem:[%s2398_s11 + $0x288] sm:$0xff]  ;;  %v1883_v45 = vcombine.low %v682_v34, %v686_v35  ;;  %v619_v34 = vld [vmem:[%s2398_s11 + $0xd0] sm:$0xff] }
  0x7b   : > { %v1882_v38 = vcombine.high %v681_v32, %v685_v33  ;;  %v673_v40 = vld [vmem:[%s2398_s11 + $0x280] sm:$0xff]  ;;  %v678_v43 = vld [vmem:[%s2398_s11 + $0x2a8] sm:$0xff]  ;;  %v1881_v44 = vcombine.low %v681_v32, %v685_v33  ;;  %v1830_v32 = vcombine.high %v627_v26, %v631_v27  ;;  %v623_v35 = vld [vmem:[%s2398_s11 + $0xf0] sm:$0xff] }
  0x7c   : > { %v677_v41 = vld [vmem:[%s2398_s11 + $0x2a0] sm:$0xff]  ;;  %v1876_v47 = vcombine.high %v674_v42, %v678_v43  ;;  %v666_v50 = vld [vmem:[%s2398_s11 + $0x248] sm:$0xff]  ;;  %v1875_v54 = vcombine.low %v674_v42, %v678_v43  ;;  %v615_v42 = vld [vmem:[%s2398_s11 + $0xb0] sm:$0xff] }
  0x7d   : > { %1381 = vmatpush1.bf16.msra.mxu0 %v1801_v60  ;;  %1422 = vmatpush1.bf16.msra.mxu1 %v1803_v61  ;;  %v1874_v46 = vcombine.high %v673_v40, %v677_v41  ;;  %v665_v48 = vld [vmem:[%s2398_s11 + $0x240] sm:$0xff]  ;;  %v670_v51 = vld [vmem:[%s2398_s11 + $0x268] sm:$0xff]  ;;  %v1873_v52 = vcombine.low %v673_v40, %v677_v41  ;;  %v611_v41 = vld [vmem:[%s2398_s11 + $0x90] sm:$0xff] }
  0x7e   : > { %1382 = vmatprep.subr.bf16.mxu0 %v1794_v62  ;;  %1423 = vmatprep.subr.bf16.mxu1 %v1796_v63  ;;  %v669_v49 = vld [vmem:[%s2398_s11 + $0x260] sm:$0xff]  ;;  %v1868_v56 = vcombine.high %v666_v50, %v670_v51  ;;  %v658_v60 = vld [vmem:[%s2398_s11 + $0x208] sm:$0xff]  ;;  %v1867_v63 = vcombine.low %v666_v50, %v670_v51  ;;  %v612_v43 = vld [vmem:[%s2398_s11 + $0x98] sm:$0xff] }
  0x7f   : > { %v1866_v55 = vcombine.high %v665_v48, %v669_v49  ;;  %v657_v58 = vld [vmem:[%s2398_s11 + $0x200] sm:$0xff]  ;;  %v662_v61 = vld [vmem:[%s2398_s11 + $0x228] sm:$0xff]  ;;  %v1865_v62 = vcombine.low %v665_v48, %v669_v49  ;;  %v603_v49 = vld [vmem:[%s2398_s11 + $0x50] sm:$0xff] }
  0x80   : > { %v661_v59 = vld [vmem:[%s2398_s11 + $0x220] sm:$0xff]  ;;  %v1860_v1 = vcombine.high %v658_v60, %v662_v61  ;;  %v607_v50 = vld [vmem:[%s2398_s11 + $0x70] sm:$0xff]  ;;  %v604_v51 = vld [vmem:[%s2398_s11 + $0x58] sm:$0xff] }
  0x81   : > { %1383 = vmatpush1.bf16.msra.mxu0 %v1793_v4  ;;  %1424 = vmatpush1.bf16.msra.mxu1 %v1795_v5  ;;  %v1858_v0 = vcombine.high %v657_v58, %v661_v59  ;;  %v652_v4 = vld [vmem:[%s2398_s11 + $0x1d8] sm:$0xff] }
  0x82   : > { %1384 = vmatprep.subr.bf16.mxu0 %v1914_v6  ;;  %1425 = vmatprep.subr.bf16.mxu1 %v1916_v7  ;;  %v656_v5 = vld [vmem:[%s2398_s11 + $0x1f8] sm:$0xff]  ;;  %v1857_v6 = vcombine.low %v657_v58, %v661_v59  ;;  %v1859_v7 = vcombine.low %v658_v60, %v662_v61  ;;  %v595_v59 = vld [vmem:[%s2398_s11 + $0x10] sm:$0xff] }
  0x83   : > { %v1856_v9 = vcombine.high %v652_v4, %v656_v5  ;;  %v1855_v16 = vcombine.low %v652_v4, %v656_v5  ;;  %v599_v60 = vld [vmem:[%s2398_s11 + $0x30] sm:$0xff]  ;;  %v596_v61 = vld [vmem:[%s2398_s11 + $0x18] sm:$0xff] }
  0x84   : > { %v719_v4 = vld [vmem:[%s2398_s11 + $0x3f0] sm:$0xff]  ;;  %v716_v5 = vld [vmem:[%s2398_s11 + $0x3d8] sm:$0xff] }
  0x85   : > { %1385 = vmatpush2.bf16.msra.mxu0 %v1913_v12  ;;  %1426 = vmatpush2.bf16.msra.mxu1 %v1915_v13  ;;  %v2488_v12 = vcombine.low %v2436_v53, %v2436_v53  ;;  %v644_v13 = vld [vmem:[%s2398_s11 + $0x198] sm:$0xff] }
  0x86   : > { %1386 = vmatprep.subr.bf16.mxu0 %v1906_v14  ;;  %1427 = vmatprep.subr.bf16.mxu1 %v1908_v15  ;;  %v648_v14 = vld [vmem:[%s2398_s11 + $0x1b8] sm:$0xff]  ;;  %v1853_v15 = vcombine.low %v651_v2, %v655_v3  ;;  %v715_v3 = vld [vmem:[%s2398_s11 + $0x3d0] sm:$0xff] }
  0x87   : > { %v1848_v18 = vcombine.high %v644_v13, %v648_v14  ;;  %v636_v53 = vld [vmem:[%s2398_s11 + $0x158] sm:$0xff] }
  0x89   : > { %1387 = vmatpush2.bf16.msra.mxu0 %v1905_v20  ;;  %1428 = vmatpush2.bf16.msra.mxu1 %v1907_v21  ;;  %v639_v20 = vld [vmem:[%s2398_s11 + $0x170] sm:$0xff]  ;;  %v640_v21 = vld [vmem:[%s2398_s11 + $0x178] sm:$0xff] }
  0x8a   : > { %1388 = vmatprep.subr.bf16.mxu0 %v1898_v22  ;;  %1429 = vmatprep.subr.bf16.mxu1 %v1900_v23  ;;  %v1845_v22 = vcombine.low %v643_v10, %v647_v11  ;;  %v1847_v23 = vcombine.low %v644_v13, %v648_v14  ;;  %v1838_v24 = vcombine.high %v635_v19, %v639_v20  ;;  %v707_v11 = vld [vmem:[%s2398_s11 + $0x390] sm:$0xff]  ;;  %v708_v14 = vld [vmem:[%s2398_s11 + $0x398] sm:$0xff] }
  0x8b   : > { %v1840_v25 = vcombine.high %v636_v53, %v640_v21  ;;  %v711_v13 = vld [vmem:[%s2398_s11 + $0x3b0] sm:$0xff] }
  0x8d   : > { %1389 = vmatpush2.bf16.msra.mxu0 %v1897_v28  ;;  %1430 = vmatpush2.bf16.msra.mxu1 %v1899_v29  ;;  %v628_v28 = vld [vmem:[%s2398_s11 + $0x118] sm:$0xff] }
  0x8e   : > { %1390 = vmatprep.subr.bf16.mxu0 %v1890_v30  ;;  %1431 = vmatprep.subr.bf16.mxu1 %v1892_v31  ;;  %v632_v29 = vld [vmem:[%s2398_s11 + $0x138] sm:$0xff]  ;;  %v1837_v30 = vcombine.low %v635_v19, %v639_v20  ;;  %v1839_v31 = vcombine.low %v636_v53, %v640_v21  ;;  %v699_v20 = vld [vmem:[%s2398_s11 + $0x350] sm:$0xff] }
  0x8f   : > { %v1832_v33 = vcombine.high %v628_v28, %v632_v29  ;;  %v703_v53 = vld [vmem:[%s2398_s11 + $0x370] sm:$0xff]  ;;  %v700_v21 = vld [vmem:[%s2398_s11 + $0x358] sm:$0xff] }
  0x91   : > { %1391 = vmatpush2.bf16.msra.mxu0 %v1889_v36  ;;  %1432 = vmatpush2.bf16.msra.mxu1 %v1891_v37  ;;  %v620_v36 = vld [vmem:[%s2398_s11 + $0xd8] sm:$0xff] }
  0x92   : > { %1392 = vmatprep.subr.bf16.mxu0 %v1882_v38  ;;  %1433 = vmatprep.subr.bf16.mxu1 %v1884_v39  ;;  %v624_v37 = vld [vmem:[%s2398_s11 + $0xf8] sm:$0xff]  ;;  %v1829_v38 = vcombine.low %v627_v26, %v631_v27  ;;  %v1822_v39 = vcombine.high %v619_v34, %v623_v35  ;;  %v691_v27 = vld [vmem:[%s2398_s11 + $0x310] sm:$0xff] }
  0x93   : > { %v1824_v40 = vcombine.high %v620_v36, %v624_v37 }
  0x95   : > { %1393 = vmatpush2.bf16.msra.mxu0 %v1881_v44  ;;  %1434 = vmatpush2.bf16.msra.mxu1 %v1883_v45  ;;  %v616_v44 = vld [vmem:[%s2398_s11 + $0xb8] sm:$0xff]  ;;  %v1821_v45 = vcombine.low %v619_v34, %v623_v35  ;;  %v683_v35 = vld [vmem:[%s2398_s11 + $0x2d0] sm:$0xff] }
  0x96   : > { %1394 = vmatprep.subr.bf16.mxu0 %v1874_v46  ;;  %1435 = vmatprep.subr.bf16.mxu1 %v1876_v47  ;;  %v1823_v46 = vcombine.low %v620_v36, %v624_v37  ;;  %v1814_v47 = vcombine.high %v611_v41, %v615_v42  ;;  %v1816_v48 = vcombine.high %v612_v43, %v616_v44  ;;  %v687_v36 = vld [vmem:[%s2398_s11 + $0x2f0] sm:$0xff]  ;;  %v684_v37 = vld [vmem:[%s2398_s11 + $0x2d8] sm:$0xff] }
  0x99   : > { %1395 = vmatpush2.bf16.msra.mxu0 %v1873_v52  ;;  %1436 = vmatpush2.bf16.msra.mxu1 %v1875_v54  ;;  %v608_v52 = vld [vmem:[%s2398_s11 + $0x78] sm:$0xff]  ;;  %v1813_v54 = vcombine.low %v611_v41, %v615_v42  ;;  %v675_v42 = vld [vmem:[%s2398_s11 + $0x290] sm:$0xff] }
  0x9a   : > { %1396 = vmatprep.subr.bf16.mxu0 %v1866_v55  ;;  %1437 = vmatprep.subr.bf16.mxu1 %v1868_v56  ;;  %v1815_v55 = vcombine.low %v612_v43, %v616_v44  ;;  %v1806_v56 = vcombine.high %v603_v49, %v607_v50  ;;  %v1808_v58 = vcombine.high %v604_v51, %v608_v52  ;;  %v679_v43 = vld [vmem:[%s2398_s11 + $0x2b0] sm:$0xff]  ;;  %v676_v44 = vld [vmem:[%s2398_s11 + $0x298] sm:$0xff] }
  0x9d   : > { %1397 = vmatpush2.bf16.msra.mxu0 %v1865_v62  ;;  %1438 = vmatpush2.bf16.msra.mxu1 %v1867_v63  ;;  %v600_v62 = vld [vmem:[%s2398_s11 + $0x38] sm:$0xff]  ;;  %v1805_v63 = vcombine.low %v603_v49, %v607_v50  ;;  %v667_v50 = vld [vmem:[%s2398_s11 + $0x250] sm:$0xff] }
  0x9e   : > { %1398 = vmatprep.subr.bf16.mxu0 %v1858_v0  ;;  %1439 = vmatprep.subr.bf16.mxu1 %v1860_v1  ;;  %v1807_v0 = vcombine.low %v604_v51, %v608_v52  ;;  %v1798_v1 = vcombine.high %v595_v59, %v599_v60  ;;  %v1800_v2 = vcombine.high %v596_v61, %v600_v62  ;;  %v671_v51 = vld [vmem:[%s2398_s11 + $0x270] sm:$0xff]  ;;  %v668_v52 = vld [vmem:[%s2398_s11 + $0x258] sm:$0xff] }
  0xa1   : > { %1399 = vmatpush2.bf16.msra.mxu0 %v1857_v6  ;;  %1440 = vmatpush2.bf16.msra.mxu1 %v1859_v7  ;;  %v720_v6 = vld [vmem:[%s2398_s11 + $0x3f8] sm:$0xff]  ;;  %v1797_v7 = vcombine.low %v595_v59, %v599_v60  ;;  %v659_v60 = vld [vmem:[%s2398_s11 + $0x210] sm:$0xff] }
  0xa2   : > { %1450 = vmatprep.subr.bf16.mxu0 %v1854_v8  ;;  %1491 = vmatprep.subr.bf16.mxu1 %v1856_v9  ;;  %v1799_v8 = vcombine.low %v596_v61, %v600_v62  ;;  %v1918_v9 = vcombine.high %v715_v3, %v719_v4  ;;  %v1920_v10 = vcombine.high %v716_v5, %v720_v6  ;;  %v663_v61 = vld [vmem:[%s2398_s11 + $0x230] sm:$0xff]  ;;  %v660_v62 = vld [vmem:[%s2398_s11 + $0x218] sm:$0xff] }
  0xa4   : > { %1401 = vmatmul.mubr.bf16.vlgmr.msra.gmra.mxu0 %v2488_v12  ;;  %1442 = vmatmul.mubr.bf16.vlgmr.msra.gmra.mxu1 %v2488_v12 }
  0xa5   : > { %1451 = vmatpush1.bf16.msra.mxu0 %v1853_v15  ;;  %1492 = vmatpush1.bf16.msra.mxu1 %v1855_v16  ;;  %v712_v15 = vld [vmem:[%s2398_s11 + $0x3b8] sm:$0xff]  ;;  %v1917_v16 = vcombine.low %v715_v3, %v719_v4  ;;  %v1861_v4 = vcombine.low %v659_v60, %v663_v61 }
  0xa6   : > { %1452 = vmatprep.subr.bf16.mxu0 %v1846_v17  ;;  %1493 = vmatprep.subr.bf16.mxu1 %v1848_v18  ;;  %v1919_v17 = vcombine.low %v716_v5, %v720_v6  ;;  %v1910_v18 = vcombine.high %v707_v11, %v711_v13  ;;  %v1912_v19 = vcombine.high %v708_v14, %v712_v15  ;;  %v1561_v6 = vlaneseq }
  0xa7   : > { %1482 = vmatprep.mubr.bf16.mxu0 %v2442_v57  ;;  %1523 = vmatprep.mubr.bf16.mxu1 %v2442_v57  ;;  %v1831_v57 = vcombine.low %v628_v28, %v632_v29  ;;  %v695_v28 = vld [vmem:[%s2398_s11 + $0x330] sm:$0xff]  ;;  %v692_v29 = vld [vmem:[%s2398_s11 + $0x318] sm:$0xff] }
  0xa9   : > { %1453 = vmatpush1.bf16.msra.mxu0 %v1845_v22  ;;  %1494 = vmatpush1.bf16.msra.mxu1 %v1847_v23  ;;  %v704_v22 = vld [vmem:[%s2398_s11 + $0x378] sm:$0xff]  ;;  %v1909_v23 = vcombine.low %v707_v11, %v711_v13 }
  0xaa   : > { %1454 = vmatprep.subr.bf16.mxu0 %v1838_v24  ;;  %1495 = vmatprep.subr.bf16.mxu1 %v1840_v25  ;;  %v1911_v24 = vcombine.low %v708_v14, %v712_v15  ;;  %v1902_v25 = vcombine.high %v699_v20, %v703_v53  ;;  %v1904_v26 = vcombine.high %v700_v21, %v704_v22 }
  0xad   : > { %1455 = vmatpush1.bf16.msra.mxu0 %v1837_v30  ;;  %1496 = vmatpush1.bf16.msra.mxu1 %v1839_v31  ;;  %v696_v30 = vld [vmem:[%s2398_s11 + $0x338] sm:$0xff]  ;;  %v1901_v31 = vcombine.low %v699_v20, %v703_v53 }
  0xae   : > { %1456 = vmatprep.subr.bf16.mxu0 %v1830_v32  ;;  %1497 = vmatprep.subr.bf16.mxu1 %v1832_v33  ;;  %v1903_v32 = vcombine.low %v700_v21, %v704_v22  ;;  %v1894_v33 = vcombine.high %v691_v27, %v695_v28  ;;  %v1896_v34 = vcombine.high %v692_v29, %v696_v30 }
  0xb1   : > { %1457 = vmatpush1.bf16.msra.mxu0 %v1829_v38  ;;  %1498 = vmatpush1.bf16.msra.mxu1 %v1831_v57  ;;  %v688_v38 = vld [vmem:[%s2398_s11 + $0x2f8] sm:$0xff]  ;;  %v1893_v57 = vcombine.low %v691_v27, %v695_v28 }
  0xb2   : > { %1458 = vmatprep.subr.bf16.mxu0 %v1822_v39  ;;  %1499 = vmatprep.subr.bf16.mxu1 %v1824_v40  ;;  %v1895_v39 = vcombine.low %v692_v29, %v696_v30  ;;  %v1886_v40 = vcombine.high %v683_v35, %v687_v36  ;;  %v1888_v41 = vcombine.high %v684_v37, %v688_v38 }
  0xb5   : > { %1459 = vmatpush1.bf16.msra.mxu0 %v1821_v45  ;;  %1500 = vmatpush1.bf16.msra.mxu1 %v1823_v46  ;;  %v680_v45 = vld [vmem:[%s2398_s11 + $0x2b8] sm:$0xff]  ;;  %v1885_v46 = vcombine.low %v683_v35, %v687_v36 }
  0xb6   : > { %1460 = vmatprep.subr.bf16.mxu0 %v1814_v47  ;;  %1501 = vmatprep.subr.bf16.mxu1 %v1816_v48  ;;  %v1887_v47 = vcombine.low %v684_v37, %v688_v38  ;;  %v1878_v48 = vcombine.high %v675_v42, %v679_v43  ;;  %v1880_v49 = vcombine.high %v676_v44, %v680_v45 }
  0xb9   : > { %1461 = vmatpush1.bf16.msra.mxu0 %v1813_v54  ;;  %1502 = vmatpush1.bf16.msra.mxu1 %v1815_v55  ;;  %v672_v54 = vld [vmem:[%s2398_s11 + $0x278] sm:$0xff]  ;;  %v1877_v55 = vcombine.low %v675_v42, %v679_v43 }
  0xba   : > { %1462 = vmatprep.subr.bf16.mxu0 %v1806_v56  ;;  %1503 = vmatprep.subr.bf16.mxu1 %v1808_v58  ;;  %v1879_v56 = vcombine.low %v676_v44, %v680_v45  ;;  %v1870_v58 = vcombine.high %v667_v50, %v671_v51  ;;  %v1872_v59 = vcombine.high %v668_v52, %v672_v54 }
  0xbd   : > { %1463 = vmatpush1.bf16.msra.mxu0 %v1805_v63  ;;  %1504 = vmatpush1.bf16.msra.mxu1 %v1807_v0  ;;  %v664_v63 = vld [vmem:[%s2398_s11 + $0x238] sm:$0xff]  ;;  %v1869_v0 = vcombine.low %v667_v50, %v671_v51 }
  0xbe   : > { %1464 = vmatprep.subr.bf16.mxu0 %v1798_v1  ;;  %1505 = vmatprep.subr.bf16.mxu1 %v1800_v2  ;;  %v1871_v1 = vcombine.low %v668_v52, %v672_v54  ;;  %v1862_v2 = vcombine.high %v659_v60, %v663_v61  ;;  %v1864_v3 = vcombine.high %v660_v62, %v664_v63 }
  0xbf   : > { %v1863_v5 = vcombine.low %v660_v62, %v664_v63 }
  0xc1   : > { %1465 = vmatpush1.bf16.msra.mxu0 %v1797_v7  ;;  %1506 = vmatpush1.bf16.msra.mxu1 %v1799_v8  ;;  %v1562_v7 = vshrl.u32 %v1561_v6, 7 }
  0xc2   : > { %1466 = vmatprep.subr.bf16.mxu0 %v1918_v9  ;;  %1507 = vmatprep.subr.bf16.mxu1 %v1920_v10  ;;  %v1559_v9 = vld [vmem:[%s556_s28] sm:$0xff] }
  0xc3   : > { %v1563_v8 = vsub.s32 0, %v1562_v7  ;;  %v1571_v10 = vsub.s32 2, %v1562_v7  ;;  %v1567_v11 = vsub.s32 1, %v1562_v7  ;;  %v1575_v13 = vsub.s32 3, %v1562_v7 }
  0xc4   : > { %v1591_v35 = vsub.s32 7, %v1562_v7 }
  0xc5   : > { %1467 = vmatpush2.bf16.msra.mxu0 %v1917_v16  ;;  %1508 = vmatpush2.bf16.msra.mxu1 %v1919_v17  ;;  %v1564_v14 = vrot.slane %v1559_v9, %v1563_v8  ;;  %v1568_v17 = vrot.slane %v1559_v9, %v1567_v11 }
  0xc6   : > { %1468 = vmatprep.subr.bf16.mxu0 %v1910_v18  ;;  %1509 = vmatprep.subr.bf16.mxu1 %v1912_v19  ;;  %v1576_v19 = vrot.slane %v1559_v9, %v1575_v13 }
  0xc9   : > { %1469 = vmatpush2.bf16.msra.mxu0 %v1909_v23  ;;  %1510 = vmatpush2.bf16.msra.mxu1 %v1911_v24 }
  0xca   : > { %1470 = vmatprep.subr.bf16.mxu0 %v1902_v25  ;;  %1511 = vmatprep.subr.bf16.mxu1 %v1904_v26 }
  0xcd   : > { %1471 = vmatpush2.bf16.msra.mxu0 %v1901_v31  ;;  %1512 = vmatpush2.bf16.msra.mxu1 %v1903_v32  ;;  %v1579_v32 = vsub.s32 4, %v1562_v7 }
  0xce   : > { %1472 = vmatprep.subr.bf16.mxu0 %v1894_v33  ;;  %1513 = vmatprep.subr.bf16.mxu1 %v1896_v34  ;;  %v1587_v33 = vsub.s32 6, %v1562_v7  ;;  %v1583_v34 = vsub.s32 5, %v1562_v7 }
  0xcf   : > { %v1580_v36 = vrot.slane %v1559_v9, %v1579_v32 }
  0xd0   : > { %v1588_v38 = vrot.slane %v1559_v9, %v1587_v33 }
  0xd1   : > { %1473 = vmatpush2.bf16.msra.mxu0 %v1893_v57  ;;  %1514 = vmatpush2.bf16.msra.mxu1 %v1895_v39  ;;  %v1584_v39 = vrot.slane %v1559_v9, %v1583_v34 }
  0xd2   : > { %1474 = vmatprep.subr.bf16.mxu0 %v1886_v40  ;;  %1515 = vmatprep.subr.bf16.mxu1 %v1888_v41  ;;  %v1592_v41 = vrot.slane %v1559_v9, %v1591_v35 }
  0xd5   : > { %1475 = vmatpush2.bf16.msra.mxu0 %v1885_v46  ;;  %1516 = vmatpush2.bf16.msra.mxu1 %v1887_v47 }
  0xd6   : > { %1476 = vmatprep.subr.bf16.mxu0 %v1878_v48  ;;  %1517 = vmatprep.subr.bf16.mxu1 %v1880_v49 }
  0xd9   : > { %1477 = vmatpush2.bf16.msra.mxu0 %v1877_v55  ;;  %1518 = vmatpush2.bf16.msra.mxu1 %v1879_v56 }
  0xda   : > { %1478 = vmatprep.subr.bf16.mxu0 %v1870_v58  ;;  %1519 = vmatprep.subr.bf16.mxu1 %v1872_v59 }
  0xdd   : > { %1479 = vmatpush2.bf16.msra.mxu0 %v1869_v0  ;;  %1520 = vmatpush2.bf16.msra.mxu1 %v1871_v1 }
  0xde   : > { %1480 = vmatprep.subr.bf16.mxu0 %v1862_v2  ;;  %1521 = vmatprep.subr.bf16.mxu1 %v1864_v3 }
  0xe1   : > { %1481 = vmatpush2.bf16.msra.mxu0 %v1861_v4  ;;  %1522 = vmatpush2.bf16.msra.mxu1 %v1863_v5 }
  0xe4   : > { %1483 = vmatmul.mubr.bf16.vlgmr.msra.gmra.mxu0 %v2488_v12  ;;  %1524 = vmatmul.mubr.bf16.vlgmr.msra.gmra.mxu1 %v2488_v12  ;;  %v1572_v12 = vrot.slane %v1559_v9, %v1571_v10 }
 0x164   : > { %v1402_v15 = vpop.f32.mrf.mxu0  ;;  %v1443_v16 = vpop.f32.mrf.mxu1 }
 0x165   : > { %v1601_v20 = vadd.f32 %v1564_v14, %v1402_v15  ;;  %v1603_v21 = vadd.f32 %v1572_v12, %v1443_v16 }
 0x166   : > { %v1404_v18 = vpop.f32.mrf.mxu0  ;;  %v1445_v53 = vpop.f32.mrf.mxu1 }
 0x167   : > { %1983 = vtanh.f32 %v1601_v20  ;;  %v1602_v23 = vadd.f32 %v1568_v17, %v1404_v18  ;;  %v1604_v25 = vadd.f32 %v1576_v19, %v1445_v53 }
 0x168   : > { %v1406_v22 = vpop.f32.mrf.mxu0  ;;  %v1447_v24 = vpop.f32.mrf.mxu1  ;;  %1985 = vtanh.f32 %v1603_v21 }
 0x169   : > { %1987 = vtanh.f32 %v1602_v23 }
 0x16a   : > { %v1407_v26 = vpop.f32.mrf.mxu0  ;;  %v1448_v27 = vpop.f32.mrf.mxu1  ;;  %1989 = vtanh.f32 %v1604_v25 }
 0x174   : > { %v1984_v28 = vpop.eup %1983 }
 0x175   : > { %v1986_v29 = vpop.eup %1985  ;;  %1617 = vst [vmem:[%s2566_s6] sm:$0xff] %v1984_v28 }
 0x176   : > { %v1988_v30 = vpop.eup %1987  ;;  %1619 = vst [vmem:[%s2566_s6 + $0x10] sm:$0xff] %v1986_v29 }
 0x177   : > { %v1990_v31 = vpop.eup %1989  ;;  %1618 = vst [vmem:[%s2566_s6 + $0x8] sm:$0xff] %v1988_v30 }
 0x178   : > { %1620 = vst [vmem:[%s2566_s6 + $0x18] sm:$0xff] %v1990_v31 }
 0x1a4   : > { %v1484_v37 = vpop.f32.mrf.mxu0  ;;  %v1525_v57 = vpop.f32.mrf.mxu1 }
 0x1a5   : > { %v1605_v42 = vadd.f32 %v1580_v36, %v1484_v37  ;;  %v1607_v44 = vadd.f32 %v1588_v38, %v1525_v57 }
 0x1a6   : > { %v1486_v40 = vpop.f32.mrf.mxu0  ;;  %v1527_v43 = vpop.f32.mrf.mxu1 }
 0x1a7   : > { %1991 = vtanh.f32 %v1605_v42  ;;  %v1606_v46 = vadd.f32 %v1584_v39, %v1486_v40  ;;  %v1608_v48 = vadd.f32 %v1592_v41, %v1527_v43 }
 0x1a8   : > { %v1488_v45 = vpop.f32.mrf.mxu0  ;;  %v1529_v47 = vpop.f32.mrf.mxu1  ;;  %1993 = vtanh.f32 %v1607_v44 }
 0x1a9   : > { %1995 = vtanh.f32 %v1606_v46 }
 0x1aa   : > { %v1489_v49 = vpop.f32.mrf.mxu0  ;;  %v1530_v50 = vpop.f32.mrf.mxu1  ;;  %1997 = vtanh.f32 %v1608_v48 }
 0x1b4   : > { %v1992_v51 = vpop.eup %1991 }
 0x1b5   : > { %v1994_v52 = vpop.eup %1993  ;;  %1621 = vst [vmem:[%s2566_s6 + $0x20] sm:$0xff] %v1992_v51 }
 0x1b6   : > { %v1996_v54 = vpop.eup %1995  ;;  %1623 = vst [vmem:[%s2566_s6 + $0x30] sm:$0xff] %v1994_v52 }
 0x1b7   : > { %v1998_v55 = vpop.eup %1997  ;;  %1622 = vst [vmem:[%s2566_s6 + $0x28] sm:$0xff] %v1996_v54 }
 0x1b8   : > { %1624 = vst [vmem:[%s2566_s6 + $0x38] sm:$0xff] %v1998_v55 }
 0x1b9 PF: > { %s13_s18 = sadd.s32 1, %s2053_s18   ;;  %s2601_s12 = smov %s2033_s13 }
 0x1ba   : > { %p10_p12 = scmp.ge.s32.totalorder %s13_s18, 10   ;;  %s2602_s13 = smov %s2126_s25 }
 0x1bb   : > { %s2603_s14 = smov %s2045_s16  ;;  %s2604_s15 = smov %s2049_s17 }
 0x1bc   : > { %s2605_s16 = smov %s2608_s19  ;;  %s2606_s17 = smov %s2612_s20 }
 0x1bd   :  { %12 = sbr.rel (!%p10_p12) target bundleno = 4 (0x4), region = 104 }

</bundles_post_ra>
